<compile_context>
chip_gen: v6e
topology: v6e:2x2x1
jax: 0.10.0
libtpu: 0.0.40
codegen_flags: <defaults>
</compile_context>

<pallas_src>
import functools

import jax
import jax.numpy as jnp
from jax import lax
from jax.experimental import pallas as pl
from jax.experimental.pallas import tpu as pltpu


def _maml_block_kernel(xs_ref, y_ref, xq_ref, wb_ref, bb_ref, out_ref, *,
                       update_lr: float, update_step: int, num_classes: int,
                       approx_recip: bool, unroll: bool):
    """One grid step == a block of TB independent MAML tasks (task-minor layout).

    xs_ref  : (1, N_s, D, TB)  support features (f32 or bf16)
    y_ref   : (1, N_s, TB)     support labels, int32
    xq_ref  : (1, N_q, D, TB)  query features
    wb_ref  : (C, D, TB)       meta weight, pre-broadcast over tasks (f32)
    bb_ref  : (C, 1, TB)       meta bias, pre-broadcast over tasks (f32)
    out_ref : (1, C, N_q, TB)  adapted query logits (f32 out)
    """
    C = num_classes

    # Activations are DMA'd in their storage dtype (possibly bf16) and cast to
    # f32 once; all VPU arithmetic stays f32 (v5e has no bf16 VALU).
    xs = xs_ref[0].astype(jnp.float32)          # (N_s, D, TB)
    xq = xq_ref[0].astype(jnp.float32)          # (N_q, D, TB)
    y = y_ref[0]                                # (N_s, TB) int32

    # One-hot support labels, per class, as dense (N_s, TB) slabs.
    yoh = [(y == c).astype(jnp.float32) for c in range(C)]

    # Task-local adapted params start from the meta params (already broadcast
    # to task-minor layout in the wrapper) and are carried through the loop.
    w0 = tuple(wb_ref[c] for c in range(C))     # each (D, TB) f32
    b0 = tuple(bb_ref[c] for c in range(C))     # each (1, TB) f32

    def logits_per_class(x, ws, bs):
        # x: (N, D, TB) -> list of C arrays (N, TB):
        # logits[c][n, t] = sum_d x[n, d, t] * ws[c][d, t] + bs[c][0, t]
        return [jnp.sum(x * ws[c][None, :, :], axis=1) + bs[c] for c in range(C)]

    def inner(step, carry):
        del step
        ws, bs = carry
        s = logits_per_class(xs, ws, bs)                      # C x (N_s, TB)
        # d(sum cross_entropy)/d(logits) = softmax(logits) - onehot(y)
        m = s[0]
        for c in range(1, C):
            m = jnp.maximum(m, s[c])
        e = [jnp.exp(s[c] - m) for c in range(C)]
        denom = e[0]
        for c in range(1, C):
            denom = denom + e[c]
        inv = pl.reciprocal(denom, approx=approx_recip)       # (N_s, TB)
        d = [e[c] * inv - yoh[c] for c in range(C)]           # C x (N_s, TB)
        # grad_W[c] = sum_n d[c][n] * xs[n]   ; grad_b[c] = sum_n d[c][n]
        new_ws = tuple(
            ws[c] - update_lr * jnp.sum(d[c][:, None, :] * xs, axis=0)
            for c in range(C))                                # (D, TB)
        new_bs = tuple(
            bs[c] - update_lr * jnp.sum(d[c], axis=0, keepdims=True)
            for c in range(C))                                # (1, TB)
        return new_ws, new_bs

    ws, bs = lax.fori_loop(0, update_step, inner, (w0, b0), unroll=unroll)

    # Query forward with adapted parameters; lane-dense (N_q, TB) stores.
    lq = logits_per_class(xq, ws, bs)                         # C x (N_q, TB)
    for c in range(C):
        out_ref[0, c] = lq[c].astype(out_ref.dtype)


def maml_forward_pallas(x_support, y_support, x_query, w, b, *,
                        update_lr: float, update_step: int,
                        task_block: int = 128,
                        activation_dtype=jnp.bfloat16,
                        exact_softmax: bool = False):
    """Pallas implementation of Meta.forward (classification, adaptation path).

    x_support : [T, n_way, k_shot_s, D] float32
    y_support : [T, n_way, k_shot_s]    int class labels
    x_query   : [T, n_way, k_shot_q, D] float32
    w         : [C, D] float32 (nn.Linear weight)
    b         : [C]    float32 (nn.Linear bias)
    returns   : (pred [T, n_way, k_shot_q] int32, logits_q [T, N_q, C] f32)
    """
    T, n_way, ks_s, D = x_support.shape
    _, _, ks_q, _ = x_query.shape
    C = w.shape[0]
    N_s = n_way * ks_s
    N_q = n_way * ks_q

    # Note: with T > task_block the grid has >= 2 blocks, which lets the
    # "parallel" grid axis shard tasks across both TensorCores on v7x.
    TB = max(1, min(int(task_block), T))
    n_blocks = pl.cdiv(T, TB)
    T_pad = n_blocks * TB

    xs = x_support.reshape(T, N_s, D).astype(activation_dtype)
    xq = x_query.reshape(T, N_q, D).astype(activation_dtype)
    y = y_support.reshape(T, N_s).astype(jnp.int32)

    if T_pad != T:
        pad = T_pad - T
        xs = jnp.concatenate([xs, jnp.zeros((pad, N_s, D), xs.dtype)], axis=0)
        xq = jnp.concatenate([xq, jnp.zeros((pad, N_q, D), xq.dtype)], axis=0)
        y = jnp.concatenate([y, jnp.zeros((pad, N_s), y.dtype)], axis=0)

    # Task-minor layout: the task-block dim TB becomes the minor (lane) dim.
    xs_t = xs.reshape(n_blocks, TB, N_s, D).transpose(0, 2, 3, 1)  # (nb,N_s,D,TB)
    xq_t = xq.reshape(n_blocks, TB, N_q, D).transpose(0, 2, 3, 1)  # (nb,N_q,D,TB)
    y_t = y.reshape(n_blocks, TB, N_s).transpose(0, 2, 1)          # (nb,N_s,TB)

    # Meta parameters, pre-broadcast over the task lanes (tiny, fetched once —
    # the constant index_map means Pallas does not re-DMA them per step).
    wb = jnp.broadcast_to(w.astype(jnp.float32)[:, :, None], (C, D, TB))
    bb = jnp.broadcast_to(b.astype(jnp.float32).reshape(C, 1, 1), (C, 1, TB))

    # Tight VMEM budget: double-buffered blocks + params + f32 working set
    # (upcast activations, broadcast-multiply temporaries, carried params),
    # plus slack for compiler scratch; capped below v7x's 64 MiB physical VMEM.
    act_bytes = jnp.dtype(activation_dtype).itemsize
    in_block = TB * (N_s + N_q) * D * act_bytes + TB * N_s * 4
    par_block = (C * D * TB + C * TB) * 4
    out_block = C * N_q * TB * 4
    work = (TB * (N_s + N_q) * D * 4
            + 2 * TB * max(N_s, N_q) * D * 4
            + 4 * (C * D * TB + C * TB) * 4)
    est = 2 * (in_block + out_block + par_block) + work + (4 << 20)
    vmem_limit = int(min(max(est, 8 << 20), 48 << 20))

    kernel = functools.partial(
        _maml_block_kernel,
        update_lr=float(update_lr),
        update_step=int(update_step),
        num_classes=C,
        approx_recip=not exact_softmax,
        unroll=bool(int(update_step) <= 4),
    )

    out = pl.pallas_call(
        kernel,
        out_shape=jax.ShapeDtypeStruct((n_blocks, C, N_q, TB), jnp.float32),
        grid_spec=pltpu.PrefetchScalarGridSpec(
            num_scalar_prefetch=0,
            grid=(n_blocks,),
            in_specs=[
                pl.BlockSpec((1, N_s, D, TB), lambda i: (i, 0, 0, 0)),
                pl.BlockSpec((1, N_s, TB), lambda i: (i, 0, 0)),
                pl.BlockSpec((1, N_q, D, TB), lambda i: (i, 0, 0, 0)),
                pl.BlockSpec((C, D, TB), lambda i: (0, 0, 0)),
                pl.BlockSpec((C, 1, TB), lambda i: (0, 0, 0)),
            ],
            out_specs=pl.BlockSpec((1, C, N_q, TB), lambda i: (i, 0, 0, 0)),
        ),
        compiler_params=pltpu.CompilerParams(
            dimension_semantics=("parallel",),   # tasks are independent
            vmem_limit_bytes=vmem_limit),
    )(xs_t, y_t, xq_t, wb, bb)

    # (nb, C, N_q, TB) -> (T, N_q, C); argmax in the wrapper keeps the kernel
    # output lane-dense.
    logits_q = out.transpose(0, 3, 2, 1).reshape(T_pad, N_q, C)[:T]
    pred_y = jnp.argmax(logits_q, axis=-1).astype(jnp.int32).reshape(
        T, n_way, ks_q)
    return pred_y, logits_q


def maml_forward_ref(x_support, y_support, x_query, w, b,
                     *, update_lr, update_step):
    """Pure-JAX reference of the same semantics (for verification)."""
    T, n_way, ks_s, D = x_support.shape
    _, _, ks_q, _ = x_query.shape
    C = w.shape[0]
    xs = x_support.reshape(T, -1, D)
    xq = x_query.reshape(T, -1, D)
    yoh = jax.nn.one_hot(y_support.reshape(T, -1), C, dtype=jnp.float32)

    preds, logits_all = [], []
    for t in range(T):
        wt, bt = w, b
        for _ in range(update_step):
            logits = xs[t] @ wt.T + bt
            p = jax.nn.softmax(logits, axis=-1)
            d = p - yoh[t]
            g_w = d.T @ xs[t]
            g_b = jnp.sum(d, axis=0)
            wt = wt - update_lr * g_w
            bt = bt - update_lr * g_b
        lq = xq[t] @ wt.T + bt
        logits_all.append(lq)
        preds.append(jnp.argmax(lq, axis=-1).astype(jnp.int32))
    pred = jnp.stack(preds, 0).reshape(T, n_way, ks_q)
    return pred, jnp.stack(logits_all, 0)


def _margin_aware_pred_check(pred, pred_ref, logits_ref_arr, shape, eps=1e-3):
    """Require argmax agreement wherever the reference top-2 margin > eps
    (reduced-precision / approx-reciprocal paths may legitimately flip ties)."""
    srt = jnp.sort(logits_ref_arr, axis=-1)
    margin = (srt[..., -1] - srt[..., -2]).reshape(shape)
    ok = jnp.where(margin > eps, pred == pred_ref, True)
    return bool(jnp.all(ok))


if __name__ == "__main__":
    # Small shapes consistent with Meta.forward's feature path.
    task_size, n_way, k_shot_s, k_shot_q, feat_dim = 2, 4, 2, 3, 32
    num_classes = n_way
    update_lr, update_step = 0.01, 3  # update_step >= 2 (see Meta.forward)

    key = jax.random.PRNGKey(0)
    k1, k2, k3, k4, k5 = jax.random.split(key, 5)

    x_support = jax.random.normal(
        k1, (task_size, n_way, k_shot_s, feat_dim), dtype=jnp.float32)
    x_query = jax.random.normal(
        k2, (task_size, n_way, k_shot_q, feat_dim), dtype=jnp.float32)
    y_support = jax.random.randint(
        k3, (task_size, n_way, k_shot_s), 0, num_classes, dtype=jnp.int32)

    # Deterministic synthetic Learner parameters (nn.Linear C x D).
    w = 0.1 * jax.random.normal(k4, (num_classes, feat_dim), dtype=jnp.float32)
    b = 0.1 * jax.random.normal(k5, (num_classes,), dtype=jnp.float32)

    pred_ref, logits_ref_arr = maml_forward_ref(
        x_support, y_support, x_query, w, b,
        update_lr=update_lr, update_step=update_step)

    # --- f32-activation path: strict check ---------------------------------
    pred, logits_q = maml_forward_pallas(
        x_support, y_support, x_query, w, b,
        update_lr=update_lr, update_step=update_step,
        task_block=128, activation_dtype=jnp.float32)
    pred = jax.block_until_ready(pred)
    logits_q = jax.block_until_ready(logits_q)

    assert pred.shape == (task_size, n_way, k_shot_q)
    assert jnp.allclose(logits_q, logits_ref_arr, rtol=2e-2, atol=2e-2), (
        "query logits mismatch vs reference (f32 path)")
    assert _margin_aware_pred_check(
        pred, pred_ref, logits_ref_arr,
        (task_size, n_way, k_shot_q)), "argmax predictions mismatch (f32 path)"

    # --- bf16-activation path (halved HBM->VMEM DMA, v5e-friendly) ----------
    pred_bf, logits_bf = maml_forward_pallas(
        x_support, y_support, x_query, w, b,
        update_lr=update_lr, update_step=update_step,
        task_block=128, activation_dtype=jnp.bfloat16)
    logits_bf = jax.block_until_ready(logits_bf)
    assert jnp.allclose(logits_bf, logits_ref_arr, rtol=5e-2, atol=5e-2), (
        "query logits mismatch vs reference (bf16 path)")

    # --- odd task count: exercises task-block padding + grid > 1 ------------
    T2 = 5
    kk = jax.random.split(jax.random.PRNGKey(1), 3)
    xs2 = jax.random.normal(kk[0], (T2, n_way, k_shot_s, feat_dim), jnp.float32)
    xq2 = jax.random.normal(kk[1], (T2, n_way, k_shot_q, feat_dim), jnp.float32)
    ys2 = jax.random.randint(kk[2], (T2, n_way, k_shot_s), 0, num_classes,
                             dtype=jnp.int32)
    pred2, logits2 = maml_forward_pallas(
        xs2, ys2, xq2, w, b, update_lr=update_lr, update_step=update_step,
        task_block=2, activation_dtype=jnp.float32)
    logits2 = jax.block_until_ready(logits2)
    pred2_ref, logits2_ref = maml_forward_ref(
        xs2, ys2, xq2, w, b, update_lr=update_lr, update_step=update_step)
    assert jnp.allclose(logits2, logits2_ref, rtol=2e-2, atol=2e-2), (
        "query logits mismatch vs reference (padded-grid path)")
    assert _margin_aware_pred_check(
        pred2, pred2_ref, logits2_ref,
        (T2, n_way, k_shot_q)), "argmax predictions mismatch (padded-grid path)"

    print("KERNEL_OK")
</pallas_src>

<mosaic_0001>
module attributes {stable_mosaic.version = 11 : i64} {
  func.func @_maml_block_kernel(%arg0: i32, %arg1: memref<1x8x32x2xf32, #tpu.memory_space<vmem>>, %arg2: memref<1x8x2xi32, #tpu.memory_space<vmem>>, %arg3: memref<1x12x32x2xf32, #tpu.memory_space<vmem>>, %arg4: memref<4x32x2xf32, #tpu.memory_space<vmem>>, %arg5: memref<4x1x2xf32, #tpu.memory_space<vmem>>, %arg6: memref<1x4x12x2xf32, #tpu.memory_space<vmem>>) attributes {dimension_semantics = [#tpu.dimension_semantics<parallel>], iteration_bounds = array<i64: 1>, scalar_prefetch = 0 : i64, scratch_operands = 0 : i64, tpu.core_type = #tpu.core_type<tc>, window_params = [{transform_indices = @transform_0, window_bounds = array<i64: 1, 8, 32, 2>}, {transform_indices = @transform_1, window_bounds = array<i64: 1, 8, 2>}, {transform_indices = @transform_2, window_bounds = array<i64: 1, 12, 32, 2>}, {pipeline_mode = #tpu.pipeline_mode<synchronous>, transform_indices = @transform_3, window_bounds = array<i64: 4, 32, 2>}, {pipeline_mode = #tpu.pipeline_mode<synchronous>, transform_indices = @transform_4, window_bounds = array<i64: 4, 1, 2>}, {transform_indices = @transform_5, window_bounds = array<i64: 1, 4, 12, 2>}]} {
    %c0 = arith.constant 0 : index
    %c0_0 = arith.constant 0 : index
    %c0_1 = arith.constant 0 : index
    %c0_2 = arith.constant 0 : index
    %0 = vector.load %arg1[%c0, %c0_0, %c0_1, %c0_2] : memref<1x8x32x2xf32, #tpu.memory_space<vmem>>, vector<1x8x32x2xf32>
    %1 = vector.shape_cast %0 : vector<1x8x32x2xf32> to vector<8x32x2xf32>
    %c0_3 = arith.constant 0 : index
    %c0_4 = arith.constant 0 : index
    %c0_5 = arith.constant 0 : index
    %c0_6 = arith.constant 0 : index
    %2 = vector.load %arg3[%c0_3, %c0_4, %c0_5, %c0_6] : memref<1x12x32x2xf32, #tpu.memory_space<vmem>>, vector<1x12x32x2xf32>
    %3 = vector.shape_cast %2 : vector<1x12x32x2xf32> to vector<12x32x2xf32>
    %c0_7 = arith.constant 0 : index
    %c0_8 = arith.constant 0 : index
    %c0_9 = arith.constant 0 : index
    %4 = vector.load %arg2[%c0_7, %c0_8, %c0_9] : memref<1x8x2xi32, #tpu.memory_space<vmem>>, vector<1x8x2xi32>
    %5 = vector.shape_cast %4 : vector<1x8x2xi32> to vector<8x2xi32>
    %c0_i32 = arith.constant 0 : i32
    %6 = vector.broadcast %c0_i32 : i32 to vector<8x2xi32>
    %7 = arith.cmpi eq, %5, %6 : vector<8x2xi32>
    %8 = arith.extui %7 : vector<8x2xi1> to vector<8x2xi32>
    %9 = arith.sitofp %8 : vector<8x2xi32> to vector<8x2xf32>
    %c1_i32 = arith.constant 1 : i32
    %10 = vector.broadcast %c1_i32 : i32 to vector<8x2xi32>
    %11 = arith.cmpi eq, %5, %10 : vector<8x2xi32>
    %12 = arith.extui %11 : vector<8x2xi1> to vector<8x2xi32>
    %13 = arith.sitofp %12 : vector<8x2xi32> to vector<8x2xf32>
    %c2_i32 = arith.constant 2 : i32
    %14 = vector.broadcast %c2_i32 : i32 to vector<8x2xi32>
    %15 = arith.cmpi eq, %5, %14 : vector<8x2xi32>
    %16 = arith.extui %15 : vector<8x2xi1> to vector<8x2xi32>
    %17 = arith.sitofp %16 : vector<8x2xi32> to vector<8x2xf32>
    %c3_i32 = arith.constant 3 : i32
    %18 = vector.broadcast %c3_i32 : i32 to vector<8x2xi32>
    %19 = arith.cmpi eq, %5, %18 : vector<8x2xi32>
    %20 = arith.extui %19 : vector<8x2xi1> to vector<8x2xi32>
    %21 = arith.sitofp %20 : vector<8x2xi32> to vector<8x2xf32>
    %c0_10 = arith.constant 0 : index
    %c0_11 = arith.constant 0 : index
    %c0_12 = arith.constant 0 : index
    %22 = vector.load %arg4[%c0_10, %c0_11, %c0_12] : memref<4x32x2xf32, #tpu.memory_space<vmem>>, vector<1x32x2xf32>
    %23 = vector.shape_cast %22 : vector<1x32x2xf32> to vector<32x2xf32>
    %c1 = arith.constant 1 : index
    %c0_13 = arith.constant 0 : index
    %c0_14 = arith.constant 0 : index
    %24 = vector.load %arg4[%c1, %c0_13, %c0_14] : memref<4x32x2xf32, #tpu.memory_space<vmem>>, vector<1x32x2xf32>
    %25 = vector.shape_cast %24 : vector<1x32x2xf32> to vector<32x2xf32>
    %c2 = arith.constant 2 : index
    %c0_15 = arith.constant 0 : index
    %c0_16 = arith.constant 0 : index
    %26 = vector.load %arg4[%c2, %c0_15, %c0_16] : memref<4x32x2xf32, #tpu.memory_space<vmem>>, vector<1x32x2xf32>
    %27 = vector.shape_cast %26 : vector<1x32x2xf32> to vector<32x2xf32>
    %c3 = arith.constant 3 : index
    %c0_17 = arith.constant 0 : index
    %c0_18 = arith.constant 0 : index
    %28 = vector.load %arg4[%c3, %c0_17, %c0_18] : memref<4x32x2xf32, #tpu.memory_space<vmem>>, vector<1x32x2xf32>
    %29 = vector.shape_cast %28 : vector<1x32x2xf32> to vector<32x2xf32>
    %c0_19 = arith.constant 0 : index
    %c0_20 = arith.constant 0 : index
    %c0_21 = arith.constant 0 : index
    %30 = vector.load %arg5[%c0_19, %c0_20, %c0_21] : memref<4x1x2xf32, #tpu.memory_space<vmem>>, vector<1x1x2xf32>
    %31 = vector.shape_cast %30 : vector<1x1x2xf32> to vector<1x2xf32>
    %c1_22 = arith.constant 1 : index
    %c0_23 = arith.constant 0 : index
    %c0_24 = arith.constant 0 : index
    %32 = vector.load %arg5[%c1_22, %c0_23, %c0_24] : memref<4x1x2xf32, #tpu.memory_space<vmem>>, vector<1x1x2xf32>
    %33 = vector.shape_cast %32 : vector<1x1x2xf32> to vector<1x2xf32>
    %c2_25 = arith.constant 2 : index
    %c0_26 = arith.constant 0 : index
    %c0_27 = arith.constant 0 : index
    %34 = vector.load %arg5[%c2_25, %c0_26, %c0_27] : memref<4x1x2xf32, #tpu.memory_space<vmem>>, vector<1x1x2xf32>
    %35 = vector.shape_cast %34 : vector<1x1x2xf32> to vector<1x2xf32>
    %c3_28 = arith.constant 3 : index
    %c0_29 = arith.constant 0 : index
    %c0_30 = arith.constant 0 : index
    %36 = vector.load %arg5[%c3_28, %c0_29, %c0_30] : memref<4x1x2xf32, #tpu.memory_space<vmem>>, vector<1x1x2xf32>
    %37 = vector.shape_cast %36 : vector<1x1x2xf32> to vector<1x2xf32>
    %c0_i32_31 = arith.constant 0 : i32
    %38 = vector.shape_cast %23 : vector<32x2xf32> to vector<1x32x2xf32>
    %39 = vector.broadcast %38 : vector<1x32x2xf32> to vector<8x32x2xf32>
    %40 = arith.mulf %1, %39 : vector<8x32x2xf32>
    %cst = arith.constant dense<0.000000e+00> : vector<8x2xf32>
    %41 = vector.multi_reduction <add>, %40, %cst [1] : vector<8x32x2xf32> to vector<8x2xf32>
    %42 = vector.broadcast %31 : vector<1x2xf32> to vector<8x2xf32>
    %43 = arith.addf %41, %42 : vector<8x2xf32>
    %44 = vector.shape_cast %25 : vector<32x2xf32> to vector<1x32x2xf32>
    %45 = vector.broadcast %44 : vector<1x32x2xf32> to vector<8x32x2xf32>
    %46 = arith.mulf %1, %45 : vector<8x32x2xf32>
    %cst_32 = arith.constant dense<0.000000e+00> : vector<8x2xf32>
    %47 = vector.multi_reduction <add>, %46, %cst_32 [1] : vector<8x32x2xf32> to vector<8x2xf32>
    %48 = vector.broadcast %33 : vector<1x2xf32> to vector<8x2xf32>
    %49 = arith.addf %47, %48 : vector<8x2xf32>
    %50 = vector.shape_cast %27 : vector<32x2xf32> to vector<1x32x2xf32>
    %51 = vector.broadcast %50 : vector<1x32x2xf32> to vector<8x32x2xf32>
    %52 = arith.mulf %1, %51 : vector<8x32x2xf32>
    %cst_33 = arith.constant dense<0.000000e+00> : vector<8x2xf32>
    %53 = vector.multi_reduction <add>, %52, %cst_33 [1] : vector<8x32x2xf32> to vector<8x2xf32>
    %54 = vector.broadcast %35 : vector<1x2xf32> to vector<8x2xf32>
    %55 = arith.addf %53, %54 : vector<8x2xf32>
    %56 = vector.shape_cast %29 : vector<32x2xf32> to vector<1x32x2xf32>
    %57 = vector.broadcast %56 : vector<1x32x2xf32> to vector<8x32x2xf32>
    %58 = arith.mulf %1, %57 : vector<8x32x2xf32>
    %cst_34 = arith.constant dense<0.000000e+00> : vector<8x2xf32>
    %59 = vector.multi_reduction <add>, %58, %cst_34 [1] : vector<8x32x2xf32> to vector<8x2xf32>
    %60 = vector.broadcast %37 : vector<1x2xf32> to vector<8x2xf32>
    %61 = arith.addf %59, %60 : vector<8x2xf32>
    %62 = arith.maximumf %43, %49 : vector<8x2xf32>
    %63 = arith.maximumf %62, %55 : vector<8x2xf32>
    %64 = arith.maximumf %63, %61 : vector<8x2xf32>
    %65 = arith.subf %43, %64 : vector<8x2xf32>
    %66 = math.exp %65 : vector<8x2xf32>
    %67 = arith.subf %49, %64 : vector<8x2xf32>
    %68 = math.exp %67 : vector<8x2xf32>
    %69 = arith.subf %55, %64 : vector<8x2xf32>
    %70 = math.exp %69 : vector<8x2xf32>
    %71 = arith.subf %61, %64 : vector<8x2xf32>
    %72 = math.exp %71 : vector<8x2xf32>
    %73 = arith.addf %66, %68 : vector<8x2xf32>
    %74 = arith.addf %73, %70 : vector<8x2xf32>
    %75 = arith.addf %74, %72 : vector<8x2xf32>
    %76 = tpu.reciprocal %75 {approx = true} : vector<8x2xf32> -> vector<8x2xf32>
    %77 = arith.mulf %66, %76 : vector<8x2xf32>
    %78 = arith.subf %77, %9 : vector<8x2xf32>
    %79 = arith.mulf %68, %76 : vector<8x2xf32>
    %80 = arith.subf %79, %13 : vector<8x2xf32>
    %81 = arith.mulf %70, %76 : vector<8x2xf32>
    %82 = arith.subf %81, %17 : vector<8x2xf32>
    %83 = arith.mulf %72, %76 : vector<8x2xf32>
    %84 = arith.subf %83, %21 : vector<8x2xf32>
    %85 = vector.shape_cast %78 : vector<8x2xf32> to vector<8x1x2xf32>
    %86 = vector.broadcast %85 : vector<8x1x2xf32> to vector<8x32x2xf32>
    %87 = arith.mulf %86, %1 : vector<8x32x2xf32>
    %cst_35 = arith.constant dense<0.000000e+00> : vector<32x2xf32>
    %88 = vector.multi_reduction <add>, %87, %cst_35 [0] : vector<8x32x2xf32> to vector<32x2xf32>
    %cst_36 = arith.constant 0.00999999977 : f32
    %89 = vector.broadcast %cst_36 : f32 to vector<32x2xf32>
    %90 = arith.mulf %89, %88 : vector<32x2xf32>
    %91 = arith.subf %23, %90 : vector<32x2xf32>
    %92 = vector.shape_cast %80 : vector<8x2xf32> to vector<8x1x2xf32>
    %93 = vector.broadcast %92 : vector<8x1x2xf32> to vector<8x32x2xf32>
    %94 = arith.mulf %93, %1 : vector<8x32x2xf32>
    %cst_37 = arith.constant dense<0.000000e+00> : vector<32x2xf32>
    %95 = vector.multi_reduction <add>, %94, %cst_37 [0] : vector<8x32x2xf32> to vector<32x2xf32>
    %cst_38 = arith.constant 0.00999999977 : f32
    %96 = vector.broadcast %cst_38 : f32 to vector<32x2xf32>
    %97 = arith.mulf %96, %95 : vector<32x2xf32>
    %98 = arith.subf %25, %97 : vector<32x2xf32>
    %99 = vector.shape_cast %82 : vector<8x2xf32> to vector<8x1x2xf32>
    %100 = vector.broadcast %99 : vector<8x1x2xf32> to vector<8x32x2xf32>
    %101 = arith.mulf %100, %1 : vector<8x32x2xf32>
    %cst_39 = arith.constant dense<0.000000e+00> : vector<32x2xf32>
    %102 = vector.multi_reduction <add>, %101, %cst_39 [0] : vector<8x32x2xf32> to vector<32x2xf32>
    %cst_40 = arith.constant 0.00999999977 : f32
    %103 = vector.broadcast %cst_40 : f32 to vector<32x2xf32>
    %104 = arith.mulf %103, %102 : vector<32x2xf32>
    %105 = arith.subf %27, %104 : vector<32x2xf32>
    %106 = vector.shape_cast %84 : vector<8x2xf32> to vector<8x1x2xf32>
    %107 = vector.broadcast %106 : vector<8x1x2xf32> to vector<8x32x2xf32>
    %108 = arith.mulf %107, %1 : vector<8x32x2xf32>
    %cst_41 = arith.constant dense<0.000000e+00> : vector<32x2xf32>
    %109 = vector.multi_reduction <add>, %108, %cst_41 [0] : vector<8x32x2xf32> to vector<32x2xf32>
    %cst_42 = arith.constant 0.00999999977 : f32
    %110 = vector.broadcast %cst_42 : f32 to vector<32x2xf32>
    %111 = arith.mulf %110, %109 : vector<32x2xf32>
    %112 = arith.subf %29, %111 : vector<32x2xf32>
    %cst_43 = arith.constant dense<0.000000e+00> : vector<2xf32>
    %113 = vector.multi_reduction <add>, %78, %cst_43 [0] : vector<8x2xf32> to vector<2xf32>
    %114 = vector.shape_cast %113 : vector<2xf32> to vector<1x2xf32>
    %cst_44 = arith.constant 0.00999999977 : f32
    %115 = vector.broadcast %cst_44 : f32 to vector<1x2xf32>
    %116 = arith.mulf %115, %114 : vector<1x2xf32>
    %117 = arith.subf %31, %116 : vector<1x2xf32>
    %cst_45 = arith.constant dense<0.000000e+00> : vector<2xf32>
    %118 = vector.multi_reduction <add>, %80, %cst_45 [0] : vector<8x2xf32> to vector<2xf32>
    %119 = vector.shape_cast %118 : vector<2xf32> to vector<1x2xf32>
    %cst_46 = arith.constant 0.00999999977 : f32
    %120 = vector.broadcast %cst_46 : f32 to vector<1x2xf32>
    %121 = arith.mulf %120, %119 : vector<1x2xf32>
    %122 = arith.subf %33, %121 : vector<1x2xf32>
    %cst_47 = arith.constant dense<0.000000e+00> : vector<2xf32>
    %123 = vector.multi_reduction <add>, %82, %cst_47 [0] : vector<8x2xf32> to vector<2xf32>
    %124 = vector.shape_cast %123 : vector<2xf32> to vector<1x2xf32>
    %cst_48 = arith.constant 0.00999999977 : f32
    %125 = vector.broadcast %cst_48 : f32 to vector<1x2xf32>
    %126 = arith.mulf %125, %124 : vector<1x2xf32>
    %127 = arith.subf %35, %126 : vector<1x2xf32>
    %cst_49 = arith.constant dense<0.000000e+00> : vector<2xf32>
    %128 = vector.multi_reduction <add>, %84, %cst_49 [0] : vector<8x2xf32> to vector<2xf32>
    %129 = vector.shape_cast %128 : vector<2xf32> to vector<1x2xf32>
    %cst_50 = arith.constant 0.00999999977 : f32
    %130 = vector.broadcast %cst_50 : f32 to vector<1x2xf32>
    %131 = arith.mulf %130, %129 : vector<1x2xf32>
    %132 = arith.subf %37, %131 : vector<1x2xf32>
    %c1_i32_51 = arith.constant 1 : i32
    %133 = vector.shape_cast %91 : vector<32x2xf32> to vector<1x32x2xf32>
    %134 = vector.broadcast %133 : vector<1x32x2xf32> to vector<8x32x2xf32>
    %135 = arith.mulf %1, %134 : vector<8x32x2xf32>
    %cst_52 = arith.constant dense<0.000000e+00> : vector<8x2xf32>
    %136 = vector.multi_reduction <add>, %135, %cst_52 [1] : vector<8x32x2xf32> to vector<8x2xf32>
    %137 = vector.broadcast %117 : vector<1x2xf32> to vector<8x2xf32>
    %138 = arith.addf %136, %137 : vector<8x2xf32>
    %139 = vector.shape_cast %98 : vector<32x2xf32> to vector<1x32x2xf32>
    %140 = vector.broadcast %139 : vector<1x32x2xf32> to vector<8x32x2xf32>
    %141 = arith.mulf %1, %140 : vector<8x32x2xf32>
    %cst_53 = arith.constant dense<0.000000e+00> : vector<8x2xf32>
    %142 = vector.multi_reduction <add>, %141, %cst_53 [1] : vector<8x32x2xf32> to vector<8x2xf32>
    %143 = vector.broadcast %122 : vector<1x2xf32> to vector<8x2xf32>
    %144 = arith.addf %142, %143 : vector<8x2xf32>
    %145 = vector.shape_cast %105 : vector<32x2xf32> to vector<1x32x2xf32>
    %146 = vector.broadcast %145 : vector<1x32x2xf32> to vector<8x32x2xf32>
    %147 = arith.mulf %1, %146 : vector<8x32x2xf32>
    %cst_54 = arith.constant dense<0.000000e+00> : vector<8x2xf32>
    %148 = vector.multi_reduction <add>, %147, %cst_54 [1] : vector<8x32x2xf32> to vector<8x2xf32>
    %149 = vector.broadcast %127 : vector<1x2xf32> to vector<8x2xf32>
    %150 = arith.addf %148, %149 : vector<8x2xf32>
    %151 = vector.shape_cast %112 : vector<32x2xf32> to vector<1x32x2xf32>
    %152 = vector.broadcast %151 : vector<1x32x2xf32> to vector<8x32x2xf32>
    %153 = arith.mulf %1, %152 : vector<8x32x2xf32>
    %cst_55 = arith.constant dense<0.000000e+00> : vector<8x2xf32>
    %154 = vector.multi_reduction <add>, %153, %cst_55 [1] : vector<8x32x2xf32> to vector<8x2xf32>
    %155 = vector.broadcast %132 : vector<1x2xf32> to vector<8x2xf32>
    %156 = arith.addf %154, %155 : vector<8x2xf32>
    %157 = arith.maximumf %138, %144 : vector<8x2xf32>
    %158 = arith.maximumf %157, %150 : vector<8x2xf32>
    %159 = arith.maximumf %158, %156 : vector<8x2xf32>
    %160 = arith.subf %138, %159 : vector<8x2xf32>
    %161 = math.exp %160 : vector<8x2xf32>
    %162 = arith.subf %144, %159 : vector<8x2xf32>
    %163 = math.exp %162 : vector<8x2xf32>
    %164 = arith.subf %150, %159 : vector<8x2xf32>
    %165 = math.exp %164 : vector<8x2xf32>
    %166 = arith.subf %156, %159 : vector<8x2xf32>
    %167 = math.exp %166 : vector<8x2xf32>
    %168 = arith.addf %161, %163 : vector<8x2xf32>
    %169 = arith.addf %168, %165 : vector<8x2xf32>
    %170 = arith.addf %169, %167 : vector<8x2xf32>
    %171 = tpu.reciprocal %170 {approx = true} : vector<8x2xf32> -> vector<8x2xf32>
    %172 = arith.mulf %161, %171 : vector<8x2xf32>
    %173 = arith.subf %172, %9 : vector<8x2xf32>
    %174 = arith.mulf %163, %171 : vector<8x2xf32>
    %175 = arith.subf %174, %13 : vector<8x2xf32>
    %176 = arith.mulf %165, %171 : vector<8x2xf32>
    %177 = arith.subf %176, %17 : vector<8x2xf32>
    %178 = arith.mulf %167, %171 : vector<8x2xf32>
    %179 = arith.subf %178, %21 : vector<8x2xf32>
    %180 = vector.shape_cast %173 : vector<8x2xf32> to vector<8x1x2xf32>
    %181 = vector.broadcast %180 : vector<8x1x2xf32> to vector<8x32x2xf32>
    %182 = arith.mulf %181, %1 : vector<8x32x2xf32>
    %cst_56 = arith.constant dense<0.000000e+00> : vector<32x2xf32>
    %183 = vector.multi_reduction <add>, %182, %cst_56 [0] : vector<8x32x2xf32> to vector<32x2xf32>
    %cst_57 = arith.constant 0.00999999977 : f32
    %184 = vector.broadcast %cst_57 : f32 to vector<32x2xf32>
    %185 = arith.mulf %184, %183 : vector<32x2xf32>
    %186 = arith.subf %91, %185 : vector<32x2xf32>
    %187 = vector.shape_cast %175 : vector<8x2xf32> to vector<8x1x2xf32>
    %188 = vector.broadcast %187 : vector<8x1x2xf32> to vector<8x32x2xf32>
    %189 = arith.mulf %188, %1 : vector<8x32x2xf32>
    %cst_58 = arith.constant dense<0.000000e+00> : vector<32x2xf32>
    %190 = vector.multi_reduction <add>, %189, %cst_58 [0] : vector<8x32x2xf32> to vector<32x2xf32>
    %cst_59 = arith.constant 0.00999999977 : f32
    %191 = vector.broadcast %cst_59 : f32 to vector<32x2xf32>
    %192 = arith.mulf %191, %190 : vector<32x2xf32>
    %193 = arith.subf %98, %192 : vector<32x2xf32>
    %194 = vector.shape_cast %177 : vector<8x2xf32> to vector<8x1x2xf32>
    %195 = vector.broadcast %194 : vector<8x1x2xf32> to vector<8x32x2xf32>
    %196 = arith.mulf %195, %1 : vector<8x32x2xf32>
    %cst_60 = arith.constant dense<0.000000e+00> : vector<32x2xf32>
    %197 = vector.multi_reduction <add>, %196, %cst_60 [0] : vector<8x32x2xf32> to vector<32x2xf32>
    %cst_61 = arith.constant 0.00999999977 : f32
    %198 = vector.broadcast %cst_61 : f32 to vector<32x2xf32>
    %199 = arith.mulf %198, %197 : vector<32x2xf32>
    %200 = arith.subf %105, %199 : vector<32x2xf32>
    %201 = vector.shape_cast %179 : vector<8x2xf32> to vector<8x1x2xf32>
    %202 = vector.broadcast %201 : vector<8x1x2xf32> to vector<8x32x2xf32>
    %203 = arith.mulf %202, %1 : vector<8x32x2xf32>
    %cst_62 = arith.constant dense<0.000000e+00> : vector<32x2xf32>
    %204 = vector.multi_reduction <add>, %203, %cst_62 [0] : vector<8x32x2xf32> to vector<32x2xf32>
    %cst_63 = arith.constant 0.00999999977 : f32
    %205 = vector.broadcast %cst_63 : f32 to vector<32x2xf32>
    %206 = arith.mulf %205, %204 : vector<32x2xf32>
    %207 = arith.subf %112, %206 : vector<32x2xf32>
    %cst_64 = arith.constant dense<0.000000e+00> : vector<2xf32>
    %208 = vector.multi_reduction <add>, %173, %cst_64 [0] : vector<8x2xf32> to vector<2xf32>
    %209 = vector.shape_cast %208 : vector<2xf32> to vector<1x2xf32>
    %cst_65 = arith.constant 0.00999999977 : f32
    %210 = vector.broadcast %cst_65 : f32 to vector<1x2xf32>
    %211 = arith.mulf %210, %209 : vector<1x2xf32>
    %212 = arith.subf %117, %211 : vector<1x2xf32>
    %cst_66 = arith.constant dense<0.000000e+00> : vector<2xf32>
    %213 = vector.multi_reduction <add>, %175, %cst_66 [0] : vector<8x2xf32> to vector<2xf32>
    %214 = vector.shape_cast %213 : vector<2xf32> to vector<1x2xf32>
    %cst_67 = arith.constant 0.00999999977 : f32
    %215 = vector.broadcast %cst_67 : f32 to vector<1x2xf32>
    %216 = arith.mulf %215, %214 : vector<1x2xf32>
    %217 = arith.subf %122, %216 : vector<1x2xf32>
    %cst_68 = arith.constant dense<0.000000e+00> : vector<2xf32>
    %218 = vector.multi_reduction <add>, %177, %cst_68 [0] : vector<8x2xf32> to vector<2xf32>
    %219 = vector.shape_cast %218 : vector<2xf32> to vector<1x2xf32>
    %cst_69 = arith.constant 0.00999999977 : f32
    %220 = vector.broadcast %cst_69 : f32 to vector<1x2xf32>
    %221 = arith.mulf %220, %219 : vector<1x2xf32>
    %222 = arith.subf %127, %221 : vector<1x2xf32>
    %cst_70 = arith.constant dense<0.000000e+00> : vector<2xf32>
    %223 = vector.multi_reduction <add>, %179, %cst_70 [0] : vector<8x2xf32> to vector<2xf32>
    %224 = vector.shape_cast %223 : vector<2xf32> to vector<1x2xf32>
    %cst_71 = arith.constant 0.00999999977 : f32
    %225 = vector.broadcast %cst_71 : f32 to vector<1x2xf32>
    %226 = arith.mulf %225, %224 : vector<1x2xf32>
    %227 = arith.subf %132, %226 : vector<1x2xf32>
    %c2_i32_72 = arith.constant 2 : i32
    %228 = vector.shape_cast %186 : vector<32x2xf32> to vector<1x32x2xf32>
    %229 = vector.broadcast %228 : vector<1x32x2xf32> to vector<8x32x2xf32>
    %230 = arith.mulf %1, %229 : vector<8x32x2xf32>
    %cst_73 = arith.constant dense<0.000000e+00> : vector<8x2xf32>
    %231 = vector.multi_reduction <add>, %230, %cst_73 [1] : vector<8x32x2xf32> to vector<8x2xf32>
    %232 = vector.broadcast %212 : vector<1x2xf32> to vector<8x2xf32>
    %233 = arith.addf %231, %232 : vector<8x2xf32>
    %234 = vector.shape_cast %193 : vector<32x2xf32> to vector<1x32x2xf32>
    %235 = vector.broadcast %234 : vector<1x32x2xf32> to vector<8x32x2xf32>
    %236 = arith.mulf %1, %235 : vector<8x32x2xf32>
    %cst_74 = arith.constant dense<0.000000e+00> : vector<8x2xf32>
    %237 = vector.multi_reduction <add>, %236, %cst_74 [1] : vector<8x32x2xf32> to vector<8x2xf32>
    %238 = vector.broadcast %217 : vector<1x2xf32> to vector<8x2xf32>
    %239 = arith.addf %237, %238 : vector<8x2xf32>
    %240 = vector.shape_cast %200 : vector<32x2xf32> to vector<1x32x2xf32>
    %241 = vector.broadcast %240 : vector<1x32x2xf32> to vector<8x32x2xf32>
    %242 = arith.mulf %1, %241 : vector<8x32x2xf32>
    %cst_75 = arith.constant dense<0.000000e+00> : vector<8x2xf32>
    %243 = vector.multi_reduction <add>, %242, %cst_75 [1] : vector<8x32x2xf32> to vector<8x2xf32>
    %244 = vector.broadcast %222 : vector<1x2xf32> to vector<8x2xf32>
    %245 = arith.addf %243, %244 : vector<8x2xf32>
    %246 = vector.shape_cast %207 : vector<32x2xf32> to vector<1x32x2xf32>
    %247 = vector.broadcast %246 : vector<1x32x2xf32> to vector<8x32x2xf32>
    %248 = arith.mulf %1, %247 : vector<8x32x2xf32>
    %cst_76 = arith.constant dense<0.000000e+00> : vector<8x2xf32>
    %249 = vector.multi_reduction <add>, %248, %cst_76 [1] : vector<8x32x2xf32> to vector<8x2xf32>
    %250 = vector.broadcast %227 : vector<1x2xf32> to vector<8x2xf32>
    %251 = arith.addf %249, %250 : vector<8x2xf32>
    %252 = arith.maximumf %233, %239 : vector<8x2xf32>
    %253 = arith.maximumf %252, %245 : vector<8x2xf32>
    %254 = arith.maximumf %253, %251 : vector<8x2xf32>
    %255 = arith.subf %233, %254 : vector<8x2xf32>
    %256 = math.exp %255 : vector<8x2xf32>
    %257 = arith.subf %239, %254 : vector<8x2xf32>
    %258 = math.exp %257 : vector<8x2xf32>
    %259 = arith.subf %245, %254 : vector<8x2xf32>
    %260 = math.exp %259 : vector<8x2xf32>
    %261 = arith.subf %251, %254 : vector<8x2xf32>
    %262 = math.exp %261 : vector<8x2xf32>
    %263 = arith.addf %256, %258 : vector<8x2xf32>
    %264 = arith.addf %263, %260 : vector<8x2xf32>
    %265 = arith.addf %264, %262 : vector<8x2xf32>
    %266 = tpu.reciprocal %265 {approx = true} : vector<8x2xf32> -> vector<8x2xf32>
    %267 = arith.mulf %256, %266 : vector<8x2xf32>
    %268 = arith.subf %267, %9 : vector<8x2xf32>
    %269 = arith.mulf %258, %266 : vector<8x2xf32>
    %270 = arith.subf %269, %13 : vector<8x2xf32>
    %271 = arith.mulf %260, %266 : vector<8x2xf32>
    %272 = arith.subf %271, %17 : vector<8x2xf32>
    %273 = arith.mulf %262, %266 : vector<8x2xf32>
    %274 = arith.subf %273, %21 : vector<8x2xf32>
    %275 = vector.shape_cast %268 : vector<8x2xf32> to vector<8x1x2xf32>
    %276 = vector.broadcast %275 : vector<8x1x2xf32> to vector<8x32x2xf32>
    %277 = arith.mulf %276, %1 : vector<8x32x2xf32>
    %cst_77 = arith.constant dense<0.000000e+00> : vector<32x2xf32>
    %278 = vector.multi_reduction <add>, %277, %cst_77 [0] : vector<8x32x2xf32> to vector<32x2xf32>
    %cst_78 = arith.constant 0.00999999977 : f32
    %279 = vector.broadcast %cst_78 : f32 to vector<32x2xf32>
    %280 = arith.mulf %279, %278 : vector<32x2xf32>
    %281 = arith.subf %186, %280 : vector<32x2xf32>
    %282 = vector.shape_cast %270 : vector<8x2xf32> to vector<8x1x2xf32>
    %283 = vector.broadcast %282 : vector<8x1x2xf32> to vector<8x32x2xf32>
    %284 = arith.mulf %283, %1 : vector<8x32x2xf32>
    %cst_79 = arith.constant dense<0.000000e+00> : vector<32x2xf32>
    %285 = vector.multi_reduction <add>, %284, %cst_79 [0] : vector<8x32x2xf32> to vector<32x2xf32>
    %cst_80 = arith.constant 0.00999999977 : f32
    %286 = vector.broadcast %cst_80 : f32 to vector<32x2xf32>
    %287 = arith.mulf %286, %285 : vector<32x2xf32>
    %288 = arith.subf %193, %287 : vector<32x2xf32>
    %289 = vector.shape_cast %272 : vector<8x2xf32> to vector<8x1x2xf32>
    %290 = vector.broadcast %289 : vector<8x1x2xf32> to vector<8x32x2xf32>
    %291 = arith.mulf %290, %1 : vector<8x32x2xf32>
    %cst_81 = arith.constant dense<0.000000e+00> : vector<32x2xf32>
    %292 = vector.multi_reduction <add>, %291, %cst_81 [0] : vector<8x32x2xf32> to vector<32x2xf32>
    %cst_82 = arith.constant 0.00999999977 : f32
    %293 = vector.broadcast %cst_82 : f32 to vector<32x2xf32>
    %294 = arith.mulf %293, %292 : vector<32x2xf32>
    %295 = arith.subf %200, %294 : vector<32x2xf32>
    %296 = vector.shape_cast %274 : vector<8x2xf32> to vector<8x1x2xf32>
    %297 = vector.broadcast %296 : vector<8x1x2xf32> to vector<8x32x2xf32>
    %298 = arith.mulf %297, %1 : vector<8x32x2xf32>
    %cst_83 = arith.constant dense<0.000000e+00> : vector<32x2xf32>
    %299 = vector.multi_reduction <add>, %298, %cst_83 [0] : vector<8x32x2xf32> to vector<32x2xf32>
    %cst_84 = arith.constant 0.00999999977 : f32
    %300 = vector.broadcast %cst_84 : f32 to vector<32x2xf32>
    %301 = arith.mulf %300, %299 : vector<32x2xf32>
    %302 = arith.subf %207, %301 : vector<32x2xf32>
    %cst_85 = arith.constant dense<0.000000e+00> : vector<2xf32>
    %303 = vector.multi_reduction <add>, %268, %cst_85 [0] : vector<8x2xf32> to vector<2xf32>
    %304 = vector.shape_cast %303 : vector<2xf32> to vector<1x2xf32>
    %cst_86 = arith.constant 0.00999999977 : f32
    %305 = vector.broadcast %cst_86 : f32 to vector<1x2xf32>
    %306 = arith.mulf %305, %304 : vector<1x2xf32>
    %307 = arith.subf %212, %306 : vector<1x2xf32>
    %cst_87 = arith.constant dense<0.000000e+00> : vector<2xf32>
    %308 = vector.multi_reduction <add>, %270, %cst_87 [0] : vector<8x2xf32> to vector<2xf32>
    %309 = vector.shape_cast %308 : vector<2xf32> to vector<1x2xf32>
    %cst_88 = arith.constant 0.00999999977 : f32
    %310 = vector.broadcast %cst_88 : f32 to vector<1x2xf32>
    %311 = arith.mulf %310, %309 : vector<1x2xf32>
    %312 = arith.subf %217, %311 : vector<1x2xf32>
    %cst_89 = arith.constant dense<0.000000e+00> : vector<2xf32>
    %313 = vector.multi_reduction <add>, %272, %cst_89 [0] : vector<8x2xf32> to vector<2xf32>
    %314 = vector.shape_cast %313 : vector<2xf32> to vector<1x2xf32>
    %cst_90 = arith.constant 0.00999999977 : f32
    %315 = vector.broadcast %cst_90 : f32 to vector<1x2xf32>
    %316 = arith.mulf %315, %314 : vector<1x2xf32>
    %317 = arith.subf %222, %316 : vector<1x2xf32>
    %cst_91 = arith.constant dense<0.000000e+00> : vector<2xf32>
    %318 = vector.multi_reduction <add>, %274, %cst_91 [0] : vector<8x2xf32> to vector<2xf32>
    %319 = vector.shape_cast %318 : vector<2xf32> to vector<1x2xf32>
    %cst_92 = arith.constant 0.00999999977 : f32
    %320 = vector.broadcast %cst_92 : f32 to vector<1x2xf32>
    %321 = arith.mulf %320, %319 : vector<1x2xf32>
    %322 = arith.subf %227, %321 : vector<1x2xf32>
    %323 = vector.shape_cast %281 : vector<32x2xf32> to vector<1x32x2xf32>
    %324 = vector.broadcast %323 : vector<1x32x2xf32> to vector<12x32x2xf32>
    %325 = arith.mulf %3, %324 : vector<12x32x2xf32>
    %cst_93 = arith.constant dense<0.000000e+00> : vector<12x2xf32>
    %326 = vector.multi_reduction <add>, %325, %cst_93 [1] : vector<12x32x2xf32> to vector<12x2xf32>
    %327 = vector.broadcast %307 : vector<1x2xf32> to vector<12x2xf32>
    %328 = arith.addf %326, %327 : vector<12x2xf32>
    %329 = vector.shape_cast %288 : vector<32x2xf32> to vector<1x32x2xf32>
    %330 = vector.broadcast %329 : vector<1x32x2xf32> to vector<12x32x2xf32>
    %331 = arith.mulf %3, %330 : vector<12x32x2xf32>
    %cst_94 = arith.constant dense<0.000000e+00> : vector<12x2xf32>
    %332 = vector.multi_reduction <add>, %331, %cst_94 [1] : vector<12x32x2xf32> to vector<12x2xf32>
    %333 = vector.broadcast %312 : vector<1x2xf32> to vector<12x2xf32>
    %334 = arith.addf %332, %333 : vector<12x2xf32>
    %335 = vector.shape_cast %295 : vector<32x2xf32> to vector<1x32x2xf32>
    %336 = vector.broadcast %335 : vector<1x32x2xf32> to vector<12x32x2xf32>
    %337 = arith.mulf %3, %336 : vector<12x32x2xf32>
    %cst_95 = arith.constant dense<0.000000e+00> : vector<12x2xf32>
    %338 = vector.multi_reduction <add>, %337, %cst_95 [1] : vector<12x32x2xf32> to vector<12x2xf32>
    %339 = vector.broadcast %317 : vector<1x2xf32> to vector<12x2xf32>
    %340 = arith.addf %338, %339 : vector<12x2xf32>
    %341 = vector.shape_cast %302 : vector<32x2xf32> to vector<1x32x2xf32>
    %342 = vector.broadcast %341 : vector<1x32x2xf32> to vector<12x32x2xf32>
    %343 = arith.mulf %3, %342 : vector<12x32x2xf32>
    %cst_96 = arith.constant dense<0.000000e+00> : vector<12x2xf32>
    %344 = vector.multi_reduction <add>, %343, %cst_96 [1] : vector<12x32x2xf32> to vector<12x2xf32>
    %345 = vector.broadcast %322 : vector<1x2xf32> to vector<12x2xf32>
    %346 = arith.addf %344, %345 : vector<12x2xf32>
    %c0_97 = arith.constant 0 : index
    %c0_98 = arith.constant 0 : index
    %c0_99 = arith.constant 0 : index
    %c0_100 = arith.constant 0 : index
    %347 = vector.load %arg6[%c0_97, %c0_98, %c0_99, %c0_100] : memref<1x4x12x2xf32, #tpu.memory_space<vmem>>, vector<1x1x12x2xf32>
    %348 = vector.shape_cast %347 : vector<1x1x12x2xf32> to vector<12x2xf32>
    %349 = vector.shape_cast %328 : vector<12x2xf32> to vector<1x1x12x2xf32>
    tpu.vector_store %arg6[%c0_97, %c0_98, %c0_99, %c0_100], %349 {strides = array<i32>} : memref<1x4x12x2xf32, #tpu.memory_space<vmem>>, vector<1x1x12x2xf32>,
    %c0_101 = arith.constant 0 : index
    %c1_102 = arith.constant 1 : index
    %c0_103 = arith.constant 0 : index
    %c0_104 = arith.constant 0 : index
    %350 = vector.load %arg6[%c0_101, %c1_102, %c0_103, %c0_104] : memref<1x4x12x2xf32, #tpu.memory_space<vmem>>, vector<1x1x12x2xf32>
    %351 = vector.shape_cast %350 : vector<1x1x12x2xf32> to vector<12x2xf32>
    %352 = vector.shape_cast %334 : vector<12x2xf32> to vector<1x1x12x2xf32>
    tpu.vector_store %arg6[%c0_101, %c1_102, %c0_103, %c0_104], %352 {strides = array<i32>} : memref<1x4x12x2xf32, #tpu.memory_space<vmem>>, vector<1x1x12x2xf32>,
    %c0_105 = arith.constant 0 : index
    %c2_106 = arith.constant 2 : index
    %c0_107 = arith.constant 0 : index
    %c0_108 = arith.constant 0 : index
    %353 = vector.load %arg6[%c0_105, %c2_106, %c0_107, %c0_108] : memref<1x4x12x2xf32, #tpu.memory_space<vmem>>, vector<1x1x12x2xf32>
    %354 = vector.shape_cast %353 : vector<1x1x12x2xf32> to vector<12x2xf32>
    %355 = vector.shape_cast %340 : vector<12x2xf32> to vector<1x1x12x2xf32>
    tpu.vector_store %arg6[%c0_105, %c2_106, %c0_107, %c0_108], %355 {strides = array<i32>} : memref<1x4x12x2xf32, #tpu.memory_space<vmem>>, vector<1x1x12x2xf32>,
    %c0_109 = arith.constant 0 : index
    %c3_110 = arith.constant 3 : index
    %c0_111 = arith.constant 0 : index
    %c0_112 = arith.constant 0 : index
    %356 = vector.load %arg6[%c0_109, %c3_110, %c0_111, %c0_112] : memref<1x4x12x2xf32, #tpu.memory_space<vmem>>, vector<1x1x12x2xf32>
    %357 = vector.shape_cast %356 : vector<1x1x12x2xf32> to vector<12x2xf32>
    %358 = vector.shape_cast %346 : vector<12x2xf32> to vector<1x1x12x2xf32>
    tpu.vector_store %arg6[%c0_109, %c3_110, %c0_111, %c0_112], %358 {strides = array<i32>} : memref<1x4x12x2xf32, #tpu.memory_space<vmem>>, vector<1x1x12x2xf32>,
    return
  }
  func.func @transform_0(%arg0: i32) -> (i32, i32, i32, i32) {
    %c0_i32 = arith.constant 0 : i32
    %c0_i32_0 = arith.constant 0 : i32
    %c0_i32_1 = arith.constant 0 : i32
    %c0_i32_2 = arith.constant 0 : i32
    return %arg0, %c0_i32, %c0_i32_0, %c0_i32_1 : i32, i32, i32, i32
  }
  func.func @transform_1(%arg0: i32) -> (i32, i32, i32) {
    %c0_i32 = arith.constant 0 : i32
    %c0_i32_0 = arith.constant 0 : i32
    %c0_i32_1 = arith.constant 0 : i32
    return %arg0, %c0_i32, %c0_i32_0 : i32, i32, i32
  }
  func.func @transform_2(%arg0: i32) -> (i32, i32, i32, i32) {
    %c0_i32 = arith.constant 0 : i32
    %c0_i32_0 = arith.constant 0 : i32
    %c0_i32_1 = arith.constant 0 : i32
    %c0_i32_2 = arith.constant 0 : i32
    return %arg0, %c0_i32, %c0_i32_0, %c0_i32_1 : i32, i32, i32, i32
  }
  func.func @transform_3(%arg0: i32) -> (i32, i32, i32) {
    %c0_i32 = arith.constant 0 : i32
    %c0_i32_0 = arith.constant 0 : i32
    %c0_i32_1 = arith.constant 0 : i32
    %c0_i32_2 = arith.constant 0 : i32
    return %c0_i32, %c0_i32_0, %c0_i32_1 : i32, i32, i32
  }
  func.func @transform_4(%arg0: i32) -> (i32, i32, i32) {
    %c0_i32 = arith.constant 0 : i32
    %c0_i32_0 = arith.constant 0 : i32
    %c0_i32_1 = arith.constant 0 : i32
    %c0_i32_2 = arith.constant 0 : i32
    return %c0_i32, %c0_i32_0, %c0_i32_1 : i32, i32, i32
  }
  func.func @transform_5(%arg0: i32) -> (i32, i32, i32, i32) {
    %c0_i32 = arith.constant 0 : i32
    %c0_i32_0 = arith.constant 0 : i32
    %c0_i32_1 = arith.constant 0 : i32
    %c0_i32_2 = arith.constant 0 : i32
    return %arg0, %c0_i32, %c0_i32_0, %c0_i32_1 : i32, i32, i32, i32
  }
}

</mosaic_0001>

<bundles_post_ra>
// kernel: tpu_custom_call.1
= control target key start
LH: loop header
LB: loop body
LE: loop exit
PB: predicated region body
PF: predicated region fallthrough
CT: control target
= control target key end

     0   :  { %v277_v0 = vlaneseq  ;;  %vm171_vm0 = vcmask 15360   ;;  %vm1557_vm5 = vcmask 1041409   ;;  %vm1560_vm6 = vcmask 1042434   ;;  %s13300_s0 = inlined_call_operand.vmem [shape: f32[1,8,32,2], index: 0, kind: input, shape index: {}]   ;;  %s13301_s3 = inlined_call_operand.vmem [shape: f32[4,32,2], index: 3, kind: input, shape index: {}]   ;;  %s13302_s4 = inlined_call_operand.vmem [shape: f32[4,1,2], index: 4, kind: input, shape index: {}]   ;;  %s13303_s1 = inlined_call_operand.vmem [shape: s32[1,8,2], index: 1, kind: input, shape index: {}]   ;;  %s13304_s2 = inlined_call_operand.vmem [shape: f32[1,12,32,2], index: 2, kind: input, shape index: {}]   ;;  %s13305_s5 = inlined_call_operand.vmem [shape: f32[1,4,12,2], index: 5, kind: output, shape index: {}]  }
   0x1   :  { %v6199_v1 = vld [vmem:[%s13300_s0] sm:$0xff]  ;;  %v6204_v2 = vld [vmem:[%s13300_s0 + $0x8] sm:$0xff]  ;;  %v6209_v3 = vld [vmem:[%s13300_s0 + $0x10] sm:$0xff]  ;;  %vm1563_vm7 = vcmask 1043459   ;;  %vm1566_vm8 = vcmask 1044484   ;;  %vm1569_vm9 = vcmask 1045509  }
   0x2   :  { %v6214_v4 = vld [vmem:[%s13300_s0 + $0x18] sm:$0xff]  ;;  %v278_v5 = vshrl.u32 %v277_v0, 7  ;;  %v6219_v6 = vld [vmem:[%s13300_s0 + $0x20] sm:$0xff]  ;;  %v6224_v7 = vld [vmem:[%s13300_s0 + $0x28] sm:$0xff]  ;;  %vm1572_vm10 = vcmask 1046534   ;;  %vm1575_vm11 = vcmask 1047559  }
   0x3   :  { %v6229_v8 = vld [vmem:[%s13300_s0 + $0x30] sm:$0xff]  ;;  %v6234_v9 = vld [vmem:[%s13300_s0 + $0x38] sm:$0xff]  ;;  %v6239_v10 = vld [vmem:[%s13300_s0 + $0x40] sm:$0xff]  ;;  %vm5550_vm12 = vcmask 11264  }
   0x4   :  { %v6244_v11 = vld [vmem:[%s13300_s0 + $0x48] sm:$0xff]  ;;  %v6249_v12 = vld [vmem:[%s13300_s0 + $0x50] sm:$0xff]  ;;  %v6254_v13 = vld [vmem:[%s13300_s0 + $0x58] sm:$0xff]  ;;  %v6293_v23 = vsub.s32 0, %v278_v5 }
   0x5   :  { %v6259_v14 = vld [vmem:[%s13300_s0 + $0x60] sm:$0xff]  ;;  %v6264_v15 = vld [vmem:[%s13300_s0 + $0x68] sm:$0xff]  ;;  %v6269_v16 = vld [vmem:[%s13300_s0 + $0x70] sm:$0xff] }
   0x6   :  { %v6274_v17 = vld [vmem:[%s13300_s0 + $0x78] sm:$0xff]  ;;  %v113_v18 = vld [vmem:[%s13301_s3] sm:$0xff]  ;;  %v114_v19 = vld [vmem:[%s13301_s3 + $0x8] sm:$0xff]  ;;  %13921 = vst [vmem:[#allocation3_spill] sm:$0xff] %v6293_v23 }
   0x7   :  { %v6285_v20 = vld [vmem:[%s13300_s0 + $0x80] sm:$0xff]  ;;  %v115_v21 = vld [vmem:[%s13301_s3 + $0x10] sm:$0xff]  ;;  %v116_v22 = vld [vmem:[%s13301_s3 + $0x18] sm:$0xff]  ;;  %v139_v27 = vmul.f32 %v113_v18, %v6199_v1  ;;  %v140_v28 = vmul.f32 %v114_v19, %v6204_v2  ;;  %v143_v34 = vmul.f32 %v113_v18, %v6219_v6  ;;  %v144_v35 = vmul.f32 %v114_v19, %v6224_v7 }
   0x8   :  { %13920 = vst [vmem:[#allocation2_spill] sm:$0xff] %v6285_v20  ;;  %v6298_v24 = vld [vmem:[%s13300_s0 + $0x88] sm:$0xff]  ;;  %v6303_v25 = vld [vmem:[%s13300_s0 + $0x90] sm:$0xff]  ;;  %v6308_v26 = vld [vmem:[%s13300_s0 + $0x98] sm:$0xff]  ;;  %v141_v29 = vmul.f32 %v115_v21, %v6209_v3  ;;  %v142_v30 = vmul.f32 %v116_v22, %v6214_v4  ;;  %v145_v36 = vmul.f32 %v115_v21, %v6229_v8  ;;  %v146_v37 = vmul.f32 %v116_v22, %v6234_v9 }
   0x9   :  { %13922 = vst [vmem:[#allocation4_spill] sm:$0xff] %v6298_v24  ;;  %13923 = vst [vmem:[#allocation5_spill] sm:$0xff] %v6303_v25  ;;  %v6317_v31 = vld [vmem:[%s13300_s0 + $0xa0] sm:$0xff]  ;;  %v6322_v32 = vld [vmem:[%s13300_s0 + $0xa8] sm:$0xff]  ;;  %v147_v41 = vmul.f32 %v113_v18, %v6239_v10  ;;  %v148_v42 = vmul.f32 %v114_v19, %v6244_v11  ;;  %v149_v43 = vmul.f32 %v115_v21, %v6249_v12 }
   0xa   :  { %13924 = vst [vmem:[#allocation6_spill] sm:$0xff] %v6308_v26  ;;  %13925 = vst [vmem:[#allocation7_spill] sm:$0xff] %v6317_v31  ;;  %v6327_v33 = vld [vmem:[%s13300_s0 + $0xb0] sm:$0xff]  ;;  %v6336_v38 = vld [vmem:[%s13300_s0 + $0xb8] sm:$0xff]  ;;  %v150_v44 = vmul.f32 %v116_v22, %v6254_v13  ;;  %v151_v48 = vmul.f32 %v113_v18, %v6259_v14  ;;  %v152_v49 = vmul.f32 %v114_v19, %v6264_v15 }
   0xb   :  { %13926 = vst [vmem:[#allocation8_spill] sm:$0xff] %v6322_v32  ;;  %13927 = vst [vmem:[#allocation9_spill] sm:$0xff] %v6327_v33  ;;  %v6341_v39 = vld [vmem:[%s13300_s0 + $0xc0] sm:$0xff]  ;;  %v6346_v40 = vld [vmem:[%s13300_s0 + $0xc8] sm:$0xff]  ;;  %v153_v50 = vmul.f32 %v115_v21, %v6269_v16  ;;  %v154_v51 = vmul.f32 %v116_v22, %v6274_v17  ;;  %v155_v55 = vmul.f32 %v113_v18, %v6285_v20 }
   0xc   :  { %13928 = vst [vmem:[#allocation10_spill] sm:$0xff] %v6336_v38  ;;  %13929 = vst [vmem:[#allocation11_spill] sm:$0xff] %v6341_v39  ;;  %v6355_v45 = vld [vmem:[%s13300_s0 + $0xd0] sm:$0xff]  ;;  %v6360_v46 = vld [vmem:[%s13300_s0 + $0xd8] sm:$0xff]  ;;  %v156_v56 = vmul.f32 %v114_v19, %v6298_v24  ;;  %v157_v57 = vmul.f32 %v115_v21, %v6303_v25  ;;  %v158_v58 = vmul.f32 %v116_v22, %v6308_v26 }
   0xd   :  { %13930 = vst [vmem:[#allocation12_spill] sm:$0xff] %v6346_v40  ;;  %13931 = vst [vmem:[#allocation13_spill] sm:$0xff] %v6355_v45  ;;  %v6365_v47 = vld [vmem:[%s13300_s0 + $0xe0] sm:$0xff]  ;;  %v6374_v52 = vld [vmem:[%s13300_s0 + $0xe8] sm:$0xff]  ;;  %v159_v59 = vmul.f32 %v113_v18, %v6317_v31  ;;  %v160_v60 = vmul.f32 %v114_v19, %v6322_v32  ;;  %v161_v61 = vmul.f32 %v115_v21, %v6327_v33 }
   0xe   :  { %13932 = vst [vmem:[#allocation14_spill] sm:$0xff] %v6360_v46  ;;  %13933 = vst [vmem:[#allocation15_spill] sm:$0xff] %v6365_v47  ;;  %v6379_v53 = vld [vmem:[%s13300_s0 + $0xf0] sm:$0xff]  ;;  %v6384_v54 = vld [vmem:[%s13300_s0 + $0xf8] sm:$0xff]  ;;  %v162_v62 = vmul.f32 %v116_v22, %v6336_v38  ;;  %v163_v63 = vmul.f32 %v113_v18, %v6341_v39  ;;  %v164_v0 = vmul.f32 %v114_v19, %v6346_v40  ;;  %v172_v40 = vsel %vm171_vm0, %v139_v27, 0.0 }
   0xf   :  { %13934 = vst [vmem:[#allocation16_spill] sm:$0xff] %v6374_v52  ;;  %13935 = vst [vmem:[#allocation17_spill] sm:$0xff] %v6379_v53  ;;  %v6397_v5 = vmul.f32 %v115_v21, %v6355_v45  ;;  %v6400_v23 = vmul.f32 %v116_v22, %v6360_v46  ;;  %v6403_v26 = vmul.f32 %v113_v18, %v6365_v47  ;;  %v173_v45 = vsel %vm171_vm0, %v140_v28, 0.0 }
  0x10   :  { %13936 = vst [vmem:[#allocation18_spill] sm:$0xff] %v6384_v54  ;;  %v6406_v31 = vmul.f32 %v114_v19, %v6374_v52  ;;  %v6409_v33 = vmul.f32 %v115_v21, %v6379_v53  ;;  %v6412_v38 = vmul.f32 %v116_v22, %v6384_v54  ;;  %v175_v39 = vsel %vm171_vm0, %v141_v29, 0.0 }
  0x11   :  { %v177_v46 = vsel %vm171_vm0, %v142_v30, 0.0  ;;  %v174_v32 = vadd.f32 %v173_v45, %v172_v40  ;;  %v185_v18 = vsel %vm171_vm0, %v143_v34, 0.0  ;;  %v186_v19 = vsel %vm171_vm0, %v144_v35, 0.0 }
  0x12   :  { %v188_v52 = vsel %vm171_vm0, %v145_v36, 0.0  ;;  %v187_v21 = vadd.f32 %v186_v19, %v185_v18  ;;  %v190_v53 = vsel %vm171_vm0, %v146_v37, 0.0  ;;  %v198_v22 = vsel %vm171_vm0, %v147_v41, 0.0 }
  0x13   :  { %v199_v27 = vsel %vm171_vm0, %v148_v42, 0.0  ;;  %v176_v54 = vadd.f32 %v175_v39, %v174_v32  ;;  %v201_v29 = vsel %vm171_vm0, %v149_v43, 0.0  ;;  %v203_v30 = vsel %vm171_vm0, %v150_v44, 0.0 }
  0x14   :  { %v200_v28 = vadd.f32 %v199_v27, %v198_v22  ;;  %v189_v40 = vadd.f32 %v188_v52, %v187_v21  ;;  %v211_v34 = vsel %vm171_vm0, %v151_v48, 0.0  ;;  %v212_v35 = vsel %vm171_vm0, %v152_v49, 0.0 }
  0x15   :  { %v214_v36 = vsel %vm171_vm0, %v153_v50, 0.0  ;;  %v178_v45 = vadd.f32 %v177_v46, %v176_v54  ;;  %v213_v37 = vadd.f32 %v212_v35, %v211_v34  ;;  %v216_v41 = vsel %vm171_vm0, %v154_v51, 0.0 }
  0x16   :  { %v202_v18 = vadd.f32 %v201_v29, %v200_v28  ;;  %v191_v19 = vadd.f32 %v190_v53, %v189_v40  ;;  %v224_v32 = vsel %vm171_vm0, %v155_v55, 0.0  ;;  %v225_v39 = vsel %vm171_vm0, %v156_v56, 0.0 }
  0x17   :  { %v227_v42 = vsel %vm171_vm0, %v157_v57, 0.0  ;;  %v179_v43 = vrot.slane %v178_v45, 4  ;;  %v215_v52 = vadd.f32 %v214_v36, %v213_v37  ;;  %v226_v48 = vadd.f32 %v225_v39, %v224_v32 }
  0x18   :  { %v204_v44 = vadd.f32 %v203_v30, %v202_v18  ;;  %v192_v21 = vrot.slane %v191_v19, 4  ;;  %v229_v49 = vsel %vm171_vm0, %v158_v58, 0.0  ;;  %v237_v46 = vsel %vm171_vm0, %v159_v59, 0.0 }
  0x19   :  { %v238_v50 = vsel %vm171_vm0, %v160_v60, 0.0  ;;  %v180_v54 = vadd.f32 %v179_v43, %v178_v45  ;;  %v217_v53 = vadd.f32 %v216_v41, %v215_v52  ;;  %v228_v22 = vadd.f32 %v227_v42, %v226_v48 }
  0x1a   :  { %v205_v51 = vrot.slane %v204_v44, 4  ;;  %v193_v55 = vadd.f32 %v192_v21, %v191_v19  ;;  %v239_v27 = vadd.f32 %v238_v50, %v237_v46  ;;  %v240_v56 = vsel %vm171_vm0, %v161_v61, 0.0  ;;  %v6447_v46 = vld [vmem:[%s13302_s4] ss:$0 sm:$0xff] }
  0x1b   :  { %v242_v57 = vsel %vm171_vm0, %v162_v62, 0.0  ;;  %v181_v28 = vrot.slane %v180_v54, 2  ;;  %v218_v30 = vrot.slane %v217_v53, 4  ;;  %v230_v40 = vadd.f32 %v229_v49, %v228_v22 }
  0x1c   :  { %v206_v29 = vadd.f32 %v205_v51, %v204_v44  ;;  %v194_v34 = vrot.slane %v193_v55, 2  ;;  %v241_v58 = vadd.f32 %v240_v56, %v239_v27  ;;  %v250_v59 = vsel %vm171_vm0, %v163_v63, 0.0 }
  0x1d   :  { %v251_v60 = vsel %vm171_vm0, %v164_v0, 0.0  ;;  %v182_v35 = vadd.f32 %v181_v28, %v180_v54  ;;  %v219_v45 = vadd.f32 %v218_v30, %v217_v53  ;;  %v231_v18 = vrot.slane %v230_v40, 4  ;;  %v6454_v53 = vld [vmem:[%s13301_s3 + $0x20] sm:$0xff] }
  0x1e   :  { %v207_v36 = vrot.slane %v206_v29, 2  ;;  %v195_v37 = vadd.f32 %v194_v34, %v193_v55  ;;  %v243_v41 = vadd.f32 %v242_v57, %v241_v58  ;;  %v252_v19 = vadd.f32 %v251_v60, %v250_v59  ;;  %v5672_v34 = vld [vmem:[%s13301_s3 + $0x28] sm:$0xff]  ;;  %v5673_v58 = vld [vmem:[%s13301_s3 + $0x30] sm:$0xff] }
  0x1f   :  { %v253_v61 = vsel %vm171_vm0, %v6397_v5, 0.0  ;;  %v183_v62 = vrot.slane %v182_v35, 1  ;;  %v220_v39 = vrot.slane %v219_v45, 2  ;;  %v232_v42 = vadd.f32 %v231_v18, %v230_v40 }
  0x20   :  { %v208_v32 = vadd.f32 %v207_v36, %v206_v29  ;;  %v196_v43 = vrot.slane %v195_v37, 1  ;;  %v244_v44 = vrot.slane %v243_v41, 4  ;;  %v254_v52 = vadd.f32 %v253_v61, %v252_v19 }
  0x21   :  { %v255_v63 = vsel %vm171_vm0, %v6400_v23, 0.0  ;;  %v184_v0 = vadd.f32 %v183_v62, %v182_v35  ;;  %v221_v21 = vadd.f32 %v220_v39, %v219_v45  ;;  %v233_v49 = vrot.slane %v232_v42, 2 }
  0x22   :  { %v209_v48 = vrot.slane %v208_v32, 1  ;;  %v197_v5 = vadd.f32 %v196_v43, %v195_v37  ;;  %v245_v50 = vadd.f32 %v244_v44, %v243_v41  ;;  %v256_v54 = vadd.f32 %v255_v63, %v254_v52 }
  0x23   :  { %v263_v51 = vsel %vm171_vm0, %v6403_v26, 0.0  ;;  %v222_v22 = vrot.slane %v221_v21, 1  ;;  %v234_v55 = vadd.f32 %v233_v49, %v232_v42  ;;  %v264_v27 = vsel %vm171_vm0, %v6406_v31, 0.0  ;;  %v5674_v31 = vld [vmem:[%s13301_s3 + $0x38] sm:$0xff] }
  0x24   :  { %v210_v23 = vadd.f32 %v209_v48, %v208_v32  ;;  %v246_v56 = vrot.slane %v245_v50, 2  ;;  %v257_v57 = vrot.slane %v256_v54, 4  ;;  %v265_v28 = vadd.f32 %v264_v27, %v263_v51 }
  0x25   :  { %v266_v29 = vsel %vm171_vm0, %v6409_v33, 0.0  ;;  %v223_v30 = vadd.f32 %v222_v22, %v221_v21  ;;  %v235_v40 = vrot.slane %v234_v55, 1  ;;  %v268_v26 = vsel %vm171_vm0, %v6412_v38, 0.0 }
  0x26   :  { %v247_v59 = vadd.f32 %v246_v56, %v245_v50  ;;  %v258_v60 = vadd.f32 %v257_v57, %v256_v54  ;;  %v267_v33 = vadd.f32 %v266_v29, %v265_v28  ;;  %v290_v35 = vmul.f32 %v6454_v53, %v6199_v1 }
  0x27   :  { %v236_v36 = vadd.f32 %v235_v40, %v234_v55  ;;  %v6474_v38 = vadd.f32 %v6447_v46, %v184_v0  ;;  %v6477_v45 = vadd.f32 %v6447_v46, %v197_v5  ;;  %v6480_v18 = vadd.f32 %v6447_v46, %v210_v23 }
  0x28   :  { %v248_v37 = vrot.slane %v247_v59, 1  ;;  %v259_v41 = vrot.slane %v258_v60, 2  ;;  %v269_v19 = vadd.f32 %v268_v26, %v267_v33  ;;  %v6483_v61 = vadd.f32 %v6447_v46, %v223_v30 }
  0x29   :  { %13937 = vst [vmem:[#allocation19_spill] sm:$0xff] %v6474_v38  ;;  %13938 = vst [vmem:[#allocation20_spill] sm:$0xff] %v6477_v45  ;;  %v6486_v62 = vadd.f32 %v6447_v46, %v236_v36  ;;  %v291_v32 = vmul.f32 %v5672_v34, %v6204_v2  ;;  %v292_v39 = vmul.f32 %v5673_v58, %v6209_v3 }
  0x2a   :  { %13939 = vst [vmem:[#allocation21_spill] sm:$0xff] %v6480_v18  ;;  %13940 = vst [vmem:[#allocation22_spill] sm:$0xff] %v6483_v61  ;;  %v293_v42 = vmul.f32 %v5674_v31, %v6214_v4  ;;  %v249_v43 = vadd.f32 %v248_v37, %v247_v59  ;;  %v260_v44 = vadd.f32 %v259_v41, %v258_v60  ;;  %v270_v52 = vrot.slane %v269_v19, 4  ;;  %v13943_v59 = vld [vmem:[#allocation6_spill] sm:$0xff]  ;;  %v13945_v37 = vld [vmem:[#allocation7_spill] sm:$0xff] }
  0x2b   :  { %13941 = vst [vmem:[#allocation23_spill] sm:$0xff] %v6486_v62  ;;  %v294_v63 = vmul.f32 %v6454_v53, %v6219_v6  ;;  %v295_v0 = vmul.f32 %v5672_v34, %v6224_v7  ;;  %v296_v48 = vmul.f32 %v5673_v58, %v6229_v8  ;;  %v297_v21 = vmul.f32 %v5674_v31, %v6234_v9  ;;  %v13949_v62 = vld [vmem:[#allocation11_spill] sm:$0xff]  ;;  %v13950_v18 = vld [vmem:[#allocation12_spill] sm:$0xff] }
  0x2c   :  { %v298_v49 = vmul.f32 %v6454_v53, %v6239_v10  ;;  %v261_v5 = vrot.slane %v260_v44, 1  ;;  %v271_v50 = vadd.f32 %v270_v52, %v269_v19  ;;  %v6499_v54 = vadd.f32 %v6447_v46, %v249_v43  ;;  %v13946_v19 = vld [vmem:[#allocation8_spill] sm:$0xff] }
  0x2d   :  { %v299_v51 = vmul.f32 %v5672_v34, %v6244_v11  ;;  %v300_v23 = vmul.f32 %v5673_v58, %v6249_v12  ;;  %v301_v22 = vmul.f32 %v5674_v31, %v6254_v13  ;;  %v302_v55 = vmul.f32 %v6454_v53, %v6259_v14 }
  0x2e   :  { %13942 = vst [vmem:[#allocation24_spill] sm:$0xff] %v6499_v54  ;;  %v303_v27 = vmul.f32 %v5672_v34, %v6264_v15  ;;  %v262_v56 = vadd.f32 %v261_v5, %v260_v44  ;;  %v272_v57 = vrot.slane %v271_v50, 2  ;;  %v304_v28 = vmul.f32 %v5673_v58, %v6269_v16  ;;  %v13947_v44 = vld [vmem:[#allocation9_spill] sm:$0xff]  ;;  %v13948_v5 = vld [vmem:[#allocation10_spill] sm:$0xff] }
  0x2f   :  { %v305_v29 = vmul.f32 %v5674_v31, %v6274_v17  ;;  %v306_v30 = vmul.f32 %v6454_v53, %v6285_v20  ;;  %v307_v40 = vmul.f32 %v5672_v34, %v6298_v24  ;;  %v308_v26 = vmul.f32 %v5673_v58, %v6303_v25 }
  0x30   :  { %v309_v60 = vmul.f32 %v5674_v31, %v13943_v59  ;;  %v273_v33 = vadd.f32 %v272_v57, %v271_v50  ;;  %v6515_v36 = vadd.f32 %v6447_v46, %v262_v56  ;;  %v310_v41 = vmul.f32 %v6454_v53, %v13945_v37  ;;  %v13951_v50 = vld [vmem:[#allocation13_spill] sm:$0xff]  ;;  %v13952_v56 = vld [vmem:[#allocation14_spill] sm:$0xff] }
  0x31   :  { %v311_v43 = vmul.f32 %v5672_v34, %v13946_v19  ;;  %v312_v52 = vmul.f32 %v5673_v58, %v13947_v44  ;;  %v313_v54 = vmul.f32 %v5674_v31, %v13948_v5  ;;  %v314_v61 = vmul.f32 %v6454_v53, %v13949_v62  ;;  %v13953_v44 = vld [vmem:[#allocation16_spill] sm:$0xff]  ;;  %v13954_v5 = vld [vmem:[#allocation17_spill] sm:$0xff]  ;;  %v13955_v62 = vld [vmem:[#allocation18_spill] sm:$0xff] }
  0x32   :  { %13944 = vst [vmem:[#allocation25_spill] sm:$0xff] %v6515_v36  ;;  %v6525_v45 = vmul.f32 %v5672_v34, %v13950_v18  ;;  %v274_v38 = vrot.slane %v273_v33, 1  ;;  %v6528_v57 = vmul.f32 %v5673_v58, %v13951_v50  ;;  %v6531_v36 = vmul.f32 %v5674_v31, %v13952_v56 }
  0x33   :  { %v6535_v19 = vmul.f32 %v6454_v53, %v6365_v47  ;;  %v6538_v37 = vmul.f32 %v5672_v34, %v13953_v44  ;;  %v6541_v59 = vmul.f32 %v5673_v58, %v13954_v5  ;;  %v6544_v18 = vmul.f32 %v5674_v31, %v13955_v62 }
  0x34   :  { %v322_v25 = vsel %vm171_vm0, %v290_v35, 0.0  ;;  %v275_v50 = vadd.f32 %v274_v38, %v273_v33  ;;  %v323_v24 = vsel %vm171_vm0, %v291_v32, 0.0  ;;  %v325_v56 = vsel %vm171_vm0, %v292_v39, 0.0 }
  0x35   :  { %v327_v20 = vsel %vm171_vm0, %v293_v42, 0.0  ;;  %v324_v53 = vadd.f32 %v323_v24, %v322_v25  ;;  %v335_v47 = vsel %vm171_vm0, %v294_v63, 0.0  ;;  %v336_v34 = vsel %vm171_vm0, %v295_v0, 0.0 }
  0x36   :  { %v338_v58 = vsel %vm171_vm0, %v296_v48, 0.0  ;;  %v6554_v5 = vadd.f32 %v6447_v46, %v275_v50  ;;  %v337_v31 = vadd.f32 %v336_v34, %v335_v47  ;;  %v340_v35 = vsel %vm171_vm0, %v297_v21, 0.0 }
  0x37   :  { %v348_v38 = vsel %vm171_vm0, %v298_v49, 0.0  ;;  %v326_v32 = vadd.f32 %v325_v56, %v324_v53  ;;  %v349_v39 = vsel %vm171_vm0, %v299_v51, 0.0  ;;  %v351_v42 = vsel %vm171_vm0, %v300_v23, 0.0 }
  0x38   :  { %13956 = vst [vmem:[#allocation18_spill] sm:$0xff] %v6554_v5  ;;  %v353_v24 = vsel %vm171_vm0, %v301_v22, 0.0  ;;  %v339_v25 = vadd.f32 %v338_v58, %v337_v31  ;;  %v350_v63 = vadd.f32 %v349_v39, %v348_v38  ;;  %v361_v0 = vsel %vm171_vm0, %v302_v55, 0.0 }
  0x39   :  { %v362_v48 = vsel %vm171_vm0, %v303_v27, 0.0  ;;  %v328_v46 = vadd.f32 %v327_v20, %v326_v32  ;;  %v364_v47 = vsel %vm171_vm0, %v304_v28, 0.0  ;;  %v366_v21 = vsel %vm171_vm0, %v305_v29, 0.0 }
  0x3a   :  { %v363_v33 = vadd.f32 %v362_v48, %v361_v0  ;;  %v341_v49 = vadd.f32 %v340_v35, %v339_v25  ;;  %v352_v50 = vadd.f32 %v351_v42, %v350_v63  ;;  %v374_v51 = vsel %vm171_vm0, %v306_v30, 0.0 }
  0x3b   :  { %v375_v23 = vsel %vm171_vm0, %v307_v40, 0.0  ;;  %v329_v56 = vrot.slane %v328_v46, 4  ;;  %v377_v34 = vsel %vm171_vm0, %v308_v26, 0.0  ;;  %v379_v20 = vsel %vm171_vm0, %v309_v60, 0.0 }
  0x3c   :  { %v365_v22 = vadd.f32 %v364_v47, %v363_v33  ;;  %v376_v53 = vadd.f32 %v375_v23, %v374_v51  ;;  %v342_v55 = vrot.slane %v341_v49, 4  ;;  %v354_v58 = vadd.f32 %v353_v24, %v352_v50 }
  0x3d   :  { %v387_v27 = vsel %vm171_vm0, %v310_v41, 0.0  ;;  %v330_v28 = vadd.f32 %v329_v56, %v328_v46  ;;  %v388_v35 = vsel %vm171_vm0, %v311_v43, 0.0  ;;  %v390_v40 = vsel %vm171_vm0, %v312_v52, 0.0 }
  0x3e   :  { %v367_v31 = vadd.f32 %v366_v21, %v365_v22  ;;  %v378_v29 = vadd.f32 %v377_v34, %v376_v53  ;;  %v343_v38 = vadd.f32 %v342_v55, %v341_v49  ;;  %v355_v30 = vrot.slane %v354_v58, 4 }
  0x3f   :  { %v389_v32 = vadd.f32 %v388_v35, %v387_v27  ;;  %v331_v39 = vrot.slane %v330_v28, 2  ;;  %v392_v26 = vsel %vm171_vm0, %v313_v54, 0.0  ;;  %v400_v41 = vsel %vm171_vm0, %v314_v61, 0.0 }
  0x40   :  { %v368_v42 = vrot.slane %v367_v31, 4  ;;  %v380_v25 = vadd.f32 %v379_v20, %v378_v29  ;;  %v344_v24 = vrot.slane %v343_v38, 2  ;;  %v356_v63 = vadd.f32 %v355_v30, %v354_v58  ;;  %v6597_v30 = vld [vmem:[%s13301_s3 + $0x48] sm:$0xff] }
  0x41   :  { %v391_v60 = vadd.f32 %v390_v40, %v389_v32  ;;  %v332_v0 = vadd.f32 %v331_v39, %v330_v28  ;;  %v401_v43 = vsel %vm171_vm0, %v6525_v45, 0.0  ;;  %v403_v54 = vsel %vm171_vm0, %v6528_v57, 0.0  ;;  %v6602_v32 = vld [vmem:[%s13301_s3 + $0x50] sm:$0xff] }
  0x42   :  { %v369_v48 = vadd.f32 %v368_v42, %v367_v31  ;;  %v381_v46 = vrot.slane %v380_v25, 4  ;;  %v345_v33 = vadd.f32 %v344_v24, %v343_v38  ;;  %v357_v47 = vrot.slane %v356_v63, 2  ;;  %v6583_v31 = vld [vmem:[%s13302_s4 + $0x1] ss:$0 sm:$0xff] }
  0x43   :  { %v393_v21 = vadd.f32 %v392_v26, %v391_v60  ;;  %v402_v52 = vadd.f32 %v401_v43, %v400_v41  ;;  %v333_v49 = vrot.slane %v332_v0, 1  ;;  %v405_v45 = vsel %vm171_vm0, %v6531_v36, 0.0  ;;  %v6592_v36 = vld [vmem:[%s13301_s3 + $0x40] sm:$0xff] }
  0x44   :  { %v370_v50 = vrot.slane %v369_v48, 2  ;;  %v382_v51 = vadd.f32 %v381_v46, %v380_v25  ;;  %v346_v23 = vrot.slane %v345_v33, 1  ;;  %v358_v56 = vadd.f32 %v357_v47, %v356_v63 }
  0x45   :  { %v394_v22 = vrot.slane %v393_v21, 4  ;;  %v404_v61 = vadd.f32 %v403_v54, %v402_v52  ;;  %v334_v53 = vadd.f32 %v333_v49, %v332_v0  ;;  %v413_v35 = vsel %vm171_vm0, %v6535_v19, 0.0  ;;  %v5678_v0 = vld [vmem:[%s13301_s3 + $0x58] sm:$0xff] }
  0x46   :  { %v371_v34 = vadd.f32 %v370_v50, %v369_v48  ;;  %v383_v55 = vrot.slane %v382_v51, 2  ;;  %v347_v58 = vadd.f32 %v346_v23, %v345_v33  ;;  %v359_v20 = vrot.slane %v358_v56, 1 }
  0x47   :  { %v395_v27 = vadd.f32 %v394_v22, %v393_v21  ;;  %v406_v28 = vadd.f32 %v405_v45, %v404_v61  ;;  %v414_v38 = vsel %vm171_vm0, %v6538_v37, 0.0  ;;  %v416_v26 = vsel %vm171_vm0, %v6541_v59, 0.0 }
  0x48   :  { %v372_v57 = vrot.slane %v371_v34, 1  ;;  %v384_v29 = vadd.f32 %v383_v55, %v382_v51  ;;  %v360_v40 = vadd.f32 %v359_v20, %v358_v56  ;;  %v415_v42 = vadd.f32 %v414_v38, %v413_v35 }
  0x49   :  { %v396_v19 = vrot.slane %v395_v27, 2  ;;  %v407_v39 = vrot.slane %v406_v28, 4  ;;  %v418_v24 = vsel %vm171_vm0, %v6544_v18, 0.0  ;;  %v440_v46 = vmul.f32 %v6592_v36, %v6199_v1 }
  0x4a   :  { %v373_v37 = vadd.f32 %v372_v57, %v371_v34  ;;  %v385_v25 = vrot.slane %v384_v29, 1  ;;  %v417_v41 = vadd.f32 %v416_v26, %v415_v42  ;;  %v441_v43 = vmul.f32 %v6597_v30, %v6204_v2  ;;  %v13964_v26 = vld [vmem:[#allocation4_spill] sm:$0xff] }
  0x4b   :  { %v397_v63 = vadd.f32 %v396_v19, %v395_v27  ;;  %v408_v60 = vadd.f32 %v407_v39, %v406_v28  ;;  %v442_v59 = vmul.f32 %v6602_v32, %v6209_v3  ;;  %v6618_v21 = vadd.f32 %v6583_v31, %v334_v53 }
  0x4c   :  { %v386_v48 = vadd.f32 %v385_v25, %v384_v29  ;;  %v419_v18 = vadd.f32 %v418_v24, %v417_v41  ;;  %v6621_v52 = vadd.f32 %v6583_v31, %v347_v58  ;;  %v6624_v49 = vadd.f32 %v6583_v31, %v360_v40 }
  0x4d   :  { %v398_v33 = vrot.slane %v397_v63, 1  ;;  %v409_v47 = vrot.slane %v408_v60, 2  ;;  %13957 = vst [vmem:[#allocation26_spill] sm:$0xff] %v6618_v21  ;;  %v6627_v50 = vadd.f32 %v6583_v31, %v373_v37  ;;  %v443_v22 = vmul.f32 %v5678_v0, %v6214_v4  ;;  %v13963_v37 = vld [vmem:[#allocation2_spill] sm:$0xff] }
  0x4e   :  { %13958 = vst [vmem:[#allocation27_spill] sm:$0xff] %v6621_v52  ;;  %13959 = vst [vmem:[#allocation28_spill] sm:$0xff] %v6624_v49  ;;  %v6630_v51 = vadd.f32 %v6583_v31, %v386_v48  ;;  %v420_v56 = vrot.slane %v419_v18, 4  ;;  %v444_v61 = vmul.f32 %v6592_v36, %v6219_v6  ;;  %v445_v53 = vmul.f32 %v6597_v30, %v6224_v7  ;;  %v13975_v21 = vld [vmem:[#allocation14_spill] sm:$0xff] }
  0x4f   :  { %13960 = vst [vmem:[#allocation29_spill] sm:$0xff] %v6627_v50  ;;  %v399_v54 = vadd.f32 %v398_v33, %v397_v63  ;;  %v410_v23 = vadd.f32 %v409_v47, %v408_v60  ;;  %v446_v34 = vmul.f32 %v6602_v32, %v6229_v8  ;;  %v447_v55 = vmul.f32 %v5678_v0, %v6234_v9  ;;  %v13965_v63 = vld [vmem:[#allocation5_spill] sm:$0xff]  ;;  %v13967_v33 = vld [vmem:[#allocation6_spill] sm:$0xff]  ;;  %v13972_v50 = vld [vmem:[#allocation11_spill] sm:$0xff] }
  0x50   :  { %13961 = vst [vmem:[#allocation30_spill] sm:$0xff] %v6630_v51  ;;  %v421_v58 = vadd.f32 %v420_v56, %v419_v18  ;;  %v448_v27 = vmul.f32 %v6592_v36, %v6239_v10  ;;  %v449_v28 = vmul.f32 %v6597_v30, %v6244_v11  ;;  %v450_v57 = vmul.f32 %v6602_v32, %v6249_v12  ;;  %v13968_v18 = vld [vmem:[#allocation7_spill] sm:$0xff] }
  0x51   :  { %v411_v45 = vrot.slane %v410_v23, 1  ;;  %v6641_v20 = vadd.f32 %v6583_v31, %v399_v54  ;;  %v451_v29 = vmul.f32 %v5678_v0, %v6254_v13  ;;  %v452_v35 = vmul.f32 %v6592_v36, %v6259_v14 }
  0x52   :  { %v422_v40 = vrot.slane %v421_v58, 2  ;;  %v453_v19 = vmul.f32 %v6597_v30, %v6264_v15  ;;  %v454_v39 = vmul.f32 %v6602_v32, %v6269_v16  ;;  %v455_v42 = vmul.f32 %v5678_v0, %v6274_v17 }
  0x53   :  { %13962 = vst [vmem:[#allocation31_spill] sm:$0xff] %v6641_v20  ;;  %v412_v38 = vadd.f32 %v411_v45, %v410_v23  ;;  %v456_v25 = vmul.f32 %v6592_v36, %v13963_v37  ;;  %v457_v24 = vmul.f32 %v6597_v30, %v13964_v26  ;;  %v458_v60 = vmul.f32 %v6602_v32, %v13965_v63  ;;  %v13969_v23 = vld [vmem:[#allocation8_spill] sm:$0xff]  ;;  %v13970_v45 = vld [vmem:[#allocation9_spill] sm:$0xff]  ;;  %v13971_v20 = vld [vmem:[#allocation10_spill] sm:$0xff] }
  0x54   :  { %v423_v41 = vadd.f32 %v422_v40, %v421_v58  ;;  %v459_v47 = vmul.f32 %v5678_v0, %v13967_v33  ;;  %v460_v54 = vmul.f32 %v6592_v36, %v13968_v18  ;;  %v461_v56 = vmul.f32 %v6597_v30, %v13969_v23  ;;  %v13973_v40 = vld [vmem:[#allocation12_spill] sm:$0xff]  ;;  %v13976_v33 = vld [vmem:[#allocation15_spill] sm:$0xff] }
  0x55   :  { %v6664_v48 = vadd.f32 %v6583_v31, %v412_v38  ;;  %v462_v5 = vmul.f32 %v6602_v32, %v13970_v45  ;;  %v463_v51 = vmul.f32 %v5678_v0, %v13971_v20  ;;  %v464_v49 = vmul.f32 %v6592_v36, %v13972_v50  ;;  %v13977_v45 = vld [vmem:[#allocation17_spill] sm:$0xff] }
  0x56   :  { %v424_v58 = vrot.slane %v423_v41, 1  ;;  %v465_v38 = vmul.f32 %v6597_v30, %v13973_v40  ;;  %v6681_v18 = vmul.f32 %v5678_v0, %v13975_v21  ;;  %v6685_v23 = vmul.f32 %v6592_v36, %v13976_v33 }
  0x57   :  { %13966 = vst [vmem:[#allocation2_spill] sm:$0xff] %v6664_v48  ;;  %v13974_v48 = vld [vmem:[#allocation13_spill] sm:$0xff]  ;;  %v6689_v20 = vmul.f32 %v6597_v30, %v13953_v44  ;;  %v6693_v50 = vmul.f32 %v6602_v32, %v13977_v45  ;;  %v6696_v40 = vmul.f32 %v5678_v0, %v13955_v62  ;;  %v473_v21 = vsel %vm171_vm0, %v441_v43, 0.0 }
  0x58   :  { %v466_v52 = vmul.f32 %v6602_v32, %v13974_v48  ;;  %v425_v63 = vadd.f32 %v424_v58, %v423_v41  ;;  %v472_v48 = vsel %vm171_vm0, %v440_v46, 0.0  ;;  %v475_v26 = vsel %vm171_vm0, %v442_v59, 0.0 }
  0x59   :  { %v474_v36 = vadd.f32 %v473_v21, %v472_v48  ;;  %v477_v33 = vsel %vm171_vm0, %v443_v22, 0.0  ;;  %v485_v30 = vsel %vm171_vm0, %v444_v61, 0.0  ;;  %v486_v44 = vsel %vm171_vm0, %v445_v53, 0.0 }
  0x5a   :  { %v6705_v32 = vadd.f32 %v6583_v31, %v425_v63  ;;  %v487_v45 = vadd.f32 %v486_v44, %v485_v30  ;;  %v488_v0 = vsel %vm171_vm0, %v446_v34, 0.0  ;;  %v490_v41 = vsel %vm171_vm0, %v447_v55, 0.0 }
  0x5b   :  { %v476_v46 = vadd.f32 %v475_v26, %v474_v36  ;;  %v498_v43 = vsel %vm171_vm0, %v448_v27, 0.0  ;;  %v499_v59 = vsel %vm171_vm0, %v449_v28, 0.0  ;;  %v501_v21 = vsel %vm171_vm0, %v450_v57, 0.0 }
  0x5c   :  { %v489_v22 = vadd.f32 %v488_v0, %v487_v45  ;;  %v500_v48 = vadd.f32 %v499_v59, %v498_v43  ;;  %v503_v61 = vsel %vm171_vm0, %v451_v29, 0.0  ;;  %v511_v53 = vsel %vm171_vm0, %v452_v35, 0.0 }
  0x5d   :  { %v478_v31 = vadd.f32 %v477_v33, %v476_v46  ;;  %v512_v44 = vsel %vm171_vm0, %v453_v19, 0.0  ;;  %v514_v34 = vsel %vm171_vm0, %v454_v39, 0.0  ;;  %v516_v55 = vsel %vm171_vm0, %v455_v42, 0.0 }
  0x5e   :  { %v491_v26 = vadd.f32 %v490_v41, %v489_v22  ;;  %v502_v63 = vadd.f32 %v501_v21, %v500_v48  ;;  %v513_v27 = vadd.f32 %v512_v44, %v511_v53  ;;  %v524_v28 = vsel %vm171_vm0, %v456_v25, 0.0 }
  0x5f   :  { %v479_v58 = vrot.slane %v478_v31, 4  ;;  %v525_v57 = vsel %vm171_vm0, %v457_v24, 0.0  ;;  %v527_v45 = vsel %vm171_vm0, %v458_v60, 0.0  ;;  %v529_v29 = vsel %vm171_vm0, %v459_v47, 0.0 }
  0x60   :  { %v492_v35 = vrot.slane %v491_v26, 4  ;;  %v504_v33 = vadd.f32 %v503_v61, %v502_v63  ;;  %v515_v36 = vadd.f32 %v514_v34, %v513_v27  ;;  %v526_v19 = vadd.f32 %v525_v57, %v524_v28 }
  0x61   :  { %v480_v30 = vadd.f32 %v479_v58, %v478_v31  ;;  %v537_v39 = vsel %vm171_vm0, %v460_v54, 0.0  ;;  %v538_v42 = vsel %vm171_vm0, %v461_v56, 0.0  ;;  %v540_v0 = vsel %vm171_vm0, %v462_v5, 0.0 }
  0x62   :  { %v493_v41 = vadd.f32 %v492_v35, %v491_v26  ;;  %v505_v25 = vrot.slane %v504_v33, 4  ;;  %v517_v46 = vadd.f32 %v516_v55, %v515_v36  ;;  %v528_v43 = vadd.f32 %v527_v45, %v526_v19 }
  0x63   :  { %v481_v24 = vrot.slane %v480_v30, 2  ;;  %v539_v59 = vadd.f32 %v538_v42, %v537_v39  ;;  %v542_v60 = vsel %vm171_vm0, %v463_v51, 0.0  ;;  %v550_v47 = vsel %vm171_vm0, %v464_v49, 0.0 }
  0x64   :  { %v494_v21 = vrot.slane %v493_v41, 2  ;;  %v506_v22 = vadd.f32 %v505_v25, %v504_v33  ;;  %v518_v48 = vrot.slane %v517_v46, 4  ;;  %v530_v61 = vadd.f32 %v529_v29, %v528_v43 }
  0x65   :  { %v482_v53 = vadd.f32 %v481_v24, %v480_v30  ;;  %v541_v54 = vadd.f32 %v540_v0, %v539_v59  ;;  %v551_v56 = vsel %vm171_vm0, %v465_v38, 0.0  ;;  %v553_v5 = vsel %vm171_vm0, %v466_v52, 0.0  ;;  %v6735_v38 = vld [vmem:[%s13302_s4 + $0x2] ss:$0 sm:$0xff] }
  0x66   :  { %v495_v31 = vadd.f32 %v494_v21, %v493_v41  ;;  %v507_v44 = vrot.slane %v506_v22, 2  ;;  %v519_v34 = vadd.f32 %v518_v48, %v517_v46  ;;  %v531_v55 = vrot.slane %v530_v61, 4 }
  0x67   :  { %v483_v26 = vrot.slane %v482_v53, 1  ;;  %v543_v63 = vadd.f32 %v542_v60, %v541_v54  ;;  %v552_v27 = vadd.f32 %v551_v56, %v550_v47  ;;  %v555_v49 = vsel %vm171_vm0, %v6681_v18, 0.0  ;;  %v6740_v18 = vld [vmem:[%s13301_s3 + $0x60] sm:$0xff]  ;;  %v5680_v47 = vld [vmem:[%s13301_s3 + $0x68] sm:$0xff] }
  0x68   :  { %v496_v51 = vrot.slane %v495_v31, 1  ;;  %v508_v28 = vadd.f32 %v507_v44, %v506_v22  ;;  %v520_v58 = vrot.slane %v519_v34, 2  ;;  %v532_v57 = vadd.f32 %v531_v55, %v530_v61  ;;  %v5682_v61 = vld [vmem:[%s13301_s3 + $0x78] sm:$0xff] }
  0x69   :  { %v484_v45 = vadd.f32 %v483_v26, %v482_v53  ;;  %v544_v29 = vrot.slane %v543_v63, 4  ;;  %v554_v35 = vadd.f32 %v553_v5, %v552_v27  ;;  %v563_v52 = vsel %vm171_vm0, %v6685_v23, 0.0 }
  0x6a   :  { %v497_v33 = vadd.f32 %v496_v51, %v495_v31  ;;  %v509_v36 = vrot.slane %v508_v28, 1  ;;  %v521_v19 = vadd.f32 %v520_v58, %v519_v34  ;;  %v533_v30 = vrot.slane %v532_v57, 2 }
  0x6b   :  { %v545_v39 = vadd.f32 %v544_v29, %v543_v63  ;;  %v556_v42 = vadd.f32 %v555_v49, %v554_v35  ;;  %v564_v0 = vsel %vm171_vm0, %v6689_v20, 0.0  ;;  %v566_v23 = vsel %vm171_vm0, %v6693_v50, 0.0  ;;  %v5681_v20 = vld [vmem:[%s13301_s3 + $0x70] sm:$0xff] }
  0x6c   :  { %v510_v41 = vadd.f32 %v509_v36, %v508_v28  ;;  %v522_v25 = vrot.slane %v521_v19, 1  ;;  %v534_v46 = vadd.f32 %v533_v30, %v532_v57  ;;  %v565_v43 = vadd.f32 %v564_v0, %v563_v52 }
  0x6d   :  { %v546_v24 = vrot.slane %v545_v39, 2  ;;  %v557_v59 = vrot.slane %v556_v42, 4  ;;  %v568_v60 = vsel %vm171_vm0, %v6696_v40, 0.0  ;;  %v590_v48 = vmul.f32 %v6740_v18, %v6199_v1 }
  0x6e   :  { %v523_v21 = vadd.f32 %v522_v25, %v521_v19  ;;  %v535_v22 = vrot.slane %v534_v46, 1  ;;  %v567_v50 = vadd.f32 %v566_v23, %v565_v43  ;;  %v6760_v54 = vadd.f32 %v6735_v38, %v484_v45  ;;  %v13981_v25 = vld [vmem:[#allocation7_spill] sm:$0xff]  ;;  %v13983_v43 = vld [vmem:[#allocation9_spill] sm:$0xff] }
  0x6f   :  { %v547_v53 = vadd.f32 %v546_v24, %v545_v39  ;;  %v558_v40 = vadd.f32 %v557_v59, %v556_v42  ;;  %v6763_v56 = vadd.f32 %v6735_v38, %v497_v33  ;;  %v6766_v44 = vadd.f32 %v6735_v38, %v510_v41  ;;  %v13978_v39 = vld [vmem:[#allocation4_spill] sm:$0xff]  ;;  %v13984_v24 = vld [vmem:[#allocation10_spill] sm:$0xff] }
  0x70   :  { %v536_v5 = vadd.f32 %v535_v22, %v534_v46  ;;  %v569_v31 = vadd.f32 %v568_v60, %v567_v50  ;;  %v6769_v34 = vadd.f32 %v6735_v38, %v523_v21  ;;  %v591_v26 = vmul.f32 %v5680_v47, %v6204_v2  ;;  %v13985_v60 = vld [vmem:[#allocation11_spill] sm:$0xff]  ;;  %v13986_v22 = vld [vmem:[#allocation12_spill] sm:$0xff] }
  0x71   :  { %v548_v1 = vrot.slane %v547_v53, 1  ;;  %v559_v55 = vrot.slane %v558_v40, 2  ;;  %v592_v63 = vmul.f32 %v5681_v20, %v6209_v3  ;;  %v593_v51 = vmul.f32 %v5682_v61, %v6214_v4 }
  0x72   :  { %v570_v27 = vrot.slane %v569_v31, 4  ;;  %v6774_v49 = vadd.f32 %v6735_v38, %v536_v5  ;;  %v594_v28 = vmul.f32 %v6740_v18, %v6219_v6  ;;  %v595_v45 = vmul.f32 %v5680_v47, %v6224_v7  ;;  %v13988_v5 = vld [vmem:[#allocation14_spill] sm:$0xff] }
  0x73   :  { %v549_v58 = vadd.f32 %v548_v1, %v547_v53  ;;  %v560_v57 = vadd.f32 %v559_v55, %v558_v40  ;;  %v596_v29 = vmul.f32 %v5681_v20, %v6229_v8  ;;  %v597_v2 = vmul.f32 %v5682_v61, %v6234_v9  ;;  %v13987_v53 = vld [vmem:[#allocation13_spill] sm:$0xff]  ;;  %v13989_v1 = vld [vmem:[#allocation15_spill] sm:$0xff] }
  0x74   :  { %v571_v35 = vadd.f32 %v570_v27, %v569_v31  ;;  %v598_v3 = vmul.f32 %v6740_v18, %v6239_v10  ;;  %v599_v52 = vmul.f32 %v5680_v47, %v6244_v11  ;;  %v600_v6 = vmul.f32 %v5681_v20, %v6249_v12  ;;  %v13979_v12 = vld [vmem:[#allocation5_spill] sm:$0xff]  ;;  %v13990_v27 = vld [vmem:[#allocation16_spill] sm:$0xff] }
  0x75   :  { %v561_v33 = vrot.slane %v560_v57, 1  ;;  %v6786_v4 = vadd.f32 %v6735_v38, %v549_v58  ;;  %v601_v36 = vmul.f32 %v5682_v61, %v6254_v13  ;;  %v602_v7 = vmul.f32 %v6740_v18, %v6259_v14  ;;  %v13980_v13 = vld [vmem:[#allocation6_spill] sm:$0xff] }
  0x76   :  { %v572_v19 = vrot.slane %v571_v35, 2  ;;  %v603_v8 = vmul.f32 %v5680_v47, %v6264_v15  ;;  %v604_v9 = vmul.f32 %v5681_v20, %v6269_v16  ;;  %v605_v10 = vmul.f32 %v5682_v61, %v6274_v17  ;;  %v13982_v16 = vld [vmem:[#allocation8_spill] sm:$0xff] }
  0x77   :  { %v562_v30 = vadd.f32 %v561_v33, %v560_v57  ;;  %v606_v11 = vmul.f32 %v6740_v18, %v13963_v37  ;;  %v607_v42 = vmul.f32 %v5680_v47, %v13978_v39  ;;  %v608_v23 = vmul.f32 %v5681_v20, %v13979_v12  ;;  %v13991_v57 = vld [vmem:[#allocation17_spill] sm:$0xff] }
  0x78   :  { %v573_v0 = vadd.f32 %v572_v19, %v571_v35  ;;  %v609_v41 = vmul.f32 %v5682_v61, %v13980_v13  ;;  %v610_v14 = vmul.f32 %v6740_v18, %v13981_v25  ;;  %v611_v46 = vmul.f32 %v5680_v47, %v13982_v16 }
  0x79   :  { %v6803_v15 = vadd.f32 %v6735_v38, %v562_v30  ;;  %v612_v17 = vmul.f32 %v5681_v20, %v13983_v43  ;;  %v613_v59 = vmul.f32 %v5682_v61, %v13984_v24  ;;  %v614_v21 = vmul.f32 %v6740_v18, %v13985_v60 }
  0x7a   :  { %v574_v37 = vrot.slane %v573_v0, 1  ;;  %v615_v50 = vmul.f32 %v5680_v47, %v13986_v22  ;;  %v6812_v40 = vmul.f32 %v5681_v20, %v13987_v53  ;;  %v6815_v31 = vmul.f32 %v5682_v61, %v13988_v5 }
  0x7b   :  { %v6819_v55 = vmul.f32 %v6740_v18, %v13989_v1  ;;  %v6822_v58 = vmul.f32 %v5680_v47, %v13990_v27  ;;  %v6825_v35 = vmul.f32 %v5681_v20, %v13991_v57  ;;  %v6828_v19 = vmul.f32 %v5682_v61, %v13955_v62 }
  0x7c   :  { %v575_v33 = vadd.f32 %v574_v37, %v573_v0  ;;  %v622_v30 = vsel %vm171_vm0, %v590_v48, 0.0  ;;  %v623_v39 = vsel %vm171_vm0, %v591_v26, 0.0  ;;  %v625_v13 = vsel %vm171_vm0, %v592_v63, 0.0 }
  0x7d   :  { %v624_v12 = vadd.f32 %v623_v39, %v622_v30  ;;  %v627_v18 = vsel %vm171_vm0, %v593_v51, 0.0  ;;  %v635_v25 = vsel %vm171_vm0, %v594_v28, 0.0  ;;  %v636_v20 = vsel %vm171_vm0, %v595_v45, 0.0 }
  0x7e   :  { %v6836_v47 = vadd.f32 %v6735_v38, %v575_v33  ;;  %v638_v0 = vsel %vm171_vm0, %v596_v29, 0.0  ;;  %v640_v62 = vsel %vm171_vm0, %v597_v2, 0.0  ;;  %v637_v48 = vadd.f32 %v636_v20, %v635_v25 }
  0x7f   :  { %v626_v61 = vadd.f32 %v625_v13, %v624_v12  ;;  %v648_v26 = vsel %vm171_vm0, %v598_v3, 0.0  ;;  %v649_v16 = vsel %vm171_vm0, %v599_v52, 0.0  ;;  %v651_v51 = vsel %vm171_vm0, %v600_v6, 0.0 }
  0x80   :  { %v650_v63 = vadd.f32 %v649_v16, %v648_v26  ;;  %v653_v28 = vsel %vm171_vm0, %v601_v36, 0.0  ;;  %v661_v38 = vsel %vm171_vm0, %v602_v7, 0.0  ;;  %v639_v24 = vadd.f32 %v638_v0, %v637_v48 }
  0x81   :  { %v628_v43 = vadd.f32 %v627_v18, %v626_v61  ;;  %v662_v45 = vsel %vm171_vm0, %v603_v8, 0.0  ;;  %v664_v29 = vsel %vm171_vm0, %v604_v9, 0.0  ;;  %v666_v60 = vsel %vm171_vm0, %v605_v10, 0.0 }
  0x82   :  { %v652_v2 = vadd.f32 %v651_v51, %v650_v63  ;;  %v663_v37 = vadd.f32 %v662_v45, %v661_v38  ;;  %v674_v3 = vsel %vm171_vm0, %v606_v11, 0.0  ;;  %v641_v22 = vadd.f32 %v640_v62, %v639_v24 }
  0x83   :  { %v629_v52 = vrot.slane %v628_v43, 4  ;;  %v675_v6 = vsel %vm171_vm0, %v607_v42, 0.0  ;;  %v677_v36 = vsel %vm171_vm0, %v608_v23, 0.0  ;;  %v679_v1 = vsel %vm171_vm0, %v609_v41, 0.0 }
  0x84   :  { %v654_v53 = vadd.f32 %v653_v28, %v652_v2  ;;  %v665_v7 = vadd.f32 %v664_v29, %v663_v37  ;;  %v676_v5 = vadd.f32 %v675_v6, %v674_v3  ;;  %v642_v27 = vrot.slane %v641_v22, 4  ;;  %v6866_v3 = vld [vmem:[%s13302_s4 + $0x3] ss:$0 sm:$0xff] }
  0x85   :  { %v630_v8 = vadd.f32 %v629_v52, %v628_v43  ;;  %v687_v9 = vsel %vm171_vm0, %v610_v14, 0.0  ;;  %v688_v57 = vsel %vm171_vm0, %v611_v46, 0.0  ;;  %v690_v42 = vsel %vm171_vm0, %v612_v17, 0.0 }
  0x86   :  { %v655_v10 = vrot.slane %v654_v53, 4  ;;  %v667_v33 = vadd.f32 %v666_v60, %v665_v7  ;;  %v678_v11 = vadd.f32 %v677_v36, %v676_v5  ;;  %v689_v30 = vadd.f32 %v688_v57, %v687_v9 }
  0x87   :  { %v631_v39 = vrot.slane %v630_v8, 2  ;;  %v643_v12 = vadd.f32 %v642_v27, %v641_v22  ;;  %v692_v23 = vsel %vm171_vm0, %v613_v59, 0.0  ;;  %v700_v14 = vsel %vm171_vm0, %v614_v21, 0.0 }
  0x88   :  { %v656_v13 = vadd.f32 %v655_v10, %v654_v53  ;;  %v668_v18 = vrot.slane %v667_v33, 4  ;;  %v680_v25 = vadd.f32 %v679_v1, %v678_v11  ;;  %v691_v41 = vadd.f32 %v690_v42, %v689_v30  ;;  %v13992_v11 = vld [vmem:[#allocation26_spill] sm:$0xff]  ;;  %v13993_v30 = vld [vmem:[#allocation19_spill] sm:$0xff] }
  0x89   :  { %v632_v20 = vadd.f32 %v631_v39, %v630_v8  ;;  %v644_v0 = vrot.slane %v643_v12, 2  ;;  %v701_v46 = vsel %vm171_vm0, %v615_v50, 0.0  ;;  %v703_v17 = vsel %vm171_vm0, %v6812_v40, 0.0  ;;  %v13994_v39 = vld [vmem:[#allocation27_spill] sm:$0xff] }
  0x8a   :  { %v657_v62 = vrot.slane %v656_v13, 2  ;;  %v669_v61 = vadd.f32 %v668_v18, %v667_v33  ;;  %v681_v48 = vrot.slane %v680_v25, 4  ;;  %v693_v26 = vadd.f32 %v692_v23, %v691_v41 }
  0x8b   :  { %v633_v16 = vrot.slane %v632_v20, 1  ;;  %v645_v63 = vadd.f32 %v644_v0, %v643_v12  ;;  %v702_v51 = vadd.f32 %v701_v46, %v700_v14  ;;  %v705_v21 = vsel %vm171_vm0, %v6815_v31, 0.0  ;;  %v13995_v12 = vld [vmem:[#allocation20_spill] sm:$0xff] }
  0x8c   :  { %v658_v59 = vadd.f32 %v657_v62, %v656_v13  ;;  %v670_v28 = vrot.slane %v669_v61, 2  ;;  %v682_v38 = vadd.f32 %v681_v48, %v680_v25  ;;  %v694_v43 = vrot.slane %v693_v26, 4  ;;  %v13996_v46 = vld [vmem:[#allocation28_spill] sm:$0xff]  ;;  %v13997_v62 = vld [vmem:[#allocation21_spill] sm:$0xff] }
  0x8d   :  { %v634_v24 = vadd.f32 %v633_v16, %v632_v20  ;;  %v646_v45 = vrot.slane %v645_v63, 1  ;;  %v704_v29 = vadd.f32 %v703_v17, %v702_v51  ;;  %v713_v22 = vsel %vm171_vm0, %v6819_v55, 0.0  ;;  %v13998_v48 = vld [vmem:[#allocation29_spill] sm:$0xff]  ;;  %v14000_v17 = vld [vmem:[#allocation30_spill] sm:$0xff] }
  0x8e   :  { %v659_v50 = vrot.slane %v658_v59, 1  ;;  %v671_v2 = vadd.f32 %v670_v28, %v669_v61  ;;  %v683_v37 = vrot.slane %v682_v38, 2  ;;  %v695_v60 = vadd.f32 %v694_v43, %v693_v26  ;;  %v13999_v26 = vld [vmem:[#allocation22_spill] sm:$0xff]  ;;  %v14003_v43 = vld [vmem:[#allocation24_spill] sm:$0xff] }
  0x8f   :  { %v647_v40 = vadd.f32 %v646_v45, %v645_v63  ;;  %v706_v52 = vadd.f32 %v705_v21, %v704_v29  ;;  %v714_v6 = vsel %vm171_vm0, %v6822_v58, 0.0  ;;  %v716_v8 = vsel %vm171_vm0, %v6825_v35, 0.0  ;;  %v14004_v29 = vld [vmem:[#allocation2_spill] sm:$0xff]  ;;  %v14005_v21 = vld [vmem:[#allocation25_spill] sm:$0xff] }
  0x90   :  { %v660_v36 = vadd.f32 %v659_v50, %v658_v59  ;;  %v672_v53 = vrot.slane %v671_v2, 1  ;;  %v684_v31 = vadd.f32 %v683_v37, %v682_v38  ;;  %v696_v7 = vrot.slane %v695_v60, 2  ;;  %v14001_v59 = vld [vmem:[#allocation23_spill] sm:$0xff] }
  0x91   :  { %v707_v5 = vrot.slane %v706_v52, 4  ;;  %v715_v1 = vadd.f32 %v714_v6, %v713_v22  ;;  %v718_v27 = vsel %vm171_vm0, %v6828_v19, 0.0  ;;  %v740_v58 = vmax.f32 %v13993_v30, %v13992_v11  ;;  %v14002_v38 = vld [vmem:[#allocation31_spill] sm:$0xff] }
  0x92   :  { %v673_v9 = vadd.f32 %v672_v53, %v671_v2  ;;  %v685_v57 = vrot.slane %v684_v31, 1  ;;  %v697_v10 = vadd.f32 %v696_v7, %v695_v60  ;;  %v741_v42 = vmax.f32 %v13995_v12, %v13994_v39  ;;  %v14006_v2 = vld [vmem:[#allocation18_spill] sm:$0xff] }
  0x93   :  { %v708_v33 = vadd.f32 %v707_v5, %v706_v52  ;;  %v717_v55 = vadd.f32 %v716_v8, %v715_v1  ;;  %v6881_v18 = vadd.f32 %v6866_v3, %v634_v24  ;;  %v6884_v35 = vadd.f32 %v6866_v3, %v647_v40 }
  0x94   :  { %v686_v23 = vadd.f32 %v685_v57, %v684_v31  ;;  %v698_v13 = vrot.slane %v697_v10, 1  ;;  %v6887_v41 = vadd.f32 %v6866_v3, %v660_v36  ;;  %v6890_v20 = vadd.f32 %v6866_v3, %v673_v9 }
  0x95   :  { %v709_v19 = vrot.slane %v708_v33, 2  ;;  %v719_v25 = vadd.f32 %v718_v27, %v717_v55  ;;  %v742_v61 = vmax.f32 %v13997_v62, %v13996_v46  ;;  %v743_v16 = vmax.f32 %v13999_v26, %v13998_v48 }
  0x96   :  { %v699_v0 = vadd.f32 %v698_v13, %v697_v10  ;;  %v6893_v14 = vadd.f32 %v6866_v3, %v686_v23  ;;  %v744_v28 = vmax.f32 %v14001_v59, %v14000_v17  ;;  %v745_v24 = vmax.f32 %v14003_v43, %v14002_v38 }
  0x97   :  { %v710_v63 = vadd.f32 %v709_v19, %v708_v33  ;;  %v720_v51 = vrot.slane %v719_v25, 4  ;;  %v746_v50 = vmax.f32 %v14005_v21, %v14004_v29  ;;  %v747_v37 = vmax.f32 %v14006_v2, %v6705_v32 }
  0x98   :  { %v6904_v45 = vadd.f32 %v6866_v3, %v699_v0  ;;  %v748_v60 = vmax.f32 %v740_v58, %v6760_v54  ;;  %v749_v22 = vmax.f32 %v741_v42, %v6763_v56  ;;  %v750_v6 = vmax.f32 %v742_v61, %v6766_v44 }
  0x99   :  { %v711_v40 = vrot.slane %v710_v63, 1  ;;  %v721_v52 = vadd.f32 %v720_v51, %v719_v25  ;;  %v751_v36 = vmax.f32 %v743_v16, %v6769_v34  ;;  %v752_v53 = vmax.f32 %v744_v28, %v6774_v49 }
  0x9a   :  { %v753_v31 = vmax.f32 %v745_v24, %v6786_v4  ;;  %v754_v7 = vmax.f32 %v746_v50, %v6803_v15  ;;  %v755_v8 = vmax.f32 %v747_v37, %v6836_v47  ;;  %v6919_v27 = vmax.f32 %v748_v60, %v6881_v18 }
  0x9b   :  { %v712_v5 = vadd.f32 %v711_v40, %v710_v63  ;;  %v722_v1 = vrot.slane %v721_v52, 2  ;;  %v6922_v9 = vmax.f32 %v749_v22, %v6884_v35  ;;  %v6925_v57 = vmax.f32 %v750_v6, %v6887_v41 }
  0x9c   :  { %v6928_v10 = vmax.f32 %v751_v36, %v6890_v20  ;;  %v6931_v33 = vmax.f32 %v752_v53, %v6893_v14  ;;  %v6937_v42 = vmax.f32 %v753_v31, %v6904_v45  ;;  %v764_v23 = vsub.f32 %v13993_v30, %v6919_v27 }
  0x9d   :  { %v723_v55 = vadd.f32 %v722_v1, %v721_v52  ;;  %v6934_v58 = vadd.f32 %v6866_v3, %v712_v5  ;;  %v765_v13 = vsub.f32 %v13995_v12, %v6922_v9  ;;  %v766_v19 = vsub.f32 %v13997_v62, %v6925_v57 }
  0x9e   :  { %v767_v25 = vsub.f32 %v13999_v26, %v6928_v10  ;;  %v768_v0 = vsub.f32 %v14001_v59, %v6931_v33  ;;  %v769_v63 = vsub.f32 %v14003_v43, %v6937_v42  ;;  %v772_v30 = vmul.f32 1.442695, %v764_v23 }
  0x9f   :  { %v724_v61 = vrot.slane %v723_v55, 1  ;;  %v6950_v16 = vmax.f32 %v754_v7, %v6934_v58  ;;  %v774_v51 = vmul.f32 1.442695, %v765_v13  ;;  %v776_v28 = vmul.f32 1.442695, %v766_v19 }
  0xa0   :  { %v778_v12 = vmul.f32 1.442695, %v767_v25  ;;  %v788_v62 = vsub.f32 %v13992_v11, %v6919_v27  ;;  %5693 = vpow2.f32 %v772_v30  ;;  %v780_v59 = vmul.f32 1.442695, %v768_v0 }
  0xa1   :  { %v725_v24 = vadd.f32 %v724_v61, %v723_v55  ;;  %v770_v26 = vsub.f32 %v14005_v21, %v6950_v16  ;;  %5695 = vpow2.f32 %v774_v51  ;;  %v782_v50 = vmul.f32 1.442695, %v769_v63 }
  0xa2   :  { %v789_v37 = vsub.f32 %v13994_v39, %v6922_v9  ;;  %v790_v43 = vsub.f32 %v13996_v46, %v6925_v57  ;;  %5697 = vpow2.f32 %v776_v28  ;;  %v791_v11 = vsub.f32 %v13998_v48, %v6928_v10 }
  0xa3   :  { %v6963_v60 = vadd.f32 %v6866_v3, %v725_v24  ;;  %v784_v40 = vmul.f32 1.442695, %v770_v26  ;;  %5699 = vpow2.f32 %v778_v12  ;;  %v792_v21 = vsub.f32 %v14000_v17, %v6931_v33 }
  0xa4   :  { %5701 = vpow2.f32 %v780_v59  ;;  %v796_v39 = vmul.f32 1.442695, %v788_v62  ;;  %v798_v22 = vmul.f32 1.442695, %v789_v37  ;;  %v793_v3 = vsub.f32 %v14002_v38, %v6937_v42 }
  0xa5   :  { %v6970_v52 = vmax.f32 %v755_v8, %v6963_v60  ;;  %5703 = vpow2.f32 %v782_v50  ;;  %v800_v46 = vmul.f32 1.442695, %v790_v43  ;;  %v794_v48 = vsub.f32 %v14004_v29, %v6950_v16 }
  0xa6   :  { %5705 = vpow2.f32 %v784_v40  ;;  %v802_v36 = vmul.f32 1.442695, %v791_v11  ;;  %v804_v31 = vmul.f32 1.442695, %v792_v21  ;;  %v812_v7 = vsub.f32 %v6760_v54, %v6919_v27 }
  0xa7   :  { %v771_v6 = vsub.f32 %v14006_v2, %v6970_v52  ;;  %v795_v17 = vsub.f32 %v6705_v32, %v6970_v52  ;;  %5707 = vpow2.f32 %v796_v39  ;;  %v806_v38 = vmul.f32 1.442695, %v793_v3 }
  0xa8   :  { %5709 = vpow2.f32 %v798_v22  ;;  %v813_v2 = vsub.f32 %v6763_v56, %v6922_v9  ;;  %v808_v5 = vmul.f32 1.442695, %v794_v48  ;;  %v814_v29 = vsub.f32 %v6766_v44, %v6925_v57 }
  0xa9   :  { %v786_v53 = vmul.f32 1.442695, %v771_v6  ;;  %5711 = vpow2.f32 %v800_v46  ;;  %v810_v32 = vmul.f32 1.442695, %v795_v17  ;;  %v815_v1 = vsub.f32 %v6769_v34, %v6928_v10 }
  0xaa   :  { %v816_v8 = vsub.f32 %v6774_v49, %v6931_v33  ;;  %v820_v54 = vmul.f32 1.442695, %v812_v7  ;;  %v817_v56 = vsub.f32 %v6786_v4, %v6937_v42  ;;  %v822_v23 = vmul.f32 1.442695, %v813_v2 }
  0xab   :  { %5713 = vpow2.f32 %v786_v53  ;;  %v818_v44 = vsub.f32 %v6803_v15, %v6950_v16  ;;  %v824_v19 = vmul.f32 1.442695, %v814_v29  ;;  %v819_v49 = vsub.f32 %v6836_v47, %v6970_v52 }
  0xac   :  { %5715 = vpow2.f32 %v802_v36  ;;  %v826_v25 = vmul.f32 1.442695, %v815_v1  ;;  %v828_v61 = vmul.f32 1.442695, %v816_v8  ;;  %v836_v4 = vsub.f32 %v6881_v18, %v6919_v27  ;;  %v100_v1 = vld [vmem:[%s13303_s1] sm:$0xff] }
  0xad   :  { %5717 = vpow2.f32 %v804_v31  ;;  %v6990_v55 = vpop.eup %5693  ;;  %v830_v30 = vmul.f32 1.442695, %v817_v56  ;;  %v837_v15 = vsub.f32 %v6884_v35, %v6922_v9  ;;  %v832_v28 = vmul.f32 1.442695, %v818_v44 }
  0xae   :  { %5719 = vpow2.f32 %v806_v38  ;;  %v6994_v13 = vpop.eup %5695  ;;  %v838_v47 = vsub.f32 %v6887_v41, %v6925_v57  ;;  %v834_v62 = vmul.f32 1.442695, %v819_v49  ;;  %v839_v18 = vsub.f32 %v6890_v20, %v6928_v10 }
  0xaf   :  { %5721 = vpow2.f32 %v808_v5  ;;  %v6998_v34 = vpop.eup %5697  ;;  %v840_v35 = vsub.f32 %v6893_v14, %v6931_v33  ;;  %v844_v9 = vmul.f32 1.442695, %v836_v4  ;;  %v841_v41 = vsub.f32 %v6904_v45, %v6937_v42 }
  0xb0   :  { %5723 = vpow2.f32 %v810_v32  ;;  %v7002_v0 = vpop.eup %5699  ;;  %v846_v57 = vmul.f32 1.442695, %v837_v15  ;;  %v842_v20 = vsub.f32 %v6934_v58, %v6950_v16  ;;  %v848_v10 = vmul.f32 1.442695, %v838_v47 }
  0xb1   :  { %5725 = vpow2.f32 %v820_v54  ;;  %v7006_v63 = vpop.eup %5701  ;;  %v843_v14 = vsub.f32 %v6963_v60, %v6970_v52  ;;  %v850_v33 = vmul.f32 1.442695, %v839_v18  ;;  %v852_v37 = vmul.f32 1.442695, %v840_v35 }
  0xb2   :  { %5727 = vpow2.f32 %v822_v23  ;;  %v7010_v51 = vpop.eup %5703  ;;  %v854_v42 = vmul.f32 1.442695, %v841_v41  ;;  %v856_v58 = vmul.f32 1.442695, %v842_v20  ;;  %vm101_vm1 = vcmp.eq.s32.totalorder %v100_v1, 0 }
  0xb3   :  { %5729 = vpow2.f32 %v824_v19  ;;  %v7014_v12 = vpop.eup %5705  ;;  %v858_v40 = vmul.f32 1.442695, %v843_v14  ;;  %vm104_vm2 = vcmp.eq.s32.totalorder %v100_v1, 1  ;;  %vm107_vm3 = vcmp.eq.s32.totalorder %v100_v1, 2 }
  0xb4   :  { %5731 = vpow2.f32 %v826_v25  ;;  %v7018_v27 = vpop.eup %5707  ;;  %vm110_vm4 = vcmp.eq.s32.totalorder %v100_v1, 3 }
  0xb5   :  { %5733 = vpow2.f32 %v828_v61  ;;  %v7022_v24 = vpop.eup %5709  ;;  %v860_v52 = vadd.f32 %v7018_v27, %v6990_v55 }
  0xb6   :  { %5735 = vpow2.f32 %v830_v30  ;;  %v7026_v26 = vpop.eup %5711  ;;  %v861_v22 = vadd.f32 %v7022_v24, %v6994_v13 }
  0xb7   :  { %5737 = vpow2.f32 %v832_v28  ;;  %v862_v46 = vadd.f32 %v7026_v26, %v6998_v34 }
  0xb8   :  { %v7030_v59 = vpop.eup %5713  ;;  %5739 = vpow2.f32 %v834_v62 }
  0xb9   :  { %v7034_v50 = vpop.eup %5715  ;;  %5741 = vpow2.f32 %v844_v9  ;;  %v6165_v9 = vmov 0.0  }
  0xba   :  { %v7036_v45 = vpop.eup %5717  ;;  %5743 = vpow2.f32 %v846_v57  ;;  %v863_v48 = vadd.f32 %v7034_v50, %v7002_v0  ;;  %v7106_v41 = vsel %vm101_vm1, 1.0, %v6165_v9  ;;  %v7112_v14 = vsel %vm104_vm2, 1.0, %v6165_v9 }
  0xbb   :  { %v7038_v43 = vpop.eup %5719  ;;  %5745 = vpow2.f32 %v848_v10  ;;  %v864_v36 = vadd.f32 %v7036_v45, %v7006_v63  ;;  %14011 = vst [vmem:[#allocation8_spill] sm:$0xff] %v7106_v41  ;;  %14013 = vst [vmem:[#allocation10_spill] sm:$0xff] %v7112_v14  ;;  %v7156_v1 = vrot.slane %v7112_v14, 6 }
  0xbc   :  { %v7040_v16 = vpop.eup %5721  ;;  %5747 = vpow2.f32 %v850_v33  ;;  %v865_v7 = vadd.f32 %v7038_v43, %v7010_v51 }
  0xbd   :  { %v7042_v11 = vpop.eup %5723  ;;  %5749 = vpow2.f32 %v852_v37  ;;  %v866_v5 = vadd.f32 %v7040_v16, %v7014_v12  ;;  %v7115_v37 = vsel %vm107_vm3, 1.0, %v6165_v9  ;;  %14028 = vst [vmem:[#allocation22_spill] sm:$0xff] %v7156_v1 }
  0xbe   :  { %v7044_v60 = vpop.eup %5725  ;;  %5751 = vpow2.f32 %v854_v42  ;;  %v867_v8 = vadd.f32 %v7042_v11, %v7030_v59  ;;  %14014 = vst [vmem:[#allocation11_spill] sm:$0xff] %v7115_v37  ;;  %v7117_v42 = vsel %vm110_vm4, 1.0, %v6165_v9 }
  0xbf   :  { %v7046_v21 = vpop.eup %5727  ;;  %5753 = vpow2.f32 %v856_v58  ;;  %v868_v53 = vadd.f32 %v7044_v60, %v860_v52  ;;  %14015 = vst [vmem:[#allocation12_spill] sm:$0xff] %v7117_v42  ;;  %v7120_v58 = vrot.slane %v7106_v41, 1  ;;  %v7126_v52 = vrot.slane %v7106_v41, 3 }
  0xc0   :  { %v7050_v39 = vpop.eup %5729  ;;  %5755 = vpow2.f32 %v858_v40  ;;  %v869_v38 = vadd.f32 %v7046_v21, %v861_v22  ;;  %v7123_v40 = vrot.slane %v7106_v41, 2  ;;  %v7129_v22 = vrot.slane %v7106_v41, 4 }
  0xc1   :  { %v7054_v3 = vpop.eup %5731  ;;  %v870_v29 = vadd.f32 %v7050_v39, %v862_v46  ;;  %14016 = vst [vmem:[#allocation13_spill] sm:$0xff] %v7120_v58  ;;  %14018 = vst [vmem:[#allocation15_spill] sm:$0xff] %v7126_v52  ;;  %v7132_v46 = vrot.slane %v7106_v41, 5 }
  0xc2   :  { %v7058_v6 = vpop.eup %5733  ;;  %v871_v54 = vadd.f32 %v7054_v3, %v863_v48  ;;  %14017 = vst [vmem:[#allocation14_spill] sm:$0xff] %v7123_v40  ;;  %14019 = vst [vmem:[#allocation16_spill] sm:$0xff] %v7129_v22  ;;  %v7135_v48 = vrot.slane %v7106_v41, 6 }
  0xc3   :  { %v7062_v17 = vpop.eup %5735  ;;  %v872_v23 = vadd.f32 %v7058_v6, %v864_v36  ;;  %14020 = vst [vmem:[#allocation17_spill] sm:$0xff] %v7132_v46  ;;  %v7138_v36 = vrot.slane %v7106_v41, 7 }
  0xc4   :  { %v7067_v31 = vpop.eup %5737  ;;  %v873_v49 = vadd.f32 %v7062_v17, %v865_v7  ;;  %14021 = vst [vmem:[#allocation26_spill] sm:$0xff] %v7135_v48  ;;  %v7144_v7 = vrot.slane %v7112_v14, 2 }
  0xc5   :  { %v7072_v2 = vpop.eup %5739  ;;  %v874_v4 = vadd.f32 %v7067_v31, %v866_v5  ;;  %14022 = vst [vmem:[#allocation19_spill] sm:$0xff] %v7138_v36  ;;  %v7150_v5 = vrot.slane %v7112_v14, 4 }
  0xc6   :  { %v7077_v32 = vpop.eup %5741  ;;  %v875_v28 = vadd.f32 %v7072_v2, %v867_v8  ;;  %14024 = vst [vmem:[#allocation20_spill] sm:$0xff] %v7144_v7  ;;  %v7159_v8 = vrot.slane %v7112_v14, 7 }
  0xc7   :  { %v7085_v56 = vpop.eup %5743  ;;  %v876_v44 = vadd.f32 %v7077_v32, %v868_v53  ;;  %v7141_v53 = vrot.slane %v7112_v14, 1  ;;  %14026 = vst [vmem:[#allocation21_spill] sm:$0xff] %v7150_v5 }
  0xc8   :  { %v7089_v19 = vpop.eup %5745  ;;  %v877_v25 = vadd.f32 %v7085_v56, %v869_v38  ;;  %v7147_v38 = vrot.slane %v7112_v14, 3  ;;  %14029 = vst [vmem:[#allocation30_spill] sm:$0xff] %v7159_v8 }
  0xc9   :  { %v7093_v61 = vpop.eup %5747  ;;  %v878_v30 = vadd.f32 %v7089_v19, %v870_v29  ;;  %5757 = vrcp.f32 %v876_v44  ;;  %14023 = vst [vmem:[#allocation27_spill] sm:$0xff] %v7141_v53  ;;  %v7153_v29 = vrot.slane %v7112_v14, 5  ;;  %v7168_v44 = vrot.slane %v7115_v37, 3 }
  0xca   :  { %14007 = vst [vmem:[#allocation4_spill] sm:$0xff] %v7093_v61  ;;  %v7097_v15 = vpop.eup %5749  ;;  %v879_v47 = vadd.f32 %v7093_v61, %v871_v54  ;;  %5759 = vrcp.f32 %v877_v25  ;;  %14025 = vst [vmem:[#allocation28_spill] sm:$0xff] %v7147_v38  ;;  %v7162_v54 = vrot.slane %v7115_v37, 1  ;;  %v7174_v25 = vrot.slane %v7115_v37, 5 }
  0xcb   :  { %14008 = vst [vmem:[#allocation5_spill] sm:$0xff] %v7097_v15  ;;  %v7101_v62 = vpop.eup %5751  ;;  %v880_v18 = vadd.f32 %v7097_v15, %v872_v23  ;;  %5761 = vrcp.f32 %v878_v30  ;;  %14027 = vst [vmem:[#allocation29_spill] sm:$0xff] %v7153_v29  ;;  %v7165_v23 = vrot.slane %v7115_v37, 2  ;;  %v7180_v30 = vrot.slane %v7115_v37, 7 }
  0xcc   :  { %14009 = vst [vmem:[#allocation6_spill] sm:$0xff] %v7101_v62  ;;  %v7104_v35 = vpop.eup %5753  ;;  %v881_v57 = vadd.f32 %v7101_v62, %v873_v49  ;;  %5763 = vrcp.f32 %v879_v47  ;;  %14030 = vst [vmem:[#allocation23_spill] sm:$0xff] %v7162_v54  ;;  %v7171_v49 = vrot.slane %v7115_v37, 4  ;;  %v7186_v47 = vrot.slane %v7117_v42, 2 }
  0xcd   :  { %14010 = vst [vmem:[#allocation7_spill] sm:$0xff] %v7104_v35  ;;  %v7109_v20 = vpop.eup %5755  ;;  %v882_v10 = vadd.f32 %v7104_v35, %v874_v4  ;;  %5765 = vrcp.f32 %v880_v18  ;;  %14031 = vst [vmem:[#allocation31_spill] sm:$0xff] %v7165_v23  ;;  %v7177_v4 = vrot.slane %v7115_v37, 6  ;;  %v7189_v18 = vrot.slane %v7117_v42, 3 }
  0xce   :  { %14012 = vst [vmem:[#allocation9_spill] sm:$0xff] %v7109_v20  ;;  %v883_v33 = vadd.f32 %v7109_v20, %v875_v28  ;;  %5767 = vrcp.f32 %v881_v57  ;;  %14032 = vst [vmem:[#allocation24_spill] sm:$0xff] %v7168_v44  ;;  %v7183_v28 = vrot.slane %v7117_v42, 1  ;;  %v7192_v57 = vrot.slane %v7117_v42, 4 }
  0xcf   :  { %5769 = vrcp.f32 %v882_v10  ;;  %14033 = vst [vmem:[#allocation2_spill] sm:$0xff] %v7171_v49  ;;  %14034 = vst [vmem:[#allocation25_spill] sm:$0xff] %v7174_v25  ;;  %v7195_v10 = vrot.slane %v7117_v42, 5  ;;  %v7201_v20 = vrot.slane %v7117_v42, 7 }
  0xd0   :  { %5771 = vrcp.f32 %v883_v33  ;;  %14035 = vst [vmem:[#allocation18_spill] sm:$0xff] %v7177_v4  ;;  %14036 = vst [vmem:[#allocation32_spill] sm:$0xff] %v7180_v30  ;;  %v7198_v33 = vrot.slane %v7117_v42, 6 }
  0xd1   :  { %14037 = vst [vmem:[#allocation33_spill] sm:$0xff] %v7183_v28  ;;  %14038 = vst [vmem:[#allocation34_spill] sm:$0xff] %v7186_v47 }
  0xd2   :  { %14039 = vst [vmem:[#allocation35_spill] sm:$0xff] %v7189_v18  ;;  %14040 = vst [vmem:[#allocation36_spill] sm:$0xff] %v7192_v57 }
  0xd3   :  { %14041 = vst [vmem:[#allocation37_spill] sm:$0xff] %v7195_v10  ;;  %14042 = vst [vmem:[#allocation38_spill] sm:$0xff] %v7198_v33 }
  0xd4   :  { %14043 = vst [vmem:[#allocation39_spill] sm:$0xff] %v7201_v20 }
  0xd6   :  { %v5758_v9 = vpop.eup %5757 }
  0xd7   :  { %v5760_v28 = vpop.eup %5759  ;;  %v892_v35 = vmul.f32 %v5758_v9, %v6990_v55  ;;  %v924_v47 = vmul.f32 %v5758_v9, %v7018_v27  ;;  %v956_v18 = vmul.f32 %v5758_v9, %v7044_v60  ;;  %v988_v62 = vmul.f32 %v5758_v9, %v7077_v32 }
  0xd8   :  { %v5762_v15 = vpop.eup %5761  ;;  %v893_v57 = vmul.f32 %v5760_v28, %v6994_v13  ;;  %v925_v10 = vmul.f32 %v5760_v28, %v7022_v24  ;;  %v957_v61 = vmul.f32 %v5760_v28, %v7046_v21  ;;  %v989_v33 = vmul.f32 %v5760_v28, %v7085_v56 }
  0xd9   :  { %v5764_v42 = vpop.eup %5763  ;;  %v894_v20 = vmul.f32 %v5762_v15, %v6998_v34  ;;  %v7213_v55 = vsub.f32 %v892_v35, %v7106_v41  ;;  %v926_v27 = vmul.f32 %v5762_v15, %v7026_v26  ;;  %v7217_v60 = vsub.f32 %v924_v47, %v7112_v14  ;;  %v7442_v41 = vld [vmem:[%s13300_s0 + $0x60] sm:$0xff] }
  0xda   :  { %v5766_v32 = vpop.eup %5765  ;;  %v895_v13 = vmul.f32 %v5764_v42, %v7002_v0  ;;  %v7221_v24 = vsub.f32 %v893_v57, %v7120_v58  ;;  %v927_v21 = vmul.f32 %v5764_v42, %v7034_v50  ;;  %v7225_v56 = vsub.f32 %v925_v10, %v7141_v53  ;;  %v7426_v53 = vld [vmem:[%s13300_s0 + $0x50] sm:$0xff]  ;;  %v7434_v58 = vld [vmem:[%s13300_s0 + $0x58] sm:$0xff]  ;;  %14092 = vst [vmem:[#allocation69_spill] sm:$0xff] %v7442_v41 }
  0xdb   :  { %14044 = vst [vmem:[#allocation40_spill] sm:$0xff] %v7213_v55  ;;  %14045 = vst [vmem:[#allocation41_spill] sm:$0xff] %v7217_v60  ;;  %v5768_v34 = vpop.eup %5767  ;;  %v896_v35 = vmul.f32 %v5766_v32, %v7006_v63  ;;  %v7229_v28 = vsub.f32 %v894_v20, %v7123_v40  ;;  %v928_v26 = vmul.f32 %v5766_v32, %v7036_v45 }
  0xdc   :  { %14046 = vst [vmem:[#allocation42_spill] sm:$0xff] %v7221_v24  ;;  %14047 = vst [vmem:[#allocation43_spill] sm:$0xff] %v7225_v56  ;;  %v7233_v47 = vsub.f32 %v926_v27, %v7144_v7  ;;  %v5770_v0 = vpop.eup %5769  ;;  %v897_v9 = vmul.f32 %v5768_v34, %v7010_v51  ;;  %v7237_v57 = vsub.f32 %v895_v13, %v7126_v52  ;;  %v7420_v52 = vld [vmem:[%s13300_s0 + $0x48] sm:$0xff] }
  0xdd   :  { %14048 = vst [vmem:[#allocation44_spill] sm:$0xff] %v7229_v28  ;;  %v929_v50 = vmul.f32 %v5768_v34, %v7038_v43  ;;  %v7241_v10 = vsub.f32 %v927_v21, %v7147_v38  ;;  %v5772_v63 = vpop.eup %5771  ;;  %v898_v20 = vmul.f32 %v5770_v0, %v7014_v12  ;;  %v7245_v40 = vsub.f32 %v896_v35, %v7129_v22  ;;  %v7414_v22 = vld [vmem:[%s13300_s0 + $0x40] sm:$0xff] }
  0xde   :  { %14049 = vst [vmem:[#allocation45_spill] sm:$0xff] %v7233_v47  ;;  %14050 = vst [vmem:[#allocation46_spill] sm:$0xff] %v7237_v57  ;;  %v930_v45 = vmul.f32 %v5770_v0, %v7040_v16  ;;  %v7249_v27 = vsub.f32 %v928_v26, %v7150_v5  ;;  %v899_v51 = vmul.f32 %v5772_v63, %v7030_v59 }
  0xdf   :  { %14051 = vst [vmem:[#allocation47_spill] sm:$0xff] %v7241_v10  ;;  %14052 = vst [vmem:[#allocation48_spill] sm:$0xff] %v7245_v40  ;;  %v7253_v13 = vsub.f32 %v897_v9, %v7132_v46  ;;  %v931_v43 = vmul.f32 %v5772_v63, %v7042_v11  ;;  %v7257_v21 = vsub.f32 %v929_v50, %v7153_v29  ;;  %v7406_v46 = vld [vmem:[%s13300_s0 + $0x38] sm:$0xff] }
  0xe0   :  { %14053 = vst [vmem:[#allocation49_spill] sm:$0xff] %v7249_v27  ;;  %v7260_v12 = vsub.f32 %v898_v20, %v7135_v48  ;;  %v7263_v35 = vsub.f32 %v930_v45, %v7156_v1  ;;  %v958_v16 = vmul.f32 %v5762_v15, %v7050_v39  ;;  %v959_v26 = vmul.f32 %v5764_v42, %v7054_v3 }
  0xe1   :  { %14054 = vst [vmem:[#allocation50_spill] sm:$0xff] %v7253_v13  ;;  %14055 = vst [vmem:[#allocation51_spill] sm:$0xff] %v7257_v21  ;;  %v7268_v59 = vsub.f32 %v899_v51, %v7138_v36  ;;  %v7271_v9 = vsub.f32 %v931_v43, %v7159_v8  ;;  %v960_v11 = vmul.f32 %v5766_v32, %v7058_v6  ;;  %v7390_v36 = vld [vmem:[%s13300_s0 + $0x28] sm:$0xff] }
  0xe2   :  { %14056 = vst [vmem:[#allocation52_spill] sm:$0xff] %v7260_v12  ;;  %14057 = vst [vmem:[#allocation53_spill] sm:$0xff] %v7263_v35  ;;  %v961_v50 = vmul.f32 %v5768_v34, %v7062_v17  ;;  %v962_v20 = vmul.f32 %v5770_v0, %v7067_v31  ;;  %v963_v48 = vmul.f32 %v5772_v63, %v7072_v2 }
  0xe3   :  { %14058 = vst [vmem:[#allocation54_spill] sm:$0xff] %v7268_v59  ;;  %14059 = vst [vmem:[#allocation55_spill] sm:$0xff] %v7271_v9  ;;  %v7278_v45 = vsub.f32 %v956_v18, %v7115_v37  ;;  %v7281_v39 = vsub.f32 %v957_v61, %v7162_v54  ;;  %v7284_v3 = vsub.f32 %v958_v16, %v7165_v23  ;;  %v14068_v18 = vld [vmem:[#allocation4_spill] sm:$0xff]  ;;  %v14069_v16 = vld [vmem:[#allocation5_spill] sm:$0xff] }
  0xe4   :  { %v7287_v51 = vsub.f32 %v959_v26, %v7168_v44  ;;  %v7290_v6 = vsub.f32 %v960_v11, %v7171_v49  ;;  %v7293_v17 = vsub.f32 %v961_v50, %v7174_v25  ;;  %v7296_v31 = vsub.f32 %v962_v20, %v7177_v4  ;;  %v14070_v26 = vld [vmem:[#allocation6_spill] sm:$0xff]  ;;  %v14071_v54 = vld [vmem:[#allocation7_spill] sm:$0xff]  ;;  %v14072_v49 = vld [vmem:[#allocation9_spill] sm:$0xff]  ;;  %14090 = vst [vmem:[#allocation67_spill] sm:$0xff] %v7426_v53 }
  0xe5   :  { %14060 = vst [vmem:[#allocation56_spill] sm:$0xff] %v7278_v45  ;;  %14061 = vst [vmem:[#allocation57_spill] sm:$0xff] %v7281_v39  ;;  %v7299_v2 = vsub.f32 %v963_v48, %v7180_v30  ;;  %v990_v61 = vmul.f32 %v5762_v15, %v7089_v19  ;;  %v991_v43 = vmul.f32 %v5764_v42, %v14068_v18  ;;  %v14073_v50 = vld [vmem:[#allocation12_spill] sm:$0xff]  ;;  %v14075_v20 = vld [vmem:[#allocation33_spill] sm:$0xff] }
  0xe6   :  { %14062 = vst [vmem:[#allocation58_spill] sm:$0xff] %v7284_v3  ;;  %14063 = vst [vmem:[#allocation59_spill] sm:$0xff] %v7287_v51  ;;  %v992_v23 = vmul.f32 %v5766_v32, %v14069_v16  ;;  %v993_v44 = vmul.f32 %v5768_v34, %v14070_v26  ;;  %v994_v11 = vmul.f32 %v5770_v0, %v14071_v54  ;;  %v14077_v48 = vld [vmem:[#allocation34_spill] sm:$0xff]  ;;  %v14079_v19 = vld [vmem:[#allocation35_spill] sm:$0xff] }
  0xe7   :  { %14064 = vst [vmem:[#allocation60_spill] sm:$0xff] %v7290_v6  ;;  %14065 = vst [vmem:[#allocation61_spill] sm:$0xff] %v7293_v17  ;;  %v995_v37 = vmul.f32 %v5772_v63, %v14072_v49  ;;  %v7308_v25 = vsub.f32 %v988_v62, %v14073_v50  ;;  %v7311_v4 = vsub.f32 %v989_v33, %v14075_v20  ;;  %v14081_v42 = vld [vmem:[#allocation36_spill] sm:$0xff]  ;;  %v14083_v34 = vld [vmem:[#allocation37_spill] sm:$0xff] }
  0xe8   :  { %14066 = vst [vmem:[#allocation62_spill] sm:$0xff] %v7296_v31  ;;  %14067 = vst [vmem:[#allocation63_spill] sm:$0xff] %v7299_v2  ;;  %v7314_v30 = vsub.f32 %v990_v61, %v14077_v48  ;;  %v7317_v15 = vsub.f32 %v991_v43, %v14079_v19  ;;  %v7320_v32 = vsub.f32 %v992_v23, %v14081_v42  ;;  %v14085_v54 = vld [vmem:[#allocation38_spill] sm:$0xff]  ;;  %v14087_v62 = vld [vmem:[#allocation39_spill] sm:$0xff] }
  0xe9   :  { %14074 = vst [vmem:[#allocation4_spill] sm:$0xff] %v7308_v25  ;;  %14076 = vst [vmem:[#allocation5_spill] sm:$0xff] %v7311_v4  ;;  %v7323_v18 = vsub.f32 %v993_v44, %v14083_v34  ;;  %v7326_v49 = vsub.f32 %v994_v11, %v14085_v54  ;;  %v7329_v0 = vsub.f32 %v995_v37, %v14087_v62  ;;  %v14089_v33 = vld [vmem:[#allocation3_spill] sm:$0xff]  ;;  %v7352_v11 = vld [vmem:[%s13300_s0] sm:$0xff] }
  0xea   :  { %14078 = vst [vmem:[#allocation6_spill] sm:$0xff] %v7314_v30  ;;  %14080 = vst [vmem:[#allocation7_spill] sm:$0xff] %v7317_v15  ;;  %v1023_v63 = vrot.slane %v7213_v55, %v14089_v33  ;;  %v1027_v61 = vrot.slane %v7221_v24, %v14089_v33  ;;  %v1031_v43 = vrot.slane %v7229_v28, %v14089_v33  ;;  %v7360_v54 = vld [vmem:[%s13300_s0 + $0x8] sm:$0xff]  ;;  %v7368_v42 = vld [vmem:[%s13300_s0 + $0x10] sm:$0xff] }
  0xeb   :  { %14082 = vst [vmem:[#allocation9_spill] sm:$0xff] %v7320_v32  ;;  %14084 = vst [vmem:[#allocation64_spill] sm:$0xff] %v7323_v18  ;;  %v1035_v23 = vrot.slane %v7237_v57, %v14089_v33  ;;  %v1039_v44 = vrot.slane %v7245_v40, %v14089_v33  ;;  %v1043_v16 = vrot.slane %v7253_v13, %v14089_v33  ;;  %v7376_v48 = vld [vmem:[%s13300_s0 + $0x18] sm:$0xff]  ;;  %v7384_v50 = vld [vmem:[%s13300_s0 + $0x20] sm:$0xff] }
  0xec   :  { %14086 = vst [vmem:[#allocation65_spill] sm:$0xff] %v7326_v49  ;;  %14088 = vst [vmem:[#allocation66_spill] sm:$0xff] %v7329_v0  ;;  %v1047_v37 = vrot.slane %v7260_v12, %v14089_v33  ;;  %v7347_v26 = vrot.slane %v7268_v59, %v14089_v33  ;;  %v7355_v62 = vmul.f32 %v7352_v11, %v1023_v63  ;;  %v7448_v12 = vld [vmem:[%s13300_s0 + $0x68] sm:$0xff]  ;;  %v7454_v55 = vld [vmem:[%s13300_s0 + $0x70] sm:$0xff] }
  0xed   :  { %v7363_v34 = vmul.f32 %v7360_v54, %v1023_v63  ;;  %v7371_v19 = vmul.f32 %v7368_v42, %v1023_v63  ;;  %v7379_v20 = vmul.f32 %v7376_v48, %v1023_v63  ;;  %v1056_v8 = vmul.f32 %v7384_v50, %v1027_v61  ;;  %v7398_v63 = vld [vmem:[%s13300_s0 + $0x30] sm:$0xff]  ;;  %14091 = vst [vmem:[#allocation68_spill] sm:$0xff] %v7434_v58  ;;  %v7460_v40 = vld [vmem:[%s13300_s0 + $0x78] sm:$0xff]  ;;  %v7468_v28 = vld [vmem:[%s13300_s0 + $0x80] sm:$0xff] }
  0xee   :  { %v7393_v1 = vmul.f32 %v7390_v36, %v1027_v61  ;;  %v7401_v29 = vmul.f32 %v7398_v63, %v1027_v61  ;;  %v7409_v5 = vmul.f32 %v7406_v46, %v1027_v61  ;;  %v1060_v38 = vmul.f32 %v7414_v22, %v1031_v43  ;;  %14093 = vst [vmem:[#allocation70_spill] sm:$0xff] %v7448_v12  ;;  %v7474_v0 = vld [vmem:[%s13300_s0 + $0x88] sm:$0xff]  ;;  %v7480_v18 = vld [vmem:[%s13300_s0 + $0x90] sm:$0xff]  ;;  %v7486_v32 = vld [vmem:[%s13300_s0 + $0x98] sm:$0xff] }
  0xef   :  { %v1061_v7 = vmul.f32 %v7420_v52, %v1031_v43  ;;  %v7429_v61 = vmul.f32 %v7426_v53, %v1031_v43  ;;  %v7437_v14 = vmul.f32 %v7434_v58, %v1031_v43  ;;  %v1064_v59 = vmul.f32 %v7442_v41, %v1035_v23  ;;  %14094 = vst [vmem:[#allocation71_spill] sm:$0xff] %v7454_v55  ;;  %v7494_v30 = vld [vmem:[%s13300_s0 + $0xa0] sm:$0xff]  ;;  %v7500_v25 = vld [vmem:[%s13300_s0 + $0xa8] sm:$0xff]  ;;  %v7506_v31 = vld [vmem:[%s13300_s0 + $0xb0] sm:$0xff] }
  0xf0   :  { %v1065_v13 = vmul.f32 %v7448_v12, %v1035_v23  ;;  %v1066_v43 = vmul.f32 %v7454_v55, %v1035_v23  ;;  %14095 = vst [vmem:[#allocation72_spill] sm:$0xff] %v7460_v40  ;;  %v7463_v57 = vmul.f32 %v7460_v40, %v1035_v23  ;;  %14096 = vst [vmem:[#allocation73_spill] sm:$0xff] %v7468_v28  ;;  %v7512_v17 = vld [vmem:[%s13300_s0 + $0xb8] sm:$0xff]  ;;  %v7518_v51 = vld [vmem:[%s13300_s0 + $0xc0] sm:$0xff] }
  0xf1   :  { %v1068_v24 = vmul.f32 %v7468_v28, %v1039_v44  ;;  %14097 = vst [vmem:[#allocation74_spill] sm:$0xff] %v7474_v0  ;;  %v1069_v49 = vmul.f32 %v7474_v0, %v1039_v44  ;;  %14098 = vst [vmem:[#allocation75_spill] sm:$0xff] %v7480_v18  ;;  %v1070_v23 = vmul.f32 %v7480_v18, %v1039_v44  ;;  %v7524_v39 = vld [vmem:[%s13300_s0 + $0xc8] sm:$0xff]  ;;  %v1084_v18 = vsel %vm171_vm0, %v7355_v62, 0.0 }
  0xf2   :  { %14099 = vst [vmem:[#allocation76_spill] sm:$0xff] %v7486_v32  ;;  %v7489_v15 = vmul.f32 %v7486_v32, %v1039_v44  ;;  %14100 = vst [vmem:[#allocation77_spill] sm:$0xff] %v7494_v30  ;;  %v1072_v4 = vmul.f32 %v7494_v30, %v1043_v16  ;;  %v1073_v2 = vmul.f32 %v7500_v25, %v1043_v16  ;;  %v7549_v30 = vld [vmem:[%s13300_s0 + $0xe8] sm:$0xff]  ;;  %v1087_v0 = vsel %vm171_vm0, %v1060_v38, 0.0 }
  0xf3   :  { %14101 = vst [vmem:[#allocation78_spill] sm:$0xff] %v7500_v25  ;;  %14102 = vst [vmem:[#allocation79_spill] sm:$0xff] %v7506_v31  ;;  %v1074_v44 = vmul.f32 %v7506_v31, %v1043_v16  ;;  %v1075_v6 = vmul.f32 %v7512_v17, %v1043_v16  ;;  %v1076_v3 = vmul.f32 %v7518_v51, %v1047_v37  ;;  %v7530_v31 = vld [vmem:[%s13300_s0 + $0xd0] sm:$0xff]  ;;  %v7542_v25 = vld [vmem:[%s13300_s0 + $0xe0] sm:$0xff]  ;;  %v1089_v28 = vsel %vm171_vm0, %v1064_v59, 0.0 }
  0xf4   :  { %14103 = vst [vmem:[#allocation80_spill] sm:$0xff] %v7512_v17  ;;  %14104 = vst [vmem:[#allocation81_spill] sm:$0xff] %v7518_v51  ;;  %v1077_v45 = vmul.f32 %v7524_v39, %v1047_v37  ;;  %v1078_v16 = vmul.f32 %v7530_v31, %v1047_v37  ;;  %v7536_v17 = vld [vmem:[%s13300_s0 + $0xd8] sm:$0xff]  ;;  %v1093_v55 = vsel %vm171_vm0, %v1072_v4, 0.0  ;;  %v1100_v62 = vsel %vm171_vm0, %v7393_v1, 0.0 }
  0xf5   :  { %14105 = vst [vmem:[#allocation82_spill] sm:$0xff] %v7524_v39  ;;  %14106 = vst [vmem:[#allocation83_spill] sm:$0xff] %v7530_v31  ;;  %v1079_v51 = vmul.f32 %v7536_v17, %v1047_v37  ;;  %v1080_v39 = vmul.f32 %v7542_v25, %v7347_v26  ;;  %v1081_v31 = vmul.f32 %v7549_v30, %v7347_v26  ;;  %v7556_v37 = vld [vmem:[%s13300_s0 + $0xf0] sm:$0xff]  ;;  %v1095_v12 = vsel %vm171_vm0, %v1076_v3, 0.0 }
  0xf6   :  { %14107 = vst [vmem:[#allocation84_spill] sm:$0xff] %v7536_v17  ;;  %14108 = vst [vmem:[#allocation85_spill] sm:$0xff] %v7542_v25  ;;  %v1082_v17 = vmul.f32 %v7556_v37, %v7347_v26  ;;  %v7563_v25 = vld [vmem:[%s13300_s0 + $0xf8] sm:$0xff]  ;;  %v1108_v4 = vsel %vm171_vm0, %v1073_v2, 0.0  ;;  %v1110_v59 = vsel %vm171_vm0, %v1077_v45, 0.0  ;;  %v1114_v3 = vsel %vm171_vm0, %v7371_v19, 0.0 }
  0xf7   :  { %14109 = vst [vmem:[#allocation86_spill] sm:$0xff] %v7549_v30  ;;  %14110 = vst [vmem:[#allocation87_spill] sm:$0xff] %v7556_v37  ;;  %v1083_v32 = vmul.f32 %v7563_v25, %v7347_v26  ;;  %v1085_v30 = vsel %vm171_vm0, %v1056_v8, 0.0  ;;  %v1091_v37 = vsel %vm171_vm0, %v1068_v24, 0.0  ;;  %v1097_v41 = vsel %vm171_vm0, %v1080_v39, 0.0 }
  0xf8   :  { %14111 = vst [vmem:[#allocation88_spill] sm:$0xff] %v7563_v25  ;;  %v1086_v40 = vadd.f32 %v1085_v30, %v1084_v18  ;;  %v1099_v26 = vsel %vm171_vm0, %v7363_v34, 0.0  ;;  %v1102_v8 = vsel %vm171_vm0, %v1061_v7, 0.0  ;;  %v1104_v30 = vsel %vm171_vm0, %v1065_v13, 0.0 }
  0xf9   :  { %v1101_v25 = vadd.f32 %v1100_v62, %v1099_v26  ;;  %v1106_v24 = vsel %vm171_vm0, %v1069_v49, 0.0  ;;  %v1112_v39 = vsel %vm171_vm0, %v1081_v31, 0.0  ;;  %v1115_v7 = vsel %vm171_vm0, %v7401_v29, 0.0 }
  0xfa   :  { %v1088_v38 = vadd.f32 %v1087_v0, %v1086_v40  ;;  %v1117_v40 = vsel %vm171_vm0, %v7429_v61, 0.0  ;;  %v1116_v1 = vadd.f32 %v1115_v7, %v1114_v3  ;;  %v1119_v13 = vsel %vm171_vm0, %v1066_v43, 0.0 }
  0xfb   :  { %v1103_v18 = vadd.f32 %v1102_v8, %v1101_v25  ;;  %v1121_v2 = vsel %vm171_vm0, %v1070_v23, 0.0  ;;  %v1123_v45 = vsel %vm171_vm0, %v1074_v44, 0.0  ;;  %v1125_v0 = vsel %vm171_vm0, %v1078_v16, 0.0 }
  0xfc   :  { %v1090_v34 = vadd.f32 %v1089_v28, %v1088_v38  ;;  %v1127_v28 = vsel %vm171_vm0, %v1082_v17, 0.0  ;;  %v1118_v25 = vadd.f32 %v1117_v40, %v1116_v1  ;;  %v1129_v29 = vsel %vm171_vm0, %v7379_v20, 0.0 }
  0xfd   :  { %v1105_v31 = vadd.f32 %v1104_v30, %v1103_v18  ;;  %v1130_v19 = vsel %vm171_vm0, %v7409_v5, 0.0  ;;  %v1132_v61 = vsel %vm171_vm0, %v7437_v14, 0.0  ;;  %v1134_v44 = vsel %vm171_vm0, %v7463_v57, 0.0 }
  0xfe   :  { %v1092_v49 = vadd.f32 %v1091_v37, %v1090_v34  ;;  %v1131_v26 = vadd.f32 %v1130_v19, %v1129_v29  ;;  %v1120_v37 = vadd.f32 %v1119_v13, %v1118_v25  ;;  %v1136_v17 = vsel %vm171_vm0, %v7489_v15, 0.0 }
  0xff   :  { %v1107_v23 = vadd.f32 %v1106_v24, %v1105_v31  ;;  %v1138_v16 = vsel %vm171_vm0, %v1075_v6, 0.0  ;;  %v1140_v20 = vsel %vm171_vm0, %v1079_v51, 0.0  ;;  %v1142_v38 = vsel %vm171_vm0, %v1083_v32, 0.0 }
 0x100   :  { %v1094_v43 = vadd.f32 %v1093_v55, %v1092_v49  ;;  %v1133_v5 = vadd.f32 %v1132_v61, %v1131_v26  ;;  %v1122_v14 = vadd.f32 %v1121_v2, %v1120_v37  ;;  %v1155_v55 = vrot.slane %v7217_v60, %v14089_v33  ;;  %v5965_v49 = vld [vmem:[%s13301_s3] sm:$0xff] }
 0x101   :  { %v1109_v8 = vadd.f32 %v1108_v4, %v1107_v23  ;;  %v1159_v57 = vrot.slane %v7225_v56, %v14089_v33  ;;  %v1163_v30 = vrot.slane %v7233_v47, %v14089_v33  ;;  %v1171_v32 = vrot.slane %v7249_v27, %v14089_v33  ;;  %v14131_v47 = vld [vmem:[#allocation84_spill] sm:$0xff]  ;;  %v14132_v56 = vld [vmem:[#allocation85_spill] sm:$0xff] }
 0x102   :  { %v1096_v62 = vadd.f32 %v1095_v12, %v1094_v43  ;;  %v1135_v6 = vadd.f32 %v1134_v44, %v1133_v5  ;;  %v1167_v12 = vrot.slane %v7241_v10, %v14089_v33  ;;  %v1124_v51 = vadd.f32 %v1123_v45, %v1122_v14  ;;  %v5966_v43 = vld [vmem:[%s13301_s3 + $0x8] sm:$0xff]  ;;  %v14115_v5 = vld [vmem:[#allocation70_spill] sm:$0xff] }
 0x103   :  { %v1111_v24 = vadd.f32 %v1110_v59, %v1109_v8  ;;  %v1175_v4 = vrot.slane %v7257_v21, %v14089_v33  ;;  %v1179_v3 = vrot.slane %v7263_v35, %v14089_v33  ;;  %v1184_v40 = vmul.f32 %v7352_v11, %v1155_v55  ;;  %v14126_v35 = vld [vmem:[#allocation80_spill] sm:$0xff]  ;;  %v14130_v10 = vld [vmem:[#allocation83_spill] sm:$0xff] }
 0x104   :  { %v1098_v15 = vadd.f32 %v1097_v41, %v1096_v62  ;;  %v1137_v18 = vadd.f32 %v1136_v17, %v1135_v6  ;;  %v1183_v41 = vrot.slane %v7271_v9, %v14089_v33  ;;  %v1126_v59 = vadd.f32 %v1125_v0, %v1124_v51  ;;  %v14118_v6 = vld [vmem:[#allocation72_spill] sm:$0xff] }
 0x105   :  { %v1113_v34 = vadd.f32 %v1112_v39, %v1111_v24  ;;  %v1185_v1 = vmul.f32 %v7360_v54, %v1155_v55  ;;  %v7629_v13 = vmul.f32 %v7368_v42, %v1155_v55  ;;  %v7637_v31 = vmul.f32 %v7376_v48, %v1155_v55  ;;  %v14116_v55 = vld [vmem:[#allocation71_spill] sm:$0xff] }
 0x106   :  { %v1144_v7 = vmul.f32 0.01, %v1098_v15  ;;  %v1139_v2 = vadd.f32 %v1138_v16, %v1137_v18  ;;  %v1128_v25 = vadd.f32 %v1127_v28, %v1126_v59  ;;  %v1188_v0 = vmul.f32 %v7384_v50, %v1159_v57 }
 0x107   :  { %v1145_v45 = vmul.f32 0.01, %v1113_v34  ;;  %v1189_v29 = vmul.f32 %v7390_v36, %v1159_v57  ;;  %v1190_v19 = vmul.f32 %v7398_v63, %v1159_v57  ;;  %v7648_v26 = vmul.f32 %v7406_v46, %v1159_v57  ;;  %v5967_v57 = vld [vmem:[%s13301_s3 + $0x10] sm:$0xff]  ;;  %v14119_v34 = vld [vmem:[#allocation73_spill] sm:$0xff] }
 0x108   :  { %v7634_v39 = vsub.f32 %v5965_v49, %v1144_v7  ;;  %v1141_v61 = vadd.f32 %v1140_v20, %v1139_v2  ;;  %v1192_v44 = vmul.f32 %v7414_v22, %v1163_v30  ;;  %v1146_v37 = vmul.f32 0.01, %v1128_v25  ;;  %v14114_v20 = vld [vmem:[#allocation69_spill] sm:$0xff]  ;;  %v14120_v7 = vld [vmem:[#allocation74_spill] sm:$0xff] }
 0x109   :  { %v7645_v23 = vsub.f32 %v5966_v43, %v1145_v45  ;;  %v1193_v28 = vmul.f32 %v7420_v52, %v1163_v30  ;;  %v1194_v17 = vmul.f32 %v7426_v53, %v1163_v30  ;;  %v1195_v16 = vmul.f32 %v7434_v58, %v1163_v30  ;;  %v14122_v45 = vld [vmem:[#allocation76_spill] sm:$0xff]  ;;  %v14123_v25 = vld [vmem:[#allocation77_spill] sm:$0xff]  ;;  %v14124_v43 = vld [vmem:[#allocation78_spill] sm:$0xff] }
 0x10a   :  { %14112 = vst [vmem:[#allocation89_spill] sm:$0xff] %v7634_v39  ;;  %v1143_v62 = vadd.f32 %v1142_v38, %v1141_v61  ;;  %v1196_v8 = vmul.f32 %v14114_v20, %v1167_v12  ;;  %v1197_v14 = vmul.f32 %v14115_v5, %v1167_v12  ;;  %v1198_v15 = vmul.f32 %v14116_v55, %v1167_v12  ;;  %v14121_v38 = vld [vmem:[#allocation75_spill] sm:$0xff] }
 0x10b   :  { %14113 = vst [vmem:[#allocation90_spill] sm:$0xff] %v7645_v23  ;;  %v7660_v24 = vsub.f32 %v5967_v57, %v1146_v37  ;;  %v1199_v51 = vmul.f32 %v14118_v6, %v1167_v12  ;;  %v1200_v18 = vmul.f32 %v14119_v34, %v1171_v32  ;;  %v1201_v59 = vmul.f32 %v14120_v7, %v1171_v32  ;;  %v14125_v39 = vld [vmem:[#allocation79_spill] sm:$0xff]  ;;  %v14127_v57 = vld [vmem:[#allocation81_spill] sm:$0xff] }
 0x10c   :  { %v1147_v30 = vmul.f32 0.01, %v1143_v62  ;;  %v1202_v2 = vmul.f32 %v14121_v38, %v1171_v32  ;;  %v1203_v49 = vmul.f32 %v14122_v45, %v1171_v32  ;;  %v1204_v61 = vmul.f32 %v14123_v25, %v1175_v4  ;;  %v5968_v12 = vld [vmem:[%s13301_s3 + $0x18] sm:$0xff]  ;;  %v14129_v62 = vld [vmem:[#allocation82_spill] sm:$0xff]  ;;  %v14134_v45 = vld [vmem:[#allocation87_spill] sm:$0xff] }
 0x10d   :  { %14117 = vst [vmem:[#allocation69_spill] sm:$0xff] %v7660_v24  ;;  %v1205_v23 = vmul.f32 %v14124_v43, %v1175_v4  ;;  %v1206_v9 = vmul.f32 %v14125_v39, %v1175_v4  ;;  %v1207_v37 = vmul.f32 %v14126_v35, %v1175_v4  ;;  %v1208_v24 = vmul.f32 %v14127_v57, %v1179_v3  ;;  %v14133_v25 = vld [vmem:[#allocation86_spill] sm:$0xff]  ;;  %v14135_v35 = vld [vmem:[#allocation88_spill] sm:$0xff] }
 0x10e   :  { %v7675_v21 = vsub.f32 %v5968_v12, %v1147_v30  ;;  %v1209_v27 = vmul.f32 %v14129_v62, %v1179_v3  ;;  %v1210_v32 = vmul.f32 %v14130_v10, %v1179_v3  ;;  %v1211_v60 = vmul.f32 %v14131_v47, %v1179_v3 }
 0x10f   :  { %v1212_v43 = vmul.f32 %v14132_v56, %v1183_v41  ;;  %v1213_v39 = vmul.f32 %v14133_v25, %v1183_v41  ;;  %v1214_v4 = vmul.f32 %v14134_v45, %v1183_v41  ;;  %v1215_v57 = vmul.f32 %v14135_v35, %v1183_v41 }
 0x110   :  { %14128 = vst [vmem:[#allocation70_spill] sm:$0xff] %v7675_v21  ;;  %v1216_v38 = vsel %vm171_vm0, %v1184_v40, 0.0  ;;  %v1217_v7 = vsel %vm171_vm0, %v1188_v0, 0.0  ;;  %v1219_v30 = vsel %vm171_vm0, %v1192_v44, 0.0  ;;  %v1221_v12 = vsel %vm171_vm0, %v1196_v8, 0.0 }
 0x111   :  { %v1218_v21 = vadd.f32 %v1217_v7, %v1216_v38  ;;  %v1223_v10 = vsel %vm171_vm0, %v1200_v18, 0.0  ;;  %v1225_v3 = vsel %vm171_vm0, %v1204_v61, 0.0  ;;  %v1227_v56 = vsel %vm171_vm0, %v1208_v24, 0.0 }
 0x112   :  { %v1229_v25 = vsel %vm171_vm0, %v1212_v43, 0.0  ;;  %v1231_v45 = vsel %vm171_vm0, %v1185_v1, 0.0  ;;  %v1232_v41 = vsel %vm171_vm0, %v1189_v29, 0.0  ;;  %v1234_v40 = vsel %vm171_vm0, %v1193_v28, 0.0 }
 0x113   :  { %v1220_v0 = vadd.f32 %v1219_v30, %v1218_v21  ;;  %v1233_v35 = vadd.f32 %v1232_v41, %v1231_v45  ;;  %v1236_v44 = vsel %vm171_vm0, %v1197_v14, 0.0  ;;  %v1238_v8 = vsel %vm171_vm0, %v1201_v59, 0.0 }
 0x114   :  { %v1240_v18 = vsel %vm171_vm0, %v1205_v23, 0.0  ;;  %v1242_v7 = vsel %vm171_vm0, %v1209_v27, 0.0  ;;  %v1244_v24 = vsel %vm171_vm0, %v1213_v39, 0.0  ;;  %v1246_v38 = vsel %vm171_vm0, %v7629_v13, 0.0 }
 0x115   :  { %v1222_v1 = vadd.f32 %v1221_v12, %v1220_v0  ;;  %v1235_v61 = vadd.f32 %v1234_v40, %v1233_v35  ;;  %v1247_v29 = vsel %vm171_vm0, %v1190_v19, 0.0  ;;  %v1249_v21 = vsel %vm171_vm0, %v1194_v17, 0.0 }
 0x116   :  { %v1248_v28 = vadd.f32 %v1247_v29, %v1246_v38  ;;  %v1251_v14 = vsel %vm171_vm0, %v1198_v15, 0.0  ;;  %v1253_v59 = vsel %vm171_vm0, %v1202_v2, 0.0  ;;  %v1255_v23 = vsel %vm171_vm0, %v1206_v9, 0.0  ;;  %v14141_v29 = vld [vmem:[#allocation61_spill] sm:$0xff] }
 0x117   :  { %v1224_v45 = vadd.f32 %v1223_v10, %v1222_v1  ;;  %v1237_v27 = vadd.f32 %v1236_v44, %v1235_v61  ;;  %v1257_v39 = vsel %vm171_vm0, %v1210_v32, 0.0  ;;  %v1259_v43 = vsel %vm171_vm0, %v1214_v4, 0.0  ;;  %v14137_v44 = vld [vmem:[#allocation57_spill] sm:$0xff]  ;;  %v14140_v61 = vld [vmem:[#allocation60_spill] sm:$0xff] }
 0x118   :  { %v1250_v13 = vadd.f32 %v1249_v21, %v1248_v28  ;;  %v1261_v35 = vsel %vm171_vm0, %v7637_v31, 0.0  ;;  %v1262_v19 = vsel %vm171_vm0, %v7648_v26, 0.0  ;;  %v1264_v17 = vsel %vm171_vm0, %v1195_v16, 0.0  ;;  %v14136_v16 = vld [vmem:[#allocation56_spill] sm:$0xff]  ;;  %v14142_v28 = vld [vmem:[#allocation62_spill] sm:$0xff] }
 0x119   :  { %v1226_v15 = vadd.f32 %v1225_v3, %v1224_v45  ;;  %v1239_v30 = vadd.f32 %v1238_v8, %v1237_v27  ;;  %v1263_v2 = vadd.f32 %v1262_v19, %v1261_v35  ;;  %v1266_v9 = vsel %vm171_vm0, %v1199_v51, 0.0  ;;  %v14138_v51 = vld [vmem:[#allocation58_spill] sm:$0xff] }
 0x11a   :  { %v1252_v10 = vadd.f32 %v1251_v14, %v1250_v13  ;;  %v1268_v12 = vsel %vm171_vm0, %v1203_v49, 0.0  ;;  %v1270_v32 = vsel %vm171_vm0, %v1207_v37, 0.0  ;;  %v1272_v4 = vsel %vm171_vm0, %v1211_v60, 0.0  ;;  %v14139_v60 = vld [vmem:[#allocation59_spill] sm:$0xff] }
 0x11b   :  { %v1228_v41 = vadd.f32 %v1227_v56, %v1226_v15  ;;  %v1241_v40 = vadd.f32 %v1240_v18, %v1239_v30  ;;  %v1265_v31 = vadd.f32 %v1264_v17, %v1263_v2  ;;  %v1274_v0 = vsel %vm171_vm0, %v1215_v57, 0.0  ;;  %v5969_v30 = vld [vmem:[%s13301_s3 + $0x20] sm:$0xff] }
 0x11c   :  { %v1254_v26 = vadd.f32 %v1253_v59, %v1252_v10  ;;  %v1287_v3 = vrot.slane %v14136_v16, %v14089_v33  ;;  %v1291_v8 = vrot.slane %v14137_v44, %v14089_v33  ;;  %v1295_v38 = vrot.slane %v14138_v51, %v14089_v33  ;;  %v14157_v44 = vld [vmem:[#allocation85_spill] sm:$0xff] }
 0x11d   :  { %v1230_v49 = vadd.f32 %v1229_v25, %v1228_v41  ;;  %v1243_v1 = vadd.f32 %v1242_v7, %v1241_v40  ;;  %v1267_v37 = vadd.f32 %v1266_v9, %v1265_v31  ;;  %v1299_v56 = vrot.slane %v14139_v60, %v14089_v33  ;;  %v14143_v25 = vld [vmem:[#allocation63_spill] sm:$0xff] }
 0x11e   :  { %v1256_v18 = vadd.f32 %v1255_v23, %v1254_v26  ;;  %v1303_v57 = vrot.slane %v14140_v61, %v14089_v33  ;;  %v1307_v21 = vrot.slane %v14141_v29, %v14089_v33  ;;  %v1311_v14 = vrot.slane %v14142_v28, %v14089_v33  ;;  %v14152_v28 = vld [vmem:[#allocation79_spill] sm:$0xff]  ;;  %v14153_v61 = vld [vmem:[#allocation80_spill] sm:$0xff] }
 0x11f   :  { %v1245_v59 = vadd.f32 %v1244_v24, %v1243_v1  ;;  %v1269_v45 = vadd.f32 %v1268_v12, %v1267_v37  ;;  %v1276_v27 = vmul.f32 0.01, %v1230_v49  ;;  %v1315_v7 = vrot.slane %v14143_v25, %v14089_v33  ;;  %v14156_v60 = vld [vmem:[#allocation83_spill] sm:$0xff] }
 0x120   :  { %v1258_v13 = vadd.f32 %v1257_v39, %v1256_v18  ;;  %v1316_v35 = vmul.f32 %v7352_v11, %v1287_v3  ;;  %v1317_v23 = vmul.f32 %v7360_v54, %v1287_v3  ;;  %v7738_v19 = vmul.f32 %v7368_v42, %v1287_v3 }
 0x121   :  { %v1271_v17 = vadd.f32 %v1270_v32, %v1269_v45  ;;  %v1277_v15 = vmul.f32 0.01, %v1245_v59  ;;  %v7743_v24 = vsub.f32 %v5969_v30, %v1276_v27  ;;  %v7746_v2 = vmul.f32 %v7376_v48, %v1287_v3  ;;  %v5970_v32 = vld [vmem:[%s13301_s3 + $0x28] sm:$0xff] }
 0x122   :  { %v1260_v9 = vadd.f32 %v1259_v43, %v1258_v13  ;;  %v1320_v39 = vmul.f32 %v7384_v50, %v1291_v8  ;;  %v1321_v10 = vmul.f32 %v7390_v36, %v1291_v8  ;;  %v1322_v12 = vmul.f32 %v7398_v63, %v1291_v8 }
 0x123   :  { %14144 = vst [vmem:[#allocation71_spill] sm:$0xff] %v7743_v24  ;;  %v1273_v41 = vadd.f32 %v1272_v4, %v1271_v17  ;;  %v7754_v40 = vsub.f32 %v5970_v32, %v1277_v15  ;;  %v7757_v31 = vmul.f32 %v7406_v46, %v1291_v8  ;;  %v1324_v26 = vmul.f32 %v7414_v22, %v1295_v38  ;;  %v5971_v8 = vld [vmem:[%s13301_s3 + $0x30] sm:$0xff]  ;;  %v14147_v17 = vld [vmem:[#allocation74_spill] sm:$0xff]  ;;  %v14150_v32 = vld [vmem:[#allocation77_spill] sm:$0xff] }
 0x124   :  { %v1278_v3 = vmul.f32 0.01, %v1260_v9  ;;  %v1325_v43 = vmul.f32 %v7420_v52, %v1295_v38  ;;  %v1326_v49 = vmul.f32 %v7426_v53, %v1295_v38  ;;  %v1327_v1 = vmul.f32 %v7434_v58, %v1295_v38  ;;  %v14149_v9 = vld [vmem:[#allocation76_spill] sm:$0xff]  ;;  %v14151_v24 = vld [vmem:[#allocation78_spill] sm:$0xff] }
 0x125   :  { %14145 = vst [vmem:[#allocation72_spill] sm:$0xff] %v7754_v40  ;;  %v1275_v37 = vadd.f32 %v1274_v0, %v1273_v41  ;;  %v1328_v4 = vmul.f32 %v14114_v20, %v1299_v56  ;;  %v1329_v18 = vmul.f32 %v14115_v5, %v1299_v56  ;;  %v1330_v59 = vmul.f32 %v14116_v55, %v1299_v56  ;;  %v14148_v0 = vld [vmem:[#allocation75_spill] sm:$0xff] }
 0x126   :  { %v7769_v45 = vsub.f32 %v5971_v8, %v1278_v3  ;;  %v1331_v27 = vmul.f32 %v14118_v6, %v1299_v56  ;;  %v1332_v13 = vmul.f32 %v14119_v34, %v1303_v57  ;;  %v1333_v15 = vmul.f32 %v14147_v17, %v1303_v57  ;;  %v14154_v8 = vld [vmem:[#allocation81_spill] sm:$0xff] }
 0x127   :  { %v1279_v38 = vmul.f32 0.01, %v1275_v37  ;;  %v1334_v30 = vmul.f32 %v14148_v0, %v1303_v57  ;;  %v1335_v41 = vmul.f32 %v14149_v9, %v1303_v57  ;;  %v1336_v40 = vmul.f32 %v14150_v32, %v1307_v21  ;;  %v5972_v56 = vld [vmem:[%s13301_s3 + $0x38] sm:$0xff]  ;;  %v14158_v32 = vld [vmem:[#allocation86_spill] sm:$0xff]  ;;  %v14159_v9 = vld [vmem:[#allocation87_spill] sm:$0xff] }
 0x128   :  { %14146 = vst [vmem:[#allocation73_spill] sm:$0xff] %v7769_v45  ;;  %v1337_v25 = vmul.f32 %v14151_v24, %v1307_v21  ;;  %v1338_v29 = vmul.f32 %v14152_v28, %v1307_v21  ;;  %v1339_v3 = vmul.f32 %v14153_v61, %v1307_v21  ;;  %v1340_v45 = vmul.f32 %v14154_v8, %v1311_v14  ;;  %v14160_v61 = vld [vmem:[#allocation88_spill] sm:$0xff] }
 0x129   :  { %v7784_v16 = vsub.f32 %v5972_v56, %v1279_v38  ;;  %v1341_v37 = vmul.f32 %v14129_v62, %v1311_v14  ;;  %v1342_v57 = vmul.f32 %v14156_v60, %v1311_v14  ;;  %v1343_v51 = vmul.f32 %v14131_v47, %v1311_v14 }
 0x12a   :  { %v1344_v24 = vmul.f32 %v14157_v44, %v1315_v7  ;;  %v1345_v28 = vmul.f32 %v14158_v32, %v1315_v7  ;;  %v1346_v21 = vmul.f32 %v14159_v9, %v1315_v7  ;;  %v1347_v8 = vmul.f32 %v14160_v61, %v1315_v7 }
 0x12b   :  { %14155 = vst [vmem:[#allocation82_spill] sm:$0xff] %v7784_v16  ;;  %v1348_v0 = vsel %vm171_vm0, %v1316_v35, 0.0  ;;  %v1349_v17 = vsel %vm171_vm0, %v1320_v39, 0.0  ;;  %v1351_v38 = vsel %vm171_vm0, %v1324_v26, 0.0  ;;  %v1353_v56 = vsel %vm171_vm0, %v1328_v4, 0.0 }
 0x12c   :  { %v1350_v16 = vadd.f32 %v1349_v17, %v1348_v0  ;;  %v1355_v60 = vsel %vm171_vm0, %v1332_v13, 0.0  ;;  %v1357_v14 = vsel %vm171_vm0, %v1336_v40, 0.0  ;;  %v1359_v44 = vsel %vm171_vm0, %v1340_v45, 0.0 }
 0x12d   :  { %v1361_v32 = vsel %vm171_vm0, %v1344_v24, 0.0  ;;  %v1363_v9 = vsel %vm171_vm0, %v1317_v23, 0.0  ;;  %v1364_v7 = vsel %vm171_vm0, %v1321_v10, 0.0  ;;  %v1366_v35 = vsel %vm171_vm0, %v1325_v43, 0.0 }
 0x12e   :  { %v1352_v39 = vadd.f32 %v1351_v38, %v1350_v16  ;;  %v1365_v61 = vadd.f32 %v1364_v7, %v1363_v9  ;;  %v1368_v26 = vsel %vm171_vm0, %v1329_v18, 0.0  ;;  %v1370_v4 = vsel %vm171_vm0, %v1333_v15, 0.0 }
 0x12f   :  { %v1372_v13 = vsel %vm171_vm0, %v1337_v25, 0.0  ;;  %v1374_v40 = vsel %vm171_vm0, %v1341_v37, 0.0  ;;  %v1376_v45 = vsel %vm171_vm0, %v1345_v28, 0.0  ;;  %v1378_v24 = vsel %vm171_vm0, %v7738_v19, 0.0 }
 0x130   :  { %v1354_v23 = vadd.f32 %v1353_v56, %v1352_v39  ;;  %v1367_v17 = vadd.f32 %v1366_v35, %v1365_v61  ;;  %v1379_v10 = vsel %vm171_vm0, %v1322_v12, 0.0  ;;  %v1381_v16 = vsel %vm171_vm0, %v1326_v49, 0.0 }
 0x131   :  { %v1380_v43 = vadd.f32 %v1379_v10, %v1378_v24  ;;  %v1383_v18 = vsel %vm171_vm0, %v1330_v59, 0.0  ;;  %v1385_v15 = vsel %vm171_vm0, %v1334_v30, 0.0  ;;  %v1387_v25 = vsel %vm171_vm0, %v1338_v29, 0.0  ;;  %v14166_v10 = vld [vmem:[#allocation64_spill] sm:$0xff] }
 0x132   :  { %v1356_v0 = vadd.f32 %v1355_v60, %v1354_v23  ;;  %v1369_v9 = vadd.f32 %v1368_v26, %v1367_v17  ;;  %v1389_v28 = vsel %vm171_vm0, %v1342_v57, 0.0  ;;  %v1391_v37 = vsel %vm171_vm0, %v1346_v21, 0.0  ;;  %v14162_v26 = vld [vmem:[#allocation5_spill] sm:$0xff] }
 0x133   :  { %v1382_v19 = vadd.f32 %v1381_v16, %v1380_v43  ;;  %v1393_v61 = vsel %vm171_vm0, %v7746_v2, 0.0  ;;  %v1394_v12 = vsel %vm171_vm0, %v7757_v31, 0.0  ;;  %v1396_v49 = vsel %vm171_vm0, %v1327_v1, 0.0  ;;  %v14161_v1 = vld [vmem:[#allocation4_spill] sm:$0xff]  ;;  %v14165_v17 = vld [vmem:[#allocation9_spill] sm:$0xff] }
 0x134   :  { %v1358_v59 = vadd.f32 %v1357_v14, %v1356_v0  ;;  %v1371_v38 = vadd.f32 %v1370_v4, %v1369_v9  ;;  %v1395_v30 = vadd.f32 %v1394_v12, %v1393_v61  ;;  %v1398_v29 = vsel %vm171_vm0, %v1331_v27, 0.0  ;;  %v14163_v27 = vld [vmem:[#allocation6_spill] sm:$0xff]  ;;  %v14167_v43 = vld [vmem:[#allocation65_spill] sm:$0xff] }
 0x135   :  { %v1384_v60 = vadd.f32 %v1383_v18, %v1382_v19  ;;  %v1400_v56 = vsel %vm171_vm0, %v1335_v41, 0.0  ;;  %v1402_v57 = vsel %vm171_vm0, %v1339_v3, 0.0  ;;  %v1404_v21 = vsel %vm171_vm0, %v1343_v51, 0.0  ;;  %v14164_v51 = vld [vmem:[#allocation7_spill] sm:$0xff] }
 0x136   :  { %v1360_v7 = vadd.f32 %v1359_v44, %v1358_v59  ;;  %v1373_v35 = vadd.f32 %v1372_v13, %v1371_v38  ;;  %v1397_v2 = vadd.f32 %v1396_v49, %v1395_v30  ;;  %v1406_v39 = vsel %vm171_vm0, %v1347_v8, 0.0  ;;  %v5973_v38 = vld [vmem:[%s13301_s3 + $0x40] sm:$0xff] }
 0x137   :  { %v1386_v31 = vadd.f32 %v1385_v15, %v1384_v60  ;;  %v1419_v14 = vrot.slane %v14161_v1, %v14089_v33  ;;  %v1423_v4 = vrot.slane %v14162_v26, %v14089_v33  ;;  %v1427_v24 = vrot.slane %v14163_v27, %v14089_v33 }
 0x138   :  { %v1362_v41 = vadd.f32 %v1361_v32, %v1360_v7  ;;  %v1375_v23 = vadd.f32 %v1374_v40, %v1373_v35  ;;  %v1399_v3 = vadd.f32 %v1398_v29, %v1397_v2  ;;  %v1431_v44 = vrot.slane %v14164_v51, %v14089_v33  ;;  %v14168_v32 = vld [vmem:[#allocation66_spill] sm:$0xff] }
 0x139   :  { %v1388_v13 = vadd.f32 %v1387_v25, %v1386_v31  ;;  %v1435_v8 = vrot.slane %v14165_v17, %v14089_v33  ;;  %v1439_v16 = vrot.slane %v14166_v10, %v14089_v33  ;;  %v1443_v18 = vrot.slane %v14167_v43, %v14089_v33 }
 0x13a   :  { %v1377_v15 = vadd.f32 %v1376_v45, %v1375_v23  ;;  %v1401_v0 = vadd.f32 %v1400_v56, %v1399_v3  ;;  %v1408_v9 = vmul.f32 0.01, %v1362_v41  ;;  %v1447_v40 = vrot.slane %v14168_v32, %v14089_v33  ;;  %v14184_v33 = vld [vmem:[#allocation87_spill] sm:$0xff] }
 0x13b   :  { %v1390_v19 = vadd.f32 %v1389_v28, %v1388_v13  ;;  %v1448_v61 = vmul.f32 %v7352_v11, %v1419_v14  ;;  %v1449_v25 = vmul.f32 %v7360_v54, %v1419_v14  ;;  %v7847_v12 = vmul.f32 %v7368_v42, %v1419_v14 }
 0x13c   :  { %v1403_v49 = vadd.f32 %v1402_v57, %v1401_v0  ;;  %v1409_v59 = vmul.f32 0.01, %v1377_v15  ;;  %v7852_v45 = vsub.f32 %v5973_v38, %v1408_v9  ;;  %v7855_v30 = vmul.f32 %v7376_v48, %v1419_v14  ;;  %v5974_v57 = vld [vmem:[%s13301_s3 + $0x48] sm:$0xff]  ;;  %v14174_v38 = vld [vmem:[#allocation76_spill] sm:$0xff] }
 0x13d   :  { %v1392_v29 = vadd.f32 %v1391_v37, %v1390_v19  ;;  %v1452_v28 = vmul.f32 %v7384_v50, %v1423_v4  ;;  %v1453_v60 = vmul.f32 %v7390_v36, %v1423_v4  ;;  %v1454_v56 = vmul.f32 %v7398_v63, %v1423_v4 }
 0x13e   :  { %14169 = vst [vmem:[#allocation84_spill] sm:$0xff] %v7852_v45  ;;  %v1405_v7 = vadd.f32 %v1404_v21, %v1403_v49  ;;  %v7863_v35 = vsub.f32 %v5974_v57, %v1409_v59  ;;  %v7866_v2 = vmul.f32 %v7406_v46, %v1423_v4  ;;  %v1456_v31 = vmul.f32 %v7414_v22, %v1427_v24  ;;  %v5975_v4 = vld [vmem:[%s13301_s3 + $0x50] sm:$0xff]  ;;  %v14173_v59 = vld [vmem:[#allocation75_spill] sm:$0xff]  ;;  %v14183_v45 = vld [vmem:[#allocation86_spill] sm:$0xff] }
 0x13f   :  { %v1410_v14 = vmul.f32 0.01, %v1392_v29  ;;  %v1457_v37 = vmul.f32 %v7420_v52, %v1427_v24  ;;  %v1458_v41 = vmul.f32 %v7426_v53, %v1427_v24  ;;  %v7872_v23 = vmul.f32 %v7434_v58, %v1427_v24  ;;  %v14172_v24 = vld [vmem:[#allocation74_spill] sm:$0xff] }
 0x140   :  { %14170 = vst [vmem:[#allocation4_spill] sm:$0xff] %v7863_v35  ;;  %v1407_v21 = vadd.f32 %v1406_v39, %v1405_v7  ;;  %v1460_v3 = vmul.f32 %v14114_v20, %v1431_v44  ;;  %v1461_v13 = vmul.f32 %v14115_v5, %v1431_v44  ;;  %v1462_v15 = vmul.f32 %v14116_v55, %v1431_v44  ;;  %v14175_v55 = vld [vmem:[#allocation77_spill] sm:$0xff]  ;;  %v14176_v7 = vld [vmem:[#allocation78_spill] sm:$0xff]  ;;  %v14177_v35 = vld [vmem:[#allocation79_spill] sm:$0xff] }
 0x141   :  { %v7880_v0 = vsub.f32 %v5975_v4, %v1410_v14  ;;  %v7883_v9 = vmul.f32 %v14118_v6, %v1431_v44  ;;  %v1464_v19 = vmul.f32 %v14119_v34, %v1435_v8  ;;  %v1465_v49 = vmul.f32 %v14172_v24, %v1435_v8  ;;  %v14178_v4 = vld [vmem:[#allocation80_spill] sm:$0xff]  ;;  %v14179_v6 = vld [vmem:[#allocation81_spill] sm:$0xff] }
 0x142   :  { %v1411_v39 = vmul.f32 0.01, %v1407_v21  ;;  %v1466_v20 = vmul.f32 %v14173_v59, %v1435_v8  ;;  %v7889_v5 = vmul.f32 %v14174_v38, %v1435_v8  ;;  %v1468_v29 = vmul.f32 %v14175_v55, %v1439_v16  ;;  %v5976_v34 = vld [vmem:[%s13301_s3 + $0x58] sm:$0xff]  ;;  %v14181_v8 = vld [vmem:[#allocation83_spill] sm:$0xff] }
 0x143   :  { %14171 = vst [vmem:[#allocation5_spill] sm:$0xff] %v7880_v0  ;;  %v1469_v57 = vmul.f32 %v14176_v7, %v1439_v16  ;;  %v1470_v14 = vmul.f32 %v14177_v35, %v1439_v16  ;;  %v1471_v0 = vmul.f32 %v14178_v4, %v1439_v16  ;;  %v1472_v44 = vmul.f32 %v14179_v6, %v1443_v18  ;;  %v14182_v55 = vld [vmem:[#allocation85_spill] sm:$0xff]  ;;  %v14185_v4 = vld [vmem:[#allocation88_spill] sm:$0xff] }
 0x144   :  { %v7899_v21 = vsub.f32 %v5976_v34, %v1411_v39  ;;  %v1473_v24 = vmul.f32 %v14129_v62, %v1443_v18  ;;  %v1474_v59 = vmul.f32 %v14181_v8, %v1443_v18  ;;  %v1475_v38 = vmul.f32 %v14131_v47, %v1443_v18 }
 0x145   :  { %v1476_v7 = vmul.f32 %v14182_v55, %v1447_v40  ;;  %v1477_v35 = vmul.f32 %v14183_v45, %v1447_v40  ;;  %v1478_v16 = vmul.f32 %v14184_v33, %v1447_v40  ;;  %v1479_v6 = vmul.f32 %v14185_v4, %v1447_v40 }
 0x146   :  { %14180 = vst [vmem:[#allocation6_spill] sm:$0xff] %v7899_v21  ;;  %v1480_v58 = vsel %vm171_vm0, %v1448_v61, 0.0  ;;  %v1481_v53 = vsel %vm171_vm0, %v1452_v28, 0.0  ;;  %v1483_v39 = vsel %vm171_vm0, %v1456_v31, 0.0  ;;  %v1485_v62 = vsel %vm171_vm0, %v1460_v3, 0.0 }
 0x147   :  { %v1482_v34 = vadd.f32 %v1481_v53, %v1480_v58  ;;  %v1487_v8 = vsel %vm171_vm0, %v1464_v19, 0.0  ;;  %v1489_v47 = vsel %vm171_vm0, %v1468_v29, 0.0  ;;  %v1491_v18 = vsel %vm171_vm0, %v1472_v44, 0.0 }
 0x148   :  { %v1493_v45 = vsel %vm171_vm0, %v1476_v7, 0.0  ;;  %v1495_v33 = vsel %vm171_vm0, %v1449_v25, 0.0  ;;  %v1496_v40 = vsel %vm171_vm0, %v1453_v60, 0.0  ;;  %v1498_v61 = vsel %vm171_vm0, %v1457_v37, 0.0 }
 0x149   :  { %v1484_v28 = vadd.f32 %v1483_v39, %v1482_v34  ;;  %v1497_v55 = vadd.f32 %v1496_v40, %v1495_v33  ;;  %v1500_v31 = vsel %vm171_vm0, %v1461_v13, 0.0  ;;  %v1502_v58 = vsel %vm171_vm0, %v1465_v49, 0.0 }
 0x14a   :  { %v1504_v53 = vsel %vm171_vm0, %v1469_v57, 0.0  ;;  %v1506_v3 = vsel %vm171_vm0, %v1473_v24, 0.0  ;;  %v1508_v19 = vsel %vm171_vm0, %v1477_v35, 0.0  ;;  %v1510_v25 = vsel %vm171_vm0, %v7847_v12, 0.0 }
 0x14b   :  { %v1486_v60 = vadd.f32 %v1485_v62, %v1484_v28  ;;  %v1499_v29 = vadd.f32 %v1498_v61, %v1497_v55  ;;  %v1511_v37 = vsel %vm171_vm0, %v1454_v56, 0.0  ;;  %v1513_v44 = vsel %vm171_vm0, %v1458_v41, 0.0  ;;  %v14186_v61 = vld [vmem:[#allocation42_spill] sm:$0xff]  ;;  %v14187_v55 = vld [vmem:[#allocation44_spill] sm:$0xff] }
 0x14c   :  { %v1512_v13 = vadd.f32 %v1511_v37, %v1510_v25  ;;  %v1515_v49 = vsel %vm171_vm0, %v1462_v15, 0.0  ;;  %v1517_v57 = vsel %vm171_vm0, %v1466_v20, 0.0  ;;  %v1519_v24 = vsel %vm171_vm0, %v1470_v14, 0.0 }
 0x14d   :  { %v1488_v7 = vadd.f32 %v1487_v8, %v1486_v60  ;;  %v1501_v35 = vadd.f32 %v1500_v31, %v1499_v29  ;;  %v1521_v12 = vsel %vm171_vm0, %v1474_v59, 0.0  ;;  %v1523_v4 = vsel %vm171_vm0, %v1478_v16, 0.0 }
 0x14e   :  { %v1514_v39 = vadd.f32 %v1513_v44, %v1512_v13  ;;  %v1525_v56 = vsel %vm171_vm0, %v7855_v30, 0.0  ;;  %v1526_v41 = vsel %vm171_vm0, %v7866_v2, 0.0  ;;  %v1528_v15 = vsel %vm171_vm0, %v7872_v23, 0.0  ;;  %v14190_v44 = vld [vmem:[#allocation40_spill] sm:$0xff] }
 0x14f   :  { %v1490_v20 = vadd.f32 %v1489_v47, %v1488_v7  ;;  %v1503_v14 = vadd.f32 %v1502_v58, %v1501_v35  ;;  %v1527_v62 = vadd.f32 %v1526_v41, %v1525_v56  ;;  %v1530_v59 = vsel %vm171_vm0, %v7883_v9, 0.0  ;;  %v14188_v9 = vld [vmem:[#allocation46_spill] sm:$0xff]  ;;  %v14192_v13 = vld [vmem:[#allocation52_spill] sm:$0xff]  ;;  %v14194_v41 = vld [vmem:[#allocation43_spill] sm:$0xff] }
 0x150   :  { %v1516_v16 = vadd.f32 %v1515_v49, %v1514_v39  ;;  %v1532_v34 = vsel %vm171_vm0, %v7889_v5, 0.0  ;;  %v1534_v30 = vsel %vm171_vm0, %v1471_v0, 0.0  ;;  %v1536_v8 = vsel %vm171_vm0, %v1475_v38, 0.0  ;;  %v14189_v5 = vld [vmem:[#allocation48_spill] sm:$0xff] }
 0x151   :  { %v1492_v2 = vadd.f32 %v1491_v18, %v1490_v20  ;;  %v1505_v33 = vadd.f32 %v1504_v53, %v1503_v14  ;;  %v1529_v40 = vadd.f32 %v1528_v15, %v1527_v62  ;;  %v1538_v23 = vsel %vm171_vm0, %v1479_v6, 0.0  ;;  %v14191_v18 = vld [vmem:[#allocation50_spill] sm:$0xff] }
 0x152   :  { %v1518_v47 = vadd.f32 %v1517_v57, %v1516_v16  ;;  %v1556_v28 = vrot.slane %v14186_v61, 7  ;;  %v1559_v31 = vrot.slane %v14187_v55, 6  ;;  %v1562_v58 = vrot.slane %v14188_v9, 5  ;;  %v5977_v14 = vld [vmem:[%s13301_s3 + $0x60] sm:$0xff] }
 0x153   :  { %v1494_v25 = vadd.f32 %v1493_v45, %v1492_v2  ;;  %v1507_v60 = vadd.f32 %v1506_v3, %v1505_v33  ;;  %v1531_v29 = vadd.f32 %v1530_v59, %v1529_v40  ;;  %v1565_v37 = vrot.slane %v14189_v5, 4  ;;  %v14193_v3 = vld [vmem:[#allocation54_spill] sm:$0xff]  ;;  %v14197_v2 = vld [vmem:[#allocation45_spill] sm:$0xff]  ;;  %v14201_v5 = vld [vmem:[#allocation51_spill] sm:$0xff] }
 0x154   :  { %v1520_v0 = vadd.f32 %v1519_v24, %v1518_v47  ;;  %v1558_v38 = vsel %vm1557_vm5, %v1556_v28, %v14190_v44  ;;  %v1568_v53 = vrot.slane %v14191_v18, 3  ;;  %v1571_v6 = vrot.slane %v14192_v13, 2  ;;  %v14199_v28 = vld [vmem:[#allocation47_spill] sm:$0xff] }
 0x155   :  { %v1509_v49 = vadd.f32 %v1508_v19, %v1507_v60  ;;  %v1533_v57 = vadd.f32 %v1532_v34, %v1531_v29  ;;  %v1540_v7 = vmul.f32 0.01, %v1494_v25  ;;  %v1561_v35 = vsel %vm1560_vm6, %v1559_v31, %v1558_v38 }
 0x156   :  { %v1522_v39 = vadd.f32 %v1521_v12, %v1520_v0  ;;  %v1564_v45 = vsel %vm1563_vm7, %v1562_v58, %v1561_v35  ;;  %v1574_v56 = vrot.slane %v14193_v3, 1  ;;  %v1595_v15 = vrot.slane %v14194_v41, 7  ;;  %v14196_v12 = vld [vmem:[#allocation41_spill] sm:$0xff]  ;;  %v5979_v0 = vld [vmem:[%s13301_s3 + $0x70] sm:$0xff]  ;;  %v14206_v3 = vld [vmem:[#allocation58_spill] sm:$0xff] }
 0x157   :  { %v1535_v24 = vadd.f32 %v1534_v30, %v1533_v57  ;;  %v1541_v20 = vmul.f32 0.01, %v1509_v49  ;;  %v7961_v62 = vsub.f32 %v5977_v14, %v1540_v7  ;;  %v1567_v19 = vsel %vm1566_vm8, %v1565_v37, %v1564_v45  ;;  %v5978_v30 = vld [vmem:[%s13301_s3 + $0x68] sm:$0xff]  ;;  %v14200_v58 = vld [vmem:[#allocation49_spill] sm:$0xff] }
 0x158   :  { %v1524_v59 = vadd.f32 %v1523_v4, %v1522_v39  ;;  %v1570_v16 = vsel %vm1569_vm9, %v1568_v53, %v1567_v19  ;;  %v1596_v34 = vsel %vm1557_vm5, %v1595_v15, %v14196_v12  ;;  %v1597_v33 = vrot.slane %v14197_v2, 6  ;;  %v14203_v53 = vld [vmem:[#allocation53_spill] sm:$0xff]  ;;  %v14204_v49 = vld [vmem:[#allocation55_spill] sm:$0xff]  ;;  %v14209_v19 = vld [vmem:[#allocation56_spill] sm:$0xff] }
 0x159   :  { %14195 = vst [vmem:[#allocation7_spill] sm:$0xff] %v7961_v62  ;;  %v1537_v40 = vadd.f32 %v1536_v8, %v1535_v24  ;;  %v7971_v47 = vsub.f32 %v5978_v30, %v1541_v20  ;;  %v1573_v61 = vsel %vm1572_vm10, %v1571_v6, %v1570_v16  ;;  %v1599_v55 = vrot.slane %v14199_v28, 5  ;;  %v14205_v7 = vld [vmem:[#allocation57_spill] sm:$0xff]  ;;  %v14207_v41 = vld [vmem:[#allocation59_spill] sm:$0xff]  ;;  %v14210_v16 = vld [vmem:[#allocation60_spill] sm:$0xff] }
 0x15a   :  { %v1542_v31 = vmul.f32 0.01, %v1524_v59  ;;  %v1576_v4 = vsel %vm1575_vm11, %v1574_v56, %v1573_v61  ;;  %v1598_v9 = vsel %vm1560_vm6, %v1597_v33, %v1596_v34  ;;  %v1601_v25 = vrot.slane %v14200_v58, 4  ;;  %v5980_v24 = vld [vmem:[%s13301_s3 + $0x78] sm:$0xff] }
 0x15b   :  { %14198 = vst [vmem:[#allocation9_spill] sm:$0xff] %v7971_v47  ;;  %v1539_v60 = vadd.f32 %v1538_v23, %v1537_v40  ;;  %v1578_v8 = vsel %vm171_vm0, %v1576_v4, 0.0  ;;  %v1600_v29 = vsel %vm1563_vm7, %v1599_v55, %v1598_v9  ;;  %v1603_v37 = vrot.slane %v14201_v5, 3  ;;  %v14211_v40 = vld [vmem:[#allocation61_spill] sm:$0xff]  ;;  %v14212_v55 = vld [vmem:[#allocation62_spill] sm:$0xff]  ;;  %v14213_v4 = vld [vmem:[#allocation63_spill] sm:$0xff] }
 0x15c   :  { %v7984_v44 = vsub.f32 %v5979_v0, %v1542_v31  ;;  %v1579_v38 = vrot.slane %v1578_v8, 4  ;;  %v1602_v18 = vsel %vm1566_vm8, %v1601_v25, %v1600_v29  ;;  %v1605_v13 = vrot.slane %v14203_v53, 2 }
 0x15d   :  { %v1543_v6 = vmul.f32 0.01, %v1539_v60  ;;  %v1604_v23 = vsel %vm1569_vm9, %v1603_v37, %v1602_v18  ;;  %v1607_v57 = vrot.slane %v14204_v49, 1  ;;  %v1627_v35 = vrot.slane %v14205_v7, 7 }
 0x15e   :  { %14202 = vst [vmem:[#allocation64_spill] sm:$0xff] %v7984_v44  ;;  %v1580_v39 = vadd.f32 %v1579_v38, %v1578_v8  ;;  %v1606_v45 = vsel %vm1572_vm10, %v1605_v13, %v1604_v23  ;;  %v1629_v56 = vrot.slane %v14206_v3, 6  ;;  %v1631_v15 = vrot.slane %v14207_v41, 5  ;;  %v14216_v41 = vld [vmem:[#allocation69_spill] sm:$0xff] }
 0x15f   :  { %v7997_v20 = vsub.f32 %v5980_v24, %v1543_v6  ;;  %v1608_v14 = vsel %vm1575_vm11, %v1607_v57, %v1606_v45  ;;  %v1628_v59 = vsel %vm1557_vm5, %v1627_v35, %v14209_v19  ;;  %v1633_v12 = vrot.slane %v14210_v16, 4  ;;  %v14217_v19 = vld [vmem:[#allocation70_spill] sm:$0xff] }
 0x160   :  { %v1581_v34 = vrot.slane %v1580_v39, 2  ;;  %v1610_v2 = vsel %vm171_vm0, %v1608_v14, 0.0  ;;  %v1630_v33 = vsel %vm1560_vm6, %v1629_v56, %v1628_v59  ;;  %v1635_v30 = vrot.slane %v14211_v40, 3  ;;  %v14215_v56 = vld [vmem:[#allocation90_spill] sm:$0xff] }
 0x161   :  { %14208 = vst [vmem:[#allocation65_spill] sm:$0xff] %v7997_v20  ;;  %v1611_v61 = vrot.slane %v1610_v2, 4  ;;  %v1632_v28 = vsel %vm1563_vm7, %v1631_v15, %v1630_v33  ;;  %v1637_v31 = vrot.slane %v14212_v55, 2  ;;  %v1639_v9 = vrot.slane %v14213_v4, 1  ;;  %v14219_v55 = vld [vmem:[#allocation67_spill] sm:$0xff] }
 0x162   :  { %v1582_v58 = vadd.f32 %v1581_v34, %v1580_v39  ;;  %v1634_v25 = vsel %vm1566_vm8, %v1633_v12, %v1632_v28  ;;  %v1659_v60 = vrot.slane %v14162_v26, 7  ;;  %v1661_v8 = vrot.slane %v14163_v27, 6  ;;  %v14214_v39 = vld [vmem:[#allocation89_spill] sm:$0xff] }
 0x163   :  { %v1612_v29 = vadd.f32 %v1611_v61, %v1610_v2  ;;  %v1636_v5 = vsel %vm1569_vm9, %v1635_v30, %v1634_v25  ;;  %v1663_v37 = vrot.slane %v14164_v51, 5  ;;  %v1665_v0 = vrot.slane %v14165_v17, 4  ;;  %v8104_v25 = vld [vmem:[%s13300_s0 + $0x70] sm:$0xff] }
 0x164   :  { %v1583_v38 = vrot.slane %v1582_v58, 1  ;;  %v1638_v18 = vsel %vm1572_vm10, %v1637_v31, %v1636_v5  ;;  %v1660_v53 = vsel %vm1557_vm5, %v1659_v60, %v14161_v1  ;;  %v1667_v13 = vrot.slane %v14166_v10, 3 }
 0x165   :  { %v1613_v6 = vrot.slane %v1612_v29, 2  ;;  %v1640_v26 = vsel %vm1575_vm11, %v1639_v9, %v1638_v18  ;;  %v1662_v27 = vsel %vm1560_vm6, %v1661_v8, %v1660_v53  ;;  %v1669_v23 = vrot.slane %v14167_v43, 2  ;;  %v8095_v9 = vld [vmem:[%s13300_s0 + $0x68] sm:$0xff]  ;;  %v5985_v8 = vld [vmem:[%s13302_s4 + $0x1] sm:$0x1] }
 0x166   :  { %v1584_v49 = vadd.f32 %v1583_v38, %v1582_v58  ;;  %v1642_v51 = vsel %vm171_vm0, %v1640_v26, 0.0  ;;  %v1664_v17 = vsel %vm1563_vm7, %v1663_v37, %v1662_v27  ;;  %v1671_v57 = vrot.slane %v14168_v32, 1  ;;  %v8118_v37 = vld [vmem:[%s13300_s0 + $0x78] sm:$0xff]  ;;  %v8127_v38 = vld [vmem:[%s13300_s0 + $0x80] sm:$0xff]  ;;  %v8145_v26 = vld [vmem:[%s13300_s0 + $0x90] sm:$0xff] }
 0x167   :  { %v1614_v7 = vadd.f32 %v1613_v6, %v1612_v29  ;;  %v1643_v35 = vrot.slane %v1642_v51, 4  ;;  %v1666_v1 = vsel %vm1566_vm8, %v1665_v0, %v1664_v17  ;;  %v8028_v10 = vmul.f32 %v7352_v11, %v14214_v39  ;;  %v5981_v11 = vld [vmem:[%s13302_s4] sm:$0x1]  ;;  %14222 = vst [vmem:[#allocation75_spill] sm:$0xff] %v8127_v38  ;;  %14224 = vst [vmem:[#allocation77_spill] sm:$0xff] %v8145_v26 }
 0x168   :  { %v1585_v45 = vmul.f32 0.01, %v1584_v49  ;;  %v1668_v3 = vsel %vm1569_vm9, %v1667_v13, %v1666_v1  ;;  %v8033_v43 = vmul.f32 %v7360_v54, %v14215_v56  ;;  %v8037_v15 = vmul.f32 %v7368_v42, %v14216_v41  ;;  %v8136_v13 = vld [vmem:[%s13300_s0 + $0x88] sm:$0xff]  ;;  %v8163_v17 = vld [vmem:[%s13300_s0 + $0xa0] sm:$0xff]  ;;  %v8181_v1 = vld [vmem:[%s13300_s0 + $0xb0] sm:$0xff] }
 0x169   :  { %v1615_v32 = vrot.slane %v1614_v7, 1  ;;  %v1644_v24 = vadd.f32 %v1643_v35, %v1642_v51  ;;  %v1670_v14 = vsel %vm1572_vm10, %v1669_v23, %v1668_v3  ;;  %v8042_v59 = vmul.f32 %v7376_v48, %v14217_v19  ;;  %14223 = vst [vmem:[#allocation76_spill] sm:$0xff] %v8136_v13  ;;  %v8154_v23 = vld [vmem:[%s13300_s0 + $0x98] sm:$0xff]  ;;  %14226 = vst [vmem:[#allocation79_spill] sm:$0xff] %v8163_v17 }
 0x16a   :  { %v8047_v16 = vsub.f32 %v5981_v11, %v1585_v45  ;;  %v1672_v54 = vsel %vm1575_vm11, %v1671_v57, %v1670_v14  ;;  %v8052_v42 = vmul.f32 %v7384_v50, %v14214_v39  ;;  %v8056_v12 = vmul.f32 %v7390_v36, %v14215_v56  ;;  %14225 = vst [vmem:[#allocation78_spill] sm:$0xff] %v8154_v23  ;;  %v8199_v14 = vld [vmem:[%s13300_s0 + $0xc0] sm:$0xff] }
 0x16b   :  { %v1616_v34 = vadd.f32 %v1615_v32, %v1614_v7  ;;  %v1645_v2 = vrot.slane %v1644_v24, 2  ;;  %v1674_v48 = vsel %vm171_vm0, %v1672_v54, 0.0  ;;  %v8061_v33 = vmul.f32 %v7398_v63, %v14216_v41  ;;  %v14220_v63 = vld [vmem:[#allocation68_spill] sm:$0xff]  ;;  %v8172_v7 = vld [vmem:[%s13300_s0 + $0xa8] sm:$0xff]  ;;  %14228 = vst [vmem:[#allocation81_spill] sm:$0xff] %v8181_v1  ;;  %v8190_v32 = vld [vmem:[%s13300_s0 + $0xb8] sm:$0xff] }
 0x16c   :  { %14218 = vst [vmem:[#allocation66_spill] sm:$0xff] %v8047_v16  ;;  %v1675_v40 = vrot.slane %v1674_v48, 4  ;;  %v8065_v30 = vmul.f32 %v7406_v46, %v14217_v19  ;;  %v8069_v50 = vmul.f32 %v7414_v22, %v14214_v39  ;;  %v8073_v36 = vmul.f32 %v7420_v52, %v14215_v56  ;;  %v8086_v22 = vld [vmem:[%s13300_s0 + $0x60] sm:$0xff]  ;;  %14227 = vst [vmem:[#allocation80_spill] sm:$0xff] %v8172_v7  ;;  %v8208_v54 = vld [vmem:[%s13300_s0 + $0xc8] sm:$0xff] }
 0x16d   :  { %v1617_v61 = vmul.f32 0.01, %v1616_v34  ;;  %v1646_v28 = vadd.f32 %v1645_v2, %v1644_v24  ;;  %v8077_v31 = vmul.f32 %v14219_v55, %v14216_v41  ;;  %v8081_v4 = vmul.f32 %v14220_v63, %v14217_v19  ;;  %14229 = vst [vmem:[#allocation83_spill] sm:$0xff] %v8190_v32  ;;  %14230 = vst [vmem:[#allocation85_spill] sm:$0xff] %v8199_v14  ;;  %v8235_v55 = vld [vmem:[%s13300_s0 + $0xe0] sm:$0xff] }
 0x16e   :  { %v1676_v46 = vadd.f32 %v1675_v40, %v1674_v48  ;;  %v8090_v52 = vmul.f32 %v8086_v22, %v14214_v39  ;;  %v8099_v58 = vmul.f32 %v8095_v9, %v14215_v56  ;;  %v8108_v60 = vmul.f32 %v8104_v25, %v14216_v41  ;;  %14231 = vst [vmem:[#allocation86_spill] sm:$0xff] %v8208_v54  ;;  %v8217_v48 = vld [vmem:[%s13300_s0 + $0xd0] sm:$0xff] }
 0x16f   :  { %v8113_v29 = vsub.f32 %v5985_v8, %v1617_v61  ;;  %v1647_v5 = vrot.slane %v1646_v28, 1  ;;  %v8122_v0 = vmul.f32 %v8118_v37, %v14217_v19  ;;  %v8131_v18 = vmul.f32 %v8127_v38, %v14214_v39  ;;  %14232 = vst [vmem:[#allocation87_spill] sm:$0xff] %v8217_v48  ;;  %v8226_v61 = vld [vmem:[%s13300_s0 + $0xd8] sm:$0xff]  ;;  %14234 = vst [vmem:[#allocation42_spill] sm:$0xff] %v8235_v55  ;;  %v8244_v8 = vld [vmem:[%s13300_s0 + $0xe8] sm:$0xff] }
 0x170   :  { %v1677_v53 = vrot.slane %v1676_v46, 2  ;;  %v8140_v6 = vmul.f32 %v8136_v13, %v14215_v56  ;;  %v8149_v27 = vmul.f32 %v8145_v26, %v14216_v41  ;;  %v8158_v49 = vmul.f32 %v8154_v23, %v14217_v19  ;;  %14233 = vst [vmem:[#allocation88_spill] sm:$0xff] %v8226_v61  ;;  %14235 = vst [vmem:[#allocation44_spill] sm:$0xff] %v8244_v8 }
 0x171   :  { %14221 = vst [vmem:[#allocation74_spill] sm:$0xff] %v8113_v29  ;;  %v1648_v51 = vadd.f32 %v1647_v5, %v1646_v28  ;;  %v8167_v57 = vmul.f32 %v8163_v17, %v14214_v39  ;;  %v8176_v35 = vmul.f32 %v8172_v7, %v14215_v56  ;;  %v8185_v45 = vmul.f32 %v8181_v1, %v14216_v41 }
 0x172   :  { %v1678_v3 = vadd.f32 %v1677_v53, %v1676_v46  ;;  %v8194_v24 = vmul.f32 %v8190_v32, %v14217_v19  ;;  %v8203_v11 = vmul.f32 %v8199_v14, %v14214_v39  ;;  %v8212_v34 = vmul.f32 %v8208_v54, %v14215_v56  ;;  %v8253_v53 = vld [vmem:[%s13300_s0 + $0xf0] sm:$0xff] }
 0x173   :  { %v1649_v2 = vmul.f32 0.01, %v1648_v51  ;;  %v8221_v40 = vmul.f32 %v8217_v48, %v14216_v41  ;;  %v8230_v28 = vmul.f32 %v8226_v61, %v14217_v19  ;;  %v8239_v63 = vmul.f32 %v8235_v55, %v14214_v39  ;;  %14236 = vst [vmem:[#allocation46_spill] sm:$0xff] %v8253_v53  ;;  %v8262_v39 = vld [vmem:[%s13300_s0 + $0xf8] sm:$0xff] }
 0x174   :  { %v1679_v46 = vrot.slane %v1678_v3, 1  ;;  %v8248_v5 = vmul.f32 %v8244_v8, %v14215_v56  ;;  %v8257_v51 = vmul.f32 %v8253_v53, %v14216_v41  ;;  %14237 = vst [vmem:[#allocation48_spill] sm:$0xff] %v8262_v39  ;;  %v8266_v20 = vmul.f32 %v8262_v39, %v14217_v19  ;;  %v6003_v56 = vld [vmem:[%s13302_s4 + $0x2] sm:$0x1] }
 0x175   :  { %v8271_v44 = vsub.f32 %v6003_v56, %v1649_v2  ;;  %v1715_v47 = vsel %vm171_vm0, %v8028_v10, 0.0  ;;  %v1716_v41 = vsel %vm171_vm0, %v8033_v43, 0.0  ;;  %v1718_v62 = vsel %vm171_vm0, %v8037_v15, 0.0 }
 0x176   :  { %v1680_v21 = vadd.f32 %v1679_v46, %v1678_v3  ;;  %v1717_v29 = vadd.f32 %v1716_v41, %v1715_v47  ;;  %v1720_v19 = vsel %vm171_vm0, %v8042_v59, 0.0  ;;  %v1728_v39 = vsel %vm171_vm0, %v8052_v42, 0.0 }
 0x177   :  { %14238 = vst [vmem:[#allocation40_spill] sm:$0xff] %v8271_v44  ;;  %v1729_v56 = vsel %vm171_vm0, %v8056_v12, 0.0  ;;  %v1731_v10 = vsel %vm171_vm0, %v8061_v33, 0.0  ;;  %v1733_v43 = vsel %vm171_vm0, %v8065_v30, 0.0  ;;  %v1741_v15 = vsel %vm171_vm0, %v8069_v50, 0.0 }
 0x178   :  { %v1681_v3 = vmul.f32 0.01, %v1680_v21  ;;  %v1719_v47 = vadd.f32 %v1718_v62, %v1717_v29  ;;  %v1730_v41 = vadd.f32 %v1729_v56, %v1728_v39  ;;  %v1742_v59 = vsel %vm171_vm0, %v8073_v36, 0.0  ;;  %v6004_v30 = vld [vmem:[%s13302_s4 + $0x3] sm:$0x1] }
 0x179   :  { %v1743_v2 = vadd.f32 %v1742_v59, %v1741_v15  ;;  %v1744_v42 = vsel %vm171_vm0, %v8077_v31, 0.0  ;;  %v1746_v12 = vsel %vm171_vm0, %v8081_v4, 0.0  ;;  %v1754_v33 = vsel %vm171_vm0, %v8090_v52, 0.0 }
 0x17a   :  { %v8302_v21 = vsub.f32 %v6004_v30, %v1681_v3  ;;  %v1721_v62 = vadd.f32 %v1720_v19, %v1719_v47  ;;  %v1732_v39 = vadd.f32 %v1731_v10, %v1730_v41  ;;  %v1755_v50 = vsel %vm171_vm0, %v8099_v58, 0.0 }
 0x17b   :  { %v1745_v36 = vadd.f32 %v1744_v42, %v1743_v2  ;;  %v1756_v29 = vadd.f32 %v1755_v50, %v1754_v33  ;;  %v1757_v31 = vsel %vm171_vm0, %v8108_v60, 0.0  ;;  %v1759_v4 = vsel %vm171_vm0, %v8122_v0, 0.0 }
 0x17c   :  { %14239 = vst [vmem:[#allocation50_spill] sm:$0xff] %v8302_v21  ;;  %v1722_v52 = vrot.slane %v1721_v62, 4  ;;  %v1734_v46 = vadd.f32 %v1733_v43, %v1732_v39  ;;  %v1767_v56 = vsel %vm171_vm0, %v8131_v18, 0.0  ;;  %v1768_v19 = vsel %vm171_vm0, %v8140_v6, 0.0 }
 0x17d   :  { %v1747_v10 = vadd.f32 %v1746_v12, %v1745_v36  ;;  %v1758_v15 = vadd.f32 %v1757_v31, %v1756_v29  ;;  %v1769_v3 = vadd.f32 %v1768_v19, %v1767_v56  ;;  %v1770_v58 = vsel %vm171_vm0, %v8149_v27, 0.0 }
 0x17e   :  { %v1723_v47 = vadd.f32 %v1722_v52, %v1721_v62  ;;  %v1735_v41 = vrot.slane %v1734_v46, 4  ;;  %v1772_v60 = vsel %vm171_vm0, %v8158_v49, 0.0  ;;  %v1780_v0 = vsel %vm171_vm0, %v8167_v57, 0.0 }
 0x17f   :  { %v1748_v43 = vrot.slane %v1747_v10, 4  ;;  %v1760_v59 = vadd.f32 %v1759_v4, %v1758_v15  ;;  %v1771_v18 = vadd.f32 %v1770_v58, %v1769_v3  ;;  %v1781_v6 = vsel %vm171_vm0, %v8176_v35, 0.0 }
 0x180   :  { %v1724_v2 = vrot.slane %v1723_v47, 2  ;;  %v1736_v42 = vadd.f32 %v1735_v41, %v1734_v46  ;;  %v1782_v12 = vadd.f32 %v1781_v6, %v1780_v0  ;;  %v1783_v27 = vsel %vm171_vm0, %v8185_v45, 0.0 }
 0x181   :  { %v1749_v33 = vadd.f32 %v1748_v43, %v1747_v10  ;;  %v1761_v30 = vrot.slane %v1760_v59, 4  ;;  %v1773_v62 = vadd.f32 %v1772_v60, %v1771_v18  ;;  %v1785_v49 = vsel %vm171_vm0, %v8194_v24, 0.0 }
 0x182   :  { %v1725_v39 = vadd.f32 %v1724_v2, %v1723_v47  ;;  %v1737_v57 = vrot.slane %v1736_v42, 2  ;;  %v1784_v50 = vadd.f32 %v1783_v27, %v1782_v12  ;;  %v1793_v36 = vsel %vm171_vm0, %v8203_v11, 0.0 }
 0x183   :  { %v1750_v29 = vrot.slane %v1749_v33, 2  ;;  %v1762_v35 = vadd.f32 %v1761_v30, %v1760_v59  ;;  %v1774_v31 = vrot.slane %v1773_v62, 4  ;;  %v1794_v4 = vsel %vm171_vm0, %v8212_v34, 0.0 }
 0x184   :  { %v1726_v52 = vrot.slane %v1725_v39, 1  ;;  %v1738_v45 = vadd.f32 %v1737_v57, %v1736_v42  ;;  %v1786_v46 = vadd.f32 %v1785_v49, %v1784_v50  ;;  %v1795_v56 = vadd.f32 %v1794_v4, %v1793_v36  ;;  %v14240_v57 = vld [vmem:[#allocation3_spill] sm:$0xff] }
 0x185   :  { %v1751_v19 = vadd.f32 %v1750_v29, %v1749_v33  ;;  %v1763_v10 = vrot.slane %v1762_v35, 2  ;;  %v1775_v15 = vadd.f32 %v1774_v31, %v1773_v62  ;;  %v1796_v24 = vsel %vm171_vm0, %v8221_v40, 0.0 }
 0x186   :  { %v1727_v3 = vadd.f32 %v1726_v52, %v1725_v39  ;;  %v1739_v58 = vrot.slane %v1738_v45, 1  ;;  %v1787_v47 = vrot.slane %v1786_v46, 4  ;;  %v1797_v11 = vadd.f32 %v1796_v24, %v1795_v56  ;;  %v14247_v24 = vld [vmem:[#allocation72_spill] sm:$0xff] }
 0x187   :  { %v1752_v41 = vrot.slane %v1751_v19, 1  ;;  %v1764_v60 = vadd.f32 %v1763_v10, %v1762_v35  ;;  %v1776_v0 = vrot.slane %v1775_v15, 2  ;;  %v1798_v34 = vsel %vm171_vm0, %v8230_v28, 0.0  ;;  %v14241_v35 = vld [vmem:[#allocation71_spill] sm:$0xff] }
 0x188   :  { %v1740_v43 = vadd.f32 %v1739_v58, %v1738_v45  ;;  %v1788_v59 = vadd.f32 %v1787_v47, %v1786_v46  ;;  %v1799_v18 = vadd.f32 %v1798_v34, %v1797_v11  ;;  %v1806_v6 = vsel %vm171_vm0, %v8239_v63, 0.0  ;;  %v8380_v58 = vld [vmem:[%s13300_s0 + $0x10] sm:$0xff]  ;;  %v14248_v47 = vld [vmem:[#allocation73_spill] sm:$0xff] }
 0x189   :  { %v1753_v2 = vadd.f32 %v1752_v41, %v1751_v19  ;;  %v1765_v42 = vrot.slane %v1764_v60, 1  ;;  %v1777_v12 = vadd.f32 %v1776_v0, %v1775_v15  ;;  %v1807_v40 = vsel %vm171_vm0, %v8248_v5, 0.0  ;;  %v8349_v5 = vld [vmem:[%s13300_s0] sm:$0xff]  ;;  %v8373_v15 = vld [vmem:[%s13300_s0 + $0x8] sm:$0xff]  ;;  %v8387_v41 = vld [vmem:[%s13300_s0 + $0x18] sm:$0xff] }
 0x18a   :  { %v1789_v27 = vrot.slane %v1788_v59, 2  ;;  %v1800_v33 = vrot.slane %v1799_v18, 4  ;;  %v1808_v30 = vadd.f32 %v1807_v40, %v1806_v6  ;;  %v1809_v62 = vsel %vm171_vm0, %v8257_v51, 0.0 }
 0x18b   :  { %v1766_v49 = vadd.f32 %v1765_v42, %v1764_v60  ;;  %v1778_v28 = vrot.slane %v1777_v12, 1  ;;  %v1811_v39 = vsel %vm171_vm0, %v8266_v20, 0.0  ;;  %v8344_v63 = vrot.slane %v8047_v16, %v14240_v57  ;;  %v14249_v60 = vld [vmem:[#allocation82_spill] sm:$0xff] }
 0x18c   :  { %v1790_v50 = vadd.f32 %v1789_v27, %v1788_v59  ;;  %v1801_v36 = vadd.f32 %v1800_v33, %v1799_v18  ;;  %v1810_v29 = vadd.f32 %v1809_v62, %v1808_v30  ;;  %v8353_v51 = vmul.f32 %v8349_v5, %v14241_v35  ;;  %v8394_v18 = vld [vmem:[%s13300_s0 + $0x20] sm:$0xff]  ;;  %v8415_v27 = vld [vmem:[%s13300_s0 + $0x38] sm:$0xff] }
 0x18d   :  { %v1779_v31 = vadd.f32 %v1778_v28, %v1777_v12  ;;  %v8356_v4 = vadd.f32 %v8344_v63, %v1727_v3  ;;  %v8359_v20 = vadd.f32 %v8344_v63, %v1740_v43  ;;  %v8362_v52 = vadd.f32 %v8344_v63, %v1753_v2  ;;  %v8401_v2 = vld [vmem:[%s13300_s0 + $0x28] sm:$0xff]  ;;  %v8408_v12 = vld [vmem:[%s13300_s0 + $0x30] sm:$0xff]  ;;  %v8422_v30 = vld [vmem:[%s13300_s0 + $0x40] sm:$0xff] }
 0x18e   :  { %v1791_v45 = vrot.slane %v1790_v50, 1  ;;  %v1802_v46 = vrot.slane %v1801_v36, 2  ;;  %v1812_v56 = vadd.f32 %v1811_v39, %v1810_v29  ;;  %v8365_v19 = vadd.f32 %v8344_v63, %v1766_v49  ;;  %v8439_v29 = vld [vmem:[%s13300_s0 + $0x50] sm:$0xff] }
 0x18f   :  { %14242 = vst [vmem:[#allocation52_spill] sm:$0xff] %v8356_v4  ;;  %14243 = vst [vmem:[#allocation54_spill] sm:$0xff] %v8359_v20  ;;  %v8368_v10 = vadd.f32 %v8344_v63, %v1779_v31  ;;  %v1834_v3 = vmul.f32 %v8373_v15, %v14247_v24  ;;  %v1835_v11 = vmul.f32 %v8380_v58, %v14248_v47 }
 0x190   :  { %14244 = vst [vmem:[#allocation43_spill] sm:$0xff] %v8362_v52  ;;  %14245 = vst [vmem:[#allocation41_spill] sm:$0xff] %v8365_v19  ;;  %v1836_v0 = vmul.f32 %v8387_v41, %v14249_v60  ;;  %v1792_v34 = vadd.f32 %v1791_v45, %v1790_v50  ;;  %v1803_v43 = vadd.f32 %v1802_v46, %v1801_v36  ;;  %v1813_v59 = vrot.slane %v1812_v56, 4  ;;  %v8432_v50 = vld [vmem:[%s13300_s0 + $0x48] sm:$0xff]  ;;  %v8446_v45 = vld [vmem:[%s13300_s0 + $0x58] sm:$0xff] }
 0x191   :  { %14246 = vst [vmem:[#allocation45_spill] sm:$0xff] %v8368_v10  ;;  %v1837_v6 = vmul.f32 %v8394_v18, %v14241_v35  ;;  %v1838_v42 = vmul.f32 %v8401_v2, %v14247_v24  ;;  %v1839_v40 = vmul.f32 %v8408_v12, %v14248_v47  ;;  %v1840_v33 = vmul.f32 %v8415_v27, %v14249_v60 }
 0x192   :  { %v1841_v62 = vmul.f32 %v8422_v30, %v14241_v35  ;;  %v1804_v49 = vrot.slane %v1803_v43, 1  ;;  %v1814_v28 = vadd.f32 %v1813_v59, %v1812_v56  ;;  %v8427_v39 = vadd.f32 %v8344_v63, %v1792_v34 }
 0x193   :  { %v1842_v36 = vmul.f32 %v8432_v50, %v14247_v24  ;;  %v1843_v31 = vmul.f32 %v8439_v29, %v14248_v47  ;;  %v1844_v46 = vmul.f32 %v8446_v45, %v14249_v60  ;;  %v1845_v56 = vmul.f32 %v8086_v22, %v14241_v35 }
 0x194   :  { %14250 = vst [vmem:[#allocation47_spill] sm:$0xff] %v8427_v39  ;;  %v1846_v34 = vmul.f32 %v8095_v9, %v14247_v24  ;;  %v1805_v59 = vadd.f32 %v1804_v49, %v1803_v43  ;;  %v1815_v16 = vrot.slane %v1814_v28, 2  ;;  %v1847_v39 = vmul.f32 %v8104_v25, %v14248_v47 }
 0x195   :  { %v1848_v10 = vmul.f32 %v8118_v37, %v14249_v60  ;;  %v1849_v19 = vmul.f32 %v8127_v38, %v14241_v35  ;;  %v1850_v52 = vmul.f32 %v8136_v13, %v14247_v24  ;;  %v1851_v20 = vmul.f32 %v8145_v26, %v14248_v47 }
 0x196   :  { %v1852_v4 = vmul.f32 %v8154_v23, %v14249_v60  ;;  %v1816_v43 = vadd.f32 %v1815_v16, %v1814_v28  ;;  %v8467_v49 = vadd.f32 %v8344_v63, %v1805_v59  ;;  %v1853_v21 = vmul.f32 %v8163_v17, %v14241_v35 }
 0x197   :  { %v1854_v44 = vmul.f32 %v8172_v7, %v14247_v24  ;;  %v1855_v38 = vmul.f32 %v8181_v1, %v14248_v47  ;;  %v1856_v13 = vmul.f32 %v8190_v32, %v14249_v60  ;;  %v1857_v26 = vmul.f32 %v8199_v14, %v14241_v35  ;;  %v14252_v32 = vld [vmem:[#allocation48_spill] sm:$0xff] }
 0x198   :  { %14251 = vst [vmem:[#allocation49_spill] sm:$0xff] %v8467_v49  ;;  %v8481_v16 = vmul.f32 %v8208_v54, %v14247_v24  ;;  %v1817_v28 = vrot.slane %v1816_v43, 1  ;;  %v8485_v59 = vmul.f32 %v8217_v48, %v14248_v47  ;;  %v8489_v49 = vmul.f32 %v8226_v61, %v14249_v60 }
 0x199   :  { %v8493_v1 = vmul.f32 %v8235_v55, %v14241_v35  ;;  %v8497_v14 = vmul.f32 %v8244_v8, %v14247_v24  ;;  %v8501_v54 = vmul.f32 %v8253_v53, %v14248_v47  ;;  %v8505_v48 = vmul.f32 %v14252_v32, %v14249_v60 }
 0x19a   :  { %v1865_v61 = vsel %vm171_vm0, %v8353_v51, 0.0  ;;  %v1818_v7 = vadd.f32 %v1817_v28, %v1816_v43  ;;  %v1866_v17 = vsel %vm171_vm0, %v1834_v3, 0.0  ;;  %v1868_v35 = vsel %vm171_vm0, %v1835_v11, 0.0 }
 0x19b   :  { %v1870_v55 = vsel %vm171_vm0, %v1836_v0, 0.0  ;;  %v1867_v24 = vadd.f32 %v1866_v17, %v1865_v61  ;;  %v1878_v8 = vsel %vm171_vm0, %v1837_v6, 0.0  ;;  %v1879_v47 = vsel %vm171_vm0, %v1838_v42, 0.0 }
 0x19c   :  { %v1881_v53 = vsel %vm171_vm0, %v1839_v40, 0.0  ;;  %v8516_v60 = vadd.f32 %v8344_v63, %v1818_v7  ;;  %v1880_v32 = vadd.f32 %v1879_v47, %v1878_v8  ;;  %v1883_v51 = vsel %vm171_vm0, %v1840_v33, 0.0 }
 0x19d   :  { %v1891_v43 = vsel %vm171_vm0, %v1841_v62, 0.0  ;;  %v1869_v3 = vadd.f32 %v1868_v35, %v1867_v24  ;;  %v1892_v11 = vsel %vm171_vm0, %v1842_v36, 0.0  ;;  %v1894_v0 = vsel %vm171_vm0, %v1843_v31, 0.0 }
 0x19e   :  { %14253 = vst [vmem:[#allocation51_spill] sm:$0xff] %v8516_v60  ;;  %v1896_v17 = vsel %vm171_vm0, %v1844_v46, 0.0  ;;  %v1882_v61 = vadd.f32 %v1881_v53, %v1880_v32  ;;  %v1893_v6 = vadd.f32 %v1892_v11, %v1891_v43  ;;  %v1904_v42 = vsel %vm171_vm0, %v1845_v56, 0.0  ;;  %v14272_v60 = vld [vmem:[#allocation83_spill] sm:$0xff] }
 0x19f   :  { %v1905_v40 = vsel %vm171_vm0, %v1846_v34, 0.0  ;;  %v1871_v7 = vadd.f32 %v1870_v55, %v1869_v3  ;;  %v1907_v8 = vsel %vm171_vm0, %v1847_v39, 0.0  ;;  %v1909_v47 = vsel %vm171_vm0, %v1848_v10, 0.0 }
 0x1a0   :  { %v1906_v63 = vadd.f32 %v1905_v40, %v1904_v42  ;;  %v1884_v33 = vadd.f32 %v1883_v51, %v1882_v61  ;;  %v1895_v35 = vadd.f32 %v1894_v0, %v1893_v6  ;;  %v1917_v24 = vsel %vm171_vm0, %v1849_v19, 0.0 }
 0x1a1   :  { %v1918_v62 = vsel %vm171_vm0, %v1850_v52, 0.0  ;;  %v1872_v36 = vrot.slane %v1871_v7, 4  ;;  %v1920_v53 = vsel %vm171_vm0, %v1851_v20, 0.0  ;;  %v1922_v55 = vsel %vm171_vm0, %v1852_v4, 0.0 }
 0x1a2   :  { %v1908_v31 = vadd.f32 %v1907_v8, %v1906_v63  ;;  %v1919_v32 = vadd.f32 %v1918_v62, %v1917_v24  ;;  %v1885_v46 = vrot.slane %v1884_v33, 4  ;;  %v1897_v56 = vadd.f32 %v1896_v17, %v1895_v35 }
 0x1a3   :  { %v1930_v34 = vsel %vm171_vm0, %v1853_v21, 0.0  ;;  %v1873_v39 = vadd.f32 %v1872_v36, %v1871_v7  ;;  %v1931_v51 = vsel %vm171_vm0, %v1854_v44, 0.0  ;;  %v1933_v52 = vsel %vm171_vm0, %v1855_v38, 0.0 }
 0x1a4   :  { %v1910_v28 = vadd.f32 %v1909_v47, %v1908_v31  ;;  %v1921_v10 = vadd.f32 %v1920_v53, %v1919_v32  ;;  %v1886_v43 = vadd.f32 %v1885_v46, %v1884_v33  ;;  %v1898_v19 = vrot.slane %v1897_v56, 4 }
 0x1a5   :  { %v1932_v3 = vadd.f32 %v1931_v51, %v1930_v34  ;;  %v1874_v11 = vrot.slane %v1873_v39, 2  ;;  %v1935_v20 = vsel %vm171_vm0, %v1856_v13, 0.0  ;;  %v1943_v21 = vsel %vm171_vm0, %v1857_v26, 0.0 }
 0x1a6   :  { %v1911_v0 = vrot.slane %v1910_v28, 4  ;;  %v1923_v61 = vadd.f32 %v1922_v55, %v1921_v10  ;;  %v1887_v17 = vrot.slane %v1886_v43, 2  ;;  %v1899_v6 = vadd.f32 %v1898_v19, %v1897_v56 }
 0x1a7   :  { %v1934_v4 = vadd.f32 %v1933_v52, %v1932_v3  ;;  %v1875_v42 = vadd.f32 %v1874_v11, %v1873_v39  ;;  %v1944_v44 = vsel %vm171_vm0, %v8481_v16, 0.0  ;;  %v1946_v13 = vsel %vm171_vm0, %v8485_v59, 0.0 }
 0x1a8   :  { %v1912_v40 = vadd.f32 %v1911_v0, %v1910_v28  ;;  %v1924_v7 = vrot.slane %v1923_v61, 4  ;;  %v1888_v63 = vadd.f32 %v1887_v17, %v1886_v43  ;;  %v1900_v8 = vrot.slane %v1899_v6, 2 }
 0x1a9   :  { %v1936_v47 = vadd.f32 %v1935_v20, %v1934_v4  ;;  %v1945_v38 = vadd.f32 %v1944_v44, %v1943_v21  ;;  %v1876_v33 = vrot.slane %v1875_v42, 1  ;;  %v1948_v16 = vsel %vm171_vm0, %v8489_v49, 0.0  ;;  %v14257_v44 = vld [vmem:[#allocation5_spill] sm:$0xff] }
 0x1aa   :  { %v1913_v35 = vrot.slane %v1912_v40, 2  ;;  %v1925_v24 = vadd.f32 %v1924_v7, %v1923_v61  ;;  %v1889_v62 = vrot.slane %v1888_v63, 1  ;;  %v1901_v36 = vadd.f32 %v1900_v8, %v1899_v6 }
 0x1ab   :  { %v1937_v31 = vrot.slane %v1936_v47, 4  ;;  %v1947_v26 = vadd.f32 %v1946_v13, %v1945_v38  ;;  %v1877_v32 = vadd.f32 %v1876_v33, %v1875_v42  ;;  %v1956_v51 = vsel %vm171_vm0, %v8493_v1, 0.0  ;;  %v14254_v1 = vld [vmem:[#allocation74_spill] sm:$0xff] }
 0x1ac   :  { %v1914_v53 = vadd.f32 %v1913_v35, %v1912_v40  ;;  %v1926_v46 = vrot.slane %v1925_v24, 2  ;;  %v1890_v56 = vadd.f32 %v1889_v62, %v1888_v63  ;;  %v1902_v55 = vrot.slane %v1901_v36, 1  ;;  %v14256_v40 = vld [vmem:[#allocation4_spill] sm:$0xff] }
 0x1ad   :  { %v1938_v34 = vadd.f32 %v1937_v31, %v1936_v47  ;;  %v1949_v39 = vadd.f32 %v1948_v16, %v1947_v26  ;;  %v1957_v59 = vsel %vm171_vm0, %v8497_v14, 0.0  ;;  %v1959_v49 = vsel %vm171_vm0, %v8501_v54, 0.0  ;;  %v14255_v14 = vld [vmem:[#allocation84_spill] sm:$0xff]  ;;  %v14263_v31 = vld [vmem:[#allocation6_spill] sm:$0xff] }
 0x1ae   :  { %v1915_v28 = vrot.slane %v1914_v53, 1  ;;  %v1927_v10 = vadd.f32 %v1926_v46, %v1925_v24  ;;  %v1903_v43 = vadd.f32 %v1902_v55, %v1901_v36  ;;  %v1958_v52 = vadd.f32 %v1957_v59, %v1956_v51 }
 0x1af   :  { %v1939_v19 = vrot.slane %v1938_v34, 2  ;;  %v1950_v3 = vrot.slane %v1949_v39, 4  ;;  %v1961_v61 = vsel %vm171_vm0, %v8505_v48, 0.0  ;;  %v1973_v4 = vrot.slane %v14254_v1, %v14240_v57 }
 0x1b0   :  { %v1916_v11 = vadd.f32 %v1915_v28, %v1914_v53  ;;  %v1928_v0 = vrot.slane %v1927_v10, 1  ;;  %v1960_v6 = vadd.f32 %v1959_v49, %v1958_v52  ;;  %v1983_v42 = vmul.f32 %v8349_v5, %v14255_v14 }
 0x1b1   :  { %v1940_v20 = vadd.f32 %v1939_v19, %v1938_v34  ;;  %v1951_v17 = vadd.f32 %v1950_v3, %v1949_v39  ;;  %v1984_v7 = vmul.f32 %v8373_v15, %v14256_v40  ;;  %v1985_v63 = vmul.f32 %v8380_v58, %v14257_v44 }
 0x1b2   :  { %v1929_v21 = vadd.f32 %v1928_v0, %v1927_v10  ;;  %v1962_v47 = vadd.f32 %v1961_v61, %v1960_v6  ;;  %v8558_v48 = vadd.f32 %v1973_v4, %v1877_v32  ;;  %v8560_v38 = vadd.f32 %v1973_v4, %v1890_v56  ;;  %v14265_v0 = vld [vmem:[#allocation75_spill] sm:$0xff]  ;;  %v14266_v61 = vld [vmem:[#allocation76_spill] sm:$0xff] }
 0x1b3   :  { %v1941_v54 = vrot.slane %v1940_v20, 1  ;;  %v1952_v8 = vrot.slane %v1951_v17, 2  ;;  %v8562_v33 = vadd.f32 %v1973_v4, %v1903_v43  ;;  %v8564_v35 = vadd.f32 %v1973_v4, %v1916_v11 }
 0x1b4   :  { %14258 = vst [vmem:[#allocation53_spill] sm:$0xff] %v8558_v48  ;;  %14259 = vst [vmem:[#allocation55_spill] sm:$0xff] %v8560_v38  ;;  %v8566_v24 = vadd.f32 %v1973_v4, %v1929_v21  ;;  %v1963_v36 = vrot.slane %v1962_v47, 4  ;;  %v1986_v26 = vmul.f32 %v8387_v41, %v14263_v31  ;;  %v1987_v53 = vmul.f32 %v8394_v18, %v14255_v14  ;;  %v14276_v38 = vld [vmem:[#allocation88_spill] sm:$0xff] }
 0x1b5   :  { %14260 = vst [vmem:[#allocation57_spill] sm:$0xff] %v8562_v33  ;;  %14261 = vst [vmem:[#allocation58_spill] sm:$0xff] %v8564_v35  ;;  %v1942_v13 = vadd.f32 %v1941_v54, %v1940_v20  ;;  %v1953_v62 = vadd.f32 %v1952_v8, %v1951_v17  ;;  %v1988_v32 = vmul.f32 %v8401_v2, %v14256_v40  ;;  %v14267_v17 = vld [vmem:[#allocation77_spill] sm:$0xff]  ;;  %v14275_v35 = vld [vmem:[#allocation87_spill] sm:$0xff] }
 0x1b6   :  { %14262 = vst [vmem:[#allocation59_spill] sm:$0xff] %v8566_v24  ;;  %v1989_v46 = vmul.f32 %v8408_v12, %v14257_v44  ;;  %v1990_v16 = vmul.f32 %v8415_v27, %v14263_v31  ;;  %v1964_v55 = vadd.f32 %v1963_v36, %v1962_v47  ;;  %v1991_v39 = vmul.f32 %v8422_v30, %v14255_v14  ;;  %v14269_v47 = vld [vmem:[#allocation79_spill] sm:$0xff]  ;;  %v14273_v24 = vld [vmem:[#allocation85_spill] sm:$0xff] }
 0x1b7   :  { %v1954_v56 = vrot.slane %v1953_v62, 1  ;;  %v8578_v34 = vadd.f32 %v1973_v4, %v1942_v13  ;;  %v1992_v28 = vmul.f32 %v8432_v50, %v14256_v40  ;;  %v1993_v10 = vmul.f32 %v8439_v29, %v14257_v44 }
 0x1b8   :  { %v1994_v51 = vmul.f32 %v8446_v45, %v14263_v31  ;;  %v1995_v59 = vmul.f32 %v8086_v22, %v14255_v14  ;;  %v1965_v19 = vrot.slane %v1964_v55, 2  ;;  %v1996_v3 = vmul.f32 %v8095_v9, %v14256_v40 }
 0x1b9   :  { %14264 = vst [vmem:[#allocation56_spill] sm:$0xff] %v8578_v34  ;;  %v1955_v43 = vadd.f32 %v1954_v56, %v1953_v62  ;;  %v1997_v52 = vmul.f32 %v8104_v25, %v14257_v44  ;;  %v1998_v11 = vmul.f32 %v8118_v37, %v14263_v31  ;;  %v1999_v49 = vmul.f32 %v14265_v0, %v14255_v14  ;;  %v14270_v62 = vld [vmem:[#allocation80_spill] sm:$0xff]  ;;  %v14271_v56 = vld [vmem:[#allocation81_spill] sm:$0xff] }
 0x1ba   :  { %v2000_v20 = vmul.f32 %v14266_v61, %v14256_v40  ;;  %v2001_v6 = vmul.f32 %v14267_v17, %v14257_v44  ;;  %v1966_v21 = vadd.f32 %v1965_v19, %v1964_v55  ;;  %v2002_v8 = vmul.f32 %v8154_v23, %v14263_v31  ;;  %v14274_v19 = vld [vmem:[#allocation86_spill] sm:$0xff] }
 0x1bb   :  { %v8602_v54 = vadd.f32 %v1973_v4, %v1955_v43  ;;  %v2003_v13 = vmul.f32 %v14269_v47, %v14255_v14  ;;  %v2004_v36 = vmul.f32 %v14270_v62, %v14256_v40  ;;  %v2005_v1 = vmul.f32 %v14271_v56, %v14257_v44  ;;  %v14277_v62 = vld [vmem:[#allocation42_spill] sm:$0xff] }
 0x1bc   :  { %v2006_v34 = vmul.f32 %v14272_v60, %v14263_v31  ;;  %v2007_v55 = vmul.f32 %v14273_v24, %v14255_v14  ;;  %v1967_v43 = vrot.slane %v1966_v21, 1  ;;  %v2009_v33 = vmul.f32 %v14275_v35, %v14257_v44  ;;  %v14278_v60 = vld [vmem:[#allocation44_spill] sm:$0xff]  ;;  %v14279_v24 = vld [vmem:[#allocation46_spill] sm:$0xff] }
 0x1bd   :  { %14268 = vst [vmem:[#allocation60_spill] sm:$0xff] %v8602_v54  ;;  %v2008_v54 = vmul.f32 %v14274_v19, %v14256_v40  ;;  %v8622_v48 = vmul.f32 %v14276_v38, %v14263_v31  ;;  %v8626_v56 = vmul.f32 %v14277_v62, %v14255_v14  ;;  %v8630_v47 = vmul.f32 %v14278_v60, %v14256_v40  ;;  %v14280_v19 = vld [vmem:[#allocation48_spill] sm:$0xff] }
 0x1be   :  { %v8634_v23 = vmul.f32 %v14279_v24, %v14257_v44  ;;  %v8638_v17 = vmul.f32 %v14280_v19, %v14263_v31  ;;  %v1968_v35 = vadd.f32 %v1967_v43, %v1966_v21  ;;  %v2015_v38 = vsel %vm171_vm0, %v1983_v42, 0.0 }
 0x1bf   :  { %v2016_v61 = vsel %vm171_vm0, %v1984_v7, 0.0  ;;  %v2018_v14 = vsel %vm171_vm0, %v1985_v63, 0.0  ;;  %v2020_v0 = vsel %vm171_vm0, %v1986_v26, 0.0  ;;  %v2028_v40 = vsel %vm171_vm0, %v1987_v53, 0.0 }
 0x1c0   :  { %v2017_v62 = vadd.f32 %v2016_v61, %v2015_v38  ;;  %v2029_v60 = vsel %vm171_vm0, %v1988_v32, 0.0  ;;  %v8646_v44 = vadd.f32 %v1973_v4, %v1968_v35  ;;  %v2031_v31 = vsel %vm171_vm0, %v1989_v46, 0.0 }
 0x1c1   :  { %v2030_v24 = vadd.f32 %v2029_v60, %v2028_v40  ;;  %v2033_v21 = vsel %vm171_vm0, %v1990_v16, 0.0  ;;  %v2041_v42 = vsel %vm171_vm0, %v1991_v39, 0.0  ;;  %v2042_v7 = vsel %vm171_vm0, %v1992_v28, 0.0 }
 0x1c2   :  { %v2019_v43 = vadd.f32 %v2018_v14, %v2017_v62  ;;  %v2044_v63 = vsel %vm171_vm0, %v1993_v10, 0.0  ;;  %v2043_v26 = vadd.f32 %v2042_v7, %v2041_v42  ;;  %v2046_v53 = vsel %vm171_vm0, %v1994_v51, 0.0 }
 0x1c3   :  { %v2032_v38 = vadd.f32 %v2031_v31, %v2030_v24  ;;  %v2054_v32 = vsel %vm171_vm0, %v1995_v59, 0.0  ;;  %v2055_v60 = vsel %vm171_vm0, %v1996_v3, 0.0  ;;  %v2057_v40 = vsel %vm171_vm0, %v1997_v52, 0.0 }
 0x1c4   :  { %v2021_v4 = vadd.f32 %v2020_v0, %v2019_v43  ;;  %v2059_v35 = vsel %vm171_vm0, %v1998_v11, 0.0  ;;  %v2045_v46 = vadd.f32 %v2044_v63, %v2043_v26  ;;  %v2056_v16 = vadd.f32 %v2055_v60, %v2054_v32 }
 0x1c5   :  { %v2034_v14 = vadd.f32 %v2033_v21, %v2032_v38  ;;  %v2067_v39 = vsel %vm171_vm0, %v1999_v49, 0.0  ;;  %v2068_v24 = vsel %vm171_vm0, %v2000_v20, 0.0  ;;  %v2070_v31 = vsel %vm171_vm0, %v2001_v6, 0.0 }
 0x1c6   :  { %v2022_v28 = vrot.slane %v2021_v4, 4  ;;  %v2072_v10 = vsel %vm171_vm0, %v2002_v8, 0.0  ;;  %v2047_v59 = vadd.f32 %v2046_v53, %v2045_v46  ;;  %v2058_v0 = vadd.f32 %v2057_v40, %v2056_v16 }
 0x1c7   :  { %v2035_v51 = vrot.slane %v2034_v14, 4  ;;  %v2069_v3 = vadd.f32 %v2068_v24, %v2067_v39  ;;  %v2080_v52 = vsel %vm171_vm0, %v2003_v13, 0.0  ;;  %v2081_v11 = vsel %vm171_vm0, %v2004_v36, 0.0 }
 0x1c8   :  { %v2023_v61 = vadd.f32 %v2022_v28, %v2021_v4  ;;  %v2083_v62 = vsel %vm171_vm0, %v2005_v1, 0.0  ;;  %v2048_v49 = vrot.slane %v2047_v59, 4  ;;  %v2060_v43 = vadd.f32 %v2059_v35, %v2058_v0 }
 0x1c9   :  { %v2036_v21 = vadd.f32 %v2035_v51, %v2034_v14  ;;  %v2071_v42 = vadd.f32 %v2070_v31, %v2069_v3  ;;  %v2082_v7 = vadd.f32 %v2081_v11, %v2080_v52  ;;  %v2085_v6 = vsel %vm171_vm0, %v2006_v34, 0.0 }
 0x1ca   :  { %v2024_v20 = vrot.slane %v2023_v61, 2  ;;  %v2093_v8 = vsel %vm171_vm0, %v2007_v55, 0.0  ;;  %v2049_v38 = vadd.f32 %v2048_v49, %v2047_v59  ;;  %v2061_v26 = vrot.slane %v2060_v43, 4 }
 0x1cb   :  { %v2037_v63 = vrot.slane %v2036_v21, 2  ;;  %v2073_v53 = vadd.f32 %v2072_v10, %v2071_v42  ;;  %v2084_v13 = vadd.f32 %v2083_v62, %v2082_v7  ;;  %v2094_v36 = vsel %vm171_vm0, %v2008_v54, 0.0  ;;  %v14281_v7 = vld [vmem:[#allocation40_spill] sm:$0xff] }
 0x1cc   :  { %v2025_v32 = vadd.f32 %v2024_v20, %v2023_v61  ;;  %v2096_v1 = vsel %vm171_vm0, %v2009_v33, 0.0  ;;  %v2050_v60 = vrot.slane %v2049_v38, 2  ;;  %v2062_v40 = vadd.f32 %v2061_v26, %v2060_v43 }
 0x1cd   :  { %v2038_v4 = vadd.f32 %v2037_v63, %v2036_v21  ;;  %v2074_v35 = vrot.slane %v2073_v53, 4  ;;  %v2086_v46 = vadd.f32 %v2085_v6, %v2084_v13  ;;  %v2095_v16 = vadd.f32 %v2094_v36, %v2093_v8 }
 0x1ce   :  { %v2026_v14 = vrot.slane %v2025_v32, 1  ;;  %v2098_v34 = vsel %vm171_vm0, %v8622_v48, 0.0  ;;  %v2051_v39 = vadd.f32 %v2050_v60, %v2049_v38  ;;  %v2063_v28 = vrot.slane %v2062_v40, 2 }
 0x1cf   :  { %v2039_v55 = vrot.slane %v2038_v4, 1  ;;  %v2075_v24 = vadd.f32 %v2074_v35, %v2073_v53  ;;  %v2087_v10 = vrot.slane %v2086_v46, 4  ;;  %v2097_v51 = vadd.f32 %v2096_v1, %v2095_v16  ;;  %v14283_v35 = vld [vmem:[#allocation9_spill] sm:$0xff] }
 0x1d0   :  { %v2027_v31 = vadd.f32 %v2026_v14, %v2025_v32  ;;  %v2106_v33 = vsel %vm171_vm0, %v8626_v56, 0.0  ;;  %v2052_v59 = vrot.slane %v2051_v39, 1  ;;  %v2064_v0 = vadd.f32 %v2063_v28, %v2062_v40  ;;  %v14284_v14 = vld [vmem:[#allocation64_spill] sm:$0xff] }
 0x1d1   :  { %v2040_v54 = vadd.f32 %v2039_v55, %v2038_v4  ;;  %v2076_v3 = vrot.slane %v2075_v24, 2  ;;  %v2088_v61 = vadd.f32 %v2087_v10, %v2086_v46  ;;  %v2099_v52 = vadd.f32 %v2098_v34, %v2097_v51  ;;  %v14285_v55 = vld [vmem:[#allocation65_spill] sm:$0xff] }
 0x1d2   :  { %v2107_v11 = vsel %vm171_vm0, %v8630_v47, 0.0  ;;  %v2109_v48 = vsel %vm171_vm0, %v8634_v23, 0.0  ;;  %v2053_v62 = vadd.f32 %v2052_v59, %v2051_v39  ;;  %v2065_v21 = vrot.slane %v2064_v0, 1  ;;  %v14282_v47 = vld [vmem:[#allocation7_spill] sm:$0xff] }
 0x1d3   :  { %v2077_v49 = vadd.f32 %v2076_v3, %v2075_v24  ;;  %v2108_v43 = vadd.f32 %v2107_v11, %v2106_v33  ;;  %v2089_v42 = vrot.slane %v2088_v61, 2  ;;  %v2100_v20 = vrot.slane %v2099_v52, 4 }
 0x1d4   :  { %v2111_v56 = vsel %vm171_vm0, %v8638_v17, 0.0  ;;  %v8681_v6 = vrot.slane %v14281_v7, %v14240_v57  ;;  %v2066_v8 = vadd.f32 %v2065_v21, %v2064_v0  ;;  %v2133_v26 = vmul.f32 %v8349_v5, %v14282_v47  ;;  %v14290_v21 = vld [vmem:[#allocation79_spill] sm:$0xff] }
 0x1d5   :  { %v2078_v63 = vrot.slane %v2077_v49, 1  ;;  %v2110_v38 = vadd.f32 %v2109_v48, %v2108_v43  ;;  %v2090_v23 = vadd.f32 %v2089_v42, %v2088_v61  ;;  %v2101_v53 = vadd.f32 %v2100_v20, %v2099_v52  ;;  %v14286_v61 = vld [vmem:[#allocation75_spill] sm:$0xff]  ;;  %v14287_v52 = vld [vmem:[#allocation76_spill] sm:$0xff]  ;;  %v14288_v48 = vld [vmem:[#allocation77_spill] sm:$0xff] }
 0x1d6   :  { %v8686_v32 = vadd.f32 %v8681_v6, %v2027_v31  ;;  %v8689_v13 = vadd.f32 %v8681_v6, %v2040_v54  ;;  %v8692_v1 = vadd.f32 %v8681_v6, %v2053_v62  ;;  %v8695_v4 = vadd.f32 %v8681_v6, %v2066_v8  ;;  %v14289_v62 = vld [vmem:[#allocation78_spill] sm:$0xff]  ;;  %v14292_v42 = vld [vmem:[#allocation81_spill] sm:$0xff] }
 0x1d7   :  { %v2079_v36 = vadd.f32 %v2078_v63, %v2077_v49  ;;  %v2112_v17 = vadd.f32 %v2111_v56, %v2110_v38  ;;  %v2091_v60 = vrot.slane %v2090_v23, 1  ;;  %v2102_v40 = vrot.slane %v2101_v53, 2  ;;  %v14293_v56 = vld [vmem:[#allocation83_spill] sm:$0xff]  ;;  %v14294_v38 = vld [vmem:[#allocation85_spill] sm:$0xff] }
 0x1d8   :  { %v2134_v5 = vmul.f32 %v8373_v15, %v14283_v35  ;;  %v2135_v46 = vmul.f32 %v8380_v58, %v14284_v14  ;;  %v2136_v39 = vmul.f32 %v8387_v41, %v14285_v55  ;;  %v2137_v28 = vmul.f32 %v8394_v18, %v14282_v47 }
 0x1d9   :  { %v2113_v16 = vrot.slane %v2112_v17, 4  ;;  %v8702_v34 = vadd.f32 %v8681_v6, %v2079_v36  ;;  %v2092_v24 = vadd.f32 %v2091_v60, %v2090_v23  ;;  %v2103_v31 = vadd.f32 %v2102_v40, %v2101_v53  ;;  %v14295_v53 = vld [vmem:[#allocation86_spill] sm:$0xff]  ;;  %v14297_v40 = vld [vmem:[#allocation88_spill] sm:$0xff] }
 0x1da   :  { %v2138_v10 = vmul.f32 %v8401_v2, %v14283_v35  ;;  %v2139_v15 = vmul.f32 %v8408_v12, %v14284_v14  ;;  %v2140_v58 = vmul.f32 %v8415_v27, %v14285_v55  ;;  %v2141_v33 = vmul.f32 %v8422_v30, %v14282_v47 }
 0x1db   :  { %v2114_v51 = vadd.f32 %v2113_v16, %v2112_v17  ;;  %v2142_v41 = vmul.f32 %v8432_v50, %v14283_v35  ;;  %v2104_v54 = vrot.slane %v2103_v31, 1  ;;  %v8719_v18 = vadd.f32 %v8681_v6, %v2092_v24  ;;  %v14296_v17 = vld [vmem:[#allocation87_spill] sm:$0xff]  ;;  %v14298_v24 = vld [vmem:[#allocation42_spill] sm:$0xff] }
 0x1dc   :  { %v2143_v2 = vmul.f32 %v8439_v29, %v14284_v14  ;;  %v2144_v12 = vmul.f32 %v8446_v45, %v14285_v55  ;;  %v2145_v27 = vmul.f32 %v8086_v22, %v14282_v47  ;;  %v2146_v30 = vmul.f32 %v8095_v9, %v14283_v35 }
 0x1dd   :  { %v2115_v59 = vrot.slane %v2114_v51, 2  ;;  %v2147_v50 = vmul.f32 %v8104_v25, %v14284_v14  ;;  %v2105_v0 = vadd.f32 %v2104_v54, %v2103_v31  ;;  %v2148_v3 = vmul.f32 %v8118_v37, %v14285_v55  ;;  %v14291_v37 = vld [vmem:[#allocation80_spill] sm:$0xff] }
 0x1de   :  { %v2149_v29 = vmul.f32 %v14286_v61, %v14282_v47  ;;  %v2150_v45 = vmul.f32 %v14287_v52, %v14283_v35  ;;  %v2151_v22 = vmul.f32 %v14288_v48, %v14284_v14  ;;  %v2152_v9 = vmul.f32 %v14289_v62, %v14285_v55 }
 0x1df   :  { %v2116_v11 = vadd.f32 %v2115_v59, %v2114_v51  ;;  %v2153_v25 = vmul.f32 %v14290_v21, %v14282_v47  ;;  %v8744_v49 = vadd.f32 %v8681_v6, %v2105_v0  ;;  %v2154_v43 = vmul.f32 %v14291_v37, %v14283_v35  ;;  %v14299_v51 = vld [vmem:[#allocation44_spill] sm:$0xff]  ;;  %v14300_v59 = vld [vmem:[#allocation46_spill] sm:$0xff] }
 0x1e0   :  { %v2155_v20 = vmul.f32 %v14292_v42, %v14284_v14  ;;  %v2156_v8 = vmul.f32 %v14293_v56, %v14285_v55  ;;  %v2157_v23 = vmul.f32 %v14294_v38, %v14282_v47  ;;  %v2158_v36 = vmul.f32 %v14295_v53, %v14283_v35 }
 0x1e1   :  { %v2117_v63 = vrot.slane %v2116_v11, 1  ;;  %v8758_v60 = vmul.f32 %v14296_v17, %v14284_v14  ;;  %v8762_v16 = vmul.f32 %v14297_v40, %v14285_v55  ;;  %v8766_v31 = vmul.f32 %v14298_v24, %v14282_v47  ;;  %v9280_v47 = vld [vmem:[%s13300_s0 + $0x60] sm:$0xff] }
 0x1e2   :  { %v8770_v54 = vmul.f32 %v14299_v51, %v14283_v35  ;;  %v8774_v0 = vmul.f32 %v14300_v59, %v14284_v14  ;;  %v8778_v52 = vmul.f32 %v14280_v19, %v14285_v55  ;;  %v2165_v48 = vsel %vm171_vm0, %v2133_v26, 0.0  ;;  %v9264_v55 = vld [vmem:[%s13300_s0 + $0x50] sm:$0xff]  ;;  %v9272_v14 = vld [vmem:[%s13300_s0 + $0x58] sm:$0xff] }
 0x1e3   :  { %v2118_v61 = vadd.f32 %v2117_v63, %v2116_v11  ;;  %v2166_v62 = vsel %vm171_vm0, %v2134_v5, 0.0  ;;  %v2168_v37 = vsel %vm171_vm0, %v2135_v46, 0.0  ;;  %v2170_v42 = vsel %vm171_vm0, %v2136_v39, 0.0 }
 0x1e4   :  { %v2167_v21 = vadd.f32 %v2166_v62, %v2165_v48  ;;  %v2178_v56 = vsel %vm171_vm0, %v2137_v28, 0.0  ;;  %v2179_v11 = vsel %vm171_vm0, %v2138_v10, 0.0  ;;  %v2181_v63 = vsel %vm171_vm0, %v2139_v15, 0.0 }
 0x1e5   :  { %v8786_v38 = vadd.f32 %v8681_v6, %v2118_v61  ;;  %v2183_v19 = vsel %vm171_vm0, %v2140_v58, 0.0  ;;  %v2180_v26 = vadd.f32 %v2179_v11, %v2178_v56  ;;  %v2191_v5 = vsel %vm171_vm0, %v2141_v33, 0.0 }
 0x1e6   :  { %v2169_v53 = vadd.f32 %v2168_v37, %v2167_v21  ;;  %v2192_v17 = vsel %vm171_vm0, %v2142_v41, 0.0  ;;  %v2194_v39 = vsel %vm171_vm0, %v2143_v2, 0.0  ;;  %v2196_v28 = vsel %vm171_vm0, %v2144_v12, 0.0 }
 0x1e7   :  { %v2193_v46 = vadd.f32 %v2192_v17, %v2191_v5  ;;  %v2204_v6 = vsel %vm171_vm0, %v2145_v27, 0.0  ;;  %v2182_v24 = vadd.f32 %v2181_v63, %v2180_v26  ;;  %v2205_v10 = vsel %vm171_vm0, %v2146_v30, 0.0 }
 0x1e8   :  { %v2171_v40 = vadd.f32 %v2170_v42, %v2169_v53  ;;  %v2207_v15 = vsel %vm171_vm0, %v2147_v50, 0.0  ;;  %v2206_v51 = vadd.f32 %v2205_v10, %v2204_v6  ;;  %v2209_v59 = vsel %vm171_vm0, %v2148_v3, 0.0 }
 0x1e9   :  { %v2195_v58 = vadd.f32 %v2194_v39, %v2193_v46  ;;  %v2217_v33 = vsel %vm171_vm0, %v2149_v29, 0.0  ;;  %v2184_v61 = vadd.f32 %v2183_v19, %v2182_v24  ;;  %v2218_v2 = vsel %vm171_vm0, %v2150_v45, 0.0 }
 0x1ea   :  { %v2172_v41 = vrot.slane %v2171_v40, 4  ;;  %v2220_v12 = vsel %vm171_vm0, %v2151_v22, 0.0  ;;  %v2208_v27 = vadd.f32 %v2207_v15, %v2206_v51  ;;  %v2219_v62 = vadd.f32 %v2218_v2, %v2217_v33 }
 0x1eb   :  { %v2197_v48 = vadd.f32 %v2196_v28, %v2195_v58  ;;  %v2222_v21 = vsel %vm171_vm0, %v2152_v9, 0.0  ;;  %v2185_v37 = vrot.slane %v2184_v61, 4  ;;  %v2230_v50 = vsel %vm171_vm0, %v2153_v25, 0.0 }
 0x1ec   :  { %v2173_v30 = vadd.f32 %v2172_v41, %v2171_v40  ;;  %v2231_v42 = vsel %vm171_vm0, %v2154_v43, 0.0  ;;  %v2210_v56 = vadd.f32 %v2209_v59, %v2208_v27  ;;  %v2221_v29 = vadd.f32 %v2220_v12, %v2219_v62 }
 0x1ed   :  { %v2198_v3 = vrot.slane %v2197_v48, 4  ;;  %v2232_v11 = vadd.f32 %v2231_v42, %v2230_v50  ;;  %v2186_v19 = vadd.f32 %v2185_v37, %v2184_v61  ;;  %v2233_v45 = vsel %vm171_vm0, %v2155_v20, 0.0 }
 0x1ee   :  { %v2174_v63 = vrot.slane %v2173_v30, 2  ;;  %v2235_v22 = vsel %vm171_vm0, %v2156_v8, 0.0  ;;  %v2211_v26 = vrot.slane %v2210_v56, 4  ;;  %v2223_v5 = vadd.f32 %v2222_v21, %v2221_v29 }
 0x1ef   :  { %v2199_v53 = vadd.f32 %v2198_v3, %v2197_v48  ;;  %v2234_v9 = vadd.f32 %v2233_v45, %v2232_v11  ;;  %v2187_v46 = vrot.slane %v2186_v19, 2  ;;  %v2243_v25 = vsel %vm171_vm0, %v2157_v23, 0.0 }
 0x1f0   :  { %v2175_v17 = vadd.f32 %v2174_v63, %v2173_v30  ;;  %v2244_v43 = vsel %vm171_vm0, %v2158_v36, 0.0  ;;  %v2212_v28 = vadd.f32 %v2211_v26, %v2210_v56  ;;  %v2224_v6 = vrot.slane %v2223_v5, 4  ;;  %v14303_v26 = vld [vmem:[#allocation52_spill] sm:$0xff] }
 0x1f1   :  { %v2200_v39 = vrot.slane %v2199_v53, 2  ;;  %v2236_v40 = vadd.f32 %v2235_v22, %v2234_v9  ;;  %v2188_v10 = vadd.f32 %v2187_v46, %v2186_v19  ;;  %v2245_v15 = vadd.f32 %v2244_v43, %v2243_v25  ;;  %v14304_v9 = vld [vmem:[#allocation55_spill] sm:$0xff] }
 0x1f2   :  { %v2176_v24 = vrot.slane %v2175_v17, 1  ;;  %v2246_v20 = vsel %vm171_vm0, %v8758_v60, 0.0  ;;  %v2213_v58 = vrot.slane %v2212_v28, 2  ;;  %v2225_v51 = vadd.f32 %v2224_v6, %v2223_v5 }
 0x1f3   :  { %v2201_v8 = vadd.f32 %v2200_v39, %v2199_v53  ;;  %v2237_v59 = vrot.slane %v2236_v40, 4  ;;  %v2189_v41 = vrot.slane %v2188_v10, 1  ;;  %v2247_v61 = vadd.f32 %v2246_v20, %v2245_v15  ;;  %v14302_v53 = vld [vmem:[#allocation53_spill] sm:$0xff]  ;;  %v14307_v20 = vld [vmem:[#allocation43_spill] sm:$0xff] }
 0x1f4   :  { %v2177_v33 = vadd.f32 %v2176_v24, %v2175_v17  ;;  %v2248_v23 = vsel %vm171_vm0, %v8762_v16, 0.0  ;;  %v2214_v2 = vadd.f32 %v2213_v58, %v2212_v28  ;;  %v2226_v12 = vrot.slane %v2225_v51, 2  ;;  %v14305_v17 = vld [vmem:[#allocation54_spill] sm:$0xff]  ;;  %v14306_v15 = vld [vmem:[#allocation57_spill] sm:$0xff] }
 0x1f5   :  { %v2202_v36 = vrot.slane %v2201_v8, 1  ;;  %v2238_v48 = vadd.f32 %v2237_v59, %v2236_v40  ;;  %v2190_v27 = vadd.f32 %v2189_v41, %v2188_v10  ;;  %v2249_v62 = vadd.f32 %v2248_v23, %v2247_v61  ;;  %v14308_v58 = vld [vmem:[#allocation58_spill] sm:$0xff]  ;;  %v14310_v61 = vld [vmem:[#allocation59_spill] sm:$0xff]  ;;  %v14311_v23 = vld [vmem:[#allocation45_spill] sm:$0xff] }
 0x1f6   :  { %v2256_v21 = vsel %vm171_vm0, %v8766_v31, 0.0  ;;  %v2257_v60 = vsel %vm171_vm0, %v8770_v54, 0.0  ;;  %v2215_v37 = vrot.slane %v2214_v2, 1  ;;  %v2227_v50 = vadd.f32 %v2226_v12, %v2225_v51  ;;  %v14301_v31 = vld [vmem:[#allocation50_spill] sm:$0xff]  ;;  %v14309_v51 = vld [vmem:[#allocation41_spill] sm:$0xff]  ;;  %v14313_v12 = vld [vmem:[#allocation47_spill] sm:$0xff] }
 0x1f7   :  { %v2203_v30 = vadd.f32 %v2202_v36, %v2201_v8  ;;  %v2239_v42 = vrot.slane %v2238_v48, 2  ;;  %v2250_v3 = vrot.slane %v2249_v62, 4  ;;  %v2258_v56 = vadd.f32 %v2257_v60, %v2256_v21  ;;  %v14315_v21 = vld [vmem:[#allocation49_spill] sm:$0xff] }
 0x1f8   :  { %v2259_v16 = vsel %vm171_vm0, %v8774_v0, 0.0  ;;  %v2261_v29 = vsel %vm171_vm0, %v8778_v52, 0.0  ;;  %v2216_v11 = vadd.f32 %v2215_v37, %v2214_v2  ;;  %v2228_v63 = vrot.slane %v2227_v50, 1  ;;  %v14312_v2 = vld [vmem:[#allocation56_spill] sm:$0xff]  ;;  %14383 = vst [vmem:[#allocation49_spill] sm:$0xff] %v9272_v14 }
 0x1f9   :  { %v2240_v19 = vadd.f32 %v2239_v42, %v2238_v48  ;;  %v8823_v45 = vrot.slane %v14301_v31, %v14240_v57  ;;  %v2251_v54 = vadd.f32 %v2250_v3, %v2249_v62  ;;  %v2260_v22 = vadd.f32 %v2259_v16, %v2258_v56  ;;  %v14314_v62 = vld [vmem:[#allocation60_spill] sm:$0xff]  ;;  %v9258_v31 = vld [vmem:[%s13300_s0 + $0x48] sm:$0xff] }
 0x1fa   :  { %v2283_v5 = vmax.f32 %v14303_v26, %v14302_v53  ;;  %v2284_v46 = vmax.f32 %v14305_v17, %v14304_v9  ;;  %v2229_v25 = vadd.f32 %v2228_v63, %v2227_v50  ;;  %v2285_v8 = vmax.f32 %v14307_v20, %v14306_v15  ;;  %14381 = vst [vmem:[#allocation47_spill] sm:$0xff] %v9258_v31 }
 0x1fb   :  { %v2241_v0 = vrot.slane %v2240_v19, 1  ;;  %v8830_v43 = vadd.f32 %v8823_v45, %v2177_v33  ;;  %v8833_v52 = vadd.f32 %v8823_v45, %v2190_v27  ;;  %v2252_v39 = vrot.slane %v2251_v54, 2  ;;  %14382 = vst [vmem:[#allocation60_spill] sm:$0xff] %v9264_v55 }
 0x1fc   :  { %v2262_v28 = vadd.f32 %v2261_v29, %v2260_v22  ;;  %v8836_v6 = vadd.f32 %v8823_v45, %v2203_v30  ;;  %v8839_v40 = vadd.f32 %v8823_v45, %v2216_v11  ;;  %v8842_v10 = vadd.f32 %v8823_v45, %v2229_v25  ;;  %v14316_v30 = vld [vmem:[#allocation51_spill] sm:$0xff] }
 0x1fd   :  { %v2242_v24 = vadd.f32 %v2241_v0, %v2240_v19  ;;  %v2286_v59 = vmax.f32 %v14309_v51, %v14308_v58  ;;  %v2253_v33 = vadd.f32 %v2252_v39, %v2251_v54  ;;  %v2287_v36 = vmax.f32 %v14311_v23, %v14310_v61  ;;  %14384 = vst [vmem:[#allocation51_spill] sm:$0xff] %v9280_v47 }
 0x1fe   :  { %v2263_v41 = vrot.slane %v2262_v28, 4  ;;  %v2288_v48 = vmax.f32 %v14313_v12, %v14312_v2  ;;  %v2289_v60 = vmax.f32 %v14315_v21, %v14314_v62  ;;  %v2290_v37 = vmax.f32 %v14316_v30, %v8646_v44 }
 0x1ff   :  { %v8853_v27 = vadd.f32 %v8823_v45, %v2242_v24  ;;  %v2291_v50 = vmax.f32 %v2283_v5, %v8686_v32  ;;  %v2254_v42 = vrot.slane %v2253_v33, 1  ;;  %v2292_v56 = vmax.f32 %v2284_v46, %v8689_v13 }
 0x200   :  { %v2264_v3 = vadd.f32 %v2263_v41, %v2262_v28  ;;  %v2293_v16 = vmax.f32 %v2285_v8, %v8692_v1  ;;  %v2294_v29 = vmax.f32 %v2286_v59, %v8695_v4  ;;  %v2295_v11 = vmax.f32 %v2287_v36, %v8702_v34 }
 0x201   :  { %v2296_v63 = vmax.f32 %v2288_v48, %v8719_v18  ;;  %v2297_v19 = vmax.f32 %v2289_v60, %v8744_v49  ;;  %v2255_v54 = vadd.f32 %v2254_v42, %v2253_v33  ;;  %v2298_v25 = vmax.f32 %v2290_v37, %v8786_v38 }
 0x202   :  { %v2265_v22 = vrot.slane %v2264_v3, 2  ;;  %v8868_v5 = vmax.f32 %v2291_v50, %v8830_v43  ;;  %v8871_v0 = vmax.f32 %v2292_v56, %v8833_v52  ;;  %v8874_v46 = vmax.f32 %v2293_v16, %v8836_v6 }
 0x203   :  { %v8877_v39 = vmax.f32 %v2294_v29, %v8839_v40  ;;  %v8880_v28 = vmax.f32 %v2295_v11, %v8842_v10  ;;  %v8883_v8 = vadd.f32 %v8823_v45, %v2255_v54  ;;  %v8886_v59 = vmax.f32 %v2296_v63, %v8853_v27 }
 0x204   :  { %v2266_v24 = vadd.f32 %v2265_v22, %v2264_v3  ;;  %v2307_v33 = vsub.f32 %v14303_v26, %v8868_v5  ;;  %v2308_v41 = vsub.f32 %v14305_v17, %v8871_v0  ;;  %v2309_v36 = vsub.f32 %v14307_v20, %v8874_v46 }
 0x205   :  { %v2310_v48 = vsub.f32 %v14309_v51, %v8877_v39  ;;  %v2311_v60 = vsub.f32 %v14311_v23, %v8880_v28  ;;  %v8899_v50 = vmax.f32 %v2297_v19, %v8883_v8  ;;  %v2312_v42 = vsub.f32 %v14313_v12, %v8886_v59 }
 0x206   :  { %v2267_v37 = vrot.slane %v2266_v24, 1  ;;  %v2315_v26 = vmul.f32 1.442695, %v2307_v33  ;;  %v2317_v3 = vmul.f32 1.442695, %v2308_v41  ;;  %v2331_v20 = vsub.f32 %v14302_v53, %v8868_v5 }
 0x207   :  { %v2319_v56 = vmul.f32 1.442695, %v2309_v36  ;;  %v2321_v17 = vmul.f32 1.442695, %v2310_v48  ;;  %v2313_v51 = vsub.f32 %v14315_v21, %v8899_v50  ;;  %v2323_v23 = vmul.f32 1.442695, %v2311_v60 }
 0x208   :  { %v2268_v16 = vadd.f32 %v2267_v37, %v2266_v24  ;;  %5773 = vpow2.f32 %v2315_v26  ;;  %v2325_v29 = vmul.f32 1.442695, %v2312_v42  ;;  %v2332_v11 = vsub.f32 %v14304_v9, %v8871_v0 }
 0x209   :  { %5775 = vpow2.f32 %v2317_v3  ;;  %v2333_v12 = vsub.f32 %v14306_v15, %v8874_v46  ;;  %v2327_v19 = vmul.f32 1.442695, %v2313_v51  ;;  %v2334_v53 = vsub.f32 %v14308_v58, %v8877_v39 }
 0x20a   :  { %v8912_v63 = vadd.f32 %v8823_v45, %v2268_v16  ;;  %5777 = vpow2.f32 %v2319_v56  ;;  %v2335_v21 = vsub.f32 %v14310_v61, %v8880_v28  ;;  %v2339_v9 = vmul.f32 1.442695, %v2331_v20 }
 0x20b   :  { %5779 = vpow2.f32 %v2321_v17  ;;  %v2341_v22 = vmul.f32 1.442695, %v2332_v11  ;;  %v2336_v45 = vsub.f32 %v14312_v2, %v8886_v59  ;;  %v2343_v15 = vmul.f32 1.442695, %v2333_v12 }
 0x20c   :  { %v8919_v54 = vmax.f32 %v2298_v25, %v8912_v63  ;;  %5781 = vpow2.f32 %v2323_v23  ;;  %v2337_v58 = vsub.f32 %v14314_v62, %v8899_v50  ;;  %v2345_v25 = vmul.f32 1.442695, %v2334_v53 }
 0x20d   :  { %5783 = vpow2.f32 %v2325_v29  ;;  %v2347_v41 = vmul.f32 1.442695, %v2335_v21  ;;  %v2355_v36 = vsub.f32 %v8686_v32, %v8868_v5  ;;  %v2349_v2 = vmul.f32 1.442695, %v2336_v45 }
 0x20e   :  { %v2314_v24 = vsub.f32 %v14316_v30, %v8919_v54  ;;  %5785 = vpow2.f32 %v2327_v19  ;;  %v2338_v61 = vsub.f32 %v8646_v44, %v8919_v54  ;;  %v2356_v30 = vsub.f32 %v8689_v13, %v8871_v0 }
 0x20f   :  { %5787 = vpow2.f32 %v2339_v9  ;;  %v2351_v48 = vmul.f32 1.442695, %v2337_v58  ;;  %v2357_v62 = vsub.f32 %v8692_v1, %v8874_v46  ;;  %v2358_v60 = vsub.f32 %v8695_v4, %v8877_v39 }
 0x210   :  { %v2329_v33 = vmul.f32 1.442695, %v2314_v24  ;;  %5789 = vpow2.f32 %v2341_v22  ;;  %v2353_v44 = vmul.f32 1.442695, %v2338_v61  ;;  %v2359_v37 = vsub.f32 %v8702_v34, %v8880_v28 }
 0x211   :  { %5791 = vpow2.f32 %v2343_v15  ;;  %v2363_v32 = vmul.f32 1.442695, %v2355_v36  ;;  %v2360_v13 = vsub.f32 %v8719_v18, %v8886_v59  ;;  %v2365_v26 = vmul.f32 1.442695, %v2356_v30 }
 0x212   :  { %5793 = vpow2.f32 %v2329_v33  ;;  %v2361_v1 = vsub.f32 %v8744_v49, %v8899_v50  ;;  %v2367_v56 = vmul.f32 1.442695, %v2357_v62  ;;  %v2362_v34 = vsub.f32 %v8786_v38, %v8919_v54 }
 0x213   :  { %5795 = vpow2.f32 %v2345_v25  ;;  %v2369_v17 = vmul.f32 1.442695, %v2358_v60  ;;  %v2371_v16 = vmul.f32 1.442695, %v2359_v37  ;;  %v2379_v18 = vsub.f32 %v8830_v43, %v8868_v5 }
 0x214   :  { %5797 = vpow2.f32 %v2347_v41  ;;  %v2373_v23 = vmul.f32 1.442695, %v2360_v13  ;;  %v2380_v49 = vsub.f32 %v8833_v52, %v8871_v0  ;;  %v2375_v11 = vmul.f32 1.442695, %v2361_v1 }
 0x215   :  { %v8939_v42 = vpop.eup %5773  ;;  %5799 = vpow2.f32 %v2349_v2  ;;  %v2381_v38 = vsub.f32 %v8836_v6, %v8874_v46  ;;  %v2377_v19 = vmul.f32 1.442695, %v2362_v34  ;;  %v2382_v43 = vsub.f32 %v8839_v40, %v8877_v39 }
 0x216   :  { %v8943_v3 = vpop.eup %5775  ;;  %5801 = vpow2.f32 %v2351_v48  ;;  %v2383_v52 = vsub.f32 %v8842_v10, %v8880_v28  ;;  %v2387_v0 = vmul.f32 1.442695, %v2379_v18  ;;  %v2384_v6 = vsub.f32 %v8853_v27, %v8886_v59 }
 0x217   :  { %v8947_v4 = vpop.eup %5777  ;;  %5803 = vpow2.f32 %v2353_v44  ;;  %v2389_v46 = vmul.f32 1.442695, %v2380_v49  ;;  %v2385_v40 = vsub.f32 %v8883_v8, %v8899_v50  ;;  %v2391_v39 = vmul.f32 1.442695, %v2381_v38 }
 0x218   :  { %v8951_v20 = vpop.eup %5779  ;;  %5805 = vpow2.f32 %v2363_v32  ;;  %v2386_v10 = vsub.f32 %v8912_v63, %v8919_v54  ;;  %v2393_v28 = vmul.f32 1.442695, %v2382_v43  ;;  %v2395_v45 = vmul.f32 1.442695, %v2383_v52 }
 0x219   :  { %v8955_v51 = vpop.eup %5781  ;;  %5807 = vpow2.f32 %v2365_v26  ;;  %v2397_v59 = vmul.f32 1.442695, %v2384_v6  ;;  %v2399_v8 = vmul.f32 1.442695, %v2385_v40 }
 0x21a   :  { %v8959_v29 = vpop.eup %5783  ;;  %5809 = vpow2.f32 %v2367_v56  ;;  %v2401_v24 = vmul.f32 1.442695, %v2386_v10 }
 0x21b   :  { %v8963_v12 = vpop.eup %5785  ;;  %5811 = vpow2.f32 %v2369_v17 }
 0x21c   :  { %v8967_v5 = vpop.eup %5787  ;;  %5813 = vpow2.f32 %v2371_v16 }
 0x21d   :  { %v8971_v53 = vpop.eup %5789  ;;  %5815 = vpow2.f32 %v2373_v23  ;;  %v2403_v61 = vadd.f32 %v8967_v5, %v8939_v42 }
 0x21e   :  { %v8975_v21 = vpop.eup %5791  ;;  %5817 = vpow2.f32 %v2375_v11  ;;  %v2404_v33 = vadd.f32 %v8971_v53, %v8943_v3 }
 0x21f   :  { %v8979_v9 = vpop.eup %5793  ;;  %5819 = vpow2.f32 %v2377_v19  ;;  %v2405_v36 = vadd.f32 %v8975_v21, %v8947_v4 }
 0x220   :  { %v8983_v22 = vpop.eup %5795  ;;  %5821 = vpow2.f32 %v2387_v0 }
 0x221   :  { %v8985_v27 = vpop.eup %5797  ;;  %5823 = vpow2.f32 %v2389_v46  ;;  %v2406_v30 = vadd.f32 %v8983_v22, %v8951_v20 }
 0x222   :  { %v8987_v15 = vpop.eup %5799  ;;  %5825 = vpow2.f32 %v2391_v39  ;;  %v2407_v62 = vadd.f32 %v8985_v27, %v8955_v51 }
 0x223   :  { %v8989_v50 = vpop.eup %5801  ;;  %5827 = vpow2.f32 %v2393_v28  ;;  %v2408_v37 = vadd.f32 %v8987_v15, %v8959_v29 }
 0x224   :  { %v8991_v58 = vpop.eup %5803  ;;  %5829 = vpow2.f32 %v2395_v45  ;;  %v2409_v26 = vadd.f32 %v8989_v50, %v8963_v12 }
 0x225   :  { %v5806_v63 = vpop.eup %5805  ;;  %5831 = vpow2.f32 %v2397_v59  ;;  %v2410_v34 = vadd.f32 %v8991_v58, %v8979_v9 }
 0x226   :  { %v5808_v54 = vpop.eup %5807  ;;  %5833 = vpow2.f32 %v2399_v8  ;;  %v2411_v44 = vadd.f32 %v5806_v63, %v2403_v61 }
 0x227   :  { %v8995_v25 = vpop.eup %5809  ;;  %5835 = vpow2.f32 %v2401_v24  ;;  %v2412_v32 = vadd.f32 %v5808_v54, %v2404_v33 }
 0x228   :  { %v8999_v41 = vpop.eup %5811  ;;  %v2413_v1 = vadd.f32 %v8995_v25, %v2405_v36 }
 0x229   :  { %v9003_v2 = vpop.eup %5813  ;;  %v2414_v17 = vadd.f32 %v8999_v41, %v2406_v30 }
 0x22a   :  { %v9007_v48 = vpop.eup %5815  ;;  %v2415_v18 = vadd.f32 %v9003_v2, %v2407_v62 }
 0x22b   :  { %v9011_v60 = vpop.eup %5817  ;;  %v2416_v11 = vadd.f32 %v9007_v48, %v2408_v37 }
 0x22c   :  { %v9015_v13 = vpop.eup %5819  ;;  %v2417_v43 = vadd.f32 %v9011_v60, %v2409_v26 }
 0x22d   :  { %v5822_v56 = vpop.eup %5821  ;;  %v2418_v6 = vadd.f32 %v9015_v13, %v2410_v34 }
 0x22e   :  { %v5824_v16 = vpop.eup %5823  ;;  %v2419_v23 = vadd.f32 %v5822_v56, %v2411_v44 }
 0x22f   :  { %v9024_v49 = vpop.eup %5825  ;;  %v2420_v38 = vadd.f32 %v5824_v16, %v2412_v32 }
 0x230   :  { %v9027_v19 = vpop.eup %5827  ;;  %v2421_v52 = vadd.f32 %v9024_v49, %v2413_v1  ;;  %5837 = vrcp.f32 %v2419_v23 }
 0x231   :  { %v9031_v0 = vpop.eup %5829  ;;  %v2422_v46 = vadd.f32 %v9027_v19, %v2414_v17  ;;  %5839 = vrcp.f32 %v2420_v38 }
 0x232   :  { %v9035_v40 = vpop.eup %5831  ;;  %v2423_v39 = vadd.f32 %v9031_v0, %v2415_v18  ;;  %5841 = vrcp.f32 %v2421_v52  ;;  %v14317_v18 = vld [vmem:[#allocation8_spill] sm:$0xff]  ;;  %v14325_v52 = vld [vmem:[#allocation14_spill] sm:$0xff] }
 0x233   :  { %v9038_v10 = vpop.eup %5833  ;;  %v2424_v28 = vadd.f32 %v9035_v40, %v2416_v11  ;;  %5843 = vrcp.f32 %v2422_v46  ;;  %v14327_v46 = vld [vmem:[#allocation20_spill] sm:$0xff] }
 0x234   :  { %v9041_v45 = vpop.eup %5835  ;;  %v2425_v59 = vadd.f32 %v9038_v10, %v2417_v43  ;;  %5845 = vrcp.f32 %v2423_v39 }
 0x235   :  { %v2426_v8 = vadd.f32 %v9041_v45, %v2418_v6  ;;  %5847 = vrcp.f32 %v2424_v28 }
 0x236   :  { %5849 = vrcp.f32 %v2425_v59  ;;  %v14329_v59 = vld [vmem:[#allocation15_spill] sm:$0xff] }
 0x237   :  { %5851 = vrcp.f32 %v2426_v8 }
 0x23d   :  { %v5838_v24 = vpop.eup %5837 }
 0x23e   :  { %v5840_v61 = vpop.eup %5839  ;;  %v2435_v33 = vmul.f32 %v5838_v24, %v8939_v42  ;;  %v2451_v36 = vmul.f32 %v5838_v24, %v8967_v5  ;;  %v2467_v30 = vmul.f32 %v5838_v24, %v5806_v63  ;;  %v2483_v62 = vmul.f32 %v5838_v24, %v5822_v56  ;;  %v14319_v42 = vld [vmem:[#allocation10_spill] sm:$0xff]  ;;  %v14321_v56 = vld [vmem:[#allocation13_spill] sm:$0xff]  ;;  %v14331_v24 = vld [vmem:[#allocation28_spill] sm:$0xff] }
 0x23f   :  { %v5842_v44 = vpop.eup %5841  ;;  %v2436_v37 = vmul.f32 %v5840_v61, %v8943_v3  ;;  %v2452_v32 = vmul.f32 %v5840_v61, %v8971_v53  ;;  %v2468_v26 = vmul.f32 %v5840_v61, %v5808_v54  ;;  %v2484_v1 = vmul.f32 %v5840_v61, %v5824_v16  ;;  %v14323_v54 = vld [vmem:[#allocation27_spill] sm:$0xff] }
 0x240   :  { %v5844_v34 = vpop.eup %5843  ;;  %v2437_v17 = vmul.f32 %v5842_v44, %v8947_v4  ;;  %v9051_v23 = vsub.f32 %v2435_v33, %v14317_v18  ;;  %v2453_v11 = vmul.f32 %v5842_v44, %v8975_v21  ;;  %v9055_v38 = vsub.f32 %v2451_v36, %v14319_v42  ;;  %v14333_v36 = vld [vmem:[#allocation16_spill] sm:$0xff]  ;;  %v9252_v42 = vld [vmem:[%s13300_s0 + $0x40] sm:$0xff] }
 0x241   :  { %v5846_v5 = vpop.eup %5845  ;;  %v2438_v63 = vmul.f32 %v5844_v34, %v8951_v20  ;;  %v9059_v3 = vsub.f32 %v2436_v37, %v14321_v56  ;;  %v2454_v53 = vmul.f32 %v5844_v34, %v8983_v22  ;;  %v9063_v16 = vsub.f32 %v2452_v32, %v14323_v54  ;;  %v14335_v32 = vld [vmem:[#allocation21_spill] sm:$0xff] }
 0x242   :  { %14318 = vst [vmem:[#allocation61_spill] sm:$0xff] %v9051_v23  ;;  %14320 = vst [vmem:[#allocation62_spill] sm:$0xff] %v9055_v38  ;;  %v5848_v4 = vpop.eup %5847  ;;  %v2439_v43 = vmul.f32 %v5846_v5, %v8955_v51  ;;  %v9067_v6 = vsub.f32 %v2437_v17, %v14325_v52  ;;  %v2455_v21 = vmul.f32 %v5846_v5, %v8985_v27  ;;  %v9244_v54 = vld [vmem:[%s13300_s0 + $0x38] sm:$0xff] }
 0x243   :  { %14322 = vst [vmem:[#allocation63_spill] sm:$0xff] %v9059_v3  ;;  %14324 = vst [vmem:[#allocation67_spill] sm:$0xff] %v9063_v16  ;;  %v9071_v39 = vsub.f32 %v2453_v11, %v14327_v46  ;;  %v5850_v20 = vpop.eup %5849  ;;  %v2440_v28 = vmul.f32 %v5848_v4, %v8959_v29  ;;  %v9075_v8 = vsub.f32 %v2438_v63, %v14329_v59  ;;  %v14337_v11 = vld [vmem:[#allocation17_spill] sm:$0xff]  ;;  %v14341_v59 = vld [vmem:[#allocation26_spill] sm:$0xff] }
 0x244   :  { %14326 = vst [vmem:[#allocation68_spill] sm:$0xff] %v9067_v6  ;;  %v2456_v22 = vmul.f32 %v5848_v4, %v8987_v15  ;;  %v9079_v61 = vsub.f32 %v2454_v53, %v14331_v24  ;;  %v5852_v51 = vpop.eup %5851  ;;  %v2441_v33 = vmul.f32 %v5850_v20, %v8963_v12  ;;  %v9083_v37 = vsub.f32 %v2439_v43, %v14333_v36  ;;  %v14339_v53 = vld [vmem:[#allocation29_spill] sm:$0xff]  ;;  %v14343_v43 = vld [vmem:[#allocation22_spill] sm:$0xff] }
 0x245   :  { %14328 = vst [vmem:[#allocation48_spill] sm:$0xff] %v9071_v39  ;;  %14330 = vst [vmem:[#allocation75_spill] sm:$0xff] %v9075_v8  ;;  %v2457_v27 = vmul.f32 %v5850_v20, %v8989_v50  ;;  %v9087_v17 = vsub.f32 %v2455_v21, %v14335_v32  ;;  %v2442_v29 = vmul.f32 %v5852_v51, %v8979_v9  ;;  %v14345_v32 = vld [vmem:[#allocation19_spill] sm:$0xff] }
 0x246   :  { %14332 = vst [vmem:[#allocation76_spill] sm:$0xff] %v9079_v61  ;;  %14334 = vst [vmem:[#allocation77_spill] sm:$0xff] %v9083_v37  ;;  %v9091_v63 = vsub.f32 %v2440_v28, %v14337_v11  ;;  %v2458_v15 = vmul.f32 %v5852_v51, %v8991_v58  ;;  %v9095_v24 = vsub.f32 %v2456_v22, %v14339_v53  ;;  %v14347_v28 = vld [vmem:[#allocation30_spill] sm:$0xff] }
 0x247   :  { %14336 = vst [vmem:[#allocation78_spill] sm:$0xff] %v9087_v17  ;;  %v9098_v12 = vsub.f32 %v2441_v33, %v14341_v59  ;;  %v9101_v36 = vsub.f32 %v2457_v27, %v14343_v43  ;;  %v2469_v50 = vmul.f32 %v5842_v44, %v8995_v25  ;;  %v2470_v21 = vmul.f32 %v5844_v34, %v8999_v41  ;;  %v14349_v27 = vld [vmem:[#allocation11_spill] sm:$0xff] }
 0x248   :  { %14338 = vst [vmem:[#allocation79_spill] sm:$0xff] %v9091_v63  ;;  %14340 = vst [vmem:[#allocation80_spill] sm:$0xff] %v9095_v24  ;;  %v9106_v9 = vsub.f32 %v2442_v29, %v14345_v32  ;;  %v9109_v11 = vsub.f32 %v2458_v15, %v14347_v28  ;;  %v2471_v58 = vmul.f32 %v5846_v5, %v9003_v2  ;;  %v14351_v25 = vld [vmem:[#allocation23_spill] sm:$0xff]  ;;  %v14355_v32 = vld [vmem:[#allocation24_spill] sm:$0xff] }
 0x249   :  { %14342 = vst [vmem:[#allocation81_spill] sm:$0xff] %v9098_v12  ;;  %14344 = vst [vmem:[#allocation83_spill] sm:$0xff] %v9101_v36  ;;  %v2472_v22 = vmul.f32 %v5848_v4, %v9007_v48  ;;  %v2473_v33 = vmul.f32 %v5850_v20, %v9011_v60  ;;  %v2474_v59 = vmul.f32 %v5852_v51, %v9015_v13  ;;  %v14353_v41 = vld [vmem:[#allocation31_spill] sm:$0xff]  ;;  %v14357_v28 = vld [vmem:[#allocation2_spill] sm:$0xff] }
 0x24a   :  { %14346 = vst [vmem:[#allocation85_spill] sm:$0xff] %v9106_v9  ;;  %14348 = vst [vmem:[#allocation86_spill] sm:$0xff] %v9109_v11  ;;  %v9116_v43 = vsub.f32 %v2467_v30, %v14349_v27  ;;  %v9119_v53 = vsub.f32 %v2468_v26, %v14351_v25  ;;  %v9122_v29 = vsub.f32 %v2469_v50, %v14353_v41  ;;  %v14359_v48 = vld [vmem:[#allocation25_spill] sm:$0xff]  ;;  %v14361_v60 = vld [vmem:[#allocation18_spill] sm:$0xff] }
 0x24b   :  { %v9125_v15 = vsub.f32 %v2470_v21, %v14355_v32  ;;  %v9128_v2 = vsub.f32 %v2471_v58, %v14357_v28  ;;  %v9131_v46 = vsub.f32 %v2472_v22, %v14359_v48  ;;  %v9134_v13 = vsub.f32 %v2473_v33, %v14361_v60  ;;  %v14363_v30 = vld [vmem:[#allocation32_spill] sm:$0xff]  ;;  %v14367_v33 = vld [vmem:[#allocation33_spill] sm:$0xff]  ;;  %v9228_v32 = vld [vmem:[%s13300_s0 + $0x28] sm:$0xff] }
 0x24c   :  { %14350 = vst [vmem:[#allocation87_spill] sm:$0xff] %v9116_v43  ;;  %14352 = vst [vmem:[#allocation88_spill] sm:$0xff] %v9119_v53  ;;  %v9137_v27 = vsub.f32 %v2474_v59, %v14363_v30  ;;  %v2485_v26 = vmul.f32 %v5842_v44, %v9024_v49  ;;  %v2486_v50 = vmul.f32 %v5844_v34, %v9027_v19  ;;  %v14365_v22 = vld [vmem:[#allocation12_spill] sm:$0xff]  ;;  %v14369_v59 = vld [vmem:[#allocation34_spill] sm:$0xff] }
 0x24d   :  { %14354 = vst [vmem:[#allocation42_spill] sm:$0xff] %v9122_v29  ;;  %14356 = vst [vmem:[#allocation44_spill] sm:$0xff] %v9125_v15  ;;  %v2487_v41 = vmul.f32 %v5846_v5, %v9031_v0  ;;  %v2488_v21 = vmul.f32 %v5848_v4, %v9035_v40  ;;  %v2489_v58 = vmul.f32 %v5850_v20, %v9038_v10  ;;  %v14371_v49 = vld [vmem:[#allocation35_spill] sm:$0xff]  ;;  %v14373_v19 = vld [vmem:[#allocation36_spill] sm:$0xff] }
 0x24e   :  { %14358 = vst [vmem:[#allocation46_spill] sm:$0xff] %v9128_v2  ;;  %14360 = vst [vmem:[#allocation53_spill] sm:$0xff] %v9131_v46  ;;  %v2490_v28 = vmul.f32 %v5852_v51, %v9041_v45  ;;  %v9146_v48 = vsub.f32 %v2483_v62, %v14365_v22  ;;  %v9149_v60 = vsub.f32 %v2484_v1, %v14367_v33  ;;  %v14375_v40 = vld [vmem:[#allocation37_spill] sm:$0xff]  ;;  %v14377_v10 = vld [vmem:[#allocation38_spill] sm:$0xff] }
 0x24f   :  { %14362 = vst [vmem:[#allocation52_spill] sm:$0xff] %v9134_v13  ;;  %14364 = vst [vmem:[#allocation55_spill] sm:$0xff] %v9137_v27  ;;  %v9152_v30 = vsub.f32 %v2485_v26, %v14369_v59  ;;  %v9155_v44 = vsub.f32 %v2486_v50, %v14371_v49  ;;  %v9158_v0 = vsub.f32 %v2487_v41, %v14373_v19  ;;  %v14379_v62 = vld [vmem:[#allocation39_spill] sm:$0xff]  ;;  %v9214_v49 = vld [vmem:[%s13300_s0 + $0x18] sm:$0xff] }
 0x250   :  { %14366 = vst [vmem:[#allocation54_spill] sm:$0xff] %v9146_v48  ;;  %14368 = vst [vmem:[#allocation57_spill] sm:$0xff] %v9149_v60  ;;  %v9161_v34 = vsub.f32 %v2488_v21, %v14375_v40  ;;  %v9164_v45 = vsub.f32 %v2489_v58, %v14377_v10  ;;  %v9167_v5 = vsub.f32 %v2490_v28, %v14379_v62  ;;  %v9190_v21 = vld [vmem:[%s13300_s0] sm:$0xff]  ;;  %v9198_v62 = vld [vmem:[%s13300_s0 + $0x8] sm:$0xff] }
 0x251   :  { %14370 = vst [vmem:[#allocation43_spill] sm:$0xff] %v9152_v30  ;;  %14372 = vst [vmem:[#allocation58_spill] sm:$0xff] %v9155_v44  ;;  %v2502_v1 = vrot.slane %v9051_v23, %v14240_v57  ;;  %v2506_v4 = vrot.slane %v9059_v3, %v14240_v57  ;;  %v2510_v20 = vrot.slane %v9067_v6, %v14240_v57  ;;  %v9206_v40 = vld [vmem:[%s13300_s0 + $0x10] sm:$0xff]  ;;  %v9222_v33 = vld [vmem:[%s13300_s0 + $0x20] sm:$0xff] }
 0x252   :  { %14374 = vst [vmem:[#allocation41_spill] sm:$0xff] %v9158_v0  ;;  %14376 = vst [vmem:[#allocation59_spill] sm:$0xff] %v9161_v34  ;;  %v2514_v51 = vrot.slane %v9075_v8, %v14240_v57  ;;  %v2518_v41 = vrot.slane %v9083_v37, %v14240_v57  ;;  %v2522_v26 = vrot.slane %v9091_v63, %v14240_v57  ;;  %v9292_v23 = vld [vmem:[%s13300_s0 + $0x70] sm:$0xff]  ;;  %v9298_v37 = vld [vmem:[%s13300_s0 + $0x78] sm:$0xff] }
 0x253   :  { %14378 = vst [vmem:[#allocation45_spill] sm:$0xff] %v9164_v45  ;;  %14380 = vst [vmem:[#allocation56_spill] sm:$0xff] %v9167_v5  ;;  %v2526_v28 = vrot.slane %v9098_v12, %v14240_v57  ;;  %v9185_v50 = vrot.slane %v9106_v9, %v14240_v57  ;;  %v9193_v58 = vmul.f32 %v9190_v21, %v2502_v1  ;;  %v9286_v12 = vld [vmem:[%s13300_s0 + $0x68] sm:$0xff]  ;;  %v9306_v6 = vld [vmem:[%s13300_s0 + $0x80] sm:$0xff] }
 0x254   :  { %v9201_v10 = vmul.f32 %v9198_v62, %v2502_v1  ;;  %v9209_v19 = vmul.f32 %v9206_v40, %v2502_v1  ;;  %v9217_v59 = vmul.f32 %v9214_v49, %v2502_v1  ;;  %v2535_v22 = vmul.f32 %v9222_v33, %v2506_v4  ;;  %v9236_v1 = vld [vmem:[%s13300_s0 + $0x30] sm:$0xff]  ;;  %14385 = vst [vmem:[#allocation91_spill] sm:$0xff] %v9286_v12  ;;  %v9312_v5 = vld [vmem:[%s13300_s0 + $0x88] sm:$0xff]  ;;  %v9324_v0 = vld [vmem:[%s13300_s0 + $0x98] sm:$0xff] }
 0x255   :  { %v9231_v25 = vmul.f32 %v9228_v32, %v2506_v4  ;;  %v9239_v52 = vmul.f32 %v9236_v1, %v2506_v4  ;;  %v9247_v56 = vmul.f32 %v9244_v54, %v2506_v4  ;;  %v2539_v18 = vmul.f32 %v9252_v42, %v2510_v20  ;;  %14386 = vst [vmem:[#allocation92_spill] sm:$0xff] %v9292_v23  ;;  %v9318_v34 = vld [vmem:[%s13300_s0 + $0x90] sm:$0xff]  ;;  %v9332_v30 = vld [vmem:[%s13300_s0 + $0xa0] sm:$0xff]  ;;  %v9338_v48 = vld [vmem:[%s13300_s0 + $0xa8] sm:$0xff] }
 0x256   :  { %v2540_v7 = vmul.f32 %v9258_v31, %v2510_v20  ;;  %v9267_v4 = vmul.f32 %v9264_v55, %v2510_v20  ;;  %v9275_v35 = vmul.f32 %v9272_v14, %v2510_v20  ;;  %v2543_v9 = vmul.f32 %v9280_v47, %v2514_v51  ;;  %14387 = vst [vmem:[#allocation93_spill] sm:$0xff] %v9298_v37  ;;  %v9344_v13 = vld [vmem:[%s13300_s0 + $0xb0] sm:$0xff]  ;;  %v9350_v46 = vld [vmem:[%s13300_s0 + $0xb8] sm:$0xff]  ;;  %v9356_v15 = vld [vmem:[%s13300_s0 + $0xc0] sm:$0xff] }
 0x257   :  { %v2544_v63 = vmul.f32 %v9286_v12, %v2514_v51  ;;  %v2545_v20 = vmul.f32 %v9292_v23, %v2514_v51  ;;  %v9301_v8 = vmul.f32 %v9298_v37, %v2514_v51  ;;  %14388 = vst [vmem:[#allocation94_spill] sm:$0xff] %v9306_v6  ;;  %v2547_v3 = vmul.f32 %v9306_v6, %v2518_v41  ;;  %v9362_v53 = vld [vmem:[%s13300_s0 + $0xc8] sm:$0xff] }
 0x258   :  { %14389 = vst [vmem:[#allocation95_spill] sm:$0xff] %v9312_v5  ;;  %v2548_v45 = vmul.f32 %v9312_v5, %v2518_v41  ;;  %14390 = vst [vmem:[#allocation96_spill] sm:$0xff] %v9318_v34  ;;  %v2549_v51 = vmul.f32 %v9318_v34, %v2518_v41  ;;  %v9327_v44 = vmul.f32 %v9324_v0, %v2518_v41  ;;  %v2563_v34 = vsel %vm171_vm0, %v9193_v58, 0.0 }
 0x259   :  { %14391 = vst [vmem:[#allocation97_spill] sm:$0xff] %v9324_v0  ;;  %14392 = vst [vmem:[#allocation98_spill] sm:$0xff] %v9332_v30  ;;  %v2551_v60 = vmul.f32 %v9332_v30, %v2522_v26  ;;  %v2552_v27 = vmul.f32 %v9338_v48, %v2522_v26  ;;  %v2553_v41 = vmul.f32 %v9344_v13, %v2522_v26  ;;  %v9387_v30 = vld [vmem:[%s13300_s0 + $0xe8] sm:$0xff]  ;;  %v2566_v5 = vsel %vm171_vm0, %v2539_v18, 0.0 }
 0x25a   :  { %14393 = vst [vmem:[#allocation99_spill] sm:$0xff] %v9338_v48  ;;  %14394 = vst [vmem:[#allocation100_spill] sm:$0xff] %v9344_v13  ;;  %v2554_v2 = vmul.f32 %v9350_v46, %v2522_v26  ;;  %v2555_v29 = vmul.f32 %v9356_v15, %v2526_v28  ;;  %v2556_v43 = vmul.f32 %v9362_v53, %v2526_v28  ;;  %v9368_v13 = vld [vmem:[%s13300_s0 + $0xd0] sm:$0xff]  ;;  %v9380_v48 = vld [vmem:[%s13300_s0 + $0xe0] sm:$0xff]  ;;  %v2568_v6 = vsel %vm171_vm0, %v2543_v9, 0.0 }
 0x25b   :  { %14395 = vst [vmem:[#allocation101_spill] sm:$0xff] %v9350_v46  ;;  %14396 = vst [vmem:[#allocation102_spill] sm:$0xff] %v9356_v15  ;;  %v2557_v26 = vmul.f32 %v9368_v13, %v2526_v28  ;;  %v9374_v46 = vld [vmem:[%s13300_s0 + $0xd8] sm:$0xff]  ;;  %v2572_v23 = vsel %vm171_vm0, %v2551_v60, 0.0  ;;  %v2579_v58 = vsel %vm171_vm0, %v9231_v25, 0.0  ;;  %v2583_v9 = vsel %vm171_vm0, %v2544_v63, 0.0 }
 0x25c   :  { %14397 = vst [vmem:[#allocation103_spill] sm:$0xff] %v9362_v53  ;;  %14398 = vst [vmem:[#allocation104_spill] sm:$0xff] %v9368_v13  ;;  %v2558_v15 = vmul.f32 %v9374_v46, %v2526_v28  ;;  %v2559_v53 = vmul.f32 %v9380_v48, %v9185_v50  ;;  %v2560_v13 = vmul.f32 %v9387_v30, %v9185_v50  ;;  %v9394_v28 = vld [vmem:[%s13300_s0 + $0xf0] sm:$0xff]  ;;  %v2574_v12 = vsel %vm171_vm0, %v2555_v29, 0.0 }
 0x25d   :  { %14399 = vst [vmem:[#allocation105_spill] sm:$0xff] %v9374_v46  ;;  %14400 = vst [vmem:[#allocation106_spill] sm:$0xff] %v9380_v48  ;;  %v2561_v46 = vmul.f32 %v9394_v28, %v9185_v50  ;;  %v9401_v48 = vld [vmem:[%s13300_s0 + $0xf8] sm:$0xff]  ;;  %v2587_v60 = vsel %vm171_vm0, %v2552_v27, 0.0  ;;  %v2589_v29 = vsel %vm171_vm0, %v2556_v43, 0.0  ;;  %v2598_v25 = vsel %vm171_vm0, %v2545_v20, 0.0 }
 0x25e   :  { %14401 = vst [vmem:[#allocation107_spill] sm:$0xff] %v9387_v30  ;;  %14402 = vst [vmem:[#allocation108_spill] sm:$0xff] %v9394_v28  ;;  %v2562_v0 = vmul.f32 %v9401_v48, %v9185_v50  ;;  %v2564_v30 = vsel %vm171_vm0, %v2535_v22, 0.0  ;;  %v2570_v28 = vsel %vm171_vm0, %v2547_v3, 0.0  ;;  %v2576_v47 = vsel %vm171_vm0, %v2559_v53, 0.0 }
 0x25f   :  { %14403 = vst [vmem:[#allocation109_spill] sm:$0xff] %v9401_v48  ;;  %v2565_v37 = vadd.f32 %v2564_v30, %v2563_v34  ;;  %v2578_v50 = vsel %vm171_vm0, %v9201_v10, 0.0  ;;  %v2581_v22 = vsel %vm171_vm0, %v2540_v7, 0.0  ;;  %v2585_v3 = vsel %vm171_vm0, %v2548_v45, 0.0 }
 0x260   :  { %v2580_v48 = vadd.f32 %v2579_v58, %v2578_v50  ;;  %v2591_v53 = vsel %vm171_vm0, %v2560_v13, 0.0  ;;  %v2593_v30 = vsel %vm171_vm0, %v9209_v19, 0.0  ;;  %v2594_v7 = vsel %vm171_vm0, %v9239_v52, 0.0 }
 0x261   :  { %v2567_v18 = vadd.f32 %v2566_v5, %v2565_v37  ;;  %v2596_v37 = vsel %vm171_vm0, %v9267_v4, 0.0  ;;  %v2595_v63 = vadd.f32 %v2594_v7, %v2593_v30  ;;  %v2600_v27 = vsel %vm171_vm0, %v2549_v51, 0.0 }
 0x262   :  { %v2582_v10 = vadd.f32 %v2581_v22, %v2580_v48  ;;  %v2602_v43 = vsel %vm171_vm0, %v2553_v41, 0.0  ;;  %v2604_v5 = vsel %vm171_vm0, %v2557_v26, 0.0  ;;  %v2608_v52 = vsel %vm171_vm0, %v9217_v59, 0.0 }
 0x263   :  { %v2569_v34 = vadd.f32 %v2568_v6, %v2567_v18  ;;  %v2606_v6 = vsel %vm171_vm0, %v2561_v46, 0.0  ;;  %v2597_v48 = vadd.f32 %v2596_v37, %v2595_v63  ;;  %v2609_v19 = vsel %vm171_vm0, %v9247_v56, 0.0 }
 0x264   :  { %v2584_v13 = vadd.f32 %v2583_v9, %v2582_v10  ;;  %v2611_v4 = vsel %vm171_vm0, %v9275_v35, 0.0  ;;  %v2610_v50 = vadd.f32 %v2609_v19, %v2608_v52  ;;  %v2613_v41 = vsel %vm171_vm0, %v9301_v8, 0.0 }
 0x265   :  { %v2571_v45 = vadd.f32 %v2570_v28, %v2569_v34  ;;  %v2599_v28 = vadd.f32 %v2598_v25, %v2597_v48  ;;  %v2615_v46 = vsel %vm171_vm0, %v9327_v44, 0.0  ;;  %v2617_v26 = vsel %vm171_vm0, %v2554_v2, 0.0 }
 0x266   :  { %v2586_v51 = vadd.f32 %v2585_v3, %v2584_v13  ;;  %v2619_v59 = vsel %vm171_vm0, %v2558_v15, 0.0  ;;  %v2612_v56 = vadd.f32 %v2611_v4, %v2610_v50  ;;  %v2621_v18 = vsel %vm171_vm0, %v2562_v0, 0.0 }
 0x267   :  { %v2573_v20 = vadd.f32 %v2572_v23, %v2571_v45  ;;  %v2601_v35 = vadd.f32 %v2600_v27, %v2599_v28  ;;  %v2634_v23 = vrot.slane %v9055_v38, %v14240_v57  ;;  %v2638_v8 = vrot.slane %v9063_v16, %v14240_v57  ;;  %v14404_v45 = vld [vmem:[#allocation89_spill] sm:$0xff] }
 0x268   :  { %v2588_v22 = vadd.f32 %v2587_v60, %v2586_v51  ;;  %v2642_v9 = vrot.slane %v9071_v39, %v14240_v57  ;;  %v2614_v2 = vadd.f32 %v2613_v41, %v2612_v56  ;;  %v2650_v0 = vrot.slane %v9087_v17, %v14240_v57  ;;  %v14425_v17 = vld [vmem:[#allocation103_spill] sm:$0xff]  ;;  %v14427_v38 = vld [vmem:[#allocation105_spill] sm:$0xff] }
 0x269   :  { %v2575_v58 = vadd.f32 %v2574_v12, %v2573_v20  ;;  %v2646_v12 = vrot.slane %v9079_v61, %v14240_v57  ;;  %v2603_v15 = vadd.f32 %v2602_v43, %v2601_v35  ;;  %v2654_v60 = vrot.slane %v9095_v24, %v14240_v57  ;;  %v14406_v20 = vld [vmem:[#allocation90_spill] sm:$0xff]  ;;  %v14409_v35 = vld [vmem:[#allocation91_spill] sm:$0xff] }
 0x26a   :  { %v2590_v3 = vadd.f32 %v2589_v29, %v2588_v22  ;;  %v2658_v30 = vrot.slane %v9101_v36, %v14240_v57  ;;  %v2616_v10 = vadd.f32 %v2615_v46, %v2614_v2  ;;  %v2663_v37 = vmul.f32 %v9190_v21, %v2634_v23  ;;  %v14408_v22 = vld [vmem:[#allocation51_spill] sm:$0xff]  ;;  %v14421_v36 = vld [vmem:[#allocation101_spill] sm:$0xff] }
 0x26b   :  { %v2577_v44 = vadd.f32 %v2576_v47, %v2575_v58  ;;  %v2662_v47 = vrot.slane %v9109_v11, %v14240_v57  ;;  %v2605_v29 = vadd.f32 %v2604_v5, %v2603_v15  ;;  %v2664_v63 = vmul.f32 %v9198_v62, %v2634_v23 }
 0x26c   :  { %v2592_v34 = vadd.f32 %v2591_v53, %v2590_v3  ;;  %v2665_v25 = vmul.f32 %v9206_v40, %v2634_v23  ;;  %v2618_v27 = vadd.f32 %v2617_v26, %v2616_v10  ;;  %v9471_v48 = vmul.f32 %v9214_v49, %v2634_v23  ;;  %v14410_v23 = vld [vmem:[#allocation92_spill] sm:$0xff]  ;;  %v14411_v3 = vld [vmem:[#allocation69_spill] sm:$0xff] }
 0x26d   :  { %v2623_v7 = vmul.f32 0.01, %v2577_v44  ;;  %v2607_v53 = vadd.f32 %v2606_v6, %v2605_v29  ;;  %v2667_v52 = vmul.f32 %v9222_v33, %v2638_v8  ;;  %v2668_v19 = vmul.f32 %v9228_v32, %v2638_v8 }
 0x26e   :  { %v2624_v43 = vmul.f32 0.01, %v2592_v34  ;;  %v2669_v5 = vmul.f32 %v9236_v1, %v2638_v8  ;;  %v2620_v4 = vadd.f32 %v2619_v59, %v2618_v27  ;;  %v9480_v50 = vmul.f32 %v9244_v54, %v2638_v8  ;;  %v14413_v8 = vld [vmem:[#allocation93_spill] sm:$0xff]  ;;  %v14414_v34 = vld [vmem:[#allocation94_spill] sm:$0xff] }
 0x26f   :  { %v9468_v13 = vsub.f32 %v14404_v45, %v2623_v7  ;;  %v2671_v41 = vmul.f32 %v9252_v42, %v2642_v9  ;;  %v2625_v28 = vmul.f32 0.01, %v2607_v53  ;;  %v2672_v46 = vmul.f32 %v9258_v31, %v2642_v9  ;;  %v14415_v7 = vld [vmem:[#allocation95_spill] sm:$0xff]  ;;  %v14418_v53 = vld [vmem:[#allocation98_spill] sm:$0xff] }
 0x270   :  { %v9477_v51 = vsub.f32 %v14406_v20, %v2624_v43  ;;  %v2673_v6 = vmul.f32 %v9264_v55, %v2642_v9  ;;  %v2674_v26 = vmul.f32 %v9272_v14, %v2642_v9  ;;  %v2622_v58 = vadd.f32 %v2621_v18, %v2620_v4  ;;  %v14416_v43 = vld [vmem:[#allocation96_spill] sm:$0xff]  ;;  %v14417_v9 = vld [vmem:[#allocation97_spill] sm:$0xff]  ;;  %v14419_v20 = vld [vmem:[#allocation99_spill] sm:$0xff] }
 0x271   :  { %14405 = vst [vmem:[#allocation89_spill] sm:$0xff] %v9468_v13  ;;  %v2675_v56 = vmul.f32 %v14408_v22, %v2646_v12  ;;  %v2676_v59 = vmul.f32 %v14409_v35, %v2646_v12  ;;  %v2677_v44 = vmul.f32 %v14410_v23, %v2646_v12  ;;  %v9490_v2 = vsub.f32 %v14411_v3, %v2625_v28  ;;  %v14420_v13 = vld [vmem:[#allocation100_spill] sm:$0xff]  ;;  %v14422_v3 = vld [vmem:[#allocation102_spill] sm:$0xff] }
 0x272   :  { %14407 = vst [vmem:[#allocation90_spill] sm:$0xff] %v9477_v51  ;;  %v2678_v15 = vmul.f32 %v14413_v8, %v2646_v12  ;;  %v2679_v10 = vmul.f32 %v14414_v34, %v2650_v0  ;;  %v2680_v29 = vmul.f32 %v14415_v7, %v2650_v0  ;;  %v2626_v27 = vmul.f32 0.01, %v2622_v58  ;;  %v14423_v12 = vld [vmem:[#allocation70_spill] sm:$0xff]  ;;  %v14426_v58 = vld [vmem:[#allocation104_spill] sm:$0xff] }
 0x273   :  { %14412 = vst [vmem:[#allocation69_spill] sm:$0xff] %v9490_v2  ;;  %v2681_v45 = vmul.f32 %v14416_v43, %v2650_v0  ;;  %v2682_v18 = vmul.f32 %v14417_v9, %v2650_v0  ;;  %v2683_v4 = vmul.f32 %v14418_v53, %v2654_v60  ;;  %v2684_v51 = vmul.f32 %v14419_v20, %v2654_v60  ;;  %v14428_v0 = vld [vmem:[#allocation106_spill] sm:$0xff]  ;;  %v14429_v53 = vld [vmem:[#allocation107_spill] sm:$0xff]  ;;  %v14430_v20 = vld [vmem:[#allocation108_spill] sm:$0xff] }
 0x274   :  { %v2685_v11 = vmul.f32 %v14420_v13, %v2654_v60  ;;  %v2686_v28 = vmul.f32 %v14421_v36, %v2654_v60  ;;  %v2687_v2 = vmul.f32 %v14422_v3, %v2658_v30  ;;  %v9503_v24 = vsub.f32 %v14423_v12, %v2626_v27  ;;  %v14431_v13 = vld [vmem:[#allocation109_spill] sm:$0xff] }
 0x275   :  { %v2688_v61 = vmul.f32 %v14425_v17, %v2658_v30  ;;  %v2689_v39 = vmul.f32 %v14426_v58, %v2658_v30  ;;  %v2690_v16 = vmul.f32 %v14427_v38, %v2658_v30  ;;  %v2691_v9 = vmul.f32 %v14428_v0, %v2662_v47 }
 0x276   :  { %14424 = vst [vmem:[#allocation101_spill] sm:$0xff] %v9503_v24  ;;  %v2692_v43 = vmul.f32 %v14429_v53, %v2662_v47  ;;  %v2693_v7 = vmul.f32 %v14430_v20, %v2662_v47  ;;  %v2694_v34 = vmul.f32 %v14431_v13, %v2662_v47  ;;  %v2695_v60 = vsel %vm171_vm0, %v2663_v37, 0.0 }
 0x277   :  { %v2696_v3 = vsel %vm171_vm0, %v2667_v52, 0.0  ;;  %v2698_v27 = vsel %vm171_vm0, %v2671_v41, 0.0  ;;  %v2700_v12 = vsel %vm171_vm0, %v2675_v56, 0.0  ;;  %v2702_v58 = vsel %vm171_vm0, %v2679_v10, 0.0 }
 0x278   :  { %v2697_v24 = vadd.f32 %v2696_v3, %v2695_v60  ;;  %v2704_v30 = vsel %vm171_vm0, %v2683_v4, 0.0  ;;  %v2706_v0 = vsel %vm171_vm0, %v2687_v2, 0.0  ;;  %v2708_v53 = vsel %vm171_vm0, %v2691_v9, 0.0 }
 0x279   :  { %v2710_v20 = vsel %vm171_vm0, %v2664_v63, 0.0  ;;  %v2711_v47 = vsel %vm171_vm0, %v2668_v19, 0.0  ;;  %v2713_v37 = vsel %vm171_vm0, %v2672_v46, 0.0  ;;  %v2715_v41 = vsel %vm171_vm0, %v2676_v59, 0.0 }
 0x27a   :  { %v2699_v52 = vadd.f32 %v2698_v27, %v2697_v24  ;;  %v2712_v13 = vadd.f32 %v2711_v47, %v2710_v20  ;;  %v2717_v56 = vsel %vm171_vm0, %v2680_v29, 0.0  ;;  %v2719_v10 = vsel %vm171_vm0, %v2684_v51, 0.0 }
 0x27b   :  { %v2721_v4 = vsel %vm171_vm0, %v2688_v61, 0.0  ;;  %v2723_v2 = vsel %vm171_vm0, %v2692_v43, 0.0  ;;  %v2725_v9 = vsel %vm171_vm0, %v2665_v25, 0.0  ;;  %v2726_v19 = vsel %vm171_vm0, %v2669_v5, 0.0 }
 0x27c   :  { %v2701_v3 = vadd.f32 %v2700_v12, %v2699_v52  ;;  %v2714_v63 = vadd.f32 %v2713_v37, %v2712_v13  ;;  %v2728_v46 = vsel %vm171_vm0, %v2673_v6, 0.0  ;;  %v2727_v24 = vadd.f32 %v2726_v19, %v2725_v9  ;;  %v14437_v19 = vld [vmem:[#allocation53_spill] sm:$0xff] }
 0x27d   :  { %v2730_v20 = vsel %vm171_vm0, %v2677_v44, 0.0  ;;  %v2732_v59 = vsel %vm171_vm0, %v2681_v45, 0.0  ;;  %v2734_v29 = vsel %vm171_vm0, %v2685_v11, 0.0  ;;  %v2736_v61 = vsel %vm171_vm0, %v2689_v39, 0.0 }
 0x27e   :  { %v2703_v51 = vadd.f32 %v2702_v58, %v2701_v3  ;;  %v2716_v60 = vadd.f32 %v2715_v41, %v2714_v63  ;;  %v2738_v43 = vsel %vm171_vm0, %v2693_v7, 0.0  ;;  %v2729_v25 = vadd.f32 %v2728_v46, %v2727_v24  ;;  %v14433_v41 = vld [vmem:[#allocation88_spill] sm:$0xff]  ;;  %v14436_v63 = vld [vmem:[#allocation46_spill] sm:$0xff] }
 0x27f   :  { %v2740_v13 = vsel %vm171_vm0, %v9471_v48, 0.0  ;;  %v2741_v5 = vsel %vm171_vm0, %v9480_v50, 0.0  ;;  %v2743_v6 = vsel %vm171_vm0, %v2674_v26, 0.0  ;;  %v2745_v11 = vsel %vm171_vm0, %v2678_v15, 0.0  ;;  %v14432_v26 = vld [vmem:[#allocation87_spill] sm:$0xff]  ;;  %v14434_v15 = vld [vmem:[#allocation42_spill] sm:$0xff] }
 0x280   :  { %v2705_v44 = vadd.f32 %v2704_v30, %v2703_v51  ;;  %v2718_v27 = vadd.f32 %v2717_v56, %v2716_v60  ;;  %v2742_v45 = vadd.f32 %v2741_v5, %v2740_v13  ;;  %v2731_v58 = vadd.f32 %v2730_v20, %v2729_v25  ;;  %v14438_v24 = vld [vmem:[#allocation52_spill] sm:$0xff] }
 0x281   :  { %v2747_v12 = vsel %vm171_vm0, %v2682_v18, 0.0  ;;  %v2749_v39 = vsel %vm171_vm0, %v2686_v28, 0.0  ;;  %v2751_v7 = vsel %vm171_vm0, %v2690_v16, 0.0  ;;  %v2753_v52 = vsel %vm171_vm0, %v2694_v34, 0.0  ;;  %v14435_v16 = vld [vmem:[#allocation44_spill] sm:$0xff] }
 0x282   :  { %v2707_v47 = vadd.f32 %v2706_v0, %v2705_v44  ;;  %v2720_v37 = vadd.f32 %v2719_v10, %v2718_v27  ;;  %v2744_v48 = vadd.f32 %v2743_v6, %v2742_v45  ;;  %v2733_v50 = vadd.f32 %v2732_v59, %v2731_v58  ;;  %v14440_v27 = vld [vmem:[#allocation71_spill] sm:$0xff] }
 0x283   :  { %v2766_v30 = vrot.slane %v14432_v26, %v14240_v57  ;;  %v2770_v56 = vrot.slane %v14433_v41, %v14240_v57  ;;  %v2774_v9 = vrot.slane %v14434_v15, %v14240_v57  ;;  %v2778_v0 = vrot.slane %v14435_v16, %v14240_v57 }
 0x284   :  { %v2709_v18 = vadd.f32 %v2708_v53, %v2707_v47  ;;  %v2722_v3 = vadd.f32 %v2721_v4, %v2720_v37  ;;  %v2746_v28 = vadd.f32 %v2745_v11, %v2744_v48  ;;  %v2735_v10 = vadd.f32 %v2734_v29, %v2733_v50  ;;  %v14439_v53 = vld [vmem:[#allocation55_spill] sm:$0xff]  ;;  %v14442_v37 = vld [vmem:[#allocation72_spill] sm:$0xff] }
 0x285   :  { %v2782_v34 = vrot.slane %v14436_v63, %v14240_v57  ;;  %v2786_v46 = vrot.slane %v14437_v19, %v14240_v57  ;;  %v2790_v20 = vrot.slane %v14438_v24, %v14240_v57  ;;  %v2794_v4 = vrot.slane %v14439_v53, %v14240_v57  ;;  %v14451_v53 = vld [vmem:[#allocation99_spill] sm:$0xff]  ;;  %v14452_v19 = vld [vmem:[#allocation100_spill] sm:$0xff] }
 0x286   :  { %v2724_v59 = vadd.f32 %v2723_v2, %v2722_v3  ;;  %v2748_v51 = vadd.f32 %v2747_v12, %v2746_v28  ;;  %v2755_v60 = vmul.f32 0.01, %v2709_v18  ;;  %v2737_v25 = vadd.f32 %v2736_v61, %v2735_v10 }
 0x287   :  { %v2795_v13 = vmul.f32 %v9190_v21, %v2766_v30  ;;  %v2796_v29 = vmul.f32 %v9198_v62, %v2766_v30  ;;  %v2797_v5 = vmul.f32 %v9206_v40, %v2766_v30  ;;  %v9569_v11 = vmul.f32 %v9214_v49, %v2766_v30 }
 0x288   :  { %v2750_v6 = vadd.f32 %v2749_v39, %v2748_v51  ;;  %v2756_v44 = vmul.f32 0.01, %v2724_v59  ;;  %v9566_v45 = vsub.f32 %v14440_v27, %v2755_v60  ;;  %v2739_v2 = vadd.f32 %v2738_v43, %v2737_v25  ;;  %v14444_v51 = vld [vmem:[#allocation73_spill] sm:$0xff]  ;;  %v14446_v25 = vld [vmem:[#allocation94_spill] sm:$0xff] }
 0x289   :  { %v2799_v58 = vmul.f32 %v9222_v33, %v2770_v56  ;;  %v2800_v12 = vmul.f32 %v9228_v32, %v2770_v56  ;;  %v2801_v61 = vmul.f32 %v9236_v1, %v2770_v56  ;;  %v9578_v39 = vmul.f32 %v9244_v54, %v2770_v56 }
 0x28a   :  { %14441 = vst [vmem:[#allocation70_spill] sm:$0xff] %v9566_v45  ;;  %v2752_v47 = vadd.f32 %v2751_v7, %v2750_v6  ;;  %v9575_v48 = vsub.f32 %v14442_v37, %v2756_v44  ;;  %v2803_v50 = vmul.f32 %v9252_v42, %v2774_v9  ;;  %v2757_v18 = vmul.f32 0.01, %v2739_v2  ;;  %v14447_v44 = vld [vmem:[#allocation95_spill] sm:$0xff]  ;;  %v14448_v37 = vld [vmem:[#allocation96_spill] sm:$0xff] }
 0x28b   :  { %v2804_v30 = vmul.f32 %v9258_v31, %v2774_v9  ;;  %v2805_v43 = vmul.f32 %v9264_v55, %v2774_v9  ;;  %v2806_v3 = vmul.f32 %v9272_v14, %v2774_v9  ;;  %v2807_v10 = vmul.f32 %v14408_v22, %v2778_v0  ;;  %v14449_v9 = vld [vmem:[#allocation97_spill] sm:$0xff] }
 0x28c   :  { %14443 = vst [vmem:[#allocation103_spill] sm:$0xff] %v9575_v48  ;;  %v2754_v28 = vadd.f32 %v2753_v52, %v2752_v47  ;;  %v2808_v7 = vmul.f32 %v14409_v35, %v2778_v0  ;;  %v2809_v59 = vmul.f32 %v14410_v23, %v2778_v0  ;;  %v9588_v60 = vsub.f32 %v14444_v51, %v2757_v18  ;;  %v14450_v47 = vld [vmem:[#allocation98_spill] sm:$0xff] }
 0x28d   :  { %v2810_v56 = vmul.f32 %v14413_v8, %v2778_v0  ;;  %v2811_v6 = vmul.f32 %v14446_v25, %v2782_v34  ;;  %v2812_v27 = vmul.f32 %v14447_v44, %v2782_v34  ;;  %v2813_v48 = vmul.f32 %v14448_v37, %v2782_v34  ;;  %v14453_v51 = vld [vmem:[#allocation102_spill] sm:$0xff] }
 0x28e   :  { %14445 = vst [vmem:[#allocation105_spill] sm:$0xff] %v9588_v60  ;;  %v2758_v2 = vmul.f32 0.01, %v2754_v28  ;;  %v2814_v52 = vmul.f32 %v14449_v9, %v2782_v34  ;;  %v2815_v45 = vmul.f32 %v14450_v47, %v2786_v46  ;;  %v2816_v24 = vmul.f32 %v14451_v53, %v2786_v46  ;;  %v14454_v0 = vld [vmem:[#allocation82_spill] sm:$0xff]  ;;  %v14456_v28 = vld [vmem:[#allocation104_spill] sm:$0xff]  ;;  %v14458_v47 = vld [vmem:[#allocation107_spill] sm:$0xff] }
 0x28f   :  { %v2817_v63 = vmul.f32 %v14452_v19, %v2786_v46  ;;  %v2818_v18 = vmul.f32 %v14421_v36, %v2786_v46  ;;  %v2819_v60 = vmul.f32 %v14453_v51, %v2790_v20  ;;  %v2820_v16 = vmul.f32 %v14425_v17, %v2790_v20  ;;  %v14457_v34 = vld [vmem:[#allocation106_spill] sm:$0xff]  ;;  %v14459_v53 = vld [vmem:[#allocation108_spill] sm:$0xff]  ;;  %v14460_v19 = vld [vmem:[#allocation109_spill] sm:$0xff] }
 0x290   :  { %v9601_v26 = vsub.f32 %v14454_v0, %v2758_v2  ;;  %v2821_v15 = vmul.f32 %v14456_v28, %v2790_v20  ;;  %v2822_v41 = vmul.f32 %v14427_v38, %v2790_v20  ;;  %v2823_v9 = vmul.f32 %v14457_v34, %v2794_v4 }
 0x291   :  { %v2824_v37 = vmul.f32 %v14458_v47, %v2794_v4  ;;  %v2825_v44 = vmul.f32 %v14459_v53, %v2794_v4  ;;  %v2826_v25 = vmul.f32 %v14460_v19, %v2794_v4  ;;  %v2827_v46 = vsel %vm171_vm0, %v2795_v13, 0.0 }
 0x292   :  { %14455 = vst [vmem:[#allocation71_spill] sm:$0xff] %v9601_v26  ;;  %v2828_v51 = vsel %vm171_vm0, %v2799_v58, 0.0  ;;  %v2830_v2 = vsel %vm171_vm0, %v2803_v50, 0.0  ;;  %v2832_v0 = vsel %vm171_vm0, %v2807_v10, 0.0  ;;  %v2834_v28 = vsel %vm171_vm0, %v2811_v6, 0.0 }
 0x293   :  { %v2829_v26 = vadd.f32 %v2828_v51, %v2827_v46  ;;  %v2836_v20 = vsel %vm171_vm0, %v2815_v45, 0.0  ;;  %v2838_v34 = vsel %vm171_vm0, %v2819_v60, 0.0  ;;  %v2840_v47 = vsel %vm171_vm0, %v2823_v9, 0.0 }
 0x294   :  { %v2842_v53 = vsel %vm171_vm0, %v2796_v29, 0.0  ;;  %v2843_v4 = vsel %vm171_vm0, %v2800_v12, 0.0  ;;  %v2845_v13 = vsel %vm171_vm0, %v2804_v30, 0.0  ;;  %v2847_v50 = vsel %vm171_vm0, %v2808_v7, 0.0 }
 0x295   :  { %v2831_v58 = vadd.f32 %v2830_v2, %v2829_v26  ;;  %v2844_v19 = vadd.f32 %v2843_v4, %v2842_v53  ;;  %v2849_v10 = vsel %vm171_vm0, %v2812_v27, 0.0  ;;  %v2851_v6 = vsel %vm171_vm0, %v2816_v24, 0.0 }
 0x296   :  { %v2853_v45 = vsel %vm171_vm0, %v2820_v16, 0.0  ;;  %v2855_v60 = vsel %vm171_vm0, %v2824_v37, 0.0  ;;  %v2857_v9 = vsel %vm171_vm0, %v2797_v5, 0.0  ;;  %v2858_v12 = vsel %vm171_vm0, %v2801_v61, 0.0 }
 0x297   :  { %v2833_v51 = vadd.f32 %v2832_v0, %v2831_v58  ;;  %v2846_v29 = vadd.f32 %v2845_v13, %v2844_v19  ;;  %v2860_v30 = vsel %vm171_vm0, %v2805_v43, 0.0  ;;  %v2859_v26 = vadd.f32 %v2858_v12, %v2857_v9  ;;  %v14466_v12 = vld [vmem:[#allocation59_spill] sm:$0xff] }
 0x298   :  { %v2862_v53 = vsel %vm171_vm0, %v2809_v59, 0.0  ;;  %v2864_v7 = vsel %vm171_vm0, %v2813_v48, 0.0  ;;  %v2866_v27 = vsel %vm171_vm0, %v2817_v63, 0.0  ;;  %v2868_v16 = vsel %vm171_vm0, %v2821_v15, 0.0 }
 0x299   :  { %v2835_v24 = vadd.f32 %v2834_v28, %v2833_v51  ;;  %v2848_v46 = vadd.f32 %v2847_v50, %v2846_v29  ;;  %v2870_v37 = vsel %vm171_vm0, %v2825_v44, 0.0  ;;  %v2861_v5 = vadd.f32 %v2860_v30, %v2859_v26  ;;  %v14462_v50 = vld [vmem:[#allocation57_spill] sm:$0xff] }
 0x29a   :  { %v2872_v19 = vsel %vm171_vm0, %v9569_v11, 0.0  ;;  %v2873_v61 = vsel %vm171_vm0, %v9578_v39, 0.0  ;;  %v2875_v43 = vsel %vm171_vm0, %v2806_v3, 0.0  ;;  %v2877_v63 = vsel %vm171_vm0, %v2810_v56, 0.0  ;;  %v14461_v3 = vld [vmem:[#allocation54_spill] sm:$0xff]  ;;  %v14463_v56 = vld [vmem:[#allocation43_spill] sm:$0xff] }
 0x29b   :  { %v2837_v59 = vadd.f32 %v2836_v20, %v2835_v24  ;;  %v2850_v2 = vadd.f32 %v2849_v10, %v2848_v46  ;;  %v2874_v48 = vadd.f32 %v2873_v61, %v2872_v19  ;;  %v2863_v28 = vadd.f32 %v2862_v53, %v2861_v5  ;;  %v14465_v29 = vld [vmem:[#allocation41_spill] sm:$0xff] }
 0x29c   :  { %v2879_v0 = vsel %vm171_vm0, %v2814_v52, 0.0  ;;  %v2881_v15 = vsel %vm171_vm0, %v2818_v18, 0.0  ;;  %v2883_v44 = vsel %vm171_vm0, %v2822_v41, 0.0  ;;  %v2885_v58 = vsel %vm171_vm0, %v2826_v25, 0.0  ;;  %v14464_v41 = vld [vmem:[#allocation58_spill] sm:$0xff]  ;;  %v14467_v26 = vld [vmem:[#allocation45_spill] sm:$0xff] }
 0x29d   :  { %v2839_v4 = vadd.f32 %v2838_v34, %v2837_v59  ;;  %v2852_v13 = vadd.f32 %v2851_v6, %v2850_v2  ;;  %v2876_v11 = vadd.f32 %v2875_v43, %v2874_v48  ;;  %v2865_v39 = vadd.f32 %v2864_v7, %v2863_v28  ;;  %v14469_v2 = vld [vmem:[#allocation84_spill] sm:$0xff] }
 0x29e   :  { %v2898_v20 = vrot.slane %v14461_v3, %v14240_v57  ;;  %v2902_v10 = vrot.slane %v14462_v50, %v14240_v57  ;;  %v2906_v9 = vrot.slane %v14463_v56, %v14240_v57  ;;  %v2910_v34 = vrot.slane %v14464_v41, %v14240_v57 }
 0x29f   :  { %v2841_v52 = vadd.f32 %v2840_v47, %v2839_v4  ;;  %v2854_v51 = vadd.f32 %v2853_v45, %v2852_v13  ;;  %v2878_v18 = vadd.f32 %v2877_v63, %v2876_v11  ;;  %v2867_v6 = vadd.f32 %v2866_v27, %v2865_v39  ;;  %v14468_v47 = vld [vmem:[#allocation56_spill] sm:$0xff] }
 0x2a0   :  { %v2914_v25 = vrot.slane %v14465_v29, %v14240_v57  ;;  %v2918_v30 = vrot.slane %v14466_v12, %v14240_v57  ;;  %v2922_v53 = vrot.slane %v14467_v26, %v14240_v57  ;;  %v2926_v45 = vrot.slane %v14468_v47, %v14240_v57  ;;  %v14471_v13 = vld [vmem:[#allocation4_spill] sm:$0xff]  ;;  %v14480_v57 = vld [vmem:[#allocation99_spill] sm:$0xff] }
 0x2a1   :  { %v2856_v7 = vadd.f32 %v2855_v60, %v2854_v51  ;;  %v2880_v24 = vadd.f32 %v2879_v0, %v2878_v18  ;;  %v2887_v46 = vmul.f32 0.01, %v2841_v52  ;;  %v2869_v5 = vadd.f32 %v2868_v16, %v2867_v6 }
 0x2a2   :  { %v2927_v19 = vmul.f32 %v9190_v21, %v2898_v20  ;;  %v2928_v27 = vmul.f32 %v9198_v62, %v2898_v20  ;;  %v2929_v61 = vmul.f32 %v9206_v40, %v2898_v20  ;;  %v9667_v63 = vmul.f32 %v9214_v49, %v2898_v20 }
 0x2a3   :  { %v2882_v43 = vadd.f32 %v2881_v15, %v2880_v24  ;;  %v2888_v59 = vmul.f32 0.01, %v2856_v7  ;;  %v9664_v48 = vsub.f32 %v14469_v2, %v2887_v46  ;;  %v2871_v60 = vadd.f32 %v2870_v37, %v2869_v5  ;;  %v14473_v24 = vld [vmem:[#allocation5_spill] sm:$0xff]  ;;  %v14475_v5 = vld [vmem:[#allocation94_spill] sm:$0xff] }
 0x2a4   :  { %v2931_v28 = vmul.f32 %v9222_v33, %v2902_v10  ;;  %v2932_v0 = vmul.f32 %v9228_v32, %v2902_v10  ;;  %v2933_v16 = vmul.f32 %v9236_v1, %v2902_v10  ;;  %v9676_v15 = vmul.f32 %v9244_v54, %v2902_v10 }
 0x2a5   :  { %14470 = vst [vmem:[#allocation72_spill] sm:$0xff] %v9664_v48  ;;  %v2884_v4 = vadd.f32 %v2883_v44, %v2882_v43  ;;  %v9673_v11 = vsub.f32 %v14471_v13, %v2888_v59  ;;  %v2935_v39 = vmul.f32 %v9252_v42, %v2906_v9  ;;  %v2889_v52 = vmul.f32 0.01, %v2871_v60  ;;  %v14476_v59 = vld [vmem:[#allocation95_spill] sm:$0xff]  ;;  %v14477_v13 = vld [vmem:[#allocation96_spill] sm:$0xff] }
 0x2a6   :  { %v2936_v20 = vmul.f32 %v9258_v31, %v2906_v9  ;;  %v2937_v37 = vmul.f32 %v9264_v55, %v2906_v9  ;;  %v2938_v51 = vmul.f32 %v9272_v14, %v2906_v9  ;;  %v2939_v6 = vmul.f32 %v14408_v22, %v2910_v34  ;;  %v14478_v9 = vld [vmem:[#allocation97_spill] sm:$0xff]  ;;  %v14481_v22 = vld [vmem:[#allocation100_spill] sm:$0xff] }
 0x2a7   :  { %14472 = vst [vmem:[#allocation73_spill] sm:$0xff] %v9673_v11  ;;  %v2886_v18 = vadd.f32 %v2885_v58, %v2884_v4  ;;  %v2940_v44 = vmul.f32 %v14409_v35, %v2910_v34  ;;  %v2941_v7 = vmul.f32 %v14410_v23, %v2910_v34  ;;  %v9686_v46 = vsub.f32 %v14473_v24, %v2889_v52  ;;  %v14479_v4 = vld [vmem:[#allocation98_spill] sm:$0xff] }
 0x2a8   :  { %v2942_v10 = vmul.f32 %v14413_v8, %v2910_v34  ;;  %v2943_v43 = vmul.f32 %v14475_v5, %v2914_v25  ;;  %v2944_v2 = vmul.f32 %v14476_v59, %v2914_v25  ;;  %v2945_v11 = vmul.f32 %v14477_v13, %v2914_v25  ;;  %v14482_v24 = vld [vmem:[#allocation102_spill] sm:$0xff] }
 0x2a9   :  { %14474 = vst [vmem:[#allocation82_spill] sm:$0xff] %v9686_v46  ;;  %v2890_v60 = vmul.f32 0.01, %v2886_v18  ;;  %v2946_v58 = vmul.f32 %v14478_v9, %v2914_v25  ;;  %v2947_v48 = vmul.f32 %v14479_v4, %v2918_v30  ;;  %v2948_v35 = vmul.f32 %v14480_v57, %v2918_v30  ;;  %v14483_v34 = vld [vmem:[#allocation6_spill] sm:$0xff]  ;;  %v14485_v18 = vld [vmem:[#allocation104_spill] sm:$0xff]  ;;  %v14487_v4 = vld [vmem:[#allocation107_spill] sm:$0xff] }
 0x2aa   :  { %v2949_v23 = vmul.f32 %v14481_v22, %v2918_v30  ;;  %v2950_v52 = vmul.f32 %v14421_v36, %v2918_v30  ;;  %v2951_v46 = vmul.f32 %v14482_v24, %v2922_v53  ;;  %v2952_v59 = vmul.f32 %v14425_v17, %v2922_v53  ;;  %v14486_v25 = vld [vmem:[#allocation106_spill] sm:$0xff]  ;;  %v14488_v57 = vld [vmem:[#allocation108_spill] sm:$0xff]  ;;  %v14489_v22 = vld [vmem:[#allocation109_spill] sm:$0xff] }
 0x2ab   :  { %v9699_v8 = vsub.f32 %v14483_v34, %v2890_v60  ;;  %v2953_v5 = vmul.f32 %v14485_v18, %v2922_v53  ;;  %v2954_v13 = vmul.f32 %v14427_v38, %v2922_v53  ;;  %v2955_v9 = vmul.f32 %v14486_v25, %v2926_v45 }
 0x2ac   :  { %v2956_v14 = vmul.f32 %v14487_v4, %v2926_v45  ;;  %v2957_v55 = vmul.f32 %v14488_v57, %v2926_v45  ;;  %v2958_v31 = vmul.f32 %v14489_v22, %v2926_v45  ;;  %v2959_v30 = vsel %vm171_vm0, %v2927_v19, 0.0 }
 0x2ad   :  { %14484 = vst [vmem:[#allocation54_spill] sm:$0xff] %v9699_v8  ;;  %v2960_v24 = vsel %vm171_vm0, %v2931_v28, 0.0  ;;  %v2962_v60 = vsel %vm171_vm0, %v2935_v39, 0.0  ;;  %v2964_v34 = vsel %vm171_vm0, %v2939_v6, 0.0  ;;  %v2966_v18 = vsel %vm171_vm0, %v2943_v43, 0.0 }
 0x2ae   :  { %v2961_v8 = vadd.f32 %v2960_v24, %v2959_v30  ;;  %v2968_v53 = vsel %vm171_vm0, %v2947_v48, 0.0  ;;  %v2970_v25 = vsel %vm171_vm0, %v2951_v46, 0.0  ;;  %v2972_v4 = vsel %vm171_vm0, %v2955_v9, 0.0 }
 0x2af   :  { %v2974_v57 = vsel %vm171_vm0, %v2928_v27, 0.0  ;;  %v2975_v22 = vsel %vm171_vm0, %v2932_v0, 0.0  ;;  %v2977_v45 = vsel %vm171_vm0, %v2936_v20, 0.0  ;;  %v2979_v39 = vsel %vm171_vm0, %v2940_v44, 0.0 }
 0x2b0   :  { %v2963_v19 = vadd.f32 %v2962_v60, %v2961_v8  ;;  %v2976_v28 = vadd.f32 %v2975_v22, %v2974_v57  ;;  %v2981_v6 = vsel %vm171_vm0, %v2944_v2, 0.0  ;;  %v2983_v43 = vsel %vm171_vm0, %v2948_v35, 0.0 }
 0x2b1   :  { %v2985_v48 = vsel %vm171_vm0, %v2952_v59, 0.0  ;;  %v2987_v46 = vsel %vm171_vm0, %v2956_v14, 0.0  ;;  %v2989_v9 = vsel %vm171_vm0, %v2929_v61, 0.0  ;;  %v2990_v0 = vsel %vm171_vm0, %v2933_v16, 0.0 }
 0x2b2   :  { %v2965_v24 = vadd.f32 %v2964_v34, %v2963_v19  ;;  %v2978_v27 = vadd.f32 %v2977_v45, %v2976_v28  ;;  %v2992_v20 = vsel %vm171_vm0, %v2937_v37, 0.0  ;;  %v2991_v8 = vadd.f32 %v2990_v0, %v2989_v9  ;;  %v14492_v9 = vld [vmem:[#allocation75_spill] sm:$0xff] }
 0x2b3   :  { %v2994_v30 = vsel %vm171_vm0, %v2941_v7, 0.0  ;;  %v2996_v44 = vsel %vm171_vm0, %v2945_v11, 0.0  ;;  %v2998_v2 = vsel %vm171_vm0, %v2949_v23, 0.0  ;;  %v3000_v59 = vsel %vm171_vm0, %v2953_v5, 0.0 }
 0x2b4   :  { %v2967_v35 = vadd.f32 %v2966_v18, %v2965_v24  ;;  %v2980_v60 = vadd.f32 %v2979_v39, %v2978_v27  ;;  %v3002_v14 = vsel %vm171_vm0, %v2957_v55, 0.0  ;;  %v2993_v61 = vadd.f32 %v2992_v20, %v2991_v8  ;;  %v14490_v39 = vld [vmem:[#allocation63_spill] sm:$0xff]  ;;  %v14494_v8 = vld [vmem:[#allocation61_spill] sm:$0xff] }
 0x2b5   :  { %v3004_v34 = vsel %vm171_vm0, %v9667_v63, 0.0  ;;  %v3005_v16 = vsel %vm171_vm0, %v9676_v15, 0.0  ;;  %v3007_v37 = vsel %vm171_vm0, %v2938_v51, 0.0  ;;  %v3009_v23 = vsel %vm171_vm0, %v2942_v10, 0.0 }
 0x2b6   :  { %v2969_v7 = vadd.f32 %v2968_v53, %v2967_v35  ;;  %v2982_v57 = vadd.f32 %v2981_v6, %v2980_v60  ;;  %v3006_v11 = vadd.f32 %v3005_v16, %v3004_v34  ;;  %v2995_v18 = vadd.f32 %v2994_v30, %v2993_v61  ;;  %v14491_v53 = vld [vmem:[#allocation68_spill] sm:$0xff]  ;;  %v14496_v30 = vld [vmem:[#allocation81_spill] sm:$0xff] }
 0x2b7   :  { %v3011_v22 = vsel %vm171_vm0, %v2946_v58, 0.0  ;;  %v3013_v5 = vsel %vm171_vm0, %v2950_v52, 0.0  ;;  %v3015_v55 = vsel %vm171_vm0, %v2954_v13, 0.0  ;;  %v3017_v28 = vsel %vm171_vm0, %v2958_v31, 0.0  ;;  %v14493_v58 = vld [vmem:[#allocation77_spill] sm:$0xff] }
 0x2b8   :  { %v2971_v45 = vadd.f32 %v2970_v25, %v2969_v7  ;;  %v2984_v19 = vadd.f32 %v2983_v43, %v2982_v57  ;;  %v3008_v63 = vadd.f32 %v3007_v37, %v3006_v11  ;;  %v2997_v15 = vadd.f32 %v2996_v44, %v2995_v18  ;;  %v14495_v25 = vld [vmem:[#allocation79_spill] sm:$0xff] }
 0x2b9   :  { %v3035_v51 = vrot.slane %v14490_v39, 7  ;;  %v3037_v6 = vrot.slane %v14491_v53, 6  ;;  %v3039_v24 = vrot.slane %v14492_v9, 5  ;;  %v3041_v20 = vrot.slane %v14493_v58, 4  ;;  %v14498_v37 = vld [vmem:[#allocation67_spill] sm:$0xff]  ;;  %v14503_v39 = vld [vmem:[#allocation9_spill] sm:$0xff] }
 0x2ba   :  { %v2973_v10 = vadd.f32 %v2972_v4, %v2971_v45  ;;  %v2986_v27 = vadd.f32 %v2985_v48, %v2984_v19  ;;  %v3010_v0 = vadd.f32 %v3009_v23, %v3008_v63  ;;  %v2999_v52 = vadd.f32 %v2998_v2, %v2997_v15  ;;  %v14497_v48 = vld [vmem:[#allocation85_spill] sm:$0xff]  ;;  %v14499_v11 = vld [vmem:[#allocation7_spill] sm:$0xff]  ;;  %v14505_v53 = vld [vmem:[#allocation76_spill] sm:$0xff] }
 0x2bb   :  { %v3036_v13 = vsel %vm1557_vm5, %v3035_v51, %v14494_v8  ;;  %v3043_v43 = vrot.slane %v14495_v25, 3  ;;  %v3045_v31 = vrot.slane %v14496_v30, 2  ;;  %v3047_v16 = vrot.slane %v14497_v48, 1  ;;  %v14508_v8 = vld [vmem:[#allocation64_spill] sm:$0xff]  ;;  %v14510_v30 = vld [vmem:[#allocation83_spill] sm:$0xff] }
 0x2bc   :  { %v2988_v44 = vadd.f32 %v2987_v46, %v2986_v27  ;;  %v3012_v35 = vadd.f32 %v3011_v22, %v3010_v0  ;;  %v3019_v60 = vmul.f32 0.01, %v2973_v10  ;;  %v3038_v61 = vsel %vm1560_vm6, %v3037_v6, %v3036_v13  ;;  %v14501_v22 = vld [vmem:[#allocation62_spill] sm:$0xff] }
 0x2bd   :  { %v3001_v34 = vadd.f32 %v3000_v59, %v2999_v52  ;;  %v3040_v4 = vsel %vm1563_vm7, %v3039_v24, %v3038_v61  ;;  %v3067_v7 = vrot.slane %v14498_v37, 7  ;;  %v14502_v59 = vld [vmem:[#allocation48_spill] sm:$0xff]  ;;  %v3071_v6 = vrot.slane %v14505_v53, 5  ;;  %v14506_v10 = vld [vmem:[#allocation78_spill] sm:$0xff] }
 0x2be   :  { %v3014_v2 = vadd.f32 %v3013_v5, %v3012_v35  ;;  %v3020_v57 = vmul.f32 0.01, %v2988_v44  ;;  %v9755_v23 = vsub.f32 %v14499_v11, %v3019_v60  ;;  %v3042_v18 = vsel %vm1566_vm8, %v3041_v20, %v3040_v4  ;;  %v14511_v60 = vld [vmem:[#allocation86_spill] sm:$0xff] }
 0x2bf   :  { %v3003_v45 = vadd.f32 %v3002_v14, %v3001_v34  ;;  %v3044_v46 = vsel %vm1569_vm9, %v3043_v43, %v3042_v18  ;;  %v3068_v19 = vsel %vm1557_vm5, %v3067_v7, %v14501_v22  ;;  %v3069_v63 = vrot.slane %v14502_v59, 6  ;;  %v14514_v7 = vld [vmem:[#allocation44_spill] sm:$0xff]  ;;  %v14518_v22 = vld [vmem:[#allocation46_spill] sm:$0xff] }
 0x2c0   :  { %14500 = vst [vmem:[#allocation57_spill] sm:$0xff] %v9755_v23  ;;  %v3016_v15 = vadd.f32 %v3015_v55, %v3014_v2  ;;  %v9763_v51 = vsub.f32 %v14503_v39, %v3020_v57  ;;  %v3046_v5 = vsel %vm1572_vm10, %v3045_v31, %v3044_v46  ;;  %v3073_v27 = vrot.slane %v14506_v10, 4  ;;  %v14507_v55 = vld [vmem:[#allocation80_spill] sm:$0xff]  ;;  %v14515_v57 = vld [vmem:[#allocation65_spill] sm:$0xff] }
 0x2c1   :  { %v3021_v9 = vmul.f32 0.01, %v3003_v45  ;;  %v3048_v24 = vsel %vm1575_vm11, %v3047_v16, %v3046_v5  ;;  %v3070_v14 = vsel %vm1560_vm6, %v3069_v63, %v3068_v19  ;;  %v3075_v52 = vrot.slane %v14507_v55, 3  ;;  %v14513_v16 = vld [vmem:[#allocation42_spill] sm:$0xff]  ;;  %v14517_v45 = vld [vmem:[#allocation87_spill] sm:$0xff]  ;;  %v14519_v39 = vld [vmem:[#allocation53_spill] sm:$0xff] }
 0x2c2   :  { %14504 = vst [vmem:[#allocation43_spill] sm:$0xff] %v9763_v51  ;;  %v3018_v0 = vadd.f32 %v3017_v28, %v3016_v15  ;;  %v3050_v58 = vsel %vm171_vm0, %v3048_v24, 0.0  ;;  %v3072_v20 = vsel %vm1563_vm7, %v3071_v6, %v3070_v14  ;;  %v3077_v31 = vrot.slane %v14510_v30, 2  ;;  %v14512_v28 = vld [vmem:[#allocation88_spill] sm:$0xff]  ;;  %v14521_v14 = vld [vmem:[#allocation55_spill] sm:$0xff] }
 0x2c3   :  { %v9774_v13 = vsub.f32 %v14508_v8, %v3021_v9  ;;  %v3051_v25 = vrot.slane %v3050_v58, 4  ;;  %v3074_v43 = vsel %vm1566_vm8, %v3073_v27, %v3072_v20  ;;  %v3079_v61 = vrot.slane %v14511_v60, 1  ;;  %v14520_v9 = vld [vmem:[#allocation52_spill] sm:$0xff]  ;;  %v10196_v51 = vld [vmem:[%s13300_s0 + $0xc8] sm:$0xff] }
 0x2c4   :  { %v3022_v44 = vmul.f32 0.01, %v3018_v0  ;;  %v3076_v35 = vsel %vm1569_vm9, %v3075_v52, %v3074_v43  ;;  %v3099_v34 = vrot.slane %v14512_v28, 7  ;;  %v3101_v37 = vrot.slane %v14513_v16, 6  ;;  %14575 = vst [vmem:[#allocation76_spill] sm:$0xff] %v10196_v51 }
 0x2c5   :  { %14509 = vst [vmem:[#allocation58_spill] sm:$0xff] %v9774_v13  ;;  %v3052_v4 = vadd.f32 %v3051_v25, %v3050_v58  ;;  %v3078_v48 = vsel %vm1572_vm10, %v3077_v31, %v3076_v35  ;;  %v3103_v2 = vrot.slane %v14514_v7, 5  ;;  %v3105_v19 = vrot.slane %v14518_v22, 4  ;;  %v14523_v7 = vld [vmem:[#allocation90_spill] sm:$0xff] }
 0x2c6   :  { %v9785_v11 = vsub.f32 %v14515_v57, %v3022_v44  ;;  %v3080_v18 = vsel %vm1575_vm11, %v3079_v61, %v3078_v48  ;;  %v3100_v46 = vsel %vm1557_vm5, %v3099_v34, %v14517_v45  ;;  %v3107_v5 = vrot.slane %v14519_v39, 3  ;;  %v14522_v48 = vld [vmem:[#allocation89_spill] sm:$0xff] }
 0x2c7   :  { %v3053_v59 = vrot.slane %v3052_v4, 2  ;;  %v3082_v63 = vsel %vm171_vm0, %v3080_v18, 0.0  ;;  %v3102_v15 = vsel %vm1560_vm6, %v3101_v37, %v3100_v46  ;;  %v3109_v24 = vrot.slane %v14520_v9, 2  ;;  %v14525_v46 = vld [vmem:[#allocation101_spill] sm:$0xff]  ;;  %v14528_v9 = vld [vmem:[#allocation47_spill] sm:$0xff] }
 0x2c8   :  { %14516 = vst [vmem:[#allocation41_spill] sm:$0xff] %v9785_v11  ;;  %v3083_v53 = vrot.slane %v3082_v63, 4  ;;  %v3104_v6 = vsel %vm1563_vm7, %v3103_v2, %v3102_v15  ;;  %v3111_v10 = vrot.slane %v14521_v14, 1  ;;  %v3131_v58 = vrot.slane %v14462_v50, 7  ;;  %v14524_v2 = vld [vmem:[#allocation69_spill] sm:$0xff]  ;;  %v10187_v11 = vld [vmem:[%s13300_s0 + $0xc0] sm:$0xff] }
 0x2c9   :  { %v3054_v27 = vadd.f32 %v3053_v59, %v3052_v4  ;;  %v3106_v0 = vsel %vm1566_vm8, %v3105_v19, %v3104_v6  ;;  %v3133_v20 = vrot.slane %v14463_v56, 6  ;;  %v3135_v8 = vrot.slane %v14464_v41, 5  ;;  %v14526_v19 = vld [vmem:[#allocation66_spill] sm:$0xff]  ;;  %14574 = vst [vmem:[#allocation9_spill] sm:$0xff] %v10187_v11 }
 0x2ca   :  { %v3084_v55 = vadd.f32 %v3083_v53, %v3082_v63  ;;  %v3108_v52 = vsel %vm1569_vm9, %v3107_v5, %v3106_v0  ;;  %v3137_v25 = vrot.slane %v14465_v29, 4  ;;  %v3132_v31 = vsel %vm1557_vm5, %v3131_v58, %v14461_v3 }
 0x2cb   :  { %v3055_v43 = vrot.slane %v3054_v27, 1  ;;  %v3110_v30 = vsel %vm1572_vm10, %v3109_v24, %v3108_v52  ;;  %v3139_v44 = vrot.slane %v14466_v12, 3  ;;  %v3134_v56 = vsel %vm1560_vm6, %v3133_v20, %v3132_v31 }
 0x2cc   :  { %v3085_v35 = vrot.slane %v3084_v55, 2  ;;  %v3112_v50 = vsel %vm1575_vm11, %v3111_v10, %v3110_v30  ;;  %v3141_v60 = vrot.slane %v14467_v26, 2  ;;  %v3136_v29 = vsel %vm1563_vm7, %v3135_v8, %v3134_v56  ;;  %v14534_v8 = vld [vmem:[#allocation74_spill] sm:$0xff]  ;;  %v14536_v30 = vld [vmem:[#allocation93_spill] sm:$0xff]  ;;  %v14538_v56 = vld [vmem:[#allocation95_spill] sm:$0xff] }
 0x2cd   :  { %v3056_v61 = vadd.f32 %v3055_v43, %v3054_v27  ;;  %v3114_v41 = vsel %vm171_vm0, %v3112_v50, 0.0  ;;  %v3143_v28 = vrot.slane %v14468_v47, 1  ;;  %v3138_v3 = vsel %vm1566_vm8, %v3137_v25, %v3136_v29  ;;  %v14530_v27 = vld [vmem:[#allocation49_spill] sm:$0xff] }
 0x2ce   :  { %v3086_v34 = vadd.f32 %v3085_v35, %v3084_v55  ;;  %v3115_v4 = vrot.slane %v3114_v41, 4  ;;  %v3155_v12 = vmul.f32 %v9190_v21, %v14522_v48  ;;  %v3140_v37 = vsel %vm1569_vm9, %v3139_v44, %v3138_v3  ;;  %v14537_v44 = vld [vmem:[#allocation94_spill] sm:$0xff]  ;;  %v14540_v29 = vld [vmem:[#allocation97_spill] sm:$0xff] }
 0x2cf   :  { %v3057_v16 = vmul.f32 0.01, %v3056_v61  ;;  %v3156_v26 = vmul.f32 %v9198_v62, %v14523_v7  ;;  %v3157_v57 = vmul.f32 %v9206_v40, %v14524_v2  ;;  %v3142_v47 = vsel %vm1572_vm10, %v3141_v60, %v3140_v37  ;;  %v14539_v61 = vld [vmem:[#allocation96_spill] sm:$0xff] }
 0x2d0   :  { %v3087_v18 = vrot.slane %v3086_v34, 1  ;;  %v3116_v45 = vadd.f32 %v3115_v4, %v3114_v41  ;;  %v3158_v22 = vmul.f32 %v9214_v49, %v14525_v46  ;;  %v3144_v21 = vsel %vm1575_vm11, %v3143_v28, %v3142_v47  ;;  %v14541_v4 = vld [vmem:[#allocation98_spill] sm:$0xff] }
 0x2d1   :  { %v9825_v59 = vsub.f32 %v14526_v19, %v3057_v16  ;;  %v3159_v63 = vmul.f32 %v9222_v33, %v14522_v48  ;;  %v3160_v62 = vmul.f32 %v9228_v32, %v14523_v7  ;;  %v3146_v39 = vsel %vm171_vm0, %v3144_v21, 0.0  ;;  %v14529_v32 = vld [vmem:[#allocation60_spill] sm:$0xff]  ;;  %v14542_v16 = vld [vmem:[#allocation99_spill] sm:$0xff]  ;;  %v14544_v21 = vld [vmem:[#allocation102_spill] sm:$0xff] }
 0x2d2   :  { %v3088_v15 = vadd.f32 %v3087_v18, %v3086_v34  ;;  %v3117_v40 = vrot.slane %v3116_v45, 2  ;;  %v3161_v5 = vmul.f32 %v9236_v1, %v14524_v2  ;;  %v3147_v53 = vrot.slane %v3146_v39, 4  ;;  %v14531_v1 = vld [vmem:[#allocation51_spill] sm:$0xff]  ;;  %v14543_v18 = vld [vmem:[#allocation100_spill] sm:$0xff] }
 0x2d3   :  { %14527 = vst [vmem:[#allocation59_spill] sm:$0xff] %v9825_v59  ;;  %v3162_v49 = vmul.f32 %v9244_v54, %v14525_v46  ;;  %v3163_v6 = vmul.f32 %v9252_v42, %v14522_v48  ;;  %v3164_v33 = vmul.f32 %v14528_v9, %v14523_v7  ;;  %v3165_v10 = vmul.f32 %v14529_v32, %v14524_v2  ;;  %v14532_v54 = vld [vmem:[#allocation91_spill] sm:$0xff]  ;;  %v14533_v42 = vld [vmem:[#allocation92_spill] sm:$0xff] }
 0x2d4   :  { %v3089_v24 = vmul.f32 0.01, %v3088_v15  ;;  %v3118_v14 = vadd.f32 %v3117_v40, %v3116_v45  ;;  %v3166_v0 = vmul.f32 %v14530_v27, %v14525_v46  ;;  %v3148_v58 = vadd.f32 %v3147_v53, %v3146_v39  ;;  %v14545_v53 = vld [vmem:[#allocation104_spill] sm:$0xff]  ;;  %v9899_v27 = vld [vmem:[%s13300_s0 + $0xe8] sm:$0xff] }
 0x2d5   :  { %v3167_v20 = vmul.f32 %v14531_v1, %v14522_v48  ;;  %v3168_v55 = vmul.f32 %v14532_v54, %v14523_v7  ;;  %v3169_v52 = vmul.f32 %v14533_v42, %v14524_v2  ;;  %v3170_v31 = vmul.f32 %v14536_v30, %v14525_v46  ;;  %14547 = vst [vmem:[#allocation56_spill] sm:$0xff] %v9899_v27  ;;  %v9917_v1 = vld [vmem:[%s13300_s0 + $0xf8] sm:$0xff]  ;;  %v14550_v42 = vld [vmem:[#allocation40_spill] sm:$0xff] }
 0x2d6   :  { %v9852_v25 = vsub.f32 %v14534_v8, %v3089_v24  ;;  %v3119_v43 = vrot.slane %v3118_v14, 1  ;;  %v3171_v35 = vmul.f32 %v14537_v44, %v14522_v48  ;;  %v3149_v50 = vrot.slane %v3148_v58, 2  ;;  %14549 = vst [vmem:[#allocation4_spill] sm:$0xff] %v9917_v1 }
 0x2d7   :  { %v3172_v60 = vmul.f32 %v14538_v56, %v14523_v7  ;;  %v3173_v41 = vmul.f32 %v14539_v61, %v14524_v2  ;;  %v3174_v28 = vmul.f32 %v14540_v29, %v14525_v46  ;;  %v3175_v3 = vmul.f32 %v14541_v4, %v14522_v48 }
 0x2d8   :  { %14535 = vst [vmem:[#allocation45_spill] sm:$0xff] %v9852_v25  ;;  %v3120_v34 = vadd.f32 %v3119_v43, %v3118_v14  ;;  %v3176_v37 = vmul.f32 %v14542_v16, %v14523_v7  ;;  %v9870_v45 = vmul.f32 %v14543_v18, %v14524_v2  ;;  %v3150_v47 = vadd.f32 %v3149_v50, %v3148_v58  ;;  %v9908_v58 = vld [vmem:[%s13300_s0 + $0xf0] sm:$0xff] }
 0x2d9   :  { %v9874_v19 = vmul.f32 %v14421_v36, %v14525_v46  ;;  %v9878_v15 = vmul.f32 %v14544_v21, %v14522_v48  ;;  %v9882_v40 = vmul.f32 %v14425_v17, %v14523_v7  ;;  %v9886_v9 = vmul.f32 %v14545_v53, %v14524_v2  ;;  %v14546_v36 = vld [vmem:[#allocation106_spill] sm:$0xff]  ;;  %14548 = vst [vmem:[#allocation84_spill] sm:$0xff] %v9908_v58 }
 0x2da   :  { %v3121_v39 = vmul.f32 0.01, %v3120_v34  ;;  %v9890_v24 = vmul.f32 %v14427_v38, %v14525_v46  ;;  %v9894_v14 = vmul.f32 %v14546_v36, %v14522_v48  ;;  %v3151_v32 = vrot.slane %v3150_v47, 1  ;;  %v14552_v53 = vld [vmem:[#allocation50_spill] sm:$0xff]  ;;  %v10147_v48 = vld [vmem:[%s13300_s0 + $0x98] sm:$0xff] }
 0x2db   :  { %v9903_v17 = vmul.f32 %v9899_v27, %v14523_v7  ;;  %v9912_v38 = vmul.f32 %v9908_v58, %v14524_v2  ;;  %v9921_v54 = vmul.f32 %v9917_v1, %v14525_v46  ;;  %v3187_v43 = vsel %vm171_vm0, %v3155_v12, 0.0  ;;  %v10140_v2 = vld [vmem:[%s13300_s0 + $0x90] sm:$0xff]  ;;  %14568 = vst [vmem:[#allocation81_spill] sm:$0xff] %v10147_v48 }
 0x2dc   :  { %v9924_v8 = vsub.f32 %v14550_v42, %v3121_v39  ;;  %v3188_v30 = vsel %vm171_vm0, %v3156_v26, 0.0  ;;  %v3190_v44 = vsel %vm171_vm0, %v3157_v57, 0.0  ;;  %v3152_v50 = vadd.f32 %v3151_v32, %v3150_v47  ;;  %14567 = vst [vmem:[#allocation79_spill] sm:$0xff] %v10140_v2 }
 0x2dd   :  { %v3189_v56 = vadd.f32 %v3188_v30, %v3187_v43  ;;  %v3192_v61 = vsel %vm171_vm0, %v3158_v22, 0.0  ;;  %v3200_v29 = vsel %vm171_vm0, %v3159_v63, 0.0  ;;  %v3201_v34 = vsel %vm171_vm0, %v3160_v62, 0.0 }
 0x2de   :  { %14551 = vst [vmem:[#allocation5_spill] sm:$0xff] %v9924_v8  ;;  %v3203_v4 = vsel %vm171_vm0, %v3161_v5, 0.0  ;;  %v3205_v16 = vsel %vm171_vm0, %v3162_v49, 0.0  ;;  %v3213_v18 = vsel %vm171_vm0, %v3163_v6, 0.0  ;;  %v3153_v21 = vmul.f32 0.01, %v3152_v50 }
 0x2df   :  { %v3191_v12 = vadd.f32 %v3190_v44, %v3189_v56  ;;  %v3202_v39 = vadd.f32 %v3201_v34, %v3200_v29  ;;  %v3214_v26 = vsel %vm171_vm0, %v3164_v33, 0.0  ;;  %v3216_v47 = vsel %vm171_vm0, %v3165_v10, 0.0 }
 0x2e0   :  { %v3215_v57 = vadd.f32 %v3214_v26, %v3213_v18  ;;  %v3218_v22 = vsel %vm171_vm0, %v3166_v0, 0.0  ;;  %v3226_v63 = vsel %vm171_vm0, %v3167_v20, 0.0  ;;  %v9940_v62 = vsub.f32 %v14552_v53, %v3153_v21 }
 0x2e1   :  { %v3193_v5 = vadd.f32 %v3192_v61, %v3191_v12  ;;  %v3204_v36 = vadd.f32 %v3203_v4, %v3202_v39  ;;  %v3227_v49 = vsel %vm171_vm0, %v3168_v55, 0.0  ;;  %v3229_v42 = vsel %vm171_vm0, %v3169_v52, 0.0 }
 0x2e2   :  { %14553 = vst [vmem:[#allocation6_spill] sm:$0xff] %v9940_v62  ;;  %v3217_v6 = vadd.f32 %v3216_v47, %v3215_v57  ;;  %v3228_v32 = vadd.f32 %v3227_v49, %v3226_v63  ;;  %v3231_v33 = vsel %vm171_vm0, %v3170_v31, 0.0  ;;  %v3239_v10 = vsel %vm171_vm0, %v3171_v35, 0.0 }
 0x2e3   :  { %v3194_v43 = vrot.slane %v3193_v5, 4  ;;  %v3206_v30 = vadd.f32 %v3205_v16, %v3204_v36  ;;  %v3240_v0 = vsel %vm171_vm0, %v3172_v60, 0.0  ;;  %v3242_v56 = vsel %vm171_vm0, %v3173_v41, 0.0 }
 0x2e4   :  { %v3219_v20 = vadd.f32 %v3218_v22, %v3217_v6  ;;  %v3230_v44 = vadd.f32 %v3229_v42, %v3228_v32  ;;  %v3241_v50 = vadd.f32 %v3240_v0, %v3239_v10  ;;  %v3244_v55 = vsel %vm171_vm0, %v3174_v28, 0.0 }
 0x2e5   :  { %v3195_v61 = vadd.f32 %v3194_v43, %v3193_v5  ;;  %v3207_v29 = vrot.slane %v3206_v30, 4  ;;  %v3252_v34 = vsel %vm171_vm0, %v3175_v3, 0.0  ;;  %v3253_v16 = vsel %vm171_vm0, %v3176_v37, 0.0 }
 0x2e6   :  { %v3220_v52 = vrot.slane %v3219_v20, 4  ;;  %v3232_v4 = vadd.f32 %v3231_v33, %v3230_v44  ;;  %v3243_v31 = vadd.f32 %v3242_v56, %v3241_v50  ;;  %v3254_v21 = vadd.f32 %v3253_v16, %v3252_v34 }
 0x2e7   :  { %v3196_v18 = vrot.slane %v3195_v61, 2  ;;  %v3208_v35 = vadd.f32 %v3207_v29, %v3206_v30  ;;  %v3255_v60 = vsel %vm171_vm0, %v9870_v45, 0.0  ;;  %v3257_v26 = vsel %vm171_vm0, %v9874_v19, 0.0 }
 0x2e8   :  { %v3221_v12 = vadd.f32 %v3220_v52, %v3219_v20  ;;  %v3233_v39 = vrot.slane %v3232_v4, 4  ;;  %v3245_v41 = vadd.f32 %v3244_v55, %v3243_v31  ;;  %v3256_v3 = vadd.f32 %v3255_v60, %v3254_v21  ;;  %v14554_v21 = vld [vmem:[#allocation3_spill] sm:$0xff] }
 0x2e9   :  { %v3197_v28 = vadd.f32 %v3196_v18, %v3195_v61  ;;  %v3209_v57 = vrot.slane %v3208_v35, 2  ;;  %v3265_v47 = vsel %vm171_vm0, %v9878_v15, 0.0  ;;  %v3266_v53 = vsel %vm171_vm0, %v9882_v40, 0.0 }
 0x2ea   :  { %v3222_v22 = vrot.slane %v3221_v12, 2  ;;  %v3234_v37 = vadd.f32 %v3233_v39, %v3232_v4  ;;  %v3246_v63 = vrot.slane %v3245_v41, 4  ;;  %v3258_v36 = vadd.f32 %v3257_v26, %v3256_v3 }
 0x2eb   :  { %v3198_v5 = vrot.slane %v3197_v28, 1  ;;  %v3210_v45 = vadd.f32 %v3209_v57, %v3208_v35  ;;  %v3267_v49 = vadd.f32 %v3266_v53, %v3265_v47  ;;  %v3268_v19 = vsel %vm171_vm0, %v9886_v9, 0.0  ;;  %v10002_v53 = vld [vmem:[%s13300_s0 + $0x8] sm:$0xff] }
 0x2ec   :  { %v3223_v6 = vadd.f32 %v3222_v22, %v3221_v12  ;;  %v3235_v32 = vrot.slane %v3234_v37, 2  ;;  %v3247_v42 = vadd.f32 %v3246_v63, %v3245_v41  ;;  %v3259_v30 = vrot.slane %v3258_v36, 4  ;;  %v14555_v41 = vld [vmem:[#allocation70_spill] sm:$0xff] }
 0x2ed   :  { %v3199_v33 = vadd.f32 %v3198_v5, %v3197_v28  ;;  %v3211_v43 = vrot.slane %v3210_v45, 1  ;;  %v3269_v15 = vadd.f32 %v3268_v19, %v3267_v49  ;;  %v3270_v40 = vsel %vm171_vm0, %v9890_v24, 0.0  ;;  %v14561_v5 = vld [vmem:[#allocation103_spill] sm:$0xff]  ;;  %v14562_v49 = vld [vmem:[#allocation105_spill] sm:$0xff] }
 0x2ee   :  { %v3224_v10 = vrot.slane %v3223_v6, 1  ;;  %v3236_v0 = vadd.f32 %v3235_v32, %v3234_v37  ;;  %v3248_v20 = vrot.slane %v3247_v42, 2  ;;  %v3260_v50 = vadd.f32 %v3259_v30, %v3258_v36  ;;  %v10011_v36 = vld [vmem:[%s13300_s0 + $0x10] sm:$0xff]  ;;  %v10020_v32 = vld [vmem:[%s13300_s0 + $0x18] sm:$0xff] }
 0x2ef   :  { %v3212_v44 = vadd.f32 %v3211_v43, %v3210_v45  ;;  %v3271_v56 = vadd.f32 %v3270_v40, %v3269_v15  ;;  %v3278_v61 = vsel %vm171_vm0, %v9894_v14, 0.0  ;;  %v3279_v9 = vsel %vm171_vm0, %v9903_v17, 0.0  ;;  %v9978_v17 = vld [vmem:[%s13300_s0] sm:$0xff]  ;;  %v10047_v40 = vld [vmem:[%s13300_s0 + $0x30] sm:$0xff] }
 0x2f0   :  { %v3225_v29 = vadd.f32 %v3224_v10, %v3223_v6  ;;  %v3237_v55 = vrot.slane %v3236_v0, 1  ;;  %v3249_v34 = vadd.f32 %v3248_v20, %v3247_v42  ;;  %v3261_v52 = vrot.slane %v3260_v50, 2  ;;  %v14563_v42 = vld [vmem:[#allocation71_spill] sm:$0xff]  ;;  %v10029_v15 = vld [vmem:[%s13300_s0 + $0x20] sm:$0xff] }
 0x2f1   :  { %v3272_v4 = vrot.slane %v3271_v56, 4  ;;  %v3280_v31 = vadd.f32 %v3279_v9, %v3278_v61  ;;  %v3281_v16 = vsel %vm171_vm0, %v9912_v38, 0.0  ;;  %v3283_v35 = vsel %vm171_vm0, %v9921_v54, 0.0  ;;  %v10065_v61 = vld [vmem:[%s13300_s0 + $0x40] sm:$0xff] }
 0x2f2   :  { %v3238_v18 = vadd.f32 %v3237_v55, %v3236_v0  ;;  %v3250_v24 = vrot.slane %v3249_v34, 1  ;;  %v9973_v14 = vrot.slane %v9825_v59, %v14554_v21  ;;  %v3262_v60 = vadd.f32 %v3261_v52, %v3260_v50  ;;  %v10038_v0 = vld [vmem:[%s13300_s0 + $0x28] sm:$0xff]  ;;  %v10056_v50 = vld [vmem:[%s13300_s0 + $0x38] sm:$0xff] }
 0x2f3   :  { %v3273_v12 = vadd.f32 %v3272_v4, %v3271_v56  ;;  %v3282_v39 = vadd.f32 %v3281_v16, %v3280_v31  ;;  %v9982_v38 = vmul.f32 %v9978_v17, %v14555_v41  ;;  %v10006_v45 = vmul.f32 %v10002_v53, %v14561_v5  ;;  %v10077_v52 = vld [vmem:[%s13300_s0 + $0x48] sm:$0xff]  ;;  %v10084_v31 = vld [vmem:[%s13300_s0 + $0x50] sm:$0xff] }
 0x2f4   :  { %v3251_v26 = vadd.f32 %v3250_v24, %v3249_v34  ;;  %v9985_v28 = vadd.f32 %v9973_v14, %v3199_v33  ;;  %v9988_v54 = vadd.f32 %v9973_v14, %v3212_v44  ;;  %v9991_v57 = vadd.f32 %v9973_v14, %v3225_v29  ;;  %v10133_v59 = vld [vmem:[%s13300_s0 + $0x88] sm:$0xff] }
 0x2f5   :  { %v3263_v3 = vrot.slane %v3262_v60, 1  ;;  %v3274_v47 = vrot.slane %v3273_v12, 2  ;;  %v3284_v22 = vadd.f32 %v3283_v35, %v3282_v39  ;;  %v9994_v37 = vadd.f32 %v9973_v14, %v3238_v18  ;;  %v10091_v18 = vld [vmem:[%s13300_s0 + $0x58] sm:$0xff]  ;;  %v10098_v35 = vld [vmem:[%s13300_s0 + $0x60] sm:$0xff]  ;;  %14566 = vst [vmem:[#allocation61_spill] sm:$0xff] %v10133_v59 }
 0x2f6   :  { %14556 = vst [vmem:[#allocation107_spill] sm:$0xff] %v9985_v28  ;;  %14557 = vst [vmem:[#allocation108_spill] sm:$0xff] %v9988_v54  ;;  %v9997_v63 = vadd.f32 %v9973_v14, %v3251_v26  ;;  %v10015_v6 = vmul.f32 %v10011_v36, %v14562_v49  ;;  %v10024_v19 = vmul.f32 %v10020_v32, %v14563_v42  ;;  %v10164_v28 = vld [vmem:[%s13300_s0 + $0xa8] sm:$0xff] }
 0x2f7   :  { %14558 = vst [vmem:[#allocation109_spill] sm:$0xff] %v9991_v57  ;;  %14559 = vst [vmem:[#allocation63_spill] sm:$0xff] %v9994_v37  ;;  %v3264_v33 = vadd.f32 %v3263_v3, %v3262_v60  ;;  %v3275_v43 = vadd.f32 %v3274_v47, %v3273_v12  ;;  %v3285_v30 = vrot.slane %v3284_v22, 4  ;;  %v10033_v10 = vmul.f32 %v10029_v15, %v14555_v41  ;;  %v10105_v12 = vld [vmem:[%s13300_s0 + $0x68] sm:$0xff]  ;;  %v10112_v47 = vld [vmem:[%s13300_s0 + $0x70] sm:$0xff] }
 0x2f8   :  { %14560 = vst [vmem:[#allocation68_spill] sm:$0xff] %v9997_v63  ;;  %v10042_v20 = vmul.f32 %v10038_v0, %v14561_v5  ;;  %v10051_v44 = vmul.f32 %v10047_v40, %v14562_v49  ;;  %v10060_v56 = vmul.f32 %v10056_v50, %v14563_v42  ;;  %v10069_v29 = vmul.f32 %v10065_v61, %v14555_v41  ;;  %v10157_v57 = vld [vmem:[%s13300_s0 + $0xa0] sm:$0xff] }
 0x2f9   :  { %v3276_v55 = vrot.slane %v3275_v43, 1  ;;  %v3286_v34 = vadd.f32 %v3285_v30, %v3284_v22  ;;  %v10072_v9 = vadd.f32 %v9973_v14, %v3264_v33  ;;  %v3314_v4 = vmul.f32 %v10077_v52, %v14561_v5  ;;  %v10119_v33 = vld [vmem:[%s13300_s0 + $0x78] sm:$0xff]  ;;  %14570 = vst [vmem:[#allocation67_spill] sm:$0xff] %v10157_v57  ;;  %14571 = vst [vmem:[#allocation7_spill] sm:$0xff] %v10164_v28 }
 0x2fa   :  { %v3315_v16 = vmul.f32 %v10084_v31, %v14562_v49  ;;  %v3316_v24 = vmul.f32 %v10091_v18, %v14563_v42  ;;  %v3317_v60 = vmul.f32 %v10098_v35, %v14555_v41  ;;  %v3318_v39 = vmul.f32 %v10105_v12, %v14561_v5 }
 0x2fb   :  { %14564 = vst [vmem:[#allocation75_spill] sm:$0xff] %v10072_v9  ;;  %v3277_v26 = vadd.f32 %v3276_v55, %v3275_v43  ;;  %v3287_v3 = vrot.slane %v3286_v34, 2  ;;  %v3319_v22 = vmul.f32 %v10112_v47, %v14562_v49  ;;  %v3320_v30 = vmul.f32 %v10119_v33, %v14563_v42  ;;  %v10126_v43 = vld [vmem:[%s13300_s0 + $0x80] sm:$0xff] }
 0x2fc   :  { %14565 = vst [vmem:[#allocation77_spill] sm:$0xff] %v10126_v43  ;;  %v3321_v55 = vmul.f32 %v10126_v43, %v14555_v41  ;;  %v3322_v46 = vmul.f32 %v10133_v59, %v14561_v5  ;;  %v3323_v7 = vmul.f32 %v10140_v2, %v14562_v49  ;;  %v3324_v9 = vmul.f32 %v10147_v48, %v14563_v42 }
 0x2fd   :  { %v3288_v63 = vadd.f32 %v3287_v3, %v3286_v34  ;;  %v10152_v37 = vadd.f32 %v9973_v14, %v3277_v26  ;;  %v3325_v54 = vmul.f32 %v10157_v57, %v14555_v41  ;;  %v3326_v62 = vmul.f32 %v10164_v28, %v14561_v5  ;;  %v10171_v34 = vld [vmem:[%s13300_s0 + $0xb0] sm:$0xff]  ;;  %v10178_v3 = vld [vmem:[%s13300_s0 + $0xb8] sm:$0xff] }
 0x2fe   :  { %14572 = vst [vmem:[#allocation62_spill] sm:$0xff] %v10171_v34  ;;  %v3327_v26 = vmul.f32 %v10171_v34, %v14562_v49  ;;  %14573 = vst [vmem:[#allocation48_spill] sm:$0xff] %v10178_v3  ;;  %v10191_v13 = vmul.f32 %v10187_v11, %v14555_v41  ;;  %v10200_v23 = vmul.f32 %v10196_v51, %v14561_v5  ;;  %v10214_v11 = vld [vmem:[%s13300_s0 + $0xd8] sm:$0xff]  ;;  %v10223_v51 = vld [vmem:[%s13300_s0 + $0xe0] sm:$0xff]  ;;  %v3337_v2 = vsel %vm171_vm0, %v9982_v38, 0.0 }
 0x2ff   :  { %14569 = vst [vmem:[#allocation85_spill] sm:$0xff] %v10152_v37  ;;  %v10182_v37 = vmul.f32 %v10178_v3, %v14563_v42  ;;  %v3289_v8 = vrot.slane %v3288_v63, 1  ;;  %v10205_v3 = vld [vmem:[%s13300_s0 + $0xd0] sm:$0xff]  ;;  %14577 = vst [vmem:[#allocation80_spill] sm:$0xff] %v10214_v11  ;;  %v10218_v28 = vmul.f32 %v10214_v11, %v14563_v42  ;;  %v10227_v57 = vmul.f32 %v10223_v51, %v14555_v41 }
 0x300   :  { %14576 = vst [vmem:[#allocation78_spill] sm:$0xff] %v10205_v3  ;;  %v10209_v34 = vmul.f32 %v10205_v3, %v14562_v49  ;;  %14578 = vst [vmem:[#allocation64_spill] sm:$0xff] %v10223_v51  ;;  %v10231_v3 = vmul.f32 %v9899_v27, %v14561_v5  ;;  %v10235_v48 = vmul.f32 %v9908_v58, %v14562_v49  ;;  %v3338_v41 = vsel %vm171_vm0, %v10006_v45, 0.0 }
 0x301   :  { %v10239_v11 = vmul.f32 %v9917_v1, %v14563_v42  ;;  %v3290_v59 = vadd.f32 %v3289_v8, %v3288_v63  ;;  %v3340_v51 = vsel %vm171_vm0, %v10015_v6, 0.0  ;;  %v3342_v5 = vsel %vm171_vm0, %v10024_v19, 0.0 }
 0x302   :  { %v3339_v27 = vadd.f32 %v3338_v41, %v3337_v2  ;;  %v3350_v49 = vsel %vm171_vm0, %v10033_v10, 0.0  ;;  %v3351_v42 = vsel %vm171_vm0, %v10042_v20, 0.0  ;;  %v3353_v38 = vsel %vm171_vm0, %v10051_v44, 0.0 }
 0x303   :  { %v10256_v8 = vadd.f32 %v9973_v14, %v3290_v59  ;;  %v3352_v63 = vadd.f32 %v3351_v42, %v3350_v49  ;;  %v3355_v45 = vsel %vm171_vm0, %v10060_v56, 0.0  ;;  %v3363_v6 = vsel %vm171_vm0, %v10069_v29, 0.0 }
 0x304   :  { %v3341_v2 = vadd.f32 %v3340_v51, %v3339_v27  ;;  %v3364_v41 = vsel %vm171_vm0, %v3314_v4, 0.0  ;;  %v3366_v19 = vsel %vm171_vm0, %v3315_v16, 0.0  ;;  %v3368_v10 = vsel %vm171_vm0, %v3316_v24, 0.0 }
 0x305   :  { %14579 = vst [vmem:[#allocation83_spill] sm:$0xff] %v10256_v8  ;;  %v3354_v20 = vadd.f32 %v3353_v38, %v3352_v63  ;;  %v3365_v1 = vadd.f32 %v3364_v41, %v3363_v6  ;;  %v3376_v44 = vsel %vm171_vm0, %v3317_v60, 0.0  ;;  %v3377_v59 = vsel %vm171_vm0, %v3318_v39, 0.0 }
 0x306   :  { %v3343_v14 = vadd.f32 %v3342_v5, %v3341_v2  ;;  %v3378_v49 = vadd.f32 %v3377_v59, %v3376_v44  ;;  %v3379_v42 = vsel %vm171_vm0, %v3319_v22, 0.0  ;;  %v3381_v56 = vsel %vm171_vm0, %v3320_v30, 0.0 }
 0x307   :  { %v3356_v29 = vadd.f32 %v3355_v45, %v3354_v20  ;;  %v3367_v51 = vadd.f32 %v3366_v19, %v3365_v1  ;;  %v3389_v27 = vsel %vm171_vm0, %v3321_v55, 0.0  ;;  %v3390_v4 = vsel %vm171_vm0, %v3322_v46, 0.0 }
 0x308   :  { %v3344_v16 = vrot.slane %v3343_v14, 4  ;;  %v3380_v24 = vadd.f32 %v3379_v42, %v3378_v49  ;;  %v3391_v38 = vadd.f32 %v3390_v4, %v3389_v27  ;;  %v3392_v63 = vsel %vm171_vm0, %v3323_v7, 0.0 }
 0x309   :  { %v3357_v60 = vrot.slane %v3356_v29, 4  ;;  %v3369_v6 = vadd.f32 %v3368_v10, %v3367_v51  ;;  %v3394_v5 = vsel %vm171_vm0, %v3324_v9, 0.0  ;;  %v3402_v39 = vsel %vm171_vm0, %v3325_v54, 0.0 }
 0x30a   :  { %v3345_v22 = vadd.f32 %v3344_v16, %v3343_v14  ;;  %v3382_v2 = vadd.f32 %v3381_v56, %v3380_v24  ;;  %v3393_v30 = vadd.f32 %v3392_v63, %v3391_v38  ;;  %v3403_v1 = vsel %vm171_vm0, %v3326_v62, 0.0 }
 0x30b   :  { %v3358_v45 = vadd.f32 %v3357_v60, %v3356_v29  ;;  %v3370_v55 = vrot.slane %v3369_v6, 4  ;;  %v3404_v41 = vadd.f32 %v3403_v1, %v3402_v39  ;;  %v3405_v46 = vsel %vm171_vm0, %v3327_v26, 0.0 }
 0x30c   :  { %v3346_v19 = vrot.slane %v3345_v22, 2  ;;  %v3383_v20 = vrot.slane %v3382_v2, 4  ;;  %v3395_v44 = vadd.f32 %v3394_v5, %v3393_v30  ;;  %v3407_v7 = vsel %vm171_vm0, %v10182_v37, 0.0 }
 0x30d   :  { %v3359_v10 = vrot.slane %v3358_v45, 2  ;;  %v3371_v9 = vadd.f32 %v3370_v55, %v3369_v6  ;;  %v3406_v59 = vadd.f32 %v3405_v46, %v3404_v41  ;;  %v3415_v54 = vsel %vm171_vm0, %v10191_v13, 0.0 }
 0x30e   :  { %v3347_v14 = vadd.f32 %v3346_v19, %v3345_v22  ;;  %v3384_v49 = vadd.f32 %v3383_v20, %v3382_v2  ;;  %v3396_v62 = vrot.slane %v3395_v44, 4  ;;  %v3416_v42 = vsel %vm171_vm0, %v10200_v23, 0.0 }
 0x30f   :  { %v3360_v56 = vadd.f32 %v3359_v10, %v3358_v45  ;;  %v3372_v26 = vrot.slane %v3371_v9, 2  ;;  %v3408_v29 = vadd.f32 %v3407_v7, %v3406_v59  ;;  %v3417_v51 = vadd.f32 %v3416_v42, %v3415_v54 }
 0x310   :  { %v3348_v27 = vrot.slane %v3347_v14, 1  ;;  %v3385_v4 = vrot.slane %v3384_v49, 2  ;;  %v3397_v16 = vadd.f32 %v3396_v62, %v3395_v44  ;;  %v3418_v37 = vsel %vm171_vm0, %v10209_v34, 0.0  ;;  %v14581_v62 = vld [vmem:[#allocation73_spill] sm:$0xff] }
 0x311   :  { %v3361_v24 = vrot.slane %v3360_v56, 1  ;;  %v3373_v38 = vadd.f32 %v3372_v26, %v3371_v9  ;;  %v3409_v63 = vrot.slane %v3408_v29, 4  ;;  %v3419_v13 = vadd.f32 %v3418_v37, %v3417_v51 }
 0x312   :  { %v3349_v60 = vadd.f32 %v3348_v27, %v3347_v14  ;;  %v3386_v6 = vadd.f32 %v3385_v4, %v3384_v49  ;;  %v3398_v5 = vrot.slane %v3397_v16, 2  ;;  %v3420_v23 = vsel %vm171_vm0, %v10218_v28, 0.0 }
 0x313   :  { %v3362_v39 = vadd.f32 %v3361_v24, %v3360_v56  ;;  %v3374_v22 = vrot.slane %v3373_v38, 1  ;;  %v3410_v2 = vadd.f32 %v3409_v63, %v3408_v29  ;;  %v3421_v30 = vadd.f32 %v3420_v23, %v3419_v13  ;;  %v14582_v56 = vld [vmem:[#allocation82_spill] sm:$0xff] }
 0x314   :  { %v3387_v1 = vrot.slane %v3386_v6, 1  ;;  %v3399_v45 = vadd.f32 %v3398_v5, %v3397_v16  ;;  %v3428_v55 = vsel %vm171_vm0, %v10227_v57, 0.0  ;;  %v3429_v34 = vsel %vm171_vm0, %v10231_v3, 0.0  ;;  %v14580_v3 = vld [vmem:[#allocation72_spill] sm:$0xff]  ;;  %v14588_v13 = vld [vmem:[#allocation54_spill] sm:$0xff] }
 0x315   :  { %v3375_v41 = vadd.f32 %v3374_v22, %v3373_v38  ;;  %v3411_v46 = vrot.slane %v3410_v2, 2  ;;  %v3422_v19 = vrot.slane %v3421_v30, 4  ;;  %v3430_v20 = vadd.f32 %v3429_v34, %v3428_v55 }
 0x316   :  { %v3388_v44 = vadd.f32 %v3387_v1, %v3386_v6  ;;  %v3400_v7 = vrot.slane %v3399_v45, 1  ;;  %v3431_v28 = vsel %vm171_vm0, %v10235_v48, 0.0  ;;  %v3433_v10 = vsel %vm171_vm0, %v10239_v11, 0.0 }
 0x317   :  { %v3412_v9 = vadd.f32 %v3411_v46, %v3410_v2  ;;  %v3423_v59 = vadd.f32 %v3422_v19, %v3421_v30  ;;  %v3432_v54 = vadd.f32 %v3431_v28, %v3430_v20  ;;  %v3445_v57 = vrot.slane %v9852_v25, %v14554_v21  ;;  %v14596_v25 = vld [vmem:[#allocation62_spill] sm:$0xff] }
 0x318   :  { %v3401_v14 = vadd.f32 %v3400_v7, %v3399_v45  ;;  %v3455_v49 = vmul.f32 %v9978_v17, %v14580_v3  ;;  %v3456_v42 = vmul.f32 %v10002_v53, %v14581_v62  ;;  %v3457_v26 = vmul.f32 %v10011_v36, %v14582_v56 }
 0x319   :  { %v3413_v48 = vrot.slane %v3412_v9, 1  ;;  %v3424_v29 = vrot.slane %v3423_v59, 2  ;;  %v3434_v51 = vadd.f32 %v3433_v10, %v3432_v54  ;;  %v10302_v11 = vadd.f32 %v3445_v57, %v3349_v60  ;;  %v14590_v10 = vld [vmem:[#allocation61_spill] sm:$0xff] }
 0x31a   :  { %v10304_v27 = vadd.f32 %v3445_v57, %v3362_v39  ;;  %v10306_v4 = vadd.f32 %v3445_v57, %v3375_v41  ;;  %v10308_v16 = vadd.f32 %v3445_v57, %v3388_v44  ;;  %v10310_v37 = vadd.f32 %v3445_v57, %v3401_v14 }
 0x31b   :  { %14583 = vst [vmem:[#allocation86_spill] sm:$0xff] %v10302_v11  ;;  %v3414_v24 = vadd.f32 %v3413_v48, %v3412_v9  ;;  %v3425_v38 = vadd.f32 %v3424_v29, %v3423_v59  ;;  %v3435_v63 = vrot.slane %v3434_v51, 4  ;;  %v3458_v6 = vmul.f32 %v10020_v32, %v14588_v13  ;;  %v14591_v59 = vld [vmem:[#allocation79_spill] sm:$0xff]  ;;  %v14593_v29 = vld [vmem:[#allocation81_spill] sm:$0xff]  ;;  %v14601_v11 = vld [vmem:[#allocation80_spill] sm:$0xff] }
 0x31c   :  { %14584 = vst [vmem:[#allocation88_spill] sm:$0xff] %v10304_v27  ;;  %14585 = vst [vmem:[#allocation42_spill] sm:$0xff] %v10306_v4  ;;  %v3459_v5 = vmul.f32 %v10029_v15, %v14580_v3  ;;  %v3460_v60 = vmul.f32 %v10038_v0, %v14581_v62  ;;  %v3461_v23 = vmul.f32 %v10047_v40, %v14582_v56  ;;  %v14600_v4 = vld [vmem:[#allocation78_spill] sm:$0xff] }
 0x31d   :  { %14586 = vst [vmem:[#allocation44_spill] sm:$0xff] %v10308_v16  ;;  %14587 = vst [vmem:[#allocation65_spill] sm:$0xff] %v10310_v37  ;;  %v3462_v39 = vmul.f32 %v10056_v50, %v14588_v13  ;;  %v3426_v22 = vrot.slane %v3425_v38, 1  ;;  %v3436_v2 = vadd.f32 %v3435_v63, %v3434_v51  ;;  %v10322_v30 = vadd.f32 %v3445_v57, %v3414_v24  ;;  %v14594_v24 = vld [vmem:[#allocation67_spill] sm:$0xff]  ;;  %v14598_v16 = vld [vmem:[#allocation9_spill] sm:$0xff] }
 0x31e   :  { %v3463_v1 = vmul.f32 %v10065_v61, %v14580_v3  ;;  %v3464_v45 = vmul.f32 %v10077_v52, %v14581_v62  ;;  %v3465_v55 = vmul.f32 %v10084_v31, %v14582_v56  ;;  %v3466_v34 = vmul.f32 %v10091_v18, %v14588_v13  ;;  %v14595_v63 = vld [vmem:[#allocation7_spill] sm:$0xff] }
 0x31f   :  { %14589 = vst [vmem:[#allocation87_spill] sm:$0xff] %v10322_v30  ;;  %v3467_v41 = vmul.f32 %v10098_v35, %v14580_v3  ;;  %v3427_v46 = vadd.f32 %v3426_v22, %v3425_v38  ;;  %v3437_v19 = vrot.slane %v3436_v2, 2  ;;  %v3468_v20 = vmul.f32 %v10105_v12, %v14581_v62  ;;  %v14597_v30 = vld [vmem:[#allocation48_spill] sm:$0xff] }
 0x320   :  { %v3469_v44 = vmul.f32 %v10112_v47, %v14582_v56  ;;  %v3470_v7 = vmul.f32 %v10119_v33, %v14588_v13  ;;  %v3471_v28 = vmul.f32 %v10126_v43, %v14580_v3  ;;  %v3472_v9 = vmul.f32 %v14590_v10, %v14581_v62 }
 0x321   :  { %v3473_v54 = vmul.f32 %v14591_v59, %v14582_v56  ;;  %v3438_v14 = vadd.f32 %v3437_v19, %v3436_v2  ;;  %v10346_v48 = vadd.f32 %v3445_v57, %v3427_v46  ;;  %v3474_v51 = vmul.f32 %v14593_v29, %v14588_v13  ;;  %v14599_v19 = vld [vmem:[#allocation76_spill] sm:$0xff] }
 0x322   :  { %v3475_v38 = vmul.f32 %v14594_v24, %v14580_v3  ;;  %v3476_v22 = vmul.f32 %v14595_v63, %v14581_v62  ;;  %v3477_v8 = vmul.f32 %v14596_v25, %v14582_v56  ;;  %v3478_v37 = vmul.f32 %v14597_v30, %v14588_v13  ;;  %v14602_v63 = vld [vmem:[#allocation64_spill] sm:$0xff] }
 0x323   :  { %14592 = vst [vmem:[#allocation46_spill] sm:$0xff] %v10346_v48  ;;  %v3479_v2 = vmul.f32 %v14598_v16, %v14580_v3  ;;  %v3439_v46 = vrot.slane %v3438_v14, 1  ;;  %v3480_v48 = vmul.f32 %v14599_v19, %v14581_v62  ;;  %v3481_v27 = vmul.f32 %v14600_v4, %v14582_v56  ;;  %v14603_v30 = vld [vmem:[#allocation56_spill] sm:$0xff] }
 0x324   :  { %v10366_v24 = vmul.f32 %v14601_v11, %v14588_v13  ;;  %v10370_v25 = vmul.f32 %v14602_v63, %v14580_v3  ;;  %v10374_v29 = vmul.f32 %v14603_v30, %v14581_v62  ;;  %v10378_v16 = vmul.f32 %v9908_v58, %v14582_v56  ;;  %v14604_v19 = vld [vmem:[#allocation4_spill] sm:$0xff] }
 0x325   :  { %v10382_v59 = vmul.f32 %v14604_v19, %v14588_v13  ;;  %v3440_v4 = vadd.f32 %v3439_v46, %v3438_v14  ;;  %v3487_v11 = vsel %vm171_vm0, %v3455_v49, 0.0  ;;  %v3488_v10 = vsel %vm171_vm0, %v3456_v42, 0.0 }
 0x326   :  { %v3490_v3 = vsel %vm171_vm0, %v3457_v26, 0.0  ;;  %v3489_v63 = vadd.f32 %v3488_v10, %v3487_v11  ;;  %v3492_v43 = vsel %vm171_vm0, %v3458_v6, 0.0  ;;  %v3500_v62 = vsel %vm171_vm0, %v3459_v5, 0.0 }
 0x327   :  { %v3501_v30 = vsel %vm171_vm0, %v3460_v60, 0.0  ;;  %v10390_v56 = vadd.f32 %v3445_v57, %v3440_v4  ;;  %v3503_v13 = vsel %vm171_vm0, %v3461_v23, 0.0  ;;  %v3505_v14 = vsel %vm171_vm0, %v3462_v39, 0.0 }
 0x328   :  { %v3502_v58 = vadd.f32 %v3501_v30, %v3500_v62  ;;  %v3491_v46 = vadd.f32 %v3490_v3, %v3489_v63  ;;  %v3513_v49 = vsel %vm171_vm0, %v3463_v1, 0.0  ;;  %v3514_v42 = vsel %vm171_vm0, %v3464_v45, 0.0 }
 0x329   :  { %v3516_v26 = vsel %vm171_vm0, %v3465_v55, 0.0  ;;  %v3515_v6 = vadd.f32 %v3514_v42, %v3513_v49  ;;  %v3518_v5 = vsel %vm171_vm0, %v3466_v34, 0.0  ;;  %v3526_v60 = vsel %vm171_vm0, %v3467_v41, 0.0 }
 0x32a   :  { %v3504_v11 = vadd.f32 %v3503_v13, %v3502_v58  ;;  %v3493_v57 = vadd.f32 %v3492_v43, %v3491_v46  ;;  %v3527_v62 = vsel %vm171_vm0, %v3468_v20, 0.0  ;;  %v3529_v4 = vsel %vm171_vm0, %v3469_v44, 0.0 }
 0x32b   :  { %v3531_v23 = vsel %vm171_vm0, %v3470_v7, 0.0  ;;  %v3517_v39 = vadd.f32 %v3516_v26, %v3515_v6  ;;  %v3528_v30 = vadd.f32 %v3527_v62, %v3526_v60  ;;  %v3539_v1 = vsel %vm171_vm0, %v3471_v28, 0.0 }
 0x32c   :  { %v3506_v3 = vadd.f32 %v3505_v14, %v3504_v11  ;;  %v3494_v45 = vrot.slane %v3493_v57, 4  ;;  %v3540_v58 = vsel %vm171_vm0, %v3472_v9, 0.0  ;;  %v3542_v13 = vsel %vm171_vm0, %v3473_v54, 0.0 }
 0x32d   :  { %v3544_v55 = vsel %vm171_vm0, %v3474_v51, 0.0  ;;  %v3519_v43 = vadd.f32 %v3518_v5, %v3517_v39  ;;  %v3530_v41 = vadd.f32 %v3529_v4, %v3528_v30  ;;  %v3541_v20 = vadd.f32 %v3540_v58, %v3539_v1 }
 0x32e   :  { %v3507_v34 = vrot.slane %v3506_v3, 4  ;;  %v3495_v10 = vadd.f32 %v3494_v45, %v3493_v57  ;;  %v3552_v44 = vsel %vm171_vm0, %v3475_v38, 0.0  ;;  %v3553_v7 = vsel %vm171_vm0, %v3476_v22, 0.0 }
 0x32f   :  { %v3555_v63 = vsel %vm171_vm0, %v3477_v8, 0.0  ;;  %v3520_v28 = vrot.slane %v3519_v43, 4  ;;  %v3532_v46 = vadd.f32 %v3531_v23, %v3530_v41  ;;  %v3543_v49 = vadd.f32 %v3542_v13, %v3541_v20 }
 0x330   :  { %v3508_v14 = vadd.f32 %v3507_v34, %v3506_v3  ;;  %v3496_v9 = vrot.slane %v3495_v10, 2  ;;  %v3554_v42 = vadd.f32 %v3553_v7, %v3552_v44  ;;  %v3557_v54 = vsel %vm171_vm0, %v3478_v37, 0.0 }
 0x331   :  { %v3565_v51 = vsel %vm171_vm0, %v3479_v2, 0.0  ;;  %v3521_v11 = vadd.f32 %v3520_v28, %v3519_v43  ;;  %v3533_v6 = vrot.slane %v3532_v46, 4  ;;  %v3545_v5 = vadd.f32 %v3544_v55, %v3543_v49 }
 0x332   :  { %v3509_v26 = vrot.slane %v3508_v14, 2  ;;  %v3497_v60 = vadd.f32 %v3496_v9, %v3495_v10  ;;  %v3556_v38 = vadd.f32 %v3555_v63, %v3554_v42  ;;  %v3566_v22 = vsel %vm171_vm0, %v3480_v48, 0.0  ;;  %v14605_v42 = vld [vmem:[#allocation5_spill] sm:$0xff] }
 0x333   :  { %v3568_v8 = vsel %vm171_vm0, %v3481_v27, 0.0  ;;  %v3522_v62 = vrot.slane %v3521_v11, 2  ;;  %v3534_v4 = vadd.f32 %v3533_v6, %v3532_v46  ;;  %v3546_v23 = vrot.slane %v3545_v5, 4 }
 0x334   :  { %v3510_v57 = vadd.f32 %v3509_v26, %v3508_v14  ;;  %v3498_v3 = vrot.slane %v3497_v60, 1  ;;  %v3558_v39 = vadd.f32 %v3557_v54, %v3556_v38  ;;  %v3567_v30 = vadd.f32 %v3566_v22, %v3565_v51 }
 0x335   :  { %v3570_v37 = vsel %vm171_vm0, %v10366_v24, 0.0  ;;  %v3523_v1 = vadd.f32 %v3522_v62, %v3521_v11  ;;  %v3535_v45 = vrot.slane %v3534_v4, 2  ;;  %v3547_v58 = vadd.f32 %v3546_v23, %v3545_v5  ;;  %v14607_v23 = vld [vmem:[#allocation43_spill] sm:$0xff] }
 0x336   :  { %v3511_v2 = vrot.slane %v3510_v57, 1  ;;  %v3499_v13 = vadd.f32 %v3498_v3, %v3497_v60  ;;  %v3559_v55 = vrot.slane %v3558_v39, 4  ;;  %v3569_v34 = vadd.f32 %v3568_v8, %v3567_v30  ;;  %v14608_v3 = vld [vmem:[#allocation58_spill] sm:$0xff] }
 0x337   :  { %v3578_v27 = vsel %vm171_vm0, %v10370_v25, 0.0  ;;  %v3524_v43 = vrot.slane %v3523_v1, 1  ;;  %v3536_v41 = vadd.f32 %v3535_v45, %v3534_v4  ;;  %v3548_v20 = vrot.slane %v3547_v58, 2 }
 0x338   :  { %v3512_v48 = vadd.f32 %v3511_v2, %v3510_v57  ;;  %v3560_v10 = vadd.f32 %v3559_v55, %v3558_v39  ;;  %v3571_v44 = vadd.f32 %v3570_v37, %v3569_v34  ;;  %v3579_v7 = vsel %vm171_vm0, %v10374_v29, 0.0  ;;  %v14606_v29 = vld [vmem:[#allocation57_spill] sm:$0xff] }
 0x339   :  { %v3581_v24 = vsel %vm171_vm0, %v10378_v16, 0.0  ;;  %v3525_v63 = vadd.f32 %v3524_v43, %v3523_v1  ;;  %v3537_v14 = vrot.slane %v3536_v41, 1  ;;  %v3549_v28 = vadd.f32 %v3548_v20, %v3547_v58  ;;  %v14609_v2 = vld [vmem:[#allocation41_spill] sm:$0xff] }
 0x33a   :  { %v3580_v46 = vadd.f32 %v3579_v7, %v3578_v27  ;;  %v3561_v49 = vrot.slane %v3560_v10, 2  ;;  %v3572_v9 = vrot.slane %v3571_v44, 4  ;;  %v3583_v25 = vsel %vm171_vm0, %v10382_v59, 0.0 }
 0x33b   :  { %v10425_v54 = vrot.slane %v14605_v42, %v14554_v21  ;;  %v3538_v51 = vadd.f32 %v3537_v14, %v3536_v41  ;;  %v3550_v26 = vrot.slane %v3549_v28, 1  ;;  %v3605_v6 = vmul.f32 %v9978_v17, %v14606_v29  ;;  %v14614_v14 = vld [vmem:[#allocation67_spill] sm:$0xff] }
 0x33c   :  { %v3582_v11 = vadd.f32 %v3581_v24, %v3580_v46  ;;  %v3562_v16 = vadd.f32 %v3561_v49, %v3560_v10  ;;  %v3573_v5 = vadd.f32 %v3572_v9, %v3571_v44  ;;  %v3606_v17 = vmul.f32 %v10002_v53, %v14607_v23  ;;  %v14610_v10 = vld [vmem:[#allocation77_spill] sm:$0xff]  ;;  %v14612_v24 = vld [vmem:[#allocation79_spill] sm:$0xff]  ;;  %v14616_v49 = vld [vmem:[#allocation62_spill] sm:$0xff] }
 0x33d   :  { %v10430_v60 = vadd.f32 %v10425_v54, %v3499_v13  ;;  %v10433_v38 = vadd.f32 %v10425_v54, %v3512_v48  ;;  %v3551_v22 = vadd.f32 %v3550_v26, %v3549_v28  ;;  %v10436_v8 = vadd.f32 %v10425_v54, %v3525_v63  ;;  %v14611_v44 = vld [vmem:[#allocation61_spill] sm:$0xff] }
 0x33e   :  { %v3584_v59 = vadd.f32 %v3583_v25, %v3582_v11  ;;  %v10439_v57 = vadd.f32 %v10425_v54, %v3538_v51  ;;  %v3563_v62 = vrot.slane %v3562_v16, 1  ;;  %v3574_v4 = vrot.slane %v3573_v5, 2  ;;  %v14613_v63 = vld [vmem:[#allocation81_spill] sm:$0xff]  ;;  %v14617_v25 = vld [vmem:[#allocation48_spill] sm:$0xff] }
 0x33f   :  { %v3607_v39 = vmul.f32 %v10011_v36, %v14608_v3  ;;  %v10446_v37 = vadd.f32 %v10425_v54, %v3551_v22  ;;  %v3608_v1 = vmul.f32 %v10020_v32, %v14609_v2  ;;  %v3609_v45 = vmul.f32 %v10029_v15, %v14606_v29  ;;  %v14618_v11 = vld [vmem:[#allocation9_spill] sm:$0xff] }
 0x340   :  { %v3585_v30 = vrot.slane %v3584_v59, 4  ;;  %v3564_v58 = vadd.f32 %v3563_v62, %v3562_v16  ;;  %v3575_v13 = vadd.f32 %v3574_v4, %v3573_v5  ;;  %v3610_v55 = vmul.f32 %v10038_v0, %v14607_v23  ;;  %v14619_v5 = vld [vmem:[#allocation76_spill] sm:$0xff] }
 0x341   :  { %v3611_v53 = vmul.f32 %v10047_v40, %v14608_v3  ;;  %v3612_v36 = vmul.f32 %v10056_v50, %v14609_v2  ;;  %v3613_v27 = vmul.f32 %v10065_v61, %v14606_v29  ;;  %v3614_v32 = vmul.f32 %v10077_v52, %v14607_v23  ;;  %v14621_v4 = vld [vmem:[#allocation80_spill] sm:$0xff] }
 0x342   :  { %v3586_v34 = vadd.f32 %v3585_v30, %v3584_v59  ;;  %v3576_v48 = vrot.slane %v3575_v13, 1  ;;  %v10463_v15 = vadd.f32 %v10425_v54, %v3564_v58  ;;  %v3615_v0 = vmul.f32 %v10084_v31, %v14608_v3  ;;  %v14620_v59 = vld [vmem:[#allocation78_spill] sm:$0xff]  ;;  %v14622_v58 = vld [vmem:[#allocation64_spill] sm:$0xff] }
 0x343   :  { %v3616_v40 = vmul.f32 %v10091_v18, %v14609_v2  ;;  %v3617_v50 = vmul.f32 %v10098_v35, %v14606_v29  ;;  %v3618_v61 = vmul.f32 %v10105_v12, %v14607_v23  ;;  %v3619_v52 = vmul.f32 %v10112_v47, %v14608_v3 }
 0x344   :  { %v3587_v43 = vrot.slane %v3586_v34, 2  ;;  %v3577_v41 = vadd.f32 %v3576_v48, %v3575_v13  ;;  %v3620_v20 = vmul.f32 %v10119_v33, %v14609_v2  ;;  %v3621_v31 = vmul.f32 %v14610_v10, %v14606_v29  ;;  %v14615_v33 = vld [vmem:[#allocation7_spill] sm:$0xff] }
 0x345   :  { %v3622_v18 = vmul.f32 %v14611_v44, %v14607_v23  ;;  %v3623_v35 = vmul.f32 %v14612_v24, %v14608_v3  ;;  %v3624_v12 = vmul.f32 %v14613_v63, %v14609_v2  ;;  %v3625_v47 = vmul.f32 %v14614_v14, %v14606_v29 }
 0x346   :  { %v3588_v7 = vadd.f32 %v3587_v43, %v3586_v34  ;;  %v10488_v28 = vadd.f32 %v10425_v54, %v3577_v41  ;;  %v3626_v46 = vmul.f32 %v14615_v33, %v14607_v23  ;;  %v3627_v9 = vmul.f32 %v14616_v49, %v14608_v3  ;;  %v14623_v34 = vld [vmem:[#allocation56_spill] sm:$0xff] }
 0x347   :  { %v3628_v51 = vmul.f32 %v14617_v25, %v14609_v2  ;;  %v3629_v16 = vmul.f32 %v14618_v11, %v14606_v29  ;;  %v3630_v22 = vmul.f32 %v14619_v5, %v14607_v23  ;;  %v10502_v62 = vmul.f32 %v14620_v59, %v14608_v3  ;;  %v14624_v43 = vld [vmem:[#allocation84_spill] sm:$0xff] }
 0x348   :  { %v3589_v26 = vrot.slane %v3588_v7, 1  ;;  %v10506_v30 = vmul.f32 %v14621_v4, %v14609_v2  ;;  %v10510_v13 = vmul.f32 %v14622_v58, %v14606_v29  ;;  %v10514_v48 = vmul.f32 %v14623_v34, %v14607_v23  ;;  %v11024_v29 = vld [vmem:[%s13300_s0 + $0x60] sm:$0xff] }
 0x349   :  { %v10518_v41 = vmul.f32 %v14624_v43, %v14608_v3  ;;  %v10522_v44 = vmul.f32 %v14604_v19, %v14609_v2  ;;  %v3637_v24 = vsel %vm171_vm0, %v3605_v6, 0.0  ;;  %v3638_v63 = vsel %vm171_vm0, %v3606_v17, 0.0  ;;  %v11008_v2 = vld [vmem:[%s13300_s0 + $0x50] sm:$0xff]  ;;  %v11016_v3 = vld [vmem:[%s13300_s0 + $0x58] sm:$0xff]  ;;  %14705 = vst [vmem:[#allocation62_spill] sm:$0xff] %v11024_v29 }
 0x34a   :  { %v3590_v10 = vadd.f32 %v3589_v26, %v3588_v7  ;;  %v3639_v14 = vadd.f32 %v3638_v63, %v3637_v24  ;;  %v3640_v33 = vsel %vm171_vm0, %v3607_v39, 0.0  ;;  %v3642_v49 = vsel %vm171_vm0, %v3608_v1, 0.0 }
 0x34b   :  { %v3650_v25 = vsel %vm171_vm0, %v3609_v45, 0.0  ;;  %v3651_v7 = vsel %vm171_vm0, %v3610_v55, 0.0  ;;  %v3653_v26 = vsel %vm171_vm0, %v3611_v53, 0.0  ;;  %v3655_v19 = vsel %vm171_vm0, %v3612_v36, 0.0 }
 0x34c   :  { %v10530_v11 = vadd.f32 %v10425_v54, %v3590_v10  ;;  %v3641_v5 = vadd.f32 %v3640_v33, %v3639_v14  ;;  %v3652_v6 = vadd.f32 %v3651_v7, %v3650_v25  ;;  %v3663_v17 = vsel %vm171_vm0, %v3613_v27, 0.0 }
 0x34d   :  { %v3664_v59 = vsel %vm171_vm0, %v3614_v32, 0.0  ;;  %v3666_v1 = vsel %vm171_vm0, %v3615_v0, 0.0  ;;  %v3668_v45 = vsel %vm171_vm0, %v3616_v40, 0.0  ;;  %v3676_v54 = vsel %vm171_vm0, %v3617_v50, 0.0 }
 0x34e   :  { %v3665_v39 = vadd.f32 %v3664_v59, %v3663_v17  ;;  %v3643_v4 = vadd.f32 %v3642_v49, %v3641_v5  ;;  %v3654_v58 = vadd.f32 %v3653_v26, %v3652_v6  ;;  %v3677_v55 = vsel %vm171_vm0, %v3618_v61, 0.0 }
 0x34f   :  { %v3679_v53 = vsel %vm171_vm0, %v3619_v52, 0.0  ;;  %v3678_v34 = vadd.f32 %v3677_v55, %v3676_v54  ;;  %v3681_v43 = vsel %vm171_vm0, %v3620_v20, 0.0  ;;  %v3689_v27 = vsel %vm171_vm0, %v3621_v31, 0.0 }
 0x350   :  { %v3667_v36 = vadd.f32 %v3666_v1, %v3665_v39  ;;  %v3644_v32 = vrot.slane %v3643_v4, 4  ;;  %v3656_v10 = vadd.f32 %v3655_v19, %v3654_v58  ;;  %v3690_v0 = vsel %vm171_vm0, %v3622_v18, 0.0 }
 0x351   :  { %v3692_v40 = vsel %vm171_vm0, %v3623_v35, 0.0  ;;  %v3680_v50 = vadd.f32 %v3679_v53, %v3678_v34  ;;  %v3691_v63 = vadd.f32 %v3690_v0, %v3689_v27  ;;  %v3694_v14 = vsel %vm171_vm0, %v3624_v12, 0.0 }
 0x352   :  { %v3669_v24 = vadd.f32 %v3668_v45, %v3667_v36  ;;  %v3645_v61 = vadd.f32 %v3644_v32, %v3643_v4  ;;  %v3657_v33 = vrot.slane %v3656_v10, 4  ;;  %v3702_v52 = vsel %vm171_vm0, %v3625_v47, 0.0 }
 0x353   :  { %v3703_v49 = vsel %vm171_vm0, %v3626_v46, 0.0  ;;  %v3682_v25 = vadd.f32 %v3681_v43, %v3680_v50  ;;  %v3693_v31 = vadd.f32 %v3692_v40, %v3691_v63  ;;  %v3705_v18 = vsel %vm171_vm0, %v3627_v9, 0.0 }
 0x354   :  { %v3670_v20 = vrot.slane %v3669_v24, 4  ;;  %v3704_v7 = vadd.f32 %v3703_v49, %v3702_v52  ;;  %v3646_v26 = vrot.slane %v3645_v61, 2  ;;  %v3658_v19 = vadd.f32 %v3657_v33, %v3656_v10 }
 0x355   :  { %v3707_v35 = vsel %vm171_vm0, %v3628_v51, 0.0  ;;  %v3683_v6 = vrot.slane %v3682_v25, 4  ;;  %v3695_v17 = vadd.f32 %v3694_v14, %v3693_v31  ;;  %v3715_v47 = vsel %vm171_vm0, %v3629_v16, 0.0 }
 0x356   :  { %v3671_v5 = vadd.f32 %v3670_v20, %v3669_v24  ;;  %v3706_v12 = vadd.f32 %v3705_v18, %v3704_v7  ;;  %v3647_v59 = vadd.f32 %v3646_v26, %v3645_v61  ;;  %v3659_v39 = vrot.slane %v3658_v19, 2 }
 0x357   :  { %v3716_v46 = vsel %vm171_vm0, %v3630_v22, 0.0  ;;  %v3684_v45 = vadd.f32 %v3683_v6, %v3682_v25  ;;  %v3696_v54 = vrot.slane %v3695_v17, 4  ;;  %v3718_v9 = vsel %vm171_vm0, %v10502_v62, 0.0  ;;  %v14627_v6 = vld [vmem:[#allocation107_spill] sm:$0xff] }
 0x358   :  { %v3672_v1 = vrot.slane %v3671_v5, 2  ;;  %v3708_v4 = vadd.f32 %v3707_v35, %v3706_v12  ;;  %v3648_v58 = vrot.slane %v3647_v59, 1  ;;  %v3660_v55 = vadd.f32 %v3659_v39, %v3658_v19  ;;  %v14628_v12 = vld [vmem:[#allocation88_spill] sm:$0xff] }
 0x359   :  { %v3717_v53 = vadd.f32 %v3716_v46, %v3715_v47  ;;  %v3685_v36 = vrot.slane %v3684_v45, 2  ;;  %v3697_v34 = vadd.f32 %v3696_v54, %v3695_v17  ;;  %v3720_v16 = vsel %vm171_vm0, %v10506_v30, 0.0 }
 0x35a   :  { %v3673_v51 = vadd.f32 %v3672_v1, %v3671_v5  ;;  %v3709_v43 = vrot.slane %v3708_v4, 4  ;;  %v3649_v27 = vadd.f32 %v3648_v58, %v3647_v59  ;;  %v3661_v32 = vrot.slane %v3660_v55, 1  ;;  %v14626_v5 = vld [vmem:[#allocation86_spill] sm:$0xff]  ;;  %v14629_v59 = vld [vmem:[#allocation108_spill] sm:$0xff] }
 0x35b   :  { %v3719_v10 = vadd.f32 %v3718_v9, %v3717_v53  ;;  %v3686_v0 = vadd.f32 %v3685_v36, %v3684_v45  ;;  %v3698_v40 = vrot.slane %v3697_v34, 2  ;;  %v3728_v14 = vsel %vm171_vm0, %v10510_v13, 0.0  ;;  %v14625_v13 = vld [vmem:[#allocation6_spill] sm:$0xff]  ;;  %v14631_v9 = vld [vmem:[#allocation109_spill] sm:$0xff]  ;;  %v14632_v36 = vld [vmem:[#allocation44_spill] sm:$0xff] }
 0x35c   :  { %v3674_v22 = vrot.slane %v3673_v51, 1  ;;  %v3710_v24 = vadd.f32 %v3709_v43, %v3708_v4  ;;  %v3662_v50 = vadd.f32 %v3661_v32, %v3660_v55  ;;  %v3729_v62 = vsel %vm171_vm0, %v10514_v48, 0.0  ;;  %v14630_v53 = vld [vmem:[#allocation42_spill] sm:$0xff] }
 0x35d   :  { %v3721_v63 = vadd.f32 %v3720_v16, %v3719_v10  ;;  %v3687_v33 = vrot.slane %v3686_v0, 1  ;;  %v3699_v52 = vadd.f32 %v3698_v40, %v3697_v34  ;;  %v3730_v25 = vadd.f32 %v3729_v62, %v3728_v14  ;;  %v14633_v34 = vld [vmem:[#allocation63_spill] sm:$0xff]  ;;  %v14634_v10 = vld [vmem:[#allocation65_spill] sm:$0xff]  ;;  %v14635_v16 = vld [vmem:[#allocation68_spill] sm:$0xff] }
 0x35e   :  { %v3675_v61 = vadd.f32 %v3674_v22, %v3673_v51  ;;  %v3711_v49 = vrot.slane %v3710_v24, 2  ;;  %v3731_v30 = vsel %vm171_vm0, %v10518_v41, 0.0  ;;  %v3733_v31 = vsel %vm171_vm0, %v10522_v44, 0.0  ;;  %v14637_v40 = vld [vmem:[#allocation75_spill] sm:$0xff]  ;;  %v14639_v14 = vld [vmem:[#allocation85_spill] sm:$0xff] }
 0x35f   :  { %v3722_v20 = vrot.slane %v3721_v63, 4  ;;  %v3688_v7 = vadd.f32 %v3687_v33, %v3686_v0  ;;  %v3700_v26 = vrot.slane %v3699_v52, 1  ;;  %v10567_v18 = vrot.slane %v14625_v13, %v14554_v21  ;;  %v14636_v0 = vld [vmem:[#allocation87_spill] sm:$0xff] }
 0x360   :  { %v3712_v19 = vadd.f32 %v3711_v49, %v3710_v24  ;;  %v3732_v35 = vadd.f32 %v3731_v30, %v3730_v25  ;;  %v3755_v17 = vmax.f32 %v14627_v6, %v14626_v5  ;;  %v3756_v39 = vmax.f32 %v14629_v59, %v14628_v12  ;;  %v11002_v13 = vld [vmem:[%s13300_s0 + $0x48] sm:$0xff] }
 0x361   :  { %v3723_v48 = vadd.f32 %v3722_v20, %v3721_v63  ;;  %v3701_v47 = vadd.f32 %v3700_v26, %v3699_v52  ;;  %v10574_v46 = vadd.f32 %v10567_v18, %v3649_v27  ;;  %v10577_v44 = vadd.f32 %v10567_v18, %v3662_v50  ;;  %v14638_v63 = vld [vmem:[#allocation46_spill] sm:$0xff] }
 0x362   :  { %v3713_v41 = vrot.slane %v3712_v19, 1  ;;  %v3734_v45 = vadd.f32 %v3733_v31, %v3732_v35  ;;  %v10580_v54 = vadd.f32 %v10567_v18, %v3675_v61  ;;  %v10583_v4 = vadd.f32 %v10567_v18, %v3688_v7  ;;  %v14640_v61 = vld [vmem:[#allocation83_spill] sm:$0xff] }
 0x363   :  { %v3724_v1 = vrot.slane %v3723_v48, 2  ;;  %v10586_v55 = vadd.f32 %v10567_v18, %v3701_v47  ;;  %v3757_v51 = vmax.f32 %v14631_v9, %v14630_v53  ;;  %v3758_v43 = vmax.f32 %v14633_v34, %v14632_v36 }
 0x364   :  { %v3714_v58 = vadd.f32 %v3713_v41, %v3712_v19  ;;  %v3735_v32 = vrot.slane %v3734_v45, 4  ;;  %v3759_v22 = vmax.f32 %v14635_v16, %v14634_v10  ;;  %v3760_v24 = vmax.f32 %v14637_v40, %v14636_v0 }
 0x365   :  { %v3725_v27 = vadd.f32 %v3724_v1, %v3723_v48  ;;  %v3761_v62 = vmax.f32 %v14639_v14, %v14638_v63  ;;  %v3762_v33 = vmax.f32 %v14640_v61, %v10390_v56  ;;  %v3763_v52 = vmax.f32 %v3755_v17, %v10430_v60 }
 0x366   :  { %v10597_v50 = vadd.f32 %v10567_v18, %v3714_v58  ;;  %v3736_v20 = vadd.f32 %v3735_v32, %v3734_v45  ;;  %v3764_v25 = vmax.f32 %v3756_v39, %v10433_v38  ;;  %v3765_v30 = vmax.f32 %v3757_v51, %v10436_v8 }
 0x367   :  { %v3726_v49 = vrot.slane %v3725_v27, 1  ;;  %v3766_v31 = vmax.f32 %v3758_v43, %v10439_v57  ;;  %v3767_v7 = vmax.f32 %v3759_v22, %v10446_v37  ;;  %v3768_v26 = vmax.f32 %v3760_v24, %v10463_v15 }
 0x368   :  { %v3769_v19 = vmax.f32 %v3761_v62, %v10488_v28  ;;  %v3737_v35 = vrot.slane %v3736_v20, 2  ;;  %v3770_v47 = vmax.f32 %v3762_v33, %v10530_v11  ;;  %v10612_v17 = vmax.f32 %v3763_v52, %v10574_v46 }
 0x369   :  { %v3727_v48 = vadd.f32 %v3726_v49, %v3725_v27  ;;  %v10615_v41 = vmax.f32 %v3764_v25, %v10577_v44  ;;  %v10618_v39 = vmax.f32 %v3765_v30, %v10580_v54  ;;  %v10621_v1 = vmax.f32 %v3766_v31, %v10583_v4 }
 0x36a   :  { %v10624_v45 = vmax.f32 %v3767_v7, %v10586_v55  ;;  %v3738_v58 = vadd.f32 %v3737_v35, %v3736_v20  ;;  %v10630_v43 = vmax.f32 %v3768_v26, %v10597_v50  ;;  %v3779_v27 = vsub.f32 %v14627_v6, %v10612_v17 }
 0x36b   :  { %v10627_v51 = vadd.f32 %v10567_v18, %v3727_v48  ;;  %v3780_v32 = vsub.f32 %v14629_v59, %v10615_v41  ;;  %v3781_v22 = vsub.f32 %v14631_v9, %v10618_v39  ;;  %v3782_v24 = vsub.f32 %v14633_v34, %v10621_v1 }
 0x36c   :  { %v3783_v62 = vsub.f32 %v14635_v16, %v10624_v45  ;;  %v3739_v33 = vrot.slane %v3738_v58, 1  ;;  %v3784_v49 = vsub.f32 %v14637_v40, %v10630_v43  ;;  %v3787_v6 = vmul.f32 1.442695, %v3779_v27 }
 0x36d   :  { %v10643_v52 = vmax.f32 %v3769_v19, %v10627_v51  ;;  %v3789_v20 = vmul.f32 1.442695, %v3780_v32  ;;  %v3791_v25 = vmul.f32 1.442695, %v3781_v22  ;;  %v3793_v59 = vmul.f32 1.442695, %v3782_v24 }
 0x36e   :  { %v3803_v9 = vsub.f32 %v14626_v5, %v10612_v17  ;;  %v3740_v30 = vadd.f32 %v3739_v33, %v3738_v58  ;;  %5853 = vpow2.f32 %v3787_v6  ;;  %v3795_v16 = vmul.f32 1.442695, %v3783_v62 }
 0x36f   :  { %v3785_v34 = vsub.f32 %v14639_v14, %v10643_v52  ;;  %5855 = vpow2.f32 %v3789_v20  ;;  %v3797_v31 = vmul.f32 1.442695, %v3784_v49  ;;  %v3804_v7 = vsub.f32 %v14628_v12, %v10615_v41 }
 0x370   :  { %v3805_v40 = vsub.f32 %v14630_v53, %v10618_v39  ;;  %v10656_v26 = vadd.f32 %v10567_v18, %v3740_v30  ;;  %5857 = vpow2.f32 %v3791_v25  ;;  %v3806_v5 = vsub.f32 %v14632_v36, %v10621_v1 }
 0x371   :  { %v3799_v19 = vmul.f32 1.442695, %v3785_v34  ;;  %5859 = vpow2.f32 %v3793_v59  ;;  %v3807_v14 = vsub.f32 %v14634_v10, %v10624_v45  ;;  %v3811_v12 = vmul.f32 1.442695, %v3803_v9 }
 0x372   :  { %v10663_v48 = vmax.f32 %v3770_v47, %v10656_v26  ;;  %5861 = vpow2.f32 %v3795_v16  ;;  %v3813_v35 = vmul.f32 1.442695, %v3804_v7  ;;  %v3808_v18 = vsub.f32 %v14636_v0, %v10630_v43 }
 0x373   :  { %5863 = vpow2.f32 %v3797_v31  ;;  %v3815_v53 = vmul.f32 1.442695, %v3805_v40  ;;  %v3809_v36 = vsub.f32 %v14638_v63, %v10643_v52  ;;  %v3817_v47 = vmul.f32 1.442695, %v3806_v5 }
 0x374   :  { %v3786_v58 = vsub.f32 %v14640_v61, %v10663_v48  ;;  %5865 = vpow2.f32 %v3799_v19  ;;  %v3810_v10 = vsub.f32 %v10390_v56, %v10663_v48  ;;  %v3819_v32 = vmul.f32 1.442695, %v3807_v14 }
 0x375   :  { %5867 = vpow2.f32 %v3811_v12  ;;  %v3827_v22 = vsub.f32 %v10430_v60, %v10612_v17  ;;  %v3821_v0 = vmul.f32 1.442695, %v3808_v18  ;;  %v3828_v61 = vsub.f32 %v10433_v38, %v10615_v41 }
 0x376   :  { %v3801_v27 = vmul.f32 1.442695, %v3786_v58  ;;  %5869 = vpow2.f32 %v3813_v35  ;;  %v3823_v24 = vmul.f32 1.442695, %v3809_v36  ;;  %v3829_v63 = vsub.f32 %v10436_v8, %v10618_v39 }
 0x377   :  { %5871 = vpow2.f32 %v3815_v53  ;;  %v3825_v56 = vmul.f32 1.442695, %v3810_v10  ;;  %v3830_v62 = vsub.f32 %v10439_v57, %v10621_v1  ;;  %v3831_v33 = vsub.f32 %v10446_v37, %v10624_v45 }
 0x378   :  { %5873 = vpow2.f32 %v3801_v27  ;;  %v3835_v60 = vmul.f32 1.442695, %v3827_v22  ;;  %v3832_v38 = vsub.f32 %v10463_v15, %v10630_v43  ;;  %v3837_v6 = vmul.f32 1.442695, %v3828_v61 }
 0x379   :  { %5875 = vpow2.f32 %v3817_v47  ;;  %v3833_v8 = vsub.f32 %v10488_v28, %v10643_v52  ;;  %v3839_v25 = vmul.f32 1.442695, %v3829_v63  ;;  %v3834_v37 = vsub.f32 %v10530_v11, %v10663_v48 }
 0x37a   :  { %5877 = vpow2.f32 %v3819_v32  ;;  %v3841_v59 = vmul.f32 1.442695, %v3830_v62  ;;  %v3843_v30 = vmul.f32 1.442695, %v3831_v33  ;;  %v3851_v15 = vsub.f32 %v10574_v46, %v10612_v17 }
 0x37b   :  { %v10683_v49 = vpop.eup %5853  ;;  %5879 = vpow2.f32 %v3821_v0  ;;  %v3845_v16 = vmul.f32 1.442695, %v3832_v38  ;;  %v3852_v28 = vsub.f32 %v10577_v44, %v10615_v41  ;;  %v3847_v7 = vmul.f32 1.442695, %v3833_v8 }
 0x37c   :  { %v10687_v20 = vpop.eup %5855  ;;  %5881 = vpow2.f32 %v3823_v24  ;;  %v3853_v11 = vsub.f32 %v10580_v54, %v10618_v39  ;;  %v3849_v19 = vmul.f32 1.442695, %v3834_v37  ;;  %v3854_v46 = vsub.f32 %v10583_v4, %v10621_v1 }
 0x37d   :  { %v10691_v57 = vpop.eup %5857  ;;  %5883 = vpow2.f32 %v3825_v56  ;;  %v3855_v44 = vsub.f32 %v10586_v55, %v10624_v45  ;;  %v3859_v41 = vmul.f32 1.442695, %v3851_v15  ;;  %v3856_v54 = vsub.f32 %v10597_v50, %v10630_v43 }
 0x37e   :  { %v10695_v9 = vpop.eup %5859  ;;  %5885 = vpow2.f32 %v3835_v60  ;;  %v3861_v39 = vmul.f32 1.442695, %v3852_v28  ;;  %v3857_v4 = vsub.f32 %v10627_v51, %v10643_v52  ;;  %v3863_v1 = vmul.f32 1.442695, %v3853_v11 }
 0x37f   :  { %v10699_v34 = vpop.eup %5861  ;;  %5887 = vpow2.f32 %v3837_v6  ;;  %v3858_v55 = vsub.f32 %v10656_v26, %v10663_v48  ;;  %v3865_v45 = vmul.f32 1.442695, %v3854_v46  ;;  %v3867_v18 = vmul.f32 1.442695, %v3855_v44 }
 0x380   :  { %v10703_v31 = vpop.eup %5863  ;;  %5889 = vpow2.f32 %v3839_v25  ;;  %v3869_v43 = vmul.f32 1.442695, %v3856_v54  ;;  %v3871_v51 = vmul.f32 1.442695, %v3857_v4 }
 0x381   :  { %v10707_v40 = vpop.eup %5865  ;;  %5891 = vpow2.f32 %v3841_v59  ;;  %v3873_v58 = vmul.f32 1.442695, %v3858_v55 }
 0x382   :  { %v10711_v17 = vpop.eup %5867  ;;  %5893 = vpow2.f32 %v3843_v30 }
 0x383   :  { %v10715_v5 = vpop.eup %5869  ;;  %5895 = vpow2.f32 %v3845_v16  ;;  %v3875_v10 = vadd.f32 %v10711_v17, %v10683_v49 }
 0x384   :  { %v10719_v14 = vpop.eup %5871  ;;  %5897 = vpow2.f32 %v3847_v7  ;;  %v3876_v27 = vadd.f32 %v10715_v5, %v10687_v20 }
 0x385   :  { %v10723_v12 = vpop.eup %5873  ;;  %5899 = vpow2.f32 %v3849_v19  ;;  %v3877_v22 = vadd.f32 %v10719_v14, %v10691_v57 }
 0x386   :  { %v10727_v35 = vpop.eup %5875  ;;  %5901 = vpow2.f32 %v3859_v41 }
 0x387   :  { %v10729_v50 = vpop.eup %5877  ;;  %5903 = vpow2.f32 %v3861_v39  ;;  %v3878_v61 = vadd.f32 %v10727_v35, %v10695_v9 }
 0x388   :  { %v10731_v53 = vpop.eup %5879  ;;  %5905 = vpow2.f32 %v3863_v1  ;;  %v3879_v63 = vadd.f32 %v10729_v50, %v10699_v34 }
 0x389   :  { %v10733_v52 = vpop.eup %5881  ;;  %5907 = vpow2.f32 %v3865_v45  ;;  %v3880_v33 = vadd.f32 %v10731_v53, %v10703_v31 }
 0x38a   :  { %v10735_v36 = vpop.eup %5883  ;;  %5909 = vpow2.f32 %v3867_v18  ;;  %v3881_v6 = vadd.f32 %v10733_v52, %v10707_v40 }
 0x38b   :  { %v5886_v26 = vpop.eup %5885  ;;  %5911 = vpow2.f32 %v3869_v43  ;;  %v3882_v37 = vadd.f32 %v10735_v36, %v10723_v12 }
 0x38c   :  { %v5888_v48 = vpop.eup %5887  ;;  %5913 = vpow2.f32 %v3871_v51  ;;  %v3883_v56 = vadd.f32 %v5886_v26, %v3875_v10 }
 0x38d   :  { %v10739_v47 = vpop.eup %5889  ;;  %5915 = vpow2.f32 %v3873_v58  ;;  %v3884_v60 = vadd.f32 %v5888_v48, %v3876_v27 }
 0x38e   :  { %v10743_v32 = vpop.eup %5891  ;;  %v3885_v8 = vadd.f32 %v10739_v47, %v3877_v22 }
 0x38f   :  { %v10747_v0 = vpop.eup %5893  ;;  %v3886_v59 = vadd.f32 %v10743_v32, %v3878_v61 }
 0x390   :  { %v10751_v24 = vpop.eup %5895  ;;  %v3887_v15 = vadd.f32 %v10747_v0, %v3879_v63 }
 0x391   :  { %v10755_v62 = vpop.eup %5897  ;;  %v3888_v7 = vadd.f32 %v10751_v24, %v3880_v33 }
 0x392   :  { %v10759_v38 = vpop.eup %5899  ;;  %v3889_v46 = vadd.f32 %v10755_v62, %v3881_v6 }
 0x393   :  { %v5902_v25 = vpop.eup %5901  ;;  %v3890_v54 = vadd.f32 %v10759_v38, %v3882_v37 }
 0x394   :  { %v5904_v30 = vpop.eup %5903  ;;  %v3891_v16 = vadd.f32 %v5902_v25, %v3883_v56 }
 0x395   :  { %v10768_v28 = vpop.eup %5905  ;;  %v3892_v11 = vadd.f32 %v5904_v30, %v3884_v60 }
 0x396   :  { %v10771_v19 = vpop.eup %5907  ;;  %v3893_v44 = vadd.f32 %v10768_v28, %v3885_v8  ;;  %5917 = vrcp.f32 %v3891_v16 }
 0x397   :  { %v10775_v41 = vpop.eup %5909  ;;  %v3894_v39 = vadd.f32 %v10771_v19, %v3886_v59  ;;  %5919 = vrcp.f32 %v3892_v11 }
 0x398   :  { %v10779_v4 = vpop.eup %5911  ;;  %v3895_v1 = vadd.f32 %v10775_v41, %v3887_v15  ;;  %5921 = vrcp.f32 %v3893_v44  ;;  %v14641_v15 = vld [vmem:[#allocation8_spill] sm:$0xff]  ;;  %v14649_v44 = vld [vmem:[#allocation14_spill] sm:$0xff] }
 0x399   :  { %v10782_v55 = vpop.eup %5913  ;;  %v3896_v45 = vadd.f32 %v10779_v4, %v3888_v7  ;;  %5923 = vrcp.f32 %v3894_v39  ;;  %v14651_v39 = vld [vmem:[#allocation20_spill] sm:$0xff] }
 0x39a   :  { %v10785_v18 = vpop.eup %5915  ;;  %v3897_v43 = vadd.f32 %v10782_v55, %v3889_v46  ;;  %5925 = vrcp.f32 %v3895_v1 }
 0x39b   :  { %v3898_v51 = vadd.f32 %v10785_v18, %v3890_v54  ;;  %5927 = vrcp.f32 %v3896_v45 }
 0x39c   :  { %5929 = vrcp.f32 %v3897_v43  ;;  %v14653_v43 = vld [vmem:[#allocation15_spill] sm:$0xff] }
 0x39d   :  { %5931 = vrcp.f32 %v3898_v51 }
 0x3a3   :  { %v5918_v58 = vpop.eup %5917 }
 0x3a4   :  { %v5920_v10 = vpop.eup %5919  ;;  %v3907_v27 = vmul.f32 %v5918_v58, %v10683_v49  ;;  %v3923_v22 = vmul.f32 %v5918_v58, %v10711_v17  ;;  %v3939_v61 = vmul.f32 %v5918_v58, %v5886_v26  ;;  %v3955_v63 = vmul.f32 %v5918_v58, %v5902_v25  ;;  %v14643_v49 = vld [vmem:[#allocation10_spill] sm:$0xff]  ;;  %v14645_v25 = vld [vmem:[#allocation13_spill] sm:$0xff]  ;;  %v14655_v58 = vld [vmem:[#allocation28_spill] sm:$0xff] }
 0x3a5   :  { %v5922_v56 = vpop.eup %5921  ;;  %v3908_v33 = vmul.f32 %v5920_v10, %v10687_v20  ;;  %v3924_v60 = vmul.f32 %v5920_v10, %v10715_v5  ;;  %v3940_v6 = vmul.f32 %v5920_v10, %v5888_v48  ;;  %v3956_v8 = vmul.f32 %v5920_v10, %v5904_v30  ;;  %v14647_v48 = vld [vmem:[#allocation27_spill] sm:$0xff] }
 0x3a6   :  { %v5924_v37 = vpop.eup %5923  ;;  %v3909_v59 = vmul.f32 %v5922_v56, %v10691_v57  ;;  %v10795_v16 = vsub.f32 %v3907_v27, %v14641_v15  ;;  %v3925_v7 = vmul.f32 %v5922_v56, %v10719_v14  ;;  %v10799_v11 = vsub.f32 %v3923_v22, %v14643_v49  ;;  %v14657_v22 = vld [vmem:[#allocation16_spill] sm:$0xff]  ;;  %v14661_v15 = vld [vmem:[#allocation17_spill] sm:$0xff] }
 0x3a7   :  { %v5926_v17 = vpop.eup %5925  ;;  %v3910_v26 = vmul.f32 %v5924_v37, %v10695_v9  ;;  %v10803_v20 = vsub.f32 %v3908_v33, %v14645_v25  ;;  %v3926_v5 = vmul.f32 %v5924_v37, %v10727_v35  ;;  %v10807_v30 = vsub.f32 %v3924_v60, %v14647_v48  ;;  %v14659_v60 = vld [vmem:[#allocation21_spill] sm:$0xff]  ;;  %v14665_v25 = vld [vmem:[#allocation26_spill] sm:$0xff] }
 0x3a8   :  { %14642 = vst [vmem:[#allocation53_spill] sm:$0xff] %v10795_v16  ;;  %14644 = vst [vmem:[#allocation52_spill] sm:$0xff] %v10799_v11  ;;  %v5928_v57 = vpop.eup %5927  ;;  %v3911_v46 = vmul.f32 %v5926_v17, %v10699_v34  ;;  %v10811_v54 = vsub.f32 %v3909_v59, %v14649_v44  ;;  %v3927_v14 = vmul.f32 %v5926_v17, %v10729_v50  ;;  %v14663_v49 = vld [vmem:[#allocation29_spill] sm:$0xff]  ;;  %v14669_v44 = vld [vmem:[#allocation19_spill] sm:$0xff] }
 0x3a9   :  { %14646 = vst [vmem:[#allocation55_spill] sm:$0xff] %v10803_v20  ;;  %14648 = vst [vmem:[#allocation66_spill] sm:$0xff] %v10807_v30  ;;  %v10815_v1 = vsub.f32 %v3925_v7, %v14651_v39  ;;  %v5930_v9 = vpop.eup %5929  ;;  %v3912_v45 = vmul.f32 %v5928_v57, %v10703_v31  ;;  %v10819_v51 = vsub.f32 %v3910_v26, %v14653_v43 }
 0x3aa   :  { %14650 = vst [vmem:[#allocation47_spill] sm:$0xff] %v10811_v54  ;;  %v3928_v35 = vmul.f32 %v5928_v57, %v10731_v53  ;;  %v10823_v10 = vsub.f32 %v3926_v5, %v14655_v58  ;;  %v5932_v34 = vpop.eup %5931  ;;  %v3913_v27 = vmul.f32 %v5930_v9, %v10707_v40  ;;  %v10827_v33 = vsub.f32 %v3911_v46, %v14657_v22  ;;  %v14667_v5 = vld [vmem:[#allocation22_spill] sm:$0xff]  ;;  %v14673_v58 = vld [vmem:[#allocation11_spill] sm:$0xff] }
 0x3ab   :  { %14652 = vst [vmem:[#allocation60_spill] sm:$0xff] %v10815_v1  ;;  %14654 = vst [vmem:[#allocation49_spill] sm:$0xff] %v10819_v51  ;;  %v3929_v50 = vmul.f32 %v5930_v9, %v10733_v52  ;;  %v10831_v59 = vsub.f32 %v3927_v14, %v14659_v60  ;;  %v3914_v31 = vmul.f32 %v5932_v34, %v10723_v12  ;;  %v14671_v14 = vld [vmem:[#allocation30_spill] sm:$0xff]  ;;  %v14679_v60 = vld [vmem:[#allocation24_spill] sm:$0xff] }
 0x3ac   :  { %14656 = vst [vmem:[#allocation51_spill] sm:$0xff] %v10823_v10  ;;  %14658 = vst [vmem:[#allocation91_spill] sm:$0xff] %v10827_v33  ;;  %v10835_v7 = vsub.f32 %v3912_v45, %v14661_v15  ;;  %v3930_v53 = vmul.f32 %v5932_v34, %v10735_v36  ;;  %v10839_v26 = vsub.f32 %v3928_v35, %v14663_v49  ;;  %v14681_v15 = vld [vmem:[#allocation2_spill] sm:$0xff] }
 0x3ad   :  { %14660 = vst [vmem:[#allocation92_spill] sm:$0xff] %v10831_v59  ;;  %v10842_v40 = vsub.f32 %v3913_v27, %v14665_v25  ;;  %v10845_v48 = vsub.f32 %v3929_v50, %v14667_v5  ;;  %v3941_v52 = vmul.f32 %v5922_v56, %v10739_v47  ;;  %v3942_v46 = vmul.f32 %v5924_v37, %v10743_v32  ;;  %v14675_v47 = vld [vmem:[#allocation23_spill] sm:$0xff] }
 0x3ae   :  { %14662 = vst [vmem:[#allocation74_spill] sm:$0xff] %v10835_v7  ;;  %14664 = vst [vmem:[#allocation93_spill] sm:$0xff] %v10839_v26  ;;  %v10850_v12 = vsub.f32 %v3914_v31, %v14669_v44  ;;  %v10853_v39 = vsub.f32 %v3930_v53, %v14671_v14  ;;  %v3943_v36 = vmul.f32 %v5926_v17, %v10747_v0  ;;  %v14677_v32 = vld [vmem:[#allocation31_spill] sm:$0xff]  ;;  %v14689_v14 = vld [vmem:[#allocation12_spill] sm:$0xff] }
 0x3af   :  { %14666 = vst [vmem:[#allocation94_spill] sm:$0xff] %v10842_v40  ;;  %14668 = vst [vmem:[#allocation95_spill] sm:$0xff] %v10845_v48  ;;  %v3944_v45 = vmul.f32 %v5928_v57, %v10751_v24  ;;  %v3945_v43 = vmul.f32 %v5930_v9, %v10755_v62  ;;  %v3946_v35 = vmul.f32 %v5932_v34, %v10759_v38  ;;  %v14683_v24 = vld [vmem:[#allocation25_spill] sm:$0xff]  ;;  %v14685_v62 = vld [vmem:[#allocation18_spill] sm:$0xff] }
 0x3b0   :  { %14670 = vst [vmem:[#allocation96_spill] sm:$0xff] %v10850_v12  ;;  %14672 = vst [vmem:[#allocation97_spill] sm:$0xff] %v10853_v39  ;;  %v10860_v27 = vsub.f32 %v3939_v61, %v14673_v58  ;;  %v10863_v22 = vsub.f32 %v3940_v6, %v14675_v47  ;;  %v10866_v50 = vsub.f32 %v3941_v52, %v14677_v32  ;;  %v14687_v61 = vld [vmem:[#allocation32_spill] sm:$0xff] }
 0x3b1   :  { %v10869_v31 = vsub.f32 %v3942_v46, %v14679_v60  ;;  %v10872_v0 = vsub.f32 %v3943_v36, %v14681_v15  ;;  %v10875_v53 = vsub.f32 %v3944_v45, %v14683_v24  ;;  %v10878_v38 = vsub.f32 %v3945_v43, %v14685_v62  ;;  %v14691_v45 = vld [vmem:[#allocation33_spill] sm:$0xff]  ;;  %v10934_v24 = vld [vmem:[%s13300_s0] sm:$0xff] }
 0x3b2   :  { %14674 = vst [vmem:[#allocation98_spill] sm:$0xff] %v10860_v27  ;;  %14676 = vst [vmem:[#allocation99_spill] sm:$0xff] %v10863_v22  ;;  %v10881_v49 = vsub.f32 %v3946_v35, %v14687_v61  ;;  %v3957_v6 = vmul.f32 %v5922_v56, %v10768_v28  ;;  %v3958_v25 = vmul.f32 %v5924_v37, %v10771_v19  ;;  %v14693_v35 = vld [vmem:[#allocation34_spill] sm:$0xff]  ;;  %v14695_v28 = vld [vmem:[#allocation35_spill] sm:$0xff] }
 0x3b3   :  { %14678 = vst [vmem:[#allocation100_spill] sm:$0xff] %v10866_v50  ;;  %14680 = vst [vmem:[#allocation102_spill] sm:$0xff] %v10869_v31  ;;  %v3959_v5 = vmul.f32 %v5926_v17, %v10775_v41  ;;  %v3960_v52 = vmul.f32 %v5928_v57, %v10779_v4  ;;  %v3961_v46 = vmul.f32 %v5930_v9, %v10782_v55  ;;  %v14697_v19 = vld [vmem:[#allocation36_spill] sm:$0xff]  ;;  %v14699_v4 = vld [vmem:[#allocation37_spill] sm:$0xff] }
 0x3b4   :  { %14682 = vst [vmem:[#allocation104_spill] sm:$0xff] %v10872_v0  ;;  %14684 = vst [vmem:[#allocation106_spill] sm:$0xff] %v10875_v53  ;;  %v3962_v44 = vmul.f32 %v5932_v34, %v10785_v18  ;;  %v10890_v36 = vsub.f32 %v3955_v63, %v14689_v14  ;;  %v10893_v43 = vsub.f32 %v3956_v8, %v14691_v45  ;;  %v14701_v55 = vld [vmem:[#allocation38_spill] sm:$0xff]  ;;  %v14703_v63 = vld [vmem:[#allocation39_spill] sm:$0xff] }
 0x3b5   :  { %14686 = vst [vmem:[#allocation40_spill] sm:$0xff] %v10878_v38  ;;  %14688 = vst [vmem:[#allocation50_spill] sm:$0xff] %v10881_v49  ;;  %v10896_v58 = vsub.f32 %v3957_v6, %v14693_v35  ;;  %v10899_v56 = vsub.f32 %v3958_v25, %v14695_v28  ;;  %v10902_v41 = vsub.f32 %v3959_v5, %v14697_v19  ;;  %v10942_v61 = vld [vmem:[%s13300_s0 + $0x8] sm:$0xff]  ;;  %v10950_v25 = vld [vmem:[%s13300_s0 + $0x10] sm:$0xff] }
 0x3b6   :  { %14690 = vst [vmem:[#allocation3_spill] sm:$0xff] %v10890_v36  ;;  %14692 = vst [vmem:[#allocation4_spill] sm:$0xff] %v10893_v43  ;;  %v10905_v37 = vsub.f32 %v3960_v52, %v14699_v4  ;;  %v10908_v18 = vsub.f32 %v3961_v46, %v14701_v55  ;;  %v10911_v17 = vsub.f32 %v3962_v44, %v14703_v63  ;;  %v10958_v52 = vld [vmem:[%s13300_s0 + $0x18] sm:$0xff]  ;;  %v10966_v44 = vld [vmem:[%s13300_s0 + $0x20] sm:$0xff] }
 0x3b7   :  { %14694 = vst [vmem:[#allocation77_spill] sm:$0xff] %v10896_v58  ;;  %14696 = vst [vmem:[#allocation61_spill] sm:$0xff] %v10899_v56  ;;  %v3974_v8 = vrot.slane %v10795_v16, %v14554_v21  ;;  %v3978_v57 = vrot.slane %v10803_v20, %v14554_v21  ;;  %v3982_v9 = vrot.slane %v10811_v54, %v14554_v21  ;;  %v10972_v45 = vld [vmem:[%s13300_s0 + $0x28] sm:$0xff]  ;;  %v10980_v28 = vld [vmem:[%s13300_s0 + $0x30] sm:$0xff] }
 0x3b8   :  { %14698 = vst [vmem:[#allocation79_spill] sm:$0xff] %v10902_v41  ;;  %14700 = vst [vmem:[#allocation81_spill] sm:$0xff] %v10905_v37  ;;  %v3986_v34 = vrot.slane %v10819_v51, %v14554_v21  ;;  %v3990_v47 = vrot.slane %v10827_v33, %v14554_v21  ;;  %v3994_v32 = vrot.slane %v10835_v7, %v14554_v21  ;;  %v10988_v4 = vld [vmem:[%s13300_s0 + $0x38] sm:$0xff]  ;;  %v10996_v63 = vld [vmem:[%s13300_s0 + $0x40] sm:$0xff] }
 0x3b9   :  { %14702 = vst [vmem:[#allocation67_spill] sm:$0xff] %v10908_v18  ;;  %14704 = vst [vmem:[#allocation7_spill] sm:$0xff] %v10911_v17  ;;  %v3998_v60 = vrot.slane %v10842_v40, %v14554_v21  ;;  %v10929_v15 = vrot.slane %v10850_v12, %v14554_v21  ;;  %v10937_v62 = vmul.f32 %v10934_v24, %v3974_v8  ;;  %v11030_v40 = vld [vmem:[%s13300_s0 + $0x68] sm:$0xff]  ;;  %v11036_v16 = vld [vmem:[%s13300_s0 + $0x70] sm:$0xff] }
 0x3ba   :  { %v10945_v6 = vmul.f32 %v10942_v61, %v3974_v8  ;;  %v10953_v5 = vmul.f32 %v10950_v25, %v3974_v8  ;;  %v10961_v46 = vmul.f32 %v10958_v52, %v3974_v8  ;;  %v4007_v14 = vmul.f32 %v10966_v44, %v3978_v57  ;;  %14706 = vst [vmem:[#allocation48_spill] sm:$0xff] %v11030_v40  ;;  %v11042_v33 = vld [vmem:[%s13300_s0 + $0x78] sm:$0xff]  ;;  %v11050_v54 = vld [vmem:[%s13300_s0 + $0x80] sm:$0xff]  ;;  %v11056_v17 = vld [vmem:[%s13300_s0 + $0x88] sm:$0xff] }
 0x3bb   :  { %v10975_v35 = vmul.f32 %v10972_v45, %v3978_v57  ;;  %v10983_v19 = vmul.f32 %v10980_v28, %v3978_v57  ;;  %v10991_v55 = vmul.f32 %v10988_v4, %v3978_v57  ;;  %v4011_v8 = vmul.f32 %v10996_v63, %v3982_v9  ;;  %14707 = vst [vmem:[#allocation9_spill] sm:$0xff] %v11036_v16  ;;  %v11062_v37 = vld [vmem:[%s13300_s0 + $0x90] sm:$0xff]  ;;  %v11068_v41 = vld [vmem:[%s13300_s0 + $0x98] sm:$0xff]  ;;  %v11076_v58 = vld [vmem:[%s13300_s0 + $0xa0] sm:$0xff] }
 0x3bc   :  { %v4012_v42 = vmul.f32 %v11002_v13, %v3982_v9  ;;  %v11011_v57 = vmul.f32 %v11008_v2, %v3982_v9  ;;  %v11019_v23 = vmul.f32 %v11016_v3, %v3982_v9  ;;  %v4015_v12 = vmul.f32 %v11024_v29, %v3986_v34  ;;  %14708 = vst [vmem:[#allocation76_spill] sm:$0xff] %v11042_v33  ;;  %v11082_v36 = vld [vmem:[%s13300_s0 + $0xa8] sm:$0xff]  ;;  %v11088_v38 = vld [vmem:[%s13300_s0 + $0xb0] sm:$0xff]  ;;  %v11094_v53 = vld [vmem:[%s13300_s0 + $0xb8] sm:$0xff] }
 0x3bd   :  { %v4016_v7 = vmul.f32 %v11030_v40, %v3986_v34  ;;  %v4017_v9 = vmul.f32 %v11036_v16, %v3986_v34  ;;  %v11045_v51 = vmul.f32 %v11042_v33, %v3986_v34  ;;  %14709 = vst [vmem:[#allocation78_spill] sm:$0xff] %v11050_v54  ;;  %v4019_v20 = vmul.f32 %v11050_v54, %v3990_v47  ;;  %v11100_v31 = vld [vmem:[%s13300_s0 + $0xc0] sm:$0xff]  ;;  %v11106_v22 = vld [vmem:[%s13300_s0 + $0xc8] sm:$0xff] }
 0x3be   :  { %14710 = vst [vmem:[#allocation80_spill] sm:$0xff] %v11056_v17  ;;  %v4020_v18 = vmul.f32 %v11056_v17, %v3990_v47  ;;  %14711 = vst [vmem:[#allocation64_spill] sm:$0xff] %v11062_v37  ;;  %v4021_v34 = vmul.f32 %v11062_v37, %v3990_v47  ;;  %v11071_v56 = vmul.f32 %v11068_v41, %v3990_v47  ;;  %v4035_v37 = vsel %vm171_vm0, %v10937_v62, 0.0 }
 0x3bf   :  { %14712 = vst [vmem:[#allocation56_spill] sm:$0xff] %v11068_v41  ;;  %14713 = vst [vmem:[#allocation84_spill] sm:$0xff] %v11076_v58  ;;  %v4023_v43 = vmul.f32 %v11076_v58, %v3994_v32  ;;  %v4024_v49 = vmul.f32 %v11082_v36, %v3994_v32  ;;  %v4025_v47 = vmul.f32 %v11088_v38, %v3994_v32  ;;  %v11131_v58 = vld [vmem:[%s13300_s0 + $0xe8] sm:$0xff]  ;;  %v4038_v17 = vsel %vm171_vm0, %v4011_v8, 0.0 }
 0x3c0   :  { %14714 = vst [vmem:[#allocation86_spill] sm:$0xff] %v11082_v36  ;;  %14715 = vst [vmem:[#allocation107_spill] sm:$0xff] %v11088_v38  ;;  %v4026_v0 = vmul.f32 %v11094_v53, %v3994_v32  ;;  %v4027_v50 = vmul.f32 %v11100_v31, %v3998_v60  ;;  %v4028_v27 = vmul.f32 %v11106_v22, %v3998_v60  ;;  %v11112_v38 = vld [vmem:[%s13300_s0 + $0xd0] sm:$0xff]  ;;  %v11124_v36 = vld [vmem:[%s13300_s0 + $0xe0] sm:$0xff]  ;;  %v4040_v54 = vsel %vm171_vm0, %v4015_v12, 0.0 }
 0x3c1   :  { %14716 = vst [vmem:[#allocation88_spill] sm:$0xff] %v11094_v53  ;;  %14717 = vst [vmem:[#allocation108_spill] sm:$0xff] %v11100_v31  ;;  %v4029_v32 = vmul.f32 %v11112_v38, %v3998_v60  ;;  %v11118_v53 = vld [vmem:[%s13300_s0 + $0xd8] sm:$0xff]  ;;  %v4044_v16 = vsel %vm171_vm0, %v4023_v43, 0.0  ;;  %v4051_v62 = vsel %vm171_vm0, %v10975_v35, 0.0  ;;  %v4055_v12 = vsel %vm171_vm0, %v4016_v7, 0.0 }
 0x3c2   :  { %14718 = vst [vmem:[#allocation42_spill] sm:$0xff] %v11106_v22  ;;  %14719 = vst [vmem:[#allocation109_spill] sm:$0xff] %v11112_v38  ;;  %v4030_v31 = vmul.f32 %v11118_v53, %v3998_v60  ;;  %v4031_v22 = vmul.f32 %v11124_v36, %v10929_v15  ;;  %v4032_v38 = vmul.f32 %v11131_v58, %v10929_v15  ;;  %v11138_v60 = vld [vmem:[%s13300_s0 + $0xf0] sm:$0xff]  ;;  %v4046_v40 = vsel %vm171_vm0, %v4027_v50, 0.0 }
 0x3c3   :  { %14720 = vst [vmem:[#allocation44_spill] sm:$0xff] %v11118_v53  ;;  %14721 = vst [vmem:[#allocation63_spill] sm:$0xff] %v11124_v36  ;;  %v4033_v53 = vmul.f32 %v11138_v60, %v10929_v15  ;;  %v11145_v36 = vld [vmem:[%s13300_s0 + $0xf8] sm:$0xff]  ;;  %v4059_v43 = vsel %vm171_vm0, %v4024_v49, 0.0  ;;  %v4061_v50 = vsel %vm171_vm0, %v4028_v27, 0.0  ;;  %v4072_v49 = vsel %vm171_vm0, %v4021_v34, 0.0 }
 0x3c4   :  { %14722 = vst [vmem:[#allocation65_spill] sm:$0xff] %v11131_v58  ;;  %14723 = vst [vmem:[#allocation68_spill] sm:$0xff] %v11138_v60  ;;  %v4034_v41 = vmul.f32 %v11145_v36, %v10929_v15  ;;  %v4036_v58 = vsel %vm171_vm0, %v4007_v14, 0.0  ;;  %v4042_v60 = vsel %vm171_vm0, %v4019_v20, 0.0  ;;  %v4048_v29 = vsel %vm171_vm0, %v4031_v22, 0.0 }
 0x3c5   :  { %14724 = vst [vmem:[#allocation87_spill] sm:$0xff] %v11145_v36  ;;  %v4037_v33 = vadd.f32 %v4036_v58, %v4035_v37  ;;  %v4050_v15 = vsel %vm171_vm0, %v10945_v6, 0.0  ;;  %v4053_v14 = vsel %vm171_vm0, %v4012_v42, 0.0  ;;  %v4057_v20 = vsel %vm171_vm0, %v4020_v18, 0.0 }
 0x3c6   :  { %v4052_v36 = vadd.f32 %v4051_v62, %v4050_v15  ;;  %v4063_v22 = vsel %vm171_vm0, %v4032_v38, 0.0  ;;  %v4065_v58 = vsel %vm171_vm0, %v10953_v5, 0.0  ;;  %v4066_v42 = vsel %vm171_vm0, %v10983_v19, 0.0 }
 0x3c7   :  { %v4039_v8 = vadd.f32 %v4038_v17, %v4037_v33  ;;  %v4068_v33 = vsel %vm171_vm0, %v11011_v57, 0.0  ;;  %v4067_v7 = vadd.f32 %v4066_v42, %v4065_v58  ;;  %v4070_v18 = vsel %vm171_vm0, %v4017_v9, 0.0 }
 0x3c8   :  { %v4054_v6 = vadd.f32 %v4053_v14, %v4052_v36  ;;  %v4074_v27 = vsel %vm171_vm0, %v4025_v47, 0.0  ;;  %v4076_v35 = vsel %vm171_vm0, %v4029_v32, 0.0  ;;  %v4080_v5 = vsel %vm171_vm0, %v10961_v46, 0.0 }
 0x3c9   :  { %v4041_v37 = vadd.f32 %v4040_v54, %v4039_v8  ;;  %v4078_v54 = vsel %vm171_vm0, %v4033_v53, 0.0  ;;  %v4069_v36 = vadd.f32 %v4068_v33, %v4067_v7  ;;  %v4081_v19 = vsel %vm171_vm0, %v10991_v55, 0.0 }
 0x3ca   :  { %v4056_v38 = vadd.f32 %v4055_v12, %v4054_v6  ;;  %v4083_v57 = vsel %vm171_vm0, %v11019_v23, 0.0  ;;  %v4082_v15 = vadd.f32 %v4081_v19, %v4080_v5  ;;  %v4085_v47 = vsel %vm171_vm0, %v11045_v51, 0.0 }
 0x3cb   :  { %v4043_v17 = vadd.f32 %v4042_v60, %v4041_v37  ;;  %v4071_v60 = vadd.f32 %v4070_v18, %v4069_v36  ;;  %v4087_v53 = vsel %vm171_vm0, %v11071_v56, 0.0  ;;  %v4089_v32 = vsel %vm171_vm0, %v4026_v0, 0.0 }
 0x3cc   :  { %v4058_v34 = vadd.f32 %v4057_v20, %v4056_v38  ;;  %v4091_v46 = vsel %vm171_vm0, %v4030_v31, 0.0  ;;  %v4084_v55 = vadd.f32 %v4083_v57, %v4082_v15  ;;  %v4093_v8 = vsel %vm171_vm0, %v4034_v41, 0.0 }
 0x3cd   :  { %v4045_v9 = vadd.f32 %v4044_v16, %v4043_v17  ;;  %v4073_v23 = vadd.f32 %v4072_v49, %v4071_v60  ;;  %v4106_v16 = vrot.slane %v10799_v11, %v14554_v21  ;;  %v4110_v51 = vrot.slane %v10807_v30, %v14554_v21  ;;  %v14725_v17 = vld [vmem:[#allocation89_spill] sm:$0xff]  ;;  %v14748_v11 = vld [vmem:[#allocation44_spill] sm:$0xff] }
 0x3ce   :  { %v4060_v14 = vadd.f32 %v4059_v43, %v4058_v34  ;;  %v4114_v12 = vrot.slane %v10815_v1, %v14554_v21  ;;  %v4086_v0 = vadd.f32 %v4085_v47, %v4084_v55  ;;  %v4122_v41 = vrot.slane %v10831_v59, %v14554_v21  ;;  %v14746_v59 = vld [vmem:[#allocation42_spill] sm:$0xff] }
 0x3cf   :  { %v4047_v62 = vadd.f32 %v4046_v40, %v4045_v9  ;;  %v4118_v40 = vrot.slane %v10823_v10, %v14554_v21  ;;  %v4075_v31 = vadd.f32 %v4074_v27, %v4073_v23  ;;  %v4126_v43 = vrot.slane %v10839_v26, %v14554_v21  ;;  %v14727_v9 = vld [vmem:[#allocation90_spill] sm:$0xff]  ;;  %v14730_v23 = vld [vmem:[#allocation48_spill] sm:$0xff] }
 0x3d0   :  { %v4062_v20 = vadd.f32 %v4061_v50, %v4060_v14  ;;  %v4130_v58 = vrot.slane %v10845_v48, %v14554_v21  ;;  %v4088_v6 = vadd.f32 %v4087_v53, %v4086_v0  ;;  %v4135_v33 = vmul.f32 %v10934_v24, %v4106_v16  ;;  %v14729_v14 = vld [vmem:[#allocation62_spill] sm:$0xff]  ;;  %v14742_v48 = vld [vmem:[#allocation88_spill] sm:$0xff] }
 0x3d1   :  { %v4049_v56 = vadd.f32 %v4048_v29, %v4047_v62  ;;  %v4134_v29 = vrot.slane %v10853_v39, %v14554_v21  ;;  %v4077_v50 = vadd.f32 %v4076_v35, %v4075_v31  ;;  %v4136_v7 = vmul.f32 %v10942_v61, %v4106_v16 }
 0x3d2   :  { %v4064_v37 = vadd.f32 %v4063_v22, %v4062_v20  ;;  %v4137_v18 = vmul.f32 %v10950_v25, %v4106_v16  ;;  %v4090_v49 = vadd.f32 %v4089_v32, %v4088_v6  ;;  %v11215_v36 = vmul.f32 %v10958_v52, %v4106_v16  ;;  %v14731_v16 = vld [vmem:[#allocation9_spill] sm:$0xff] }
 0x3d3   :  { %v4095_v42 = vmul.f32 0.01, %v4049_v56  ;;  %v4079_v22 = vadd.f32 %v4078_v54, %v4077_v50  ;;  %v4139_v5 = vmul.f32 %v10966_v44, %v4110_v51  ;;  %v4140_v19 = vmul.f32 %v10972_v45, %v4110_v51  ;;  %v14732_v20 = vld [vmem:[#allocation69_spill] sm:$0xff] }
 0x3d4   :  { %v4096_v27 = vmul.f32 0.01, %v4064_v37  ;;  %v4141_v35 = vmul.f32 %v10980_v28, %v4110_v51  ;;  %v4092_v57 = vadd.f32 %v4091_v46, %v4090_v49  ;;  %v11224_v15 = vmul.f32 %v10988_v4, %v4110_v51  ;;  %v14734_v51 = vld [vmem:[#allocation76_spill] sm:$0xff]  ;;  %v14735_v37 = vld [vmem:[#allocation78_spill] sm:$0xff] }
 0x3d5   :  { %v11212_v38 = vsub.f32 %v14725_v17, %v4095_v42  ;;  %v4143_v47 = vmul.f32 %v10996_v63, %v4114_v12  ;;  %v4097_v60 = vmul.f32 0.01, %v4079_v22  ;;  %v4144_v53 = vmul.f32 %v11002_v13, %v4114_v12  ;;  %v14736_v42 = vld [vmem:[#allocation80_spill] sm:$0xff] }
 0x3d6   :  { %v11221_v34 = vsub.f32 %v14727_v9, %v4096_v27  ;;  %v4145_v54 = vmul.f32 %v11008_v2, %v4114_v12  ;;  %v4146_v32 = vmul.f32 %v11016_v3, %v4114_v12  ;;  %v4094_v62 = vadd.f32 %v4093_v8, %v4092_v57  ;;  %v14737_v27 = vld [vmem:[#allocation64_spill] sm:$0xff]  ;;  %v14740_v9 = vld [vmem:[#allocation86_spill] sm:$0xff] }
 0x3d7   :  { %14726 = vst [vmem:[#allocation75_spill] sm:$0xff] %v11212_v38  ;;  %v4147_v55 = vmul.f32 %v14729_v14, %v4118_v40  ;;  %v4148_v46 = vmul.f32 %v14730_v23, %v4118_v40  ;;  %v4149_v56 = vmul.f32 %v14731_v16, %v4118_v40  ;;  %v11234_v0 = vsub.f32 %v14732_v20, %v4097_v60  ;;  %v14738_v12 = vld [vmem:[#allocation56_spill] sm:$0xff]  ;;  %v14741_v38 = vld [vmem:[#allocation107_spill] sm:$0xff] }
 0x3d8   :  { %14728 = vst [vmem:[#allocation46_spill] sm:$0xff] %v11221_v34  ;;  %v4150_v31 = vmul.f32 %v14734_v51, %v4118_v40  ;;  %v4151_v6 = vmul.f32 %v14735_v37, %v4122_v41  ;;  %v4152_v50 = vmul.f32 %v14736_v42, %v4122_v41  ;;  %v4098_v49 = vmul.f32 0.01, %v4094_v62  ;;  %v14739_v22 = vld [vmem:[#allocation84_spill] sm:$0xff]  ;;  %v14744_v40 = vld [vmem:[#allocation101_spill] sm:$0xff] }
 0x3d9   :  { %14733 = vst [vmem:[#allocation85_spill] sm:$0xff] %v11234_v0  ;;  %v4153_v17 = vmul.f32 %v14737_v27, %v4122_v41  ;;  %v4154_v8 = vmul.f32 %v14738_v12, %v4122_v41  ;;  %v4155_v57 = vmul.f32 %v14739_v22, %v4126_v43  ;;  %v4156_v34 = vmul.f32 %v14740_v9, %v4126_v43  ;;  %v14743_v20 = vld [vmem:[#allocation108_spill] sm:$0xff]  ;;  %v14747_v62 = vld [vmem:[#allocation109_spill] sm:$0xff]  ;;  %v14749_v41 = vld [vmem:[#allocation63_spill] sm:$0xff] }
 0x3da   :  { %v4157_v39 = vmul.f32 %v14741_v38, %v4126_v43  ;;  %v4158_v60 = vmul.f32 %v14742_v48, %v4126_v43  ;;  %v4159_v0 = vmul.f32 %v14743_v20, %v4130_v58  ;;  %v11247_v26 = vsub.f32 %v14744_v40, %v4098_v49  ;;  %v14750_v22 = vld [vmem:[#allocation65_spill] sm:$0xff]  ;;  %v14751_v9 = vld [vmem:[#allocation68_spill] sm:$0xff]  ;;  %v14752_v38 = vld [vmem:[#allocation87_spill] sm:$0xff] }
 0x3db   :  { %v4160_v10 = vmul.f32 %v14746_v59, %v4130_v58  ;;  %v4161_v1 = vmul.f32 %v14747_v62, %v4130_v58  ;;  %v4162_v30 = vmul.f32 %v14748_v11, %v4130_v58  ;;  %v4163_v12 = vmul.f32 %v14749_v41, %v4134_v29 }
 0x3dc   :  { %14745 = vst [vmem:[#allocation83_spill] sm:$0xff] %v11247_v26  ;;  %v4164_v27 = vmul.f32 %v14750_v22, %v4134_v29  ;;  %v4165_v42 = vmul.f32 %v14751_v9, %v4134_v29  ;;  %v4166_v37 = vmul.f32 %v14752_v38, %v4134_v29  ;;  %v4167_v43 = vsel %vm171_vm0, %v4135_v33, 0.0 }
 0x3dd   :  { %v4168_v20 = vsel %vm171_vm0, %v4139_v5, 0.0  ;;  %v4170_v49 = vsel %vm171_vm0, %v4143_v47, 0.0  ;;  %v4172_v40 = vsel %vm171_vm0, %v4147_v55, 0.0  ;;  %v4174_v62 = vsel %vm171_vm0, %v4151_v6, 0.0 }
 0x3de   :  { %v4169_v26 = vadd.f32 %v4168_v20, %v4167_v43  ;;  %v4176_v58 = vsel %vm171_vm0, %v4155_v57, 0.0  ;;  %v4178_v41 = vsel %vm171_vm0, %v4159_v0, 0.0  ;;  %v4180_v22 = vsel %vm171_vm0, %v4163_v12, 0.0 }
 0x3df   :  { %v4182_v9 = vsel %vm171_vm0, %v4136_v7, 0.0  ;;  %v4183_v29 = vsel %vm171_vm0, %v4140_v19, 0.0  ;;  %v4185_v33 = vsel %vm171_vm0, %v4144_v53, 0.0  ;;  %v4187_v47 = vsel %vm171_vm0, %v4148_v46, 0.0 }
 0x3e0   :  { %v4171_v5 = vadd.f32 %v4170_v49, %v4169_v26  ;;  %v4184_v38 = vadd.f32 %v4183_v29, %v4182_v9  ;;  %v4189_v55 = vsel %vm171_vm0, %v4152_v50, 0.0  ;;  %v4191_v6 = vsel %vm171_vm0, %v4156_v34, 0.0 }
 0x3e1   :  { %v4193_v57 = vsel %vm171_vm0, %v4160_v10, 0.0  ;;  %v4195_v0 = vsel %vm171_vm0, %v4164_v27, 0.0  ;;  %v4197_v12 = vsel %vm171_vm0, %v4137_v18, 0.0  ;;  %v4198_v19 = vsel %vm171_vm0, %v4141_v35, 0.0 }
 0x3e2   :  { %v4173_v20 = vadd.f32 %v4172_v40, %v4171_v5  ;;  %v4186_v7 = vadd.f32 %v4185_v33, %v4184_v38  ;;  %v4200_v53 = vsel %vm171_vm0, %v4145_v54, 0.0  ;;  %v4199_v26 = vadd.f32 %v4198_v19, %v4197_v12  ;;  %v14758_v19 = vld [vmem:[#allocation106_spill] sm:$0xff] }
 0x3e3   :  { %v4202_v9 = vsel %vm171_vm0, %v4149_v56, 0.0  ;;  %v4204_v46 = vsel %vm171_vm0, %v4153_v17, 0.0  ;;  %v4206_v50 = vsel %vm171_vm0, %v4157_v39, 0.0  ;;  %v4208_v10 = vsel %vm171_vm0, %v4161_v1, 0.0 }
 0x3e4   :  { %v4175_v34 = vadd.f32 %v4174_v62, %v4173_v20  ;;  %v4188_v43 = vadd.f32 %v4187_v47, %v4186_v7  ;;  %v4210_v27 = vsel %vm171_vm0, %v4165_v42, 0.0  ;;  %v4201_v18 = vadd.f32 %v4200_v53, %v4199_v26  ;;  %v14754_v47 = vld [vmem:[#allocation99_spill] sm:$0xff]  ;;  %v14757_v7 = vld [vmem:[#allocation104_spill] sm:$0xff] }
 0x3e5   :  { %v4212_v38 = vsel %vm171_vm0, %v11215_v36, 0.0  ;;  %v4213_v35 = vsel %vm171_vm0, %v11224_v15, 0.0  ;;  %v4215_v54 = vsel %vm171_vm0, %v4146_v32, 0.0  ;;  %v4217_v39 = vsel %vm171_vm0, %v4150_v31, 0.0  ;;  %v14753_v32 = vld [vmem:[#allocation98_spill] sm:$0xff]  ;;  %v14755_v31 = vld [vmem:[#allocation100_spill] sm:$0xff] }
 0x3e6   :  { %v4177_v56 = vadd.f32 %v4176_v58, %v4175_v34  ;;  %v4190_v49 = vadd.f32 %v4189_v55, %v4188_v43  ;;  %v4214_v17 = vadd.f32 %v4213_v35, %v4212_v38  ;;  %v4203_v62 = vadd.f32 %v4202_v9, %v4201_v18  ;;  %v14759_v26 = vld [vmem:[#allocation40_spill] sm:$0xff] }
 0x3e7   :  { %v4219_v40 = vsel %vm171_vm0, %v4154_v8, 0.0  ;;  %v4221_v1 = vsel %vm171_vm0, %v4158_v60, 0.0  ;;  %v4223_v42 = vsel %vm171_vm0, %v4162_v30, 0.0  ;;  %v4225_v5 = vsel %vm171_vm0, %v4166_v37, 0.0  ;;  %v14756_v30 = vld [vmem:[#allocation102_spill] sm:$0xff] }
 0x3e8   :  { %v4179_v29 = vadd.f32 %v4178_v41, %v4177_v56  ;;  %v4192_v33 = vadd.f32 %v4191_v6, %v4190_v49  ;;  %v4216_v36 = vadd.f32 %v4215_v54, %v4214_v17  ;;  %v4205_v15 = vadd.f32 %v4204_v46, %v4203_v62  ;;  %v14761_v49 = vld [vmem:[#allocation70_spill] sm:$0xff] }
 0x3e9   :  { %v4238_v58 = vrot.slane %v14753_v32, %v14554_v21  ;;  %v4242_v55 = vrot.slane %v14754_v47, %v14554_v21  ;;  %v4246_v12 = vrot.slane %v14755_v31, %v14554_v21  ;;  %v4250_v41 = vrot.slane %v14756_v30, %v14554_v21 }
 0x3ea   :  { %v4181_v8 = vadd.f32 %v4180_v22, %v4179_v29  ;;  %v4194_v20 = vadd.f32 %v4193_v57, %v4192_v33  ;;  %v4218_v60 = vadd.f32 %v4217_v39, %v4216_v36  ;;  %v4207_v6 = vadd.f32 %v4206_v50, %v4205_v15  ;;  %v14760_v22 = vld [vmem:[#allocation50_spill] sm:$0xff]  ;;  %v14763_v33 = vld [vmem:[#allocation103_spill] sm:$0xff] }
 0x3eb   :  { %v4254_v37 = vrot.slane %v14757_v7, %v14554_v21  ;;  %v4258_v53 = vrot.slane %v14758_v19, %v14554_v21  ;;  %v4262_v9 = vrot.slane %v14759_v26, %v14554_v21  ;;  %v4266_v57 = vrot.slane %v14760_v22, %v14554_v21  ;;  %v14772_v22 = vld [vmem:[#allocation86_spill] sm:$0xff]  ;;  %v14773_v19 = vld [vmem:[#allocation107_spill] sm:$0xff] }
 0x3ec   :  { %v4196_v46 = vadd.f32 %v4195_v0, %v4194_v20  ;;  %v4220_v34 = vadd.f32 %v4219_v40, %v4218_v60  ;;  %v4227_v43 = vmul.f32 0.01, %v4181_v8  ;;  %v4209_v18 = vadd.f32 %v4208_v10, %v4207_v6 }
 0x3ed   :  { %v4267_v38 = vmul.f32 %v10934_v24, %v4238_v58  ;;  %v4268_v50 = vmul.f32 %v10942_v61, %v4238_v58  ;;  %v4269_v35 = vmul.f32 %v10950_v25, %v4238_v58  ;;  %v11313_v39 = vmul.f32 %v10958_v52, %v4238_v58 }
 0x3ee   :  { %v4222_v54 = vadd.f32 %v4221_v1, %v4220_v34  ;;  %v4228_v56 = vmul.f32 0.01, %v4196_v46  ;;  %v11310_v17 = vsub.f32 %v14761_v49, %v4227_v43  ;;  %v4211_v0 = vadd.f32 %v4210_v27, %v4209_v18  ;;  %v14765_v34 = vld [vmem:[#allocation105_spill] sm:$0xff]  ;;  %v14767_v18 = vld [vmem:[#allocation78_spill] sm:$0xff] }
 0x3ef   :  { %v4271_v62 = vmul.f32 %v10966_v44, %v4242_v55  ;;  %v4272_v40 = vmul.f32 %v10972_v45, %v4242_v55  ;;  %v4273_v10 = vmul.f32 %v10980_v28, %v4242_v55  ;;  %v11322_v1 = vmul.f32 %v10988_v4, %v4242_v55 }
 0x3f0   :  { %14762 = vst [vmem:[#allocation8_spill] sm:$0xff] %v11310_v17  ;;  %v4224_v29 = vadd.f32 %v4223_v42, %v4222_v54  ;;  %v11319_v36 = vsub.f32 %v14763_v33, %v4228_v56  ;;  %v4275_v15 = vmul.f32 %v10996_v63, %v4246_v12  ;;  %v4229_v8 = vmul.f32 0.01, %v4211_v0  ;;  %v14768_v56 = vld [vmem:[#allocation80_spill] sm:$0xff] }
 0x3f1   :  { %v4276_v58 = vmul.f32 %v11002_v13, %v4246_v12  ;;  %v4277_v27 = vmul.f32 %v11008_v2, %v4246_v12  ;;  %v4278_v20 = vmul.f32 %v11016_v3, %v4246_v12  ;;  %v4279_v6 = vmul.f32 %v14729_v14, %v4250_v41  ;;  %v14769_v33 = vld [vmem:[#allocation64_spill] sm:$0xff] }
 0x3f2   :  { %14764 = vst [vmem:[#allocation10_spill] sm:$0xff] %v11319_v36  ;;  %v4226_v60 = vadd.f32 %v4225_v5, %v4224_v29  ;;  %v4280_v42 = vmul.f32 %v14730_v23, %v4250_v41  ;;  %v4281_v46 = vmul.f32 %v14731_v16, %v4250_v41  ;;  %v11332_v43 = vsub.f32 %v14765_v34, %v4229_v8  ;;  %v14770_v12 = vld [vmem:[#allocation56_spill] sm:$0xff] }
 0x3f3   :  { %v4282_v55 = vmul.f32 %v14734_v51, %v4250_v41  ;;  %v4283_v54 = vmul.f32 %v14767_v18, %v4254_v37  ;;  %v4284_v49 = vmul.f32 %v14768_v56, %v4254_v37  ;;  %v4285_v36 = vmul.f32 %v14769_v33, %v4254_v37  ;;  %v14771_v29 = vld [vmem:[#allocation84_spill] sm:$0xff]  ;;  %v14775_v41 = vld [vmem:[#allocation71_spill] sm:$0xff] }
 0x3f4   :  { %14766 = vst [vmem:[#allocation13_spill] sm:$0xff] %v11332_v43  ;;  %v4230_v0 = vmul.f32 0.01, %v4226_v60  ;;  %v4286_v5 = vmul.f32 %v14770_v12, %v4254_v37  ;;  %v4287_v17 = vmul.f32 %v14771_v29, %v4258_v53  ;;  %v4288_v26 = vmul.f32 %v14772_v22, %v4258_v53  ;;  %v14774_v34 = vld [vmem:[#allocation108_spill] sm:$0xff]  ;;  %v14777_v60 = vld [vmem:[#allocation109_spill] sm:$0xff]  ;;  %v14778_v37 = vld [vmem:[#allocation63_spill] sm:$0xff] }
 0x3f5   :  { %v4289_v7 = vmul.f32 %v14773_v19, %v4258_v53  ;;  %v4290_v8 = vmul.f32 %v14742_v48, %v4258_v53  ;;  %v4291_v43 = vmul.f32 %v14774_v34, %v4262_v9  ;;  %v4292_v30 = vmul.f32 %v14746_v59, %v4262_v9  ;;  %v14779_v29 = vld [vmem:[#allocation65_spill] sm:$0xff]  ;;  %v14780_v22 = vld [vmem:[#allocation68_spill] sm:$0xff]  ;;  %v14781_v19 = vld [vmem:[#allocation87_spill] sm:$0xff] }
 0x3f6   :  { %v11345_v32 = vsub.f32 %v14775_v41, %v4230_v0  ;;  %v4293_v31 = vmul.f32 %v14777_v60, %v4262_v9  ;;  %v4294_v47 = vmul.f32 %v14748_v11, %v4262_v9  ;;  %v4295_v12 = vmul.f32 %v14778_v37, %v4266_v57 }
 0x3f7   :  { %v4296_v33 = vmul.f32 %v14779_v29, %v4266_v57  ;;  %v4297_v56 = vmul.f32 %v14780_v22, %v4266_v57  ;;  %v4298_v18 = vmul.f32 %v14781_v19, %v4266_v57  ;;  %v4299_v53 = vsel %vm171_vm0, %v4267_v38, 0.0 }
 0x3f8   :  { %14776 = vst [vmem:[#allocation27_spill] sm:$0xff] %v11345_v32  ;;  %v4300_v34 = vsel %vm171_vm0, %v4271_v62, 0.0  ;;  %v4302_v0 = vsel %vm171_vm0, %v4275_v15, 0.0  ;;  %v4304_v41 = vsel %vm171_vm0, %v4279_v6, 0.0  ;;  %v4306_v60 = vsel %vm171_vm0, %v4283_v54, 0.0 }
 0x3f9   :  { %v4301_v32 = vadd.f32 %v4300_v34, %v4299_v53  ;;  %v4308_v9 = vsel %vm171_vm0, %v4287_v17, 0.0  ;;  %v4310_v37 = vsel %vm171_vm0, %v4291_v43, 0.0  ;;  %v4312_v29 = vsel %vm171_vm0, %v4295_v12, 0.0 }
 0x3fa   :  { %v4314_v22 = vsel %vm171_vm0, %v4268_v50, 0.0  ;;  %v4315_v57 = vsel %vm171_vm0, %v4272_v40, 0.0  ;;  %v4317_v38 = vsel %vm171_vm0, %v4276_v58, 0.0  ;;  %v4319_v15 = vsel %vm171_vm0, %v4280_v42, 0.0 }
 0x3fb   :  { %v4303_v62 = vadd.f32 %v4302_v0, %v4301_v32  ;;  %v4316_v19 = vadd.f32 %v4315_v57, %v4314_v22  ;;  %v4321_v6 = vsel %vm171_vm0, %v4284_v49, 0.0  ;;  %v4323_v54 = vsel %vm171_vm0, %v4288_v26, 0.0 }
 0x3fc   :  { %v4325_v17 = vsel %vm171_vm0, %v4292_v30, 0.0  ;;  %v4327_v43 = vsel %vm171_vm0, %v4296_v33, 0.0  ;;  %v4329_v12 = vsel %vm171_vm0, %v4269_v35, 0.0  ;;  %v4330_v40 = vsel %vm171_vm0, %v4273_v10, 0.0 }
 0x3fd   :  { %v4305_v34 = vadd.f32 %v4304_v41, %v4303_v62  ;;  %v4318_v50 = vadd.f32 %v4317_v38, %v4316_v19  ;;  %v4332_v58 = vsel %vm171_vm0, %v4277_v27, 0.0  ;;  %v4331_v32 = vadd.f32 %v4330_v40, %v4329_v12  ;;  %v14787_v40 = vld [vmem:[#allocation81_spill] sm:$0xff] }
 0x3fe   :  { %v4334_v22 = vsel %vm171_vm0, %v4281_v46, 0.0  ;;  %v4336_v42 = vsel %vm171_vm0, %v4285_v36, 0.0  ;;  %v4338_v49 = vsel %vm171_vm0, %v4289_v7, 0.0  ;;  %v4340_v30 = vsel %vm171_vm0, %v4293_v31, 0.0 }
 0x3ff   :  { %v4307_v26 = vadd.f32 %v4306_v60, %v4305_v34  ;;  %v4320_v53 = vadd.f32 %v4319_v15, %v4318_v50  ;;  %v4342_v33 = vsel %vm171_vm0, %v4297_v56, 0.0  ;;  %v4333_v35 = vadd.f32 %v4332_v58, %v4331_v32  ;;  %v14783_v15 = vld [vmem:[#allocation4_spill] sm:$0xff]  ;;  %v14786_v50 = vld [vmem:[#allocation79_spill] sm:$0xff] }
 0x400   :  { %v4344_v19 = vsel %vm171_vm0, %v11313_v39, 0.0  ;;  %v4345_v10 = vsel %vm171_vm0, %v11322_v1, 0.0  ;;  %v4347_v27 = vsel %vm171_vm0, %v4278_v20, 0.0  ;;  %v4349_v7 = vsel %vm171_vm0, %v4282_v55, 0.0  ;;  %v14782_v20 = vld [vmem:[#allocation3_spill] sm:$0xff]  ;;  %v14784_v55 = vld [vmem:[#allocation77_spill] sm:$0xff] }
 0x401   :  { %v4309_v46 = vadd.f32 %v4308_v9, %v4307_v26  ;;  %v4322_v0 = vadd.f32 %v4321_v6, %v4320_v53  ;;  %v4346_v36 = vadd.f32 %v4345_v10, %v4344_v19  ;;  %v4335_v60 = vadd.f32 %v4334_v22, %v4333_v35  ;;  %v14788_v32 = vld [vmem:[#allocation67_spill] sm:$0xff] }
 0x402   :  { %v4351_v41 = vsel %vm171_vm0, %v4286_v5, 0.0  ;;  %v4353_v31 = vsel %vm171_vm0, %v4290_v8, 0.0  ;;  %v4355_v56 = vsel %vm171_vm0, %v4294_v47, 0.0  ;;  %v4357_v62 = vsel %vm171_vm0, %v4298_v18, 0.0  ;;  %v14785_v47 = vld [vmem:[#allocation61_spill] sm:$0xff] }
 0x403   :  { %v4311_v57 = vadd.f32 %v4310_v37, %v4309_v46  ;;  %v4324_v38 = vadd.f32 %v4323_v54, %v4322_v0  ;;  %v4348_v39 = vadd.f32 %v4347_v27, %v4346_v36  ;;  %v4337_v1 = vadd.f32 %v4336_v42, %v4335_v60  ;;  %v14790_v0 = vld [vmem:[#allocation72_spill] sm:$0xff] }
 0x404   :  { %v4370_v9 = vrot.slane %v14782_v20, %v14554_v21  ;;  %v4374_v6 = vrot.slane %v14783_v15, %v14554_v21  ;;  %v4378_v12 = vrot.slane %v14784_v55, %v14554_v21  ;;  %v4382_v37 = vrot.slane %v14785_v47, %v14554_v21 }
 0x405   :  { %v4313_v5 = vadd.f32 %v4312_v29, %v4311_v57  ;;  %v4326_v34 = vadd.f32 %v4325_v17, %v4324_v38  ;;  %v4350_v8 = vadd.f32 %v4349_v7, %v4348_v39  ;;  %v4339_v54 = vadd.f32 %v4338_v49, %v4337_v1  ;;  %v14789_v29 = vld [vmem:[#allocation7_spill] sm:$0xff]  ;;  %v14792_v57 = vld [vmem:[#allocation73_spill] sm:$0xff]  ;;  %v14794_v1 = vld [vmem:[#allocation82_spill] sm:$0xff] }
 0x406   :  { %v4386_v18 = vrot.slane %v14786_v50, %v14554_v21  ;;  %v4390_v58 = vrot.slane %v14787_v40, %v14554_v21  ;;  %v4394_v22 = vrot.slane %v14788_v32, %v14554_v21  ;;  %v4398_v17 = vrot.slane %v14789_v29, %v14554_v21 }
 0x407   :  { %v4328_v42 = vadd.f32 %v4327_v43, %v4326_v34  ;;  %v4352_v26 = vadd.f32 %v4351_v41, %v4350_v8  ;;  %v4359_v53 = vmul.f32 0.01, %v4313_v5  ;;  %v4341_v35 = vadd.f32 %v4340_v30, %v4339_v54  ;;  %v14797_v5 = vld [vmem:[#allocation80_spill] sm:$0xff]  ;;  %v14801_v54 = vld [vmem:[#allocation86_spill] sm:$0xff] }
 0x408   :  { %v4399_v19 = vmul.f32 %v10934_v24, %v4370_v9  ;;  %v4400_v49 = vmul.f32 %v10942_v61, %v4370_v9  ;;  %v4401_v10 = vmul.f32 %v10950_v25, %v4370_v9  ;;  %v11411_v7 = vmul.f32 %v10958_v52, %v4370_v9 }
 0x409   :  { %v4354_v27 = vadd.f32 %v4353_v31, %v4352_v26  ;;  %v4360_v46 = vmul.f32 0.01, %v4328_v42  ;;  %v11408_v36 = vsub.f32 %v14790_v0, %v4359_v53  ;;  %v4343_v43 = vadd.f32 %v4342_v33, %v4341_v35  ;;  %v14802_v42 = vld [vmem:[#allocation107_spill] sm:$0xff]  ;;  %v14803_v53 = vld [vmem:[#allocation108_spill] sm:$0xff] }
 0x40a   :  { %v4403_v60 = vmul.f32 %v10966_v44, %v4374_v6  ;;  %v4404_v41 = vmul.f32 %v10972_v45, %v4374_v6  ;;  %v4405_v30 = vmul.f32 %v10980_v28, %v4374_v6  ;;  %v11420_v25 = vmul.f32 %v10988_v4, %v4374_v6 }
 0x40b   :  { %14791 = vst [vmem:[#allocation14_spill] sm:$0xff] %v11408_v36  ;;  %v4356_v24 = vadd.f32 %v4355_v56, %v4354_v27  ;;  %v11417_v61 = vsub.f32 %v14792_v57, %v4360_v46  ;;  %v4407_v31 = vmul.f32 %v10996_v63, %v4378_v12  ;;  %v4361_v38 = vmul.f32 0.01, %v4343_v43  ;;  %v14796_v63 = vld [vmem:[#allocation78_spill] sm:$0xff]  ;;  %v14806_v46 = vld [vmem:[#allocation109_spill] sm:$0xff]  ;;  %v11803_v36 = vld [vmem:[%s13304_s2 + $0xf0] sm:$0xff] }
 0x40c   :  { %v4408_v52 = vmul.f32 %v11002_v13, %v4378_v12  ;;  %v4409_v33 = vmul.f32 %v11008_v2, %v4378_v12  ;;  %v4410_v44 = vmul.f32 %v11016_v3, %v4378_v12  ;;  %v4411_v45 = vmul.f32 %v14729_v14, %v4382_v37  ;;  %v14798_v2 = vld [vmem:[#allocation64_spill] sm:$0xff]  ;;  %v14808_v57 = vld [vmem:[#allocation65_spill] sm:$0xff]  ;;  %14879 = vst [vmem:[#allocation44_spill] sm:$0xff] %v11803_v36 }
 0x40d   :  { %14793 = vst [vmem:[#allocation20_spill] sm:$0xff] %v11417_v61  ;;  %v4358_v39 = vadd.f32 %v4357_v62, %v4356_v24  ;;  %v4412_v28 = vmul.f32 %v14730_v23, %v4382_v37  ;;  %v4413_v56 = vmul.f32 %v14731_v16, %v4382_v37  ;;  %v11430_v9 = vsub.f32 %v14794_v1, %v4361_v38  ;;  %v14799_v3 = vld [vmem:[#allocation56_spill] sm:$0xff] }
 0x40e   :  { %v4414_v4 = vmul.f32 %v14734_v51, %v4382_v37  ;;  %v4415_v6 = vmul.f32 %v14796_v63, %v4386_v18  ;;  %v4416_v13 = vmul.f32 %v14797_v5, %v4386_v18  ;;  %v4417_v8 = vmul.f32 %v14798_v2, %v4386_v18  ;;  %v14800_v12 = vld [vmem:[#allocation84_spill] sm:$0xff]  ;;  %v14804_v51 = vld [vmem:[#allocation54_spill] sm:$0xff]  ;;  %v14810_v63 = vld [vmem:[#allocation87_spill] sm:$0xff] }
 0x40f   :  { %14795 = vst [vmem:[#allocation15_spill] sm:$0xff] %v11430_v9  ;;  %v4362_v34 = vmul.f32 0.01, %v4358_v39  ;;  %v4418_v62 = vmul.f32 %v14799_v3, %v4386_v18  ;;  %v4419_v14 = vmul.f32 %v14800_v12, %v4390_v58  ;;  %v4420_v23 = vmul.f32 %v14801_v54, %v4390_v58  ;;  %v14807_v18 = vld [vmem:[#allocation63_spill] sm:$0xff]  ;;  %v14809_v39 = vld [vmem:[#allocation68_spill] sm:$0xff] }
 0x410   :  { %v4421_v16 = vmul.f32 %v14802_v42, %v4390_v58  ;;  %v4422_v26 = vmul.f32 %v14742_v48, %v4390_v58  ;;  %v4423_v35 = vmul.f32 %v14803_v53, %v4394_v22  ;;  %v4424_v27 = vmul.f32 %v14746_v59, %v4394_v22 }
 0x411   :  { %v11443_v37 = vsub.f32 %v14804_v51, %v4362_v34  ;;  %v4425_v0 = vmul.f32 %v14806_v46, %v4394_v22  ;;  %v4426_v43 = vmul.f32 %v14748_v11, %v4394_v22  ;;  %v4427_v24 = vmul.f32 %v14807_v18, %v4398_v17 }
 0x412   :  { %v4428_v38 = vmul.f32 %v14808_v57, %v4398_v17  ;;  %v4429_v1 = vmul.f32 %v14809_v39, %v4398_v17  ;;  %v4430_v5 = vmul.f32 %v14810_v63, %v4398_v17  ;;  %v4431_v48 = vsel %vm171_vm0, %v4399_v19, 0.0 }
 0x413   :  { %14805 = vst [vmem:[#allocation28_spill] sm:$0xff] %v11443_v37  ;;  %v4432_v58 = vsel %vm171_vm0, %v4403_v60, 0.0  ;;  %v4434_v34 = vsel %vm171_vm0, %v4407_v31, 0.0  ;;  %v4436_v59 = vsel %vm171_vm0, %v4411_v45, 0.0  ;;  %v4438_v3 = vsel %vm171_vm0, %v4415_v6, 0.0 }
 0x414   :  { %v4433_v2 = vadd.f32 %v4432_v58, %v4431_v48  ;;  %v4440_v11 = vsel %vm171_vm0, %v4419_v14, 0.0  ;;  %v4442_v22 = vsel %vm171_vm0, %v4423_v35, 0.0  ;;  %v4444_v12 = vsel %vm171_vm0, %v4427_v24, 0.0 }
 0x415   :  { %v4446_v54 = vsel %vm171_vm0, %v4400_v49, 0.0  ;;  %v4447_v17 = vsel %vm171_vm0, %v4404_v41, 0.0  ;;  %v4449_v19 = vsel %vm171_vm0, %v4408_v52, 0.0  ;;  %v4451_v31 = vsel %vm171_vm0, %v4412_v28, 0.0 }
 0x416   :  { %v4435_v60 = vadd.f32 %v4434_v34, %v4433_v2  ;;  %v4448_v42 = vadd.f32 %v4447_v17, %v4446_v54  ;;  %v4453_v45 = vsel %vm171_vm0, %v4416_v13, 0.0  ;;  %v4455_v6 = vsel %vm171_vm0, %v4420_v23, 0.0  ;;  %v14811_v2 = vld [vmem:[#allocation55_spill] sm:$0xff]  ;;  %v14813_v54 = vld [vmem:[#allocation49_spill] sm:$0xff] }
 0x417   :  { %v4457_v14 = vsel %vm171_vm0, %v4424_v27, 0.0  ;;  %v4459_v53 = vsel %vm171_vm0, %v4428_v38, 0.0  ;;  %v4461_v35 = vsel %vm171_vm0, %v4401_v10, 0.0  ;;  %v4462_v41 = vsel %vm171_vm0, %v4405_v30, 0.0 }
 0x418   :  { %v4437_v51 = vadd.f32 %v4436_v59, %v4435_v60  ;;  %v4450_v49 = vadd.f32 %v4449_v19, %v4448_v42  ;;  %v4464_v52 = vsel %vm171_vm0, %v4409_v33, 0.0  ;;  %v4463_v46 = vadd.f32 %v4462_v41, %v4461_v35 }
 0x419   :  { %v4466_v18 = vsel %vm171_vm0, %v4413_v56, 0.0  ;;  %v4468_v28 = vsel %vm171_vm0, %v4417_v8, 0.0  ;;  %v4470_v13 = vsel %vm171_vm0, %v4421_v16, 0.0  ;;  %v4472_v27 = vsel %vm171_vm0, %v4425_v0, 0.0 }
 0x41a   :  { %v4439_v23 = vadd.f32 %v4438_v3, %v4437_v51  ;;  %v4452_v24 = vadd.f32 %v4451_v31, %v4450_v49  ;;  %v4474_v57 = vsel %vm171_vm0, %v4429_v1, 0.0  ;;  %v4465_v10 = vadd.f32 %v4464_v52, %v4463_v46  ;;  %v14812_v3 = vld [vmem:[#allocation47_spill] sm:$0xff]  ;;  %v14815_v31 = vld [vmem:[#allocation53_spill] sm:$0xff] }
 0x41b   :  { %v4476_v38 = vsel %vm171_vm0, %v11411_v7, 0.0  ;;  %v4477_v30 = vsel %vm171_vm0, %v11420_v25, 0.0  ;;  %v4479_v33 = vsel %vm171_vm0, %v4410_v44, 0.0  ;;  %v4481_v16 = vsel %vm171_vm0, %v4414_v4, 0.0 }
 0x41c   :  { %v4441_v56 = vadd.f32 %v4440_v11, %v4439_v23  ;;  %v4454_v39 = vadd.f32 %v4453_v45, %v4452_v24  ;;  %v4478_v8 = vadd.f32 %v4477_v30, %v4476_v38  ;;  %v4467_v63 = vadd.f32 %v4466_v18, %v4465_v10  ;;  %v14819_v18 = vld [vmem:[#allocation66_spill] sm:$0xff]  ;;  %v14820_v24 = vld [vmem:[#allocation57_spill] sm:$0xff] }
 0x41d   :  { %v4483_v48 = vsel %vm171_vm0, %v4418_v62, 0.0  ;;  %v4485_v0 = vsel %vm171_vm0, %v4422_v26, 0.0  ;;  %v4487_v1 = vsel %vm171_vm0, %v4426_v43, 0.0  ;;  %v4489_v59 = vsel %vm171_vm0, %v4430_v5, 0.0  ;;  %v14814_v62 = vld [vmem:[#allocation91_spill] sm:$0xff] }
 0x41e   :  { %v4443_v58 = vadd.f32 %v4442_v22, %v4441_v56  ;;  %v4456_v34 = vadd.f32 %v4455_v6, %v4454_v39  ;;  %v4480_v7 = vadd.f32 %v4479_v33, %v4478_v8  ;;  %v4469_v25 = vadd.f32 %v4468_v28, %v4467_v63  ;;  %v14816_v22 = vld [vmem:[#allocation74_spill] sm:$0xff]  ;;  %v14822_v33 = vld [vmem:[#allocation52_spill] sm:$0xff] }
 0x41f   :  { %v4507_v44 = vrot.slane %v14811_v2, 7  ;;  %v4509_v11 = vrot.slane %v14812_v3, 6  ;;  %v4511_v17 = vrot.slane %v14813_v54, 5  ;;  %v4513_v42 = vrot.slane %v14814_v62, 4  ;;  %v14817_v6 = vld [vmem:[#allocation94_spill] sm:$0xff]  ;;  %v14831_v62 = vld [vmem:[#allocation95_spill] sm:$0xff] }
 0x420   :  { %v4445_v4 = vadd.f32 %v4444_v12, %v4443_v58  ;;  %v4458_v19 = vadd.f32 %v4457_v14, %v4456_v34  ;;  %v4482_v60 = vadd.f32 %v4481_v16, %v4480_v7  ;;  %v4471_v26 = vadd.f32 %v4470_v13, %v4469_v25  ;;  %v14818_v14 = vld [vmem:[#allocation96_spill] sm:$0xff]  ;;  %v14824_v16 = vld [vmem:[#allocation43_spill] sm:$0xff] }
 0x421   :  { %v4508_v43 = vsel %vm1557_vm5, %v4507_v44, %v14815_v31  ;;  %v4515_v45 = vrot.slane %v14816_v22, 3  ;;  %v4517_v5 = vrot.slane %v14817_v6, 2  ;;  %v4519_v46 = vrot.slane %v14818_v14, 1  ;;  %v14827_v25 = vld [vmem:[#allocation92_spill] sm:$0xff] }
 0x422   :  { %v4460_v35 = vadd.f32 %v4459_v53, %v4458_v19  ;;  %v4484_v51 = vadd.f32 %v4483_v48, %v4482_v60  ;;  %v4491_v49 = vmul.f32 0.01, %v4445_v4  ;;  %v4510_v41 = vsel %vm1560_vm6, %v4509_v11, %v4508_v43  ;;  %v14832_v43 = vld [vmem:[#allocation97_spill] sm:$0xff] }
 0x423   :  { %v4473_v52 = vadd.f32 %v4472_v27, %v4471_v26  ;;  %v4512_v12 = vsel %vm1563_vm7, %v4511_v17, %v4510_v41  ;;  %v4539_v28 = vrot.slane %v14819_v18, 7  ;;  %v14823_v27 = vld [vmem:[#allocation60_spill] sm:$0xff]  ;;  %v4545_v2 = vrot.slane %v14827_v25, 4  ;;  %v14829_v17 = vld [vmem:[#allocation58_spill] sm:$0xff] }
 0x424   :  { %v4486_v13 = vadd.f32 %v4485_v0, %v4484_v51  ;;  %v4492_v23 = vmul.f32 0.01, %v4460_v35  ;;  %v11499_v10 = vsub.f32 %v14820_v24, %v4491_v49  ;;  %v4514_v38 = vsel %vm1566_vm8, %v4513_v42, %v4512_v12  ;;  %v14826_v0 = vld [vmem:[#allocation51_spill] sm:$0xff]  ;;  %v14834_v35 = vld [vmem:[#allocation100_spill] sm:$0xff]  ;;  %v14835_v49 = vld [vmem:[#allocation102_spill] sm:$0xff] }
 0x425   :  { %v4475_v30 = vadd.f32 %v4474_v57, %v4473_v52  ;;  %v4516_v53 = vsel %vm1569_vm9, %v4515_v45, %v4514_v38  ;;  %v4540_v56 = vsel %vm1557_vm5, %v4539_v28, %v14822_v33  ;;  %v4541_v39 = vrot.slane %v14823_v27, 6  ;;  %v14836_v52 = vld [vmem:[#allocation41_spill] sm:$0xff]  ;;  %v14839_v28 = vld [vmem:[#allocation104_spill] sm:$0xff] }
 0x426   :  { %14821 = vst [vmem:[#allocation16_spill] sm:$0xff] %v11499_v10  ;;  %v4488_v8 = vadd.f32 %v4487_v1, %v4486_v13  ;;  %v11507_v63 = vsub.f32 %v14824_v16, %v4492_v23  ;;  %v4518_v48 = vsel %vm1572_vm10, %v4517_v5, %v4516_v53  ;;  %v4543_v58 = vrot.slane %v14826_v0, 5  ;;  %v14828_v1 = vld [vmem:[#allocation93_spill] sm:$0xff]  ;;  %v14841_v27 = vld [vmem:[#allocation40_spill] sm:$0xff] }
 0x427   :  { %v4493_v34 = vmul.f32 0.01, %v4475_v30  ;;  %v4520_v7 = vsel %vm1575_vm11, %v4519_v46, %v4518_v48  ;;  %v4542_v57 = vsel %vm1560_vm6, %v4541_v39, %v4540_v56  ;;  %v4547_v54 = vrot.slane %v14828_v1, 3  ;;  %v14838_v46 = vld [vmem:[#allocation98_spill] sm:$0xff]  ;;  %v11559_v1 = vld [vmem:[%s13304_s2 + $0x8] sm:$0xff] }
 0x428   :  { %14825 = vst [vmem:[#allocation21_spill] sm:$0xff] %v11507_v63  ;;  %v4490_v44 = vadd.f32 %v4489_v59, %v4488_v8  ;;  %v4522_v3 = vsel %vm171_vm0, %v4520_v7, 0.0  ;;  %v4544_v11 = vsel %vm1563_vm7, %v4543_v58, %v4542_v57  ;;  %v4549_v42 = vrot.slane %v14831_v62, 2  ;;  %v14833_v59 = vld [vmem:[#allocation99_spill] sm:$0xff]  ;;  %v14840_v30 = vld [vmem:[#allocation106_spill] sm:$0xff]  ;;  %14843 = vst [vmem:[#allocation26_spill] sm:$0xff] %v11559_v1 }
 0x429   :  { %v11518_v4 = vsub.f32 %v14829_v17, %v4493_v34  ;;  %v4523_v19 = vrot.slane %v4522_v3, 4  ;;  %v4546_v60 = vsel %vm1566_vm8, %v4545_v2, %v4544_v11  ;;  %v4551_v22 = vrot.slane %v14832_v43, 1  ;;  %v14842_v8 = vld [vmem:[#allocation50_spill] sm:$0xff] }
 0x42a   :  { %v4494_v26 = vmul.f32 0.01, %v4490_v44  ;;  %v4548_v31 = vsel %vm1569_vm9, %v4547_v54, %v4546_v60  ;;  %v4571_v45 = vrot.slane %v14833_v59, 7  ;;  %v4573_v51 = vrot.slane %v14834_v35, 6  ;;  %v11550_v44 = vld [vmem:[%s13304_s2] sm:$0xff]  ;;  %v14848_v59 = vld [vmem:[#allocation75_spill] sm:$0xff] }
 0x42b   :  { %14830 = vst [vmem:[#allocation17_spill] sm:$0xff] %v11518_v4  ;;  %v4524_v6 = vadd.f32 %v4523_v19, %v4522_v3  ;;  %v4550_v5 = vsel %vm1572_vm10, %v4549_v42, %v4548_v31  ;;  %v4575_v41 = vrot.slane %v14835_v49, 5  ;;  %v4577_v13 = vrot.slane %v14839_v28, 4  ;;  %v14850_v35 = vld [vmem:[#allocation46_spill] sm:$0xff]  ;;  %v14851_v49 = vld [vmem:[#allocation85_spill] sm:$0xff] }
 0x42c   :  { %v11529_v12 = vsub.f32 %v14836_v52, %v4494_v26  ;;  %v4552_v14 = vsel %vm1575_vm11, %v4551_v22, %v4550_v5  ;;  %v4572_v18 = vsel %vm1557_vm5, %v4571_v45, %v14838_v46  ;;  %v4579_v53 = vrot.slane %v14840_v30, 3  ;;  %v11580_v26 = vld [vmem:[%s13304_s2 + $0x20] sm:$0xff]  ;;  %v11611_v52 = vld [vmem:[%s13304_s2 + $0x38] sm:$0xff]  ;;  %v11621_v46 = vld [vmem:[%s13304_s2 + $0x48] sm:$0xff] }
 0x42d   :  { %v4525_v23 = vrot.slane %v4524_v6, 2  ;;  %v4554_v24 = vsel %vm171_vm0, %v4552_v14, 0.0  ;;  %v4574_v38 = vsel %vm1560_vm6, %v4573_v51, %v4572_v18  ;;  %v4581_v39 = vrot.slane %v14841_v27, 2  ;;  %14846 = vst [vmem:[#allocation30_spill] sm:$0xff] %v11580_v26  ;;  %14852 = vst [vmem:[#allocation31_spill] sm:$0xff] %v11611_v52  ;;  %v11616_v14 = vld [vmem:[%s13304_s2 + $0x40] sm:$0xff] }
 0x42e   :  { %14837 = vst [vmem:[#allocation29_spill] sm:$0xff] %v11529_v12  ;;  %v4555_v33 = vrot.slane %v4554_v24, 4  ;;  %v4576_v56 = vsel %vm1563_vm7, %v4575_v41, %v4574_v38  ;;  %v4583_v16 = vrot.slane %v14842_v8, 1  ;;  %v4603_v58 = vrot.slane %v14783_v15, 7  ;;  %14853 = vst [vmem:[#allocation24_spill] sm:$0xff] %v11616_v14  ;;  %v11631_v38 = vld [vmem:[%s13304_s2 + $0x50] sm:$0xff] }
 0x42f   :  { %v4526_v48 = vadd.f32 %v4525_v23, %v4524_v6  ;;  %v4578_v0 = vsel %vm1566_vm8, %v4577_v13, %v4576_v56  ;;  %v4605_v34 = vrot.slane %v14784_v55, 6  ;;  %v4607_v25 = vrot.slane %v14785_v47, 5  ;;  %v11564_v47 = vld [vmem:[%s13304_s2 + $0x10] sm:$0xff]  ;;  %14854 = vst [vmem:[#allocation2_spill] sm:$0xff] %v11621_v46  ;;  %v14855_v23 = vld [vmem:[#allocation83_spill] sm:$0xff]  ;;  %14856 = vst [vmem:[#allocation25_spill] sm:$0xff] %v11631_v38 }
 0x430   :  { %v4556_v7 = vadd.f32 %v4555_v33, %v4554_v24  ;;  %v4580_v57 = vsel %vm1569_vm9, %v4579_v53, %v4578_v0  ;;  %v4609_v2 = vrot.slane %v14786_v50, 4  ;;  %v4604_v15 = vsel %vm1557_vm5, %v4603_v58, %v14782_v20  ;;  %14844 = vst [vmem:[#allocation22_spill] sm:$0xff] %v11564_v47  ;;  %v11572_v20 = vld [vmem:[%s13304_s2 + $0x18] sm:$0xff]  ;;  %v14858_v53 = vld [vmem:[#allocation59_spill] sm:$0xff]  ;;  %v11652_v8 = vld [vmem:[%s13304_s2 + $0x60] sm:$0xff] }
 0x431   :  { %v4527_v3 = vrot.slane %v4526_v48, 1  ;;  %v4582_v11 = vsel %vm1572_vm10, %v4581_v39, %v4580_v57  ;;  %v4611_v55 = vrot.slane %v14787_v40, 3  ;;  %v4606_v17 = vsel %vm1560_vm6, %v4605_v34, %v4604_v15  ;;  %14845 = vst [vmem:[#allocation19_spill] sm:$0xff] %v11572_v20  ;;  %v11636_v30 = vld [vmem:[%s13304_s2 + $0x58] sm:$0xff]  ;;  %14859 = vst [vmem:[#allocation32_spill] sm:$0xff] %v11652_v8  ;;  %v11781_v63 = vld [vmem:[%s13304_s2 + $0xe0] sm:$0xff] }
 0x432   :  { %v4557_v50 = vrot.slane %v4556_v7, 2  ;;  %v4584_v54 = vsel %vm1575_vm11, %v4583_v16, %v4582_v11  ;;  %v4613_v19 = vrot.slane %v14788_v32, 2  ;;  %v4608_v62 = vsel %vm1563_vm7, %v4607_v25, %v4606_v17  ;;  %v11585_v32 = vld [vmem:[%s13304_s2 + $0x28] sm:$0xff]  ;;  %14857 = vst [vmem:[#allocation18_spill] sm:$0xff] %v11636_v30  ;;  %v11672_v57 = vld [vmem:[%s13304_s2 + $0x78] sm:$0xff]  ;;  %v11677_v25 = vld [vmem:[%s13304_s2 + $0x80] sm:$0xff] }
 0x433   :  { %v4528_v40 = vadd.f32 %v4527_v3, %v4526_v48  ;;  %v4586_v60 = vsel %vm171_vm0, %v4584_v54, 0.0  ;;  %v4615_v42 = vrot.slane %v14789_v29, 1  ;;  %14847 = vst [vmem:[#allocation11_spill] sm:$0xff] %v11585_v32  ;;  %v4610_v22 = vsel %vm1566_vm8, %v4609_v2, %v4608_v62  ;;  %v11595_v29 = vld [vmem:[%s13304_s2 + $0x30] sm:$0xff]  ;;  %v11657_v16 = vld [vmem:[%s13304_s2 + $0x68] sm:$0xff]  ;;  %14862 = vst [vmem:[#allocation34_spill] sm:$0xff] %v11672_v57 }
 0x434   :  { %v4558_v31 = vadd.f32 %v4557_v50, %v4556_v7  ;;  %v4587_v43 = vrot.slane %v4586_v60, 4  ;;  %v11590_v45 = vmul.f32 %v14848_v59, %v11550_v44  ;;  %14849 = vst [vmem:[#allocation23_spill] sm:$0xff] %v11595_v29  ;;  %v4612_v5 = vsel %vm1569_vm9, %v4611_v55, %v4610_v22  ;;  %14860 = vst [vmem:[#allocation12_spill] sm:$0xff] %v11657_v16  ;;  %v11662_v48 = vld [vmem:[%s13304_s2 + $0x70] sm:$0xff]  ;;  %v11682_v2 = vld [vmem:[%s13304_s2 + $0x88] sm:$0xff] }
 0x435   :  { %v11597_v6 = vmul.f32 0.01, %v4528_v40  ;;  %v11602_v51 = vmul.f32 %v14850_v35, %v11559_v1  ;;  %v11606_v41 = vmul.f32 %v14851_v49, %v11564_v47  ;;  %v4614_v13 = vsel %vm1572_vm10, %v4613_v19, %v4612_v5  ;;  %14861 = vst [vmem:[#allocation33_spill] sm:$0xff] %v11662_v48  ;;  %14863 = vst [vmem:[#allocation35_spill] sm:$0xff] %v11677_v25  ;;  %v11699_v50 = vld [vmem:[%s13304_s2 + $0x90] sm:$0xff]  ;;  %v11704_v54 = vld [vmem:[%s13304_s2 + $0x98] sm:$0xff] }
 0x436   :  { %v4559_v18 = vrot.slane %v4558_v31, 1  ;;  %v4588_v28 = vadd.f32 %v4587_v43, %v4586_v60  ;;  %v11626_v24 = vmul.f32 %v14855_v23, %v11572_v20  ;;  %v4616_v56 = vsel %vm1575_vm11, %v4615_v42, %v4614_v13  ;;  %14864 = vst [vmem:[#allocation36_spill] sm:$0xff] %v11682_v2  ;;  %14865 = vst [vmem:[#allocation37_spill] sm:$0xff] %v11699_v50  ;;  %v11709_v17 = vld [vmem:[%s13304_s2 + $0xa0] sm:$0xff]  ;;  %v11724_v42 = vld [vmem:[%s13304_s2 + $0xa8] sm:$0xff] }
 0x437   :  { %v11643_v27 = vmul.f32 %v14848_v59, %v11580_v26  ;;  %v11647_v39 = vmul.f32 %v14850_v35, %v11585_v32  ;;  %v4618_v34 = vsel %vm171_vm0, %v4616_v56, 0.0  ;;  %v11667_v7 = vmul.f32 %v14851_v49, %v11595_v29  ;;  %14866 = vst [vmem:[#allocation38_spill] sm:$0xff] %v11704_v54  ;;  %14867 = vst [vmem:[#allocation39_spill] sm:$0xff] %v11709_v17  ;;  %v11734_v43 = vld [vmem:[%s13304_s2 + $0xb8] sm:$0xff]  ;;  %v11751_v13 = vld [vmem:[%s13304_s2 + $0xc0] sm:$0xff] }
 0x438   :  { %v4560_v0 = vadd.f32 %v4559_v18, %v4558_v31  ;;  %v4589_v58 = vrot.slane %v4588_v28, 2  ;;  %v4619_v3 = vrot.slane %v4618_v34, 4  ;;  %v11686_v11 = vmul.f32 %v14855_v23, %v11611_v52  ;;  %14869 = vst [vmem:[#allocation90_spill] sm:$0xff] %v11724_v42  ;;  %v11729_v31 = vld [vmem:[%s13304_s2 + $0xb0] sm:$0xff]  ;;  %14871 = vst [vmem:[#allocation48_spill] sm:$0xff] %v11734_v43  ;;  %v11756_v56 = vld [vmem:[%s13304_s2 + $0xc8] sm:$0xff] }
 0x439   :  { %v11690_v15 = vmul.f32 %v14848_v59, %v11616_v14  ;;  %v11694_v55 = vmul.f32 %v14850_v35, %v11621_v46  ;;  %v11715_v60 = vmul.f32 %v14851_v49, %v11631_v38  ;;  %v11719_v62 = vmul.f32 %v14855_v23, %v11636_v30  ;;  %14870 = vst [vmem:[#allocation62_spill] sm:$0xff] %v11729_v31  ;;  %v11776_v4 = vld [vmem:[%s13304_s2 + $0xd8] sm:$0xff]  ;;  %v11913_v14 = vld [vmem:[%s13304_s2 + $0x150] sm:$0xff]  ;;  %v11942_v20 = vld [vmem:[%s13304_s2 + $0x168] sm:$0xff] }
 0x43a   :  { %v11711_v19 = vmul.f32 0.01, %v4560_v0  ;;  %v4590_v40 = vadd.f32 %v4589_v58, %v4588_v28  ;;  %v4620_v22 = vadd.f32 %v4619_v3, %v4618_v34  ;;  %v11738_v5 = vmul.f32 %v14848_v59, %v11652_v8  ;;  %14872 = vst [vmem:[#allocation9_spill] sm:$0xff] %v11751_v13  ;;  %14873 = vst [vmem:[#allocation69_spill] sm:$0xff] %v11756_v56  ;;  %v11761_v0 = vld [vmem:[%s13304_s2 + $0xd0] sm:$0xff]  ;;  %v11786_v34 = vld [vmem:[%s13304_s2 + $0xe8] sm:$0xff] }
 0x43b   :  { %v11742_v18 = vmul.f32 %v14850_v35, %v11657_v16  ;;  %v11746_v28 = vmul.f32 %v14851_v49, %v11662_v48  ;;  %14874 = vst [vmem:[#allocation76_spill] sm:$0xff] %v11761_v0  ;;  %v11767_v33 = vmul.f32 %v14855_v23, %v11672_v57  ;;  %v11771_v12 = vmul.f32 %v14848_v59, %v11677_v25  ;;  %v11813_v58 = vld [vmem:[%s13304_s2 + $0x100] sm:$0xff]  ;;  %v11830_v57 = vld [vmem:[%s13304_s2 + $0x108] sm:$0xff]  ;;  %v11886_v30 = vld [vmem:[%s13304_s2 + $0x138] sm:$0xff] }
 0x43c   :  { %14868 = vst [vmem:[#allocation89_spill] sm:$0xff] %v11711_v19  ;;  %v4591_v3 = vrot.slane %v4590_v40, 1  ;;  %14876 = vst [vmem:[#allocation88_spill] sm:$0xff] %v11776_v4  ;;  %v4621_v10 = vrot.slane %v4620_v22, 2  ;;  %v11790_v37 = vmul.f32 %v14850_v35, %v11682_v2  ;;  %v11794_v9 = vmul.f32 %v14851_v49, %v11699_v50  ;;  %v11808_v19 = vld [vmem:[%s13304_s2 + $0xf8] sm:$0xff]  ;;  %v11857_v16 = vld [vmem:[%s13304_s2 + $0x120] sm:$0xff] }
 0x43d   :  { %14877 = vst [vmem:[#allocation101_spill] sm:$0xff] %v11781_v63  ;;  %14878 = vst [vmem:[#allocation42_spill] sm:$0xff] %v11786_v34  ;;  %v11798_v61 = vmul.f32 %v14855_v23, %v11704_v54  ;;  %v11817_v54 = vmul.f32 %v14848_v59, %v11709_v17  ;;  %v11821_v2 = vmul.f32 %v14850_v35, %v11724_v42  ;;  %v11918_v52 = vld [vmem:[%s13304_s2 + $0x158] sm:$0xff]  ;;  %v11947_v29 = vld [vmem:[%s13304_s2 + $0x170] sm:$0xff] }
 0x43e   :  { %14880 = vst [vmem:[#allocation70_spill] sm:$0xff] %v11808_v19  ;;  %14881 = vst [vmem:[#allocation103_spill] sm:$0xff] %v11813_v58  ;;  %v4592_v50 = vadd.f32 %v4591_v3, %v4590_v40  ;;  %v11825_v25 = vmul.f32 %v14851_v49, %v11729_v31  ;;  %v11835_v40 = vld [vmem:[%s13304_s2 + $0x110] sm:$0xff]  ;;  %v11840_v3 = vld [vmem:[%s13304_s2 + $0x118] sm:$0xff]  ;;  %v4622_v42 = vadd.f32 %v4621_v10, %v4620_v22 }
 0x43f   :  { %14882 = vst [vmem:[#allocation105_spill] sm:$0xff] %v11830_v57  ;;  %14883 = vst [vmem:[#allocation71_spill] sm:$0xff] %v11835_v40  ;;  %v11844_v31 = vmul.f32 %v14855_v23, %v11734_v43  ;;  %v11848_v17 = vmul.f32 %v14848_v59, %v11751_v13  ;;  %v11852_v48 = vmul.f32 %v14850_v35, %v11756_v56  ;;  %v11862_v10 = vld [vmem:[%s13304_s2 + $0x128] sm:$0xff]  ;;  %v11867_v22 = vld [vmem:[%s13304_s2 + $0x130] sm:$0xff] }
 0x440   :  { %14884 = vst [vmem:[#allocation3_spill] sm:$0xff] %v11840_v3  ;;  %14885 = vst [vmem:[#allocation4_spill] sm:$0xff] %v11857_v16  ;;  %v11869_v13 = vmul.f32 0.01, %v4592_v50  ;;  %v11873_v56 = vmul.f32 %v14851_v49, %v11761_v0  ;;  %v11877_v43 = vmul.f32 %v14855_v23, %v11776_v4  ;;  %v11881_v8 = vmul.f32 %v14848_v59, %v11781_v63  ;;  %v11891_v50 = vld [vmem:[%s13304_s2 + $0x140] sm:$0xff]  ;;  %v11896_v0 = vld [vmem:[%s13304_s2 + $0x148] sm:$0xff] }
 0x441   :  { %14886 = vst [vmem:[#allocation77_spill] sm:$0xff] %v11862_v10  ;;  %14887 = vst [vmem:[#allocation61_spill] sm:$0xff] %v11867_v22  ;;  %v4623_v4 = vrot.slane %v4622_v42, 1  ;;  %v11900_v63 = vmul.f32 %v14850_v35, %v11786_v34  ;;  %v11904_v38 = vmul.f32 %v14851_v49, %v11803_v36  ;;  %v11908_v46 = vmul.f32 %v14855_v23, %v11808_v19  ;;  %v11923_v34 = vld [vmem:[%s13304_s2 + $0x160] sm:$0xff] }
 0x442   :  { %14888 = vst [vmem:[#allocation79_spill] sm:$0xff] %v11869_v13  ;;  %14889 = vst [vmem:[#allocation81_spill] sm:$0xff] %v11886_v30  ;;  %v11929_v19 = vmul.f32 %v14848_v59, %v11813_v58  ;;  %v11933_v32 = vmul.f32 %v14850_v35, %v11830_v57  ;;  %v11937_v26 = vmul.f32 %v14851_v49, %v11835_v40  ;;  %v11952_v13 = vld [vmem:[%s13304_s2 + $0x178] sm:$0xff] }
 0x443   :  { %14890 = vst [vmem:[#allocation67_spill] sm:$0xff] %v11891_v50  ;;  %14891 = vst [vmem:[#allocation7_spill] sm:$0xff] %v11896_v0  ;;  %v4624_v36 = vadd.f32 %v4623_v4, %v4622_v42  ;;  %v11956_v40 = vmul.f32 %v14855_v23, %v11840_v3  ;;  %v11960_v57 = vmul.f32 %v14848_v59, %v11857_v16 }
 0x444   :  { %14892 = vst [vmem:[#allocation72_spill] sm:$0xff] %v11913_v14  ;;  %14893 = vst [vmem:[#allocation73_spill] sm:$0xff] %v11918_v52  ;;  %v11964_v58 = vmul.f32 %v14850_v35, %v11862_v10  ;;  %v11968_v47 = vmul.f32 %v14851_v49, %v11867_v22  ;;  %v11972_v1 = vmul.f32 %v14855_v23, %v11886_v30 }
 0x445   :  { %14894 = vst [vmem:[#allocation82_spill] sm:$0xff] %v11923_v34  ;;  %14896 = vst [vmem:[#allocation78_spill] sm:$0xff] %v11942_v20  ;;  %v11976_v4 = vmul.f32 %v14848_v59, %v11891_v50  ;;  %v11980_v42 = vmul.f32 %v14850_v35, %v11896_v0  ;;  %v11982_v16 = vmul.f32 0.01, %v4624_v36  ;;  %v11986_v10 = vmul.f32 %v14851_v49, %v11913_v14  ;;  %v14943_v0 = vld [vmem:[#allocation88_spill] sm:$0xff] }
 0x446   :  { %14897 = vst [vmem:[#allocation80_spill] sm:$0xff] %v11947_v29  ;;  %14898 = vst [vmem:[#allocation64_spill] sm:$0xff] %v11952_v13  ;;  %v11990_v22 = vmul.f32 %v14855_v23, %v11918_v52  ;;  %v11994_v30 = vmul.f32 %v14848_v59, %v11923_v34  ;;  %v11998_v50 = vmul.f32 %v14850_v35, %v11942_v20  ;;  %v4675_v52 = vsel %vm171_vm0, %v11590_v45, 0.0 }
 0x447   :  { %14899 = vst [vmem:[#allocation56_spill] sm:$0xff] %v11982_v16  ;;  %v12002_v36 = vmul.f32 %v14851_v49, %v11947_v29  ;;  %v12006_v14 = vmul.f32 %v14855_v23, %v11952_v13  ;;  %v4676_v59 = vsel %vm171_vm0, %v11602_v51, 0.0  ;;  %v4678_v35 = vsel %vm171_vm0, %v11606_v41, 0.0 }
 0x448   :  { %v4680_v49 = vsel %vm171_vm0, %v11626_v24, 0.0  ;;  %v4677_v29 = vadd.f32 %v4676_v59, %v4675_v52  ;;  %v4688_v23 = vsel %vm171_vm0, %v11643_v27, 0.0  ;;  %v4689_v13 = vsel %vm171_vm0, %v11647_v39, 0.0 }
 0x449   :  { %v4691_v45 = vsel %vm171_vm0, %v11667_v7, 0.0  ;;  %v4690_v3 = vadd.f32 %v4689_v13, %v4688_v23  ;;  %v4693_v51 = vsel %vm171_vm0, %v11686_v11, 0.0  ;;  %v4701_v41 = vsel %vm171_vm0, %v11690_v15, 0.0 }
 0x44a   :  { %v4702_v24 = vsel %vm171_vm0, %v11694_v55, 0.0  ;;  %v4679_v52 = vadd.f32 %v4678_v35, %v4677_v29  ;;  %v4704_v27 = vsel %vm171_vm0, %v11715_v60, 0.0  ;;  %v4706_v39 = vsel %vm171_vm0, %v11719_v62, 0.0 }
 0x44b   :  { %v4703_v59 = vadd.f32 %v4702_v24, %v4701_v41  ;;  %v4692_v16 = vadd.f32 %v4691_v45, %v4690_v3  ;;  %v4714_v7 = vsel %vm171_vm0, %v11738_v5, 0.0  ;;  %v4715_v11 = vsel %vm171_vm0, %v11742_v18, 0.0 }
 0x44c   :  { %v4717_v15 = vsel %vm171_vm0, %v11746_v28, 0.0  ;;  %v4681_v13 = vadd.f32 %v4680_v49, %v4679_v52  ;;  %v4716_v29 = vadd.f32 %v4715_v11, %v4714_v7  ;;  %v4719_v35 = vsel %vm171_vm0, %v11767_v33, 0.0 }
 0x44d   :  { %v4705_v55 = vadd.f32 %v4704_v27, %v4703_v59  ;;  %v4694_v60 = vadd.f32 %v4693_v51, %v4692_v16  ;;  %v4727_v62 = vsel %vm171_vm0, %v11771_v12, 0.0  ;;  %v4728_v3 = vsel %vm171_vm0, %v11790_v37, 0.0 }
 0x44e   :  { %v4730_v5 = vsel %vm171_vm0, %v11794_v9, 0.0  ;;  %v4682_v18 = vrot.slane %v4681_v13, 4  ;;  %v4718_v45 = vadd.f32 %v4717_v15, %v4716_v29  ;;  %v4729_v28 = vadd.f32 %v4728_v3, %v4727_v62 }
 0x44f   :  { %v4707_v23 = vadd.f32 %v4706_v39, %v4705_v55  ;;  %v4695_v49 = vrot.slane %v4694_v60, 4  ;;  %v4732_v41 = vsel %vm171_vm0, %v11798_v61, 0.0  ;;  %v4740_v33 = vsel %vm171_vm0, %v11817_v54, 0.0 }
 0x450   :  { %v4741_v12 = vsel %vm171_vm0, %v11821_v2, 0.0  ;;  %v4683_v16 = vadd.f32 %v4682_v18, %v4681_v13  ;;  %v4720_v37 = vadd.f32 %v4719_v35, %v4718_v45  ;;  %v4731_v24 = vadd.f32 %v4730_v5, %v4729_v28 }
 0x451   :  { %v4708_v51 = vrot.slane %v4707_v23, 4  ;;  %v4696_v52 = vadd.f32 %v4695_v49, %v4694_v60  ;;  %v4742_v9 = vadd.f32 %v4741_v12, %v4740_v33  ;;  %v4743_v59 = vsel %vm171_vm0, %v11825_v25, 0.0 }
 0x452   :  { %v4745_v27 = vsel %vm171_vm0, %v11844_v31, 0.0  ;;  %v4684_v39 = vrot.slane %v4683_v16, 2  ;;  %v4721_v7 = vrot.slane %v4720_v37, 4  ;;  %v4733_v11 = vadd.f32 %v4732_v41, %v4731_v24 }
 0x453   :  { %v4709_v61 = vadd.f32 %v4708_v51, %v4707_v23  ;;  %v4697_v54 = vrot.slane %v4696_v52, 2  ;;  %v4744_v15 = vadd.f32 %v4743_v59, %v4742_v9  ;;  %v4753_v2 = vsel %vm171_vm0, %v11848_v17, 0.0 }
 0x454   :  { %v4754_v13 = vsel %vm171_vm0, %v11852_v48, 0.0  ;;  %v4685_v55 = vadd.f32 %v4684_v39, %v4683_v16  ;;  %v4722_v35 = vadd.f32 %v4721_v7, %v4720_v37  ;;  %v4734_v60 = vrot.slane %v4733_v11, 4 }
 0x455   :  { %v4710_v29 = vrot.slane %v4709_v61, 2  ;;  %v4698_v25 = vadd.f32 %v4697_v54, %v4696_v52  ;;  %v4746_v62 = vadd.f32 %v4745_v27, %v4744_v15  ;;  %v4755_v3 = vadd.f32 %v4754_v13, %v4753_v2 }
 0x456   :  { %v4756_v31 = vsel %vm171_vm0, %v11873_v56, 0.0  ;;  %v4686_v5 = vrot.slane %v4685_v55, 1  ;;  %v4723_v23 = vrot.slane %v4722_v35, 2  ;;  %v4735_v45 = vadd.f32 %v4734_v60, %v4733_v11 }
 0x457   :  { %v4711_v18 = vadd.f32 %v4710_v29, %v4709_v61  ;;  %v4699_v28 = vrot.slane %v4698_v25, 1  ;;  %v4747_v49 = vrot.slane %v4746_v62, 4  ;;  %v4757_v17 = vadd.f32 %v4756_v31, %v4755_v3 }
 0x458   :  { %v4758_v48 = vsel %vm171_vm0, %v11877_v43, 0.0  ;;  %v12066_v41 = vadd.f32 %v4686_v5, %v4685_v55  ;;  %v4724_v12 = vadd.f32 %v4723_v23, %v4722_v35  ;;  %v4736_v16 = vrot.slane %v4735_v45, 2 }
 0x459   :  { %v4712_v33 = vrot.slane %v4711_v18, 1  ;;  %v12068_v51 = vadd.f32 %v4699_v28, %v4698_v25  ;;  %v4748_v37 = vadd.f32 %v4747_v49, %v4746_v62  ;;  %v4759_v24 = vadd.f32 %v4758_v48, %v4757_v17 }
 0x45a   :  { %v4766_v56 = vsel %vm171_vm0, %v11881_v8, 0.0  ;;  %v4725_v9 = vrot.slane %v4724_v12, 1  ;;  %v4737_v59 = vadd.f32 %v4736_v16, %v4735_v45  ;;  %v4767_v27 = vsel %vm171_vm0, %v11900_v63, 0.0 }
 0x45b   :  { %v12072_v52 = vadd.f32 %v4712_v33, %v4711_v18  ;;  %v4749_v43 = vrot.slane %v4748_v37, 2  ;;  %v4760_v39 = vrot.slane %v4759_v24, 4  ;;  %v4768_v61 = vadd.f32 %v4767_v27, %v4766_v56 }
 0x45c   :  { %v4769_v7 = vsel %vm171_vm0, %v11904_v38, 0.0  ;;  %v12078_v11 = vadd.f32 %v4725_v9, %v4724_v12  ;;  %v4738_v54 = vrot.slane %v4737_v59, 1  ;;  %v4771_v15 = vsel %vm171_vm0, %v11908_v46, 0.0 }
 0x45d   :  { %v4779_v8 = vsel %vm171_vm0, %v11929_v19, 0.0  ;;  %v4750_v2 = vadd.f32 %v4749_v43, %v4748_v37  ;;  %v4761_v13 = vadd.f32 %v4760_v39, %v4759_v24  ;;  %v4770_v55 = vadd.f32 %v4769_v7, %v4768_v61  ;;  %v14902_v7 = vld [vmem:[#allocation8_spill] sm:$0xff] }
 0x45e   :  { %v4780_v63 = vsel %vm171_vm0, %v11933_v32, 0.0  ;;  %v4739_v29 = vadd.f32 %v4738_v54, %v4737_v59  ;;  %v4782_v38 = vsel %vm171_vm0, %v11937_v26, 0.0  ;;  %v4784_v60 = vsel %vm171_vm0, %v11956_v40, 0.0 }
 0x45f   :  { %v4781_v35 = vadd.f32 %v4780_v63, %v4779_v8  ;;  %v4751_v25 = vrot.slane %v4750_v2, 1  ;;  %v4762_v62 = vrot.slane %v4761_v13, 2  ;;  %v4772_v46 = vadd.f32 %v4771_v15, %v4770_v55  ;;  %v14903_v15 = vld [vmem:[#allocation26_spill] sm:$0xff] }
 0x460   :  { %v4792_v19 = vsel %vm171_vm0, %v11960_v57, 0.0  ;;  %v4793_v31 = vsel %vm171_vm0, %v11964_v58, 0.0  ;;  %v4795_v32 = vsel %vm171_vm0, %v11968_v47, 0.0  ;;  %v4797_v5 = vsel %vm171_vm0, %v11972_v1, 0.0 }
 0x461   :  { %v4783_v3 = vadd.f32 %v4782_v38, %v4781_v35  ;;  %v4752_v26 = vadd.f32 %v4751_v25, %v4750_v2  ;;  %v4763_v18 = vadd.f32 %v4762_v62, %v4761_v13  ;;  %v4773_v23 = vrot.slane %v4772_v46, 4 }
 0x462   :  { %v4794_v40 = vadd.f32 %v4793_v31, %v4792_v19  ;;  %v4805_v28 = vsel %vm171_vm0, %v11976_v4, 0.0  ;;  %v4806_v57 = vsel %vm171_vm0, %v11980_v42, 0.0  ;;  %v4808_v58 = vsel %vm171_vm0, %v11986_v10, 0.0 }
 0x463   :  { %v4785_v45 = vadd.f32 %v4784_v60, %v4783_v3  ;;  %v4764_v49 = vrot.slane %v4763_v18, 1  ;;  %v4774_v17 = vadd.f32 %v4773_v23, %v4772_v46  ;;  %v4807_v48 = vadd.f32 %v4806_v57, %v4805_v28  ;;  %v14914_v23 = vld [vmem:[#allocation13_spill] sm:$0xff]  ;;  %v14916_v28 = vld [vmem:[#allocation27_spill] sm:$0xff] }
 0x464   :  { %v4796_v47 = vadd.f32 %v4795_v32, %v4794_v40  ;;  %v4810_v1 = vsel %vm171_vm0, %v11990_v22, 0.0  ;;  %v4818_v12 = vsel %vm171_vm0, %v11994_v30, 0.0  ;;  %v4819_v4 = vsel %vm171_vm0, %v11998_v50, 0.0 }
 0x465   :  { %v4786_v33 = vrot.slane %v4785_v45, 4  ;;  %v4765_v16 = vadd.f32 %v4764_v49, %v4763_v18  ;;  %v4775_v37 = vrot.slane %v4774_v17, 2  ;;  %v4809_v24 = vadd.f32 %v4808_v58, %v4807_v48 }
 0x466   :  { %v4798_v42 = vadd.f32 %v4797_v5, %v4796_v47  ;;  %v4820_v10 = vadd.f32 %v4819_v4, %v4818_v12  ;;  %v4821_v9 = vsel %vm171_vm0, %v12002_v36, 0.0  ;;  %v4823_v59 = vsel %vm171_vm0, %v12006_v14, 0.0  ;;  %v14904_v36 = vld [vmem:[#allocation10_spill] sm:$0xff]  ;;  %v14921_v4 = vld [vmem:[#allocation31_spill] sm:$0xff] }
 0x467   :  { %v4787_v56 = vadd.f32 %v4786_v33, %v4785_v45  ;;  %v4776_v27 = vadd.f32 %v4775_v37, %v4774_v17  ;;  %v4811_v43 = vadd.f32 %v4810_v1, %v4809_v24  ;;  %v14901_v30 = vsub.f32 %v14858_v53, %v11597_v6  ;;  %v14915_v45 = vld [vmem:[#allocation19_spill] sm:$0xff]  ;;  %v14922_v24 = vld [vmem:[#allocation24_spill] sm:$0xff] }
 0x468   :  { %v4799_v22 = vrot.slane %v4798_v42, 4  ;;  %v4822_v61 = vadd.f32 %v4821_v9, %v4820_v10  ;;  %v12122_v54 = vmul.f32 %v14902_v7, %v11550_v44  ;;  %v12126_v8 = vmul.f32 %v14904_v36, %v14903_v15  ;;  %v14918_v17 = vld [vmem:[#allocation11_spill] sm:$0xff]  ;;  %v14923_v10 = vld [vmem:[#allocation2_spill] sm:$0xff] }
 0x469   :  { %v12118_v50 = vrot.slane %v14901_v30, %v14554_v21  ;;  %v4788_v39 = vrot.slane %v4787_v56, 2  ;;  %v4777_v14 = vrot.slane %v4776_v27, 1  ;;  %v4812_v13 = vrot.slane %v4811_v43, 4  ;;  %v14920_v1 = vld [vmem:[#allocation23_spill] sm:$0xff] }
 0x46a   :  { %v4800_v2 = vadd.f32 %v4799_v22, %v4798_v42  ;;  %v4824_v53 = vadd.f32 %v4823_v59, %v4822_v61  ;;  %v4854_v47 = vmul.f32 %v14904_v36, %v14918_v17  ;;  %v4855_v12 = vmul.f32 %v14914_v23, %v14920_v1  ;;  %v14962_v1 = vld [vmem:[#allocation64_spill] sm:$0xff] }
 0x46b   :  { %v12130_v55 = vadd.f32 %v12118_v50, %v12066_v41  ;;  %v4789_v6 = vadd.f32 %v4788_v39, %v4787_v56  ;;  %v12134_v63 = vadd.f32 %v12118_v50, %v12068_v51  ;;  %v12138_v35 = vadd.f32 %v12118_v50, %v12072_v52  ;;  %v14926_v39 = vld [vmem:[#allocation32_spill] sm:$0xff] }
 0x46c   :  { %v4778_v38 = vadd.f32 %v4777_v14, %v4776_v27  ;;  %v4801_v60 = vrot.slane %v4800_v2, 2  ;;  %v4813_v25 = vadd.f32 %v4812_v13, %v4811_v43  ;;  %v12142_v62 = vadd.f32 %v12118_v50, %v12078_v11  ;;  %v14913_v11 = vld [vmem:[#allocation22_spill] sm:$0xff]  ;;  %v14924_v27 = vld [vmem:[#allocation25_spill] sm:$0xff]  ;;  %v14928_v13 = vld [vmem:[#allocation12_spill] sm:$0xff] }
 0x46d   :  { %14905 = vst [vmem:[#allocation84_spill] sm:$0xff] %v12130_v55  ;;  %14906 = vst [vmem:[#allocation86_spill] sm:$0xff] %v12134_v63  ;;  %v4790_v46 = vrot.slane %v4789_v6, 1  ;;  %v4825_v41 = vrot.slane %v4824_v53, 4  ;;  %v12145_v19 = vadd.f32 %v12118_v50, %v4739_v29  ;;  %v12148_v3 = vadd.f32 %v12118_v50, %v4752_v26  ;;  %v14917_v26 = vld [vmem:[#allocation30_spill] sm:$0xff]  ;;  %v14941_v55 = vld [vmem:[#allocation69_spill] sm:$0xff] }
 0x46e   :  { %14907 = vst [vmem:[#allocation107_spill] sm:$0xff] %v12138_v35  ;;  %14908 = vst [vmem:[#allocation108_spill] sm:$0xff] %v12142_v62  ;;  %v4802_v51 = vadd.f32 %v4801_v60, %v4800_v2  ;;  %v4814_v31 = vrot.slane %v4813_v25, 2  ;;  %v12151_v52 = vadd.f32 %v12118_v50, %v4765_v16  ;;  %v12154_v32 = vadd.f32 %v12118_v50, %v4778_v38  ;;  %v14925_v43 = vld [vmem:[#allocation18_spill] sm:$0xff]  ;;  %v14940_v62 = vld [vmem:[#allocation9_spill] sm:$0xff] }
 0x46f   :  { %14909 = vst [vmem:[#allocation54_spill] sm:$0xff] %v12145_v19  ;;  %14910 = vst [vmem:[#allocation109_spill] sm:$0xff] %v12148_v3  ;;  %v4791_v5 = vadd.f32 %v4790_v46, %v4789_v6  ;;  %v4826_v18 = vadd.f32 %v4825_v41, %v4824_v53  ;;  %v4851_v40 = vmul.f32 %v14914_v23, %v14913_v11  ;;  %v14929_v53 = vld [vmem:[#allocation33_spill] sm:$0xff]  ;;  %v14931_v41 = vld [vmem:[#allocation35_spill] sm:$0xff]  ;;  %v4898_v17 = vsel %vm171_vm0, %v12126_v8, 0.0 }
 0x470   :  { %14911 = vst [vmem:[#allocation63_spill] sm:$0xff] %v12151_v52  ;;  %14912 = vst [vmem:[#allocation65_spill] sm:$0xff] %v12154_v32  ;;  %v4852_v29 = vmul.f32 %v14916_v28, %v14915_v45  ;;  %v4803_v57 = vrot.slane %v4802_v51, 1  ;;  %v4815_v58 = vadd.f32 %v4814_v31, %v4813_v25  ;;  %v4853_v49 = vmul.f32 %v14902_v7, %v14917_v26  ;;  %v14930_v25 = vld [vmem:[#allocation34_spill] sm:$0xff]  ;;  %v14932_v31 = vld [vmem:[#allocation36_spill] sm:$0xff] }
 0x471   :  { %v4827_v48 = vrot.slane %v4826_v18, 2  ;;  %v12165_v33 = vadd.f32 %v12118_v50, %v4791_v5  ;;  %v4856_v16 = vmul.f32 %v14916_v28, %v14921_v4  ;;  %v4857_v56 = vmul.f32 %v14902_v7, %v14922_v24  ;;  %v14937_v32 = vld [vmem:[#allocation90_spill] sm:$0xff]  ;;  %v14960_v24 = vld [vmem:[#allocation73_spill] sm:$0xff]  ;;  %v14961_v4 = vld [vmem:[#allocation80_spill] sm:$0xff] }
 0x472   :  { %v4804_v37 = vadd.f32 %v4803_v57, %v4802_v51  ;;  %v4816_v42 = vrot.slane %v4815_v58, 1  ;;  %v4858_v9 = vmul.f32 %v14904_v36, %v14923_v10  ;;  %v4859_v22 = vmul.f32 %v14914_v23, %v14924_v27  ;;  %v14934_v57 = vld [vmem:[#allocation37_spill] sm:$0xff]  ;;  %v14938_v3 = vld [vmem:[#allocation62_spill] sm:$0xff]  ;;  %v14958_v27 = vld [vmem:[#allocation7_spill] sm:$0xff] }
 0x473   :  { %14919 = vst [vmem:[#allocation68_spill] sm:$0xff] %v12165_v33  ;;  %v4828_v59 = vadd.f32 %v4827_v48, %v4826_v18  ;;  %v4860_v30 = vmul.f32 %v14916_v28, %v14925_v43  ;;  %v4861_v61 = vmul.f32 %v14902_v7, %v14926_v39  ;;  %v4862_v6 = vmul.f32 %v14904_v36, %v14928_v13  ;;  %v14935_v48 = vld [vmem:[#allocation38_spill] sm:$0xff]  ;;  %v14955_v13 = vld [vmem:[#allocation61_spill] sm:$0xff]  ;;  %v14957_v43 = vld [vmem:[#allocation67_spill] sm:$0xff] }
 0x474   :  { %v4817_v14 = vadd.f32 %v4816_v42, %v4815_v58  ;;  %v12182_v2 = vadd.f32 %v12118_v50, %v4804_v37  ;;  %v4863_v38 = vmul.f32 %v14914_v23, %v14929_v53  ;;  %v4864_v46 = vmul.f32 %v14916_v28, %v14930_v25  ;;  %v14936_v42 = vld [vmem:[#allocation39_spill] sm:$0xff]  ;;  %v14953_v25 = vld [vmem:[#allocation4_spill] sm:$0xff]  ;;  %v14954_v53 = vld [vmem:[#allocation77_spill] sm:$0xff] }
 0x475   :  { %v4829_v60 = vrot.slane %v4828_v59, 1  ;;  %v4865_v51 = vmul.f32 %v14902_v7, %v14931_v41  ;;  %v4866_v5 = vmul.f32 %v14904_v36, %v14932_v31  ;;  %v4867_v58 = vmul.f32 %v14914_v23, %v14934_v57  ;;  %v14952_v41 = vld [vmem:[#allocation3_spill] sm:$0xff]  ;;  %v14956_v39 = vld [vmem:[#allocation81_spill] sm:$0xff]  ;;  %v14959_v10 = vld [vmem:[#allocation72_spill] sm:$0xff] }
 0x476   :  { %14927 = vst [vmem:[#allocation87_spill] sm:$0xff] %v12182_v2  ;;  %v12195_v18 = vadd.f32 %v12118_v50, %v4817_v14  ;;  %v12201_v37 = vmul.f32 %v14916_v28, %v14935_v48  ;;  %v12205_v33 = vmul.f32 %v14902_v7, %v14936_v42  ;;  %v12209_v52 = vmul.f32 %v14904_v36, %v14937_v32 }
 0x477   :  { %v4830_v2 = vadd.f32 %v4829_v60, %v4828_v59  ;;  %v12213_v14 = vmul.f32 %v14914_v23, %v14938_v3  ;;  %v12221_v35 = vmul.f32 %v14902_v7, %v14940_v62  ;;  %v12225_v63 = vmul.f32 %v14904_v36, %v14941_v55  ;;  %v14942_v59 = vld [vmem:[#allocation76_spill] sm:$0xff]  ;;  %v14946_v62 = vld [vmem:[#allocation42_spill] sm:$0xff] }
 0x478   :  { %14933 = vst [vmem:[#allocation55_spill] sm:$0xff] %v12195_v18  ;;  %v14939_v18 = vld [vmem:[#allocation48_spill] sm:$0xff]  ;;  %v12229_v60 = vmul.f32 %v14914_v23, %v14942_v59  ;;  %v12233_v3 = vmul.f32 %v14916_v28, %v14943_v0  ;;  %v12244_v48 = vmul.f32 %v14904_v36, %v14946_v62  ;;  %v14948_v59 = vld [vmem:[#allocation70_spill] sm:$0xff]  ;;  %v14949_v0 = vld [vmem:[#allocation103_spill] sm:$0xff]  ;;  %v4913_v26 = vsel %vm171_vm0, %v4855_v12, 0.0 }
 0x479   :  { %v12217_v19 = vmul.f32 %v14916_v28, %v14939_v18  ;;  %v12236_v32 = vadd.f32 %v12118_v50, %v4830_v2  ;;  %v14945_v18 = vld [vmem:[#allocation101_spill] sm:$0xff]  ;;  %v14947_v55 = vld [vmem:[#allocation44_spill] sm:$0xff]  ;;  %v12252_v31 = vmul.f32 %v14916_v28, %v14948_v59  ;;  %v12256_v50 = vmul.f32 %v14902_v7, %v14949_v0 }
 0x47a   :  { %v12240_v42 = vmul.f32 %v14902_v7, %v14945_v18  ;;  %v12248_v57 = vmul.f32 %v14914_v23, %v14947_v55  ;;  %v14950_v2 = vld [vmem:[#allocation105_spill] sm:$0xff]  ;;  %v14951_v18 = vld [vmem:[#allocation71_spill] sm:$0xff]  ;;  %v12268_v55 = vmul.f32 %v14916_v28, %v14952_v41  ;;  %v12272_v59 = vmul.f32 %v14902_v7, %v14953_v25 }
 0x47b   :  { %14944 = vst [vmem:[#allocation47_spill] sm:$0xff] %v12236_v32  ;;  %v12260_v32 = vmul.f32 %v14904_v36, %v14950_v2  ;;  %v12264_v62 = vmul.f32 %v14914_v23, %v14951_v18  ;;  %v12276_v0 = vmul.f32 %v14904_v36, %v14954_v53  ;;  %v12280_v2 = vmul.f32 %v14914_v23, %v14955_v13 }
 0x47c   :  { %v12284_v18 = vmul.f32 %v14916_v28, %v14956_v39  ;;  %v12288_v41 = vmul.f32 %v14902_v7, %v14957_v43  ;;  %v12292_v25 = vmul.f32 %v14904_v36, %v14958_v27  ;;  %v12296_v53 = vmul.f32 %v14914_v23, %v14959_v10 }
 0x47d   :  { %v12300_v13 = vmul.f32 %v14916_v28, %v14960_v24  ;;  %v12304_v39 = vmul.f32 %v14902_v7, %v11923_v34  ;;  %v12308_v43 = vmul.f32 %v14904_v36, %v11942_v20  ;;  %v12312_v27 = vmul.f32 %v14914_v23, %v14961_v4 }
 0x47e   :  { %v12316_v10 = vmul.f32 %v14916_v28, %v14962_v1  ;;  %v4897_v24 = vsel %vm171_vm0, %v12122_v54, 0.0  ;;  %v4900_v7 = vsel %vm171_vm0, %v4851_v40, 0.0  ;;  %v4902_v36 = vsel %vm171_vm0, %v4852_v29, 0.0 }
 0x47f   :  { %v4899_v34 = vadd.f32 %v4898_v17, %v4897_v24  ;;  %v4910_v20 = vsel %vm171_vm0, %v4853_v49, 0.0  ;;  %v4911_v23 = vsel %vm171_vm0, %v4854_v47, 0.0  ;;  %v4915_v28 = vsel %vm171_vm0, %v4856_v16, 0.0 }
 0x480   :  { %v4912_v4 = vadd.f32 %v4911_v23, %v4910_v20  ;;  %v4923_v1 = vsel %vm171_vm0, %v4857_v56, 0.0  ;;  %v4924_v45 = vsel %vm171_vm0, %v4858_v9, 0.0  ;;  %v4926_v8 = vsel %vm171_vm0, %v4859_v22, 0.0 }
 0x481   :  { %v4901_v54 = vadd.f32 %v4900_v7, %v4899_v34  ;;  %v4928_v40 = vsel %vm171_vm0, %v4860_v30, 0.0  ;;  %v4925_v29 = vadd.f32 %v4924_v45, %v4923_v1  ;;  %v4936_v49 = vsel %vm171_vm0, %v4861_v61, 0.0 }
 0x482   :  { %v4914_v17 = vadd.f32 %v4913_v26, %v4912_v4  ;;  %v4937_v47 = vsel %vm171_vm0, %v4862_v6, 0.0  ;;  %v4939_v12 = vsel %vm171_vm0, %v4863_v38, 0.0  ;;  %v4941_v16 = vsel %vm171_vm0, %v4864_v46, 0.0 }
 0x483   :  { %v4903_v20 = vadd.f32 %v4902_v36, %v4901_v54  ;;  %v4938_v24 = vadd.f32 %v4937_v47, %v4936_v49  ;;  %v4927_v34 = vadd.f32 %v4926_v8, %v4925_v29  ;;  %v4949_v9 = vsel %vm171_vm0, %v4865_v51, 0.0 }
 0x484   :  { %v4916_v56 = vadd.f32 %v4915_v28, %v4914_v17  ;;  %v4950_v22 = vsel %vm171_vm0, %v4866_v5, 0.0  ;;  %v4952_v45 = vsel %vm171_vm0, %v4867_v58, 0.0  ;;  %v4954_v61 = vsel %vm171_vm0, %v12201_v37, 0.0 }
 0x485   :  { %v4904_v7 = vrot.slane %v4903_v20, 4  ;;  %v4940_v30 = vadd.f32 %v4939_v12, %v4938_v24  ;;  %v4951_v26 = vadd.f32 %v4950_v22, %v4949_v9  ;;  %v4929_v4 = vadd.f32 %v4928_v40, %v4927_v34 }
 0x486   :  { %v4917_v1 = vrot.slane %v4916_v56, 4  ;;  %v4962_v6 = vsel %vm171_vm0, %v12205_v33, 0.0  ;;  %v4963_v51 = vsel %vm171_vm0, %v12209_v52, 0.0  ;;  %v4965_v58 = vsel %vm171_vm0, %v12213_v14, 0.0 }
 0x487   :  { %v4905_v38 = vadd.f32 %v4904_v7, %v4903_v20  ;;  %v4942_v46 = vadd.f32 %v4941_v16, %v4940_v30  ;;  %v4953_v36 = vadd.f32 %v4952_v45, %v4951_v26  ;;  %v4930_v23 = vrot.slane %v4929_v4, 4 }
 0x488   :  { %v4918_v5 = vadd.f32 %v4917_v1, %v4916_v56  ;;  %v4964_v28 = vadd.f32 %v4963_v51, %v4962_v6  ;;  %v4967_v37 = vsel %vm171_vm0, %v12217_v19, 0.0  ;;  %v4975_v49 = vsel %vm171_vm0, %v12221_v35, 0.0 }
 0x489   :  { %v4906_v54 = vrot.slane %v4905_v38, 2  ;;  %v4943_v8 = vrot.slane %v4942_v46, 4  ;;  %v4955_v40 = vadd.f32 %v4954_v61, %v4953_v36  ;;  %v4931_v33 = vadd.f32 %v4930_v23, %v4929_v4 }
 0x48a   :  { %v4919_v17 = vrot.slane %v4918_v5, 2  ;;  %v4966_v29 = vadd.f32 %v4965_v58, %v4964_v28  ;;  %v4976_v24 = vsel %vm171_vm0, %v12225_v63, 0.0  ;;  %v4978_v19 = vsel %vm171_vm0, %v12229_v60, 0.0 }
 0x48b   :  { %v4907_v47 = vadd.f32 %v4906_v54, %v4905_v38  ;;  %v4944_v52 = vadd.f32 %v4943_v8, %v4942_v46  ;;  %v4956_v20 = vrot.slane %v4955_v40, 4  ;;  %v4932_v14 = vrot.slane %v4931_v33, 2 }
 0x48c   :  { %v4920_v12 = vadd.f32 %v4919_v17, %v4918_v5  ;;  %v4968_v16 = vadd.f32 %v4967_v37, %v4966_v29  ;;  %v4977_v56 = vadd.f32 %v4976_v24, %v4975_v49  ;;  %v4980_v63 = vsel %vm171_vm0, %v12233_v3, 0.0 }
 0x48d   :  { %v4908_v34 = vrot.slane %v4907_v47, 1  ;;  %v4945_v9 = vrot.slane %v4944_v52, 2  ;;  %v4957_v22 = vadd.f32 %v4956_v20, %v4955_v40  ;;  %v4933_v30 = vadd.f32 %v4932_v14, %v4931_v33 }
 0x48e   :  { %v4921_v7 = vrot.slane %v4920_v12, 1  ;;  %v4969_v26 = vrot.slane %v4968_v16, 4  ;;  %v4979_v35 = vadd.f32 %v4978_v19, %v4977_v56  ;;  %v4988_v60 = vsel %vm171_vm0, %v12240_v42, 0.0 }
 0x48f   :  { %v12355_v45 = vadd.f32 %v4908_v34, %v4907_v47  ;;  %v4946_v1 = vadd.f32 %v4945_v9, %v4944_v52  ;;  %v4958_v4 = vrot.slane %v4957_v22, 2  ;;  %v4934_v6 = vrot.slane %v4933_v30, 1 }
 0x490   :  { %v12359_v61 = vadd.f32 %v4921_v7, %v4920_v12  ;;  %v4970_v38 = vadd.f32 %v4969_v26, %v4968_v16  ;;  %v4981_v46 = vadd.f32 %v4980_v63, %v4979_v35  ;;  %v4989_v5 = vsel %vm171_vm0, %v12244_v48, 0.0 }
 0x491   :  { %v4947_v36 = vrot.slane %v4946_v1, 1  ;;  %v4959_v51 = vadd.f32 %v4958_v4, %v4957_v22  ;;  %v12365_v23 = vadd.f32 %v4934_v6, %v4933_v30  ;;  %v4990_v54 = vadd.f32 %v4989_v5, %v4988_v60 }
 0x492   :  { %v4971_v28 = vrot.slane %v4970_v38, 2  ;;  %v4982_v58 = vrot.slane %v4981_v46, 4  ;;  %v4991_v40 = vsel %vm171_vm0, %v12248_v57, 0.0  ;;  %v4993_v37 = vsel %vm171_vm0, %v12252_v31, 0.0 }
 0x493   :  { %v12367_v8 = vadd.f32 %v4947_v36, %v4946_v1  ;;  %v4960_v3 = vrot.slane %v4959_v51, 1  ;;  %v4992_v42 = vadd.f32 %v4991_v40, %v4990_v54  ;;  %v5001_v48 = vsel %vm171_vm0, %v12256_v50, 0.0 }
 0x494   :  { %v4972_v17 = vadd.f32 %v4971_v28, %v4970_v38  ;;  %v4983_v33 = vadd.f32 %v4982_v58, %v4981_v46  ;;  %v5002_v49 = vsel %vm171_vm0, %v12260_v32, 0.0  ;;  %v5004_v47 = vsel %vm171_vm0, %v12264_v62, 0.0  ;;  %v14966_v58 = vld [vmem:[#allocation14_spill] sm:$0xff] }
 0x495   :  { %v4961_v29 = vadd.f32 %v4960_v3, %v4959_v51  ;;  %v5006_v52 = vsel %vm171_vm0, %v12268_v55, 0.0  ;;  %v4994_v24 = vadd.f32 %v4993_v37, %v4992_v42  ;;  %v5003_v31 = vadd.f32 %v5002_v49, %v5001_v48  ;;  %v14964_v51 = vld [vmem:[#allocation89_spill] sm:$0xff] }
 0x496   :  { %v4973_v57 = vrot.slane %v4972_v17, 1  ;;  %v4984_v20 = vrot.slane %v4983_v33, 2  ;;  %v5014_v12 = vsel %vm171_vm0, %v12272_v59, 0.0  ;;  %v5015_v50 = vsel %vm171_vm0, %v12276_v0, 0.0 }
 0x497   :  { %v5017_v14 = vsel %vm171_vm0, %v12280_v2, 0.0  ;;  %v5019_v32 = vsel %vm171_vm0, %v12284_v18, 0.0  ;;  %v4995_v56 = vrot.slane %v4994_v24, 4  ;;  %v5005_v55 = vadd.f32 %v5004_v47, %v5003_v31 }
 0x498   :  { %v4974_v62 = vadd.f32 %v4973_v57, %v4972_v17  ;;  %v4985_v16 = vadd.f32 %v4984_v20, %v4983_v33  ;;  %v5016_v34 = vadd.f32 %v5015_v50, %v5014_v12  ;;  %v5027_v9 = vsel %vm171_vm0, %v12288_v41, 0.0 }
 0x499   :  { %v5028_v59 = vsel %vm171_vm0, %v12292_v25, 0.0  ;;  %v5030_v0 = vsel %vm171_vm0, %v12296_v53, 0.0  ;;  %v4996_v19 = vadd.f32 %v4995_v56, %v4994_v24  ;;  %v5007_v2 = vadd.f32 %v5006_v52, %v5005_v55 }
 0x49a   :  { %v4986_v22 = vrot.slane %v4985_v16, 1  ;;  %v5029_v7 = vadd.f32 %v5028_v59, %v5027_v9  ;;  %v5018_v30 = vadd.f32 %v5017_v14, %v5016_v34  ;;  %v5032_v18 = vsel %vm171_vm0, %v12300_v13, 0.0  ;;  %v14977_v34 = vld [vmem:[#allocation30_spill] sm:$0xff]  ;;  %v14978_v59 = vld [vmem:[#allocation11_spill] sm:$0xff] }
 0x49b   :  { %v5040_v26 = vsel %vm171_vm0, %v12304_v39, 0.0  ;;  %v5041_v41 = vsel %vm171_vm0, %v12308_v43, 0.0  ;;  %v4997_v1 = vrot.slane %v4996_v19, 2  ;;  %v5008_v25 = vrot.slane %v5007_v2, 4  ;;  %v14963_v39 = vld [vmem:[#allocation45_spill] sm:$0xff] }
 0x49c   :  { %v4987_v35 = vadd.f32 %v4986_v22, %v4985_v16  ;;  %v5031_v4 = vadd.f32 %v5030_v0, %v5029_v7  ;;  %v5020_v63 = vadd.f32 %v5019_v32, %v5018_v30  ;;  %v5042_v53 = vadd.f32 %v5041_v41, %v5040_v26  ;;  %v14975_v16 = vld [vmem:[#allocation19_spill] sm:$0xff]  ;;  %v14982_v41 = vld [vmem:[#allocation24_spill] sm:$0xff] }
 0x49d   :  { %v5043_v6 = vsel %vm171_vm0, %v12312_v27, 0.0  ;;  %v5045_v38 = vsel %vm171_vm0, %v12316_v10, 0.0  ;;  %v4998_v46 = vadd.f32 %v4997_v1, %v4996_v19  ;;  %v5009_v13 = vadd.f32 %v5008_v25, %v5007_v2  ;;  %v14967_v27 = vld [vmem:[#allocation20_spill] sm:$0xff]  ;;  %v14979_v2 = vld [vmem:[#allocation23_spill] sm:$0xff]  ;;  %v14983_v1 = vld [vmem:[#allocation2_spill] sm:$0xff] }
 0x49e   :  { %v5033_v36 = vadd.f32 %v5032_v18, %v5031_v4  ;;  %v14965_v60 = vsub.f32 %v14963_v39, %v14964_v51  ;;  %v5021_v5 = vrot.slane %v5020_v63, 4  ;;  %v5044_v28 = vadd.f32 %v5043_v6, %v5042_v53  ;;  %v14980_v30 = vld [vmem:[#allocation31_spill] sm:$0xff]  ;;  %v14984_v53 = vld [vmem:[#allocation25_spill] sm:$0xff]  ;;  %v14987_v51 = vld [vmem:[#allocation12_spill] sm:$0xff] }
 0x49f   :  { %v12413_v54 = vmul.f32 %v14966_v58, %v11550_v44  ;;  %v12417_v3 = vmul.f32 %v14967_v27, %v14903_v15  ;;  %v4999_v10 = vrot.slane %v4998_v46, 1  ;;  %v5010_v40 = vrot.slane %v5009_v13, 2 }
 0x4a0   :  { %v12409_v43 = vrot.slane %v14965_v60, %v14554_v21  ;;  %v5034_v37 = vrot.slane %v5033_v36, 4  ;;  %v5022_v33 = vadd.f32 %v5021_v5, %v5020_v63  ;;  %v5046_v42 = vadd.f32 %v5045_v38, %v5044_v28  ;;  %v14985_v38 = vld [vmem:[#allocation18_spill] sm:$0xff]  ;;  %v14988_v5 = vld [vmem:[#allocation33_spill] sm:$0xff] }
 0x4a1   :  { %v5000_v49 = vadd.f32 %v4999_v10, %v4998_v46  ;;  %v5011_v15 = vadd.f32 %v5010_v40, %v5009_v13  ;;  %v5075_v9 = vmul.f32 %v14966_v58, %v14977_v34  ;;  %v5076_v0 = vmul.f32 %v14967_v27, %v14978_v59  ;;  %v14998_v59 = vld [vmem:[#allocation62_spill] sm:$0xff] }
 0x4a2   :  { %v12421_v17 = vadd.f32 %v12409_v43, %v12355_v45  ;;  %v12425_v48 = vadd.f32 %v12409_v43, %v12359_v61  ;;  %v12429_v44 = vadd.f32 %v12409_v43, %v12365_v23  ;;  %v5035_v47 = vadd.f32 %v5034_v37, %v5033_v36  ;;  %v14986_v36 = vld [vmem:[#allocation32_spill] sm:$0xff]  ;;  %v14990_v37 = vld [vmem:[#allocation34_spill] sm:$0xff] }
 0x4a3   :  { %v12433_v52 = vadd.f32 %v12409_v43, %v12367_v8  ;;  %v5023_v57 = vrot.slane %v5022_v33, 2  ;;  %v5047_v45 = vrot.slane %v5046_v42, 4  ;;  %v12436_v20 = vadd.f32 %v12409_v43, %v4961_v29  ;;  %v14974_v8 = vld [vmem:[#allocation15_spill] sm:$0xff]  ;;  %v14976_v29 = vld [vmem:[#allocation28_spill] sm:$0xff] }
 0x4a4   :  { %14968 = vst [vmem:[#allocation49_spill] sm:$0xff] %v12421_v17  ;;  %v12439_v24 = vadd.f32 %v12409_v43, %v4974_v62  ;;  %v5012_v61 = vrot.slane %v5011_v15, 1  ;;  %v5036_v31 = vrot.slane %v5035_v47, 2  ;;  %v12442_v23 = vadd.f32 %v12409_v43, %v4987_v35 }
 0x4a5   :  { %14969 = vst [vmem:[#allocation91_spill] sm:$0xff] %v12433_v52  ;;  %14970 = vst [vmem:[#allocation53_spill] sm:$0xff] %v12436_v20  ;;  %v12445_v12 = vadd.f32 %v12409_v43, %v5000_v49  ;;  %v5024_v50 = vadd.f32 %v5023_v57, %v5022_v33  ;;  %v5048_v14 = vadd.f32 %v5047_v45, %v5046_v42  ;;  %v14991_v42 = vld [vmem:[#allocation35_spill] sm:$0xff]  ;;  %v14994_v45 = vld [vmem:[#allocation37_spill] sm:$0xff] }
 0x4a6   :  { %14971 = vst [vmem:[#allocation74_spill] sm:$0xff] %v12439_v24  ;;  %14972 = vst [vmem:[#allocation94_spill] sm:$0xff] %v12442_v23  ;;  %v12449_v32 = vmul.f32 %v14974_v8, %v14913_v11  ;;  %v12453_v56 = vmul.f32 %v14976_v29, %v14975_v16  ;;  %v5013_v62 = vadd.f32 %v5012_v61, %v5011_v15  ;;  %v14996_v16 = vld [vmem:[#allocation39_spill] sm:$0xff]  ;;  %v15024_v23 = vld [vmem:[#allocation64_spill] sm:$0xff]  ;;  %v5120_v24 = vsel %vm171_vm0, %v12417_v3, 0.0 }
 0x4a7   :  { %14973 = vst [vmem:[#allocation96_spill] sm:$0xff] %v12445_v12  ;;  %v5037_v55 = vadd.f32 %v5036_v31, %v5035_v47  ;;  %v5025_v22 = vrot.slane %v5024_v50, 1  ;;  %v5049_v19 = vrot.slane %v5048_v14, 2  ;;  %v5077_v7 = vmul.f32 %v14974_v8, %v14979_v2  ;;  %v14993_v47 = vld [vmem:[#allocation36_spill] sm:$0xff]  ;;  %v14995_v31 = vld [vmem:[#allocation38_spill] sm:$0xff] }
 0x4a8   :  { %v5078_v11 = vmul.f32 %v14976_v29, %v14980_v30  ;;  %v12464_v26 = vadd.f32 %v12409_v43, %v5013_v62  ;;  %v5079_v35 = vmul.f32 %v14966_v58, %v14982_v41  ;;  %v5080_v25 = vmul.f32 %v14967_v27, %v14983_v1  ;;  %v15000_v30 = vld [vmem:[#allocation9_spill] sm:$0xff]  ;;  %v15023_v12 = vld [vmem:[#allocation80_spill] sm:$0xff] }
 0x4a9   :  { %v5038_v18 = vrot.slane %v5037_v55, 1  ;;  %v5026_v4 = vadd.f32 %v5025_v22, %v5024_v50  ;;  %v5050_v63 = vadd.f32 %v5049_v19, %v5048_v14  ;;  %v5081_v6 = vmul.f32 %v14974_v8, %v14984_v53  ;;  %v14999_v19 = vld [vmem:[#allocation48_spill] sm:$0xff]  ;;  %v15001_v41 = vld [vmem:[#allocation69_spill] sm:$0xff] }
 0x4aa   :  { %14981 = vst [vmem:[#allocation66_spill] sm:$0xff] %v12464_v26  ;;  %v5082_v46 = vmul.f32 %v14976_v29, %v14985_v38  ;;  %v5083_v39 = vmul.f32 %v14966_v58, %v14986_v36  ;;  %v5084_v60 = vmul.f32 %v14967_v27, %v14987_v51  ;;  %v5085_v28 = vmul.f32 %v14974_v8, %v14988_v5  ;;  %v15004_v38 = vld [vmem:[#allocation88_spill] sm:$0xff]  ;;  %v15005_v36 = vld [vmem:[#allocation101_spill] sm:$0xff]  ;;  %v15006_v5 = vld [vmem:[#allocation42_spill] sm:$0xff] }
 0x4ab   :  { %v5039_v13 = vadd.f32 %v5038_v18, %v5037_v55  ;;  %v5051_v10 = vrot.slane %v5050_v63, 1  ;;  %v12481_v40 = vadd.f32 %v12409_v43, %v5026_v4  ;;  %v5086_v33 = vmul.f32 %v14976_v29, %v14990_v37  ;;  %v14997_v55 = vld [vmem:[#allocation90_spill] sm:$0xff]  ;;  %v15002_v4 = vld [vmem:[#allocation76_spill] sm:$0xff] }
 0x4ac   :  { %v5087_v49 = vmul.f32 %v14966_v58, %v14991_v42  ;;  %v5088_v57 = vmul.f32 %v14967_v27, %v14993_v47  ;;  %v12494_v61 = vmul.f32 %v14974_v8, %v14994_v45  ;;  %v12498_v50 = vmul.f32 %v14976_v29, %v14995_v31  ;;  %v15007_v37 = vld [vmem:[#allocation44_spill] sm:$0xff]  ;;  %v15008_v47 = vld [vmem:[#allocation70_spill] sm:$0xff]  ;;  %v15009_v45 = vld [vmem:[#allocation103_spill] sm:$0xff] }
 0x4ad   :  { %14989 = vst [vmem:[#allocation57_spill] sm:$0xff] %v12481_v40  ;;  %v12488_v15 = vadd.f32 %v12409_v43, %v5039_v13  ;;  %v5052_v14 = vadd.f32 %v5051_v10, %v5050_v63  ;;  %v5091_v62 = vmul.f32 %v14966_v58, %v14996_v16  ;;  %v12504_v34 = vmul.f32 %v14967_v27, %v14997_v55  ;;  %v15011_v55 = vld [vmem:[#allocation71_spill] sm:$0xff]  ;;  %v15019_v26 = vld [vmem:[#allocation72_spill] sm:$0xff]  ;;  %v15022_v40 = vld [vmem:[#allocation78_spill] sm:$0xff] }
 0x4ae   :  { %v12508_v22 = vmul.f32 %v14974_v8, %v14998_v59  ;;  %v12512_v2 = vmul.f32 %v14976_v29, %v14999_v19  ;;  %v12516_v18 = vmul.f32 %v14966_v58, %v15000_v30  ;;  %v12520_v1 = vmul.f32 %v14967_v27, %v15001_v41  ;;  %v15012_v19 = vld [vmem:[#allocation3_spill] sm:$0xff]  ;;  %v15013_v41 = vld [vmem:[#allocation4_spill] sm:$0xff] }
 0x4af   :  { %14992 = vst [vmem:[#allocation52_spill] sm:$0xff] %v12488_v15  ;;  %v12524_v63 = vmul.f32 %v14974_v8, %v15002_v4  ;;  %v12527_v53 = vadd.f32 %v12409_v43, %v5052_v14  ;;  %v12531_v13 = vmul.f32 %v14976_v29, %v15004_v38  ;;  %v12535_v51 = vmul.f32 %v14966_v58, %v15005_v36  ;;  %v15010_v14 = vld [vmem:[#allocation105_spill] sm:$0xff]  ;;  %v15021_v15 = vld [vmem:[#allocation82_spill] sm:$0xff] }
 0x4b0   :  { %v12539_v10 = vmul.f32 %v14967_v27, %v15006_v5  ;;  %v12543_v42 = vmul.f32 %v14974_v8, %v15007_v37  ;;  %v12547_v43 = vmul.f32 %v14976_v29, %v15008_v47  ;;  %v12551_v31 = vmul.f32 %v14966_v58, %v15009_v45  ;;  %v15014_v38 = vld [vmem:[#allocation77_spill] sm:$0xff] }
 0x4b1   :  { %15003 = vst [vmem:[#allocation60_spill] sm:$0xff] %v12527_v53  ;;  %v12555_v16 = vmul.f32 %v14967_v27, %v15010_v14  ;;  %v12559_v59 = vmul.f32 %v14974_v8, %v15011_v55  ;;  %v12563_v30 = vmul.f32 %v14976_v29, %v15012_v19  ;;  %v12567_v4 = vmul.f32 %v14966_v58, %v15013_v41  ;;  %v15015_v5 = vld [vmem:[#allocation61_spill] sm:$0xff]  ;;  %v15017_v14 = vld [vmem:[#allocation67_spill] sm:$0xff] }
 0x4b2   :  { %v12571_v36 = vmul.f32 %v14967_v27, %v15014_v38  ;;  %v12575_v37 = vmul.f32 %v14974_v8, %v15015_v5  ;;  %v15016_v47 = vld [vmem:[#allocation81_spill] sm:$0xff]  ;;  %v12583_v55 = vmul.f32 %v14966_v58, %v15017_v14  ;;  %v15018_v19 = vld [vmem:[#allocation7_spill] sm:$0xff]  ;;  %v12591_v38 = vmul.f32 %v14974_v8, %v15019_v26 }
 0x4b3   :  { %v12579_v45 = vmul.f32 %v14976_v29, %v15016_v47  ;;  %v12587_v41 = vmul.f32 %v14967_v27, %v15018_v19  ;;  %v15020_v53 = vld [vmem:[#allocation73_spill] sm:$0xff]  ;;  %v12599_v47 = vmul.f32 %v14966_v58, %v15021_v15  ;;  %v12603_v14 = vmul.f32 %v14967_v27, %v15022_v40 }
 0x4b4   :  { %v12595_v5 = vmul.f32 %v14976_v29, %v15020_v53  ;;  %v12607_v19 = vmul.f32 %v14974_v8, %v15023_v12  ;;  %v12611_v26 = vmul.f32 %v14976_v29, %v15024_v23  ;;  %v5119_v53 = vsel %vm171_vm0, %v12413_v54, 0.0 }
 0x4b5   :  { %v5121_v58 = vadd.f32 %v5120_v24, %v5119_v53  ;;  %v5122_v15 = vsel %vm171_vm0, %v12449_v32, 0.0  ;;  %v5124_v27 = vsel %vm171_vm0, %v12453_v56, 0.0  ;;  %v5132_v12 = vsel %vm171_vm0, %v5075_v9, 0.0 }
 0x4b6   :  { %v5133_v8 = vsel %vm171_vm0, %v5076_v0, 0.0  ;;  %v5135_v23 = vsel %vm171_vm0, %v5077_v7, 0.0  ;;  %v5137_v29 = vsel %vm171_vm0, %v5078_v11, 0.0  ;;  %v5145_v54 = vsel %vm171_vm0, %v5079_v35, 0.0 }
 0x4b7   :  { %v5123_v40 = vadd.f32 %v5122_v15, %v5121_v58  ;;  %v5134_v17 = vadd.f32 %v5133_v8, %v5132_v12  ;;  %v5146_v3 = vsel %vm171_vm0, %v5080_v25, 0.0  ;;  %v5148_v24 = vsel %vm171_vm0, %v5081_v6, 0.0 }
 0x4b8   :  { %v5147_v32 = vadd.f32 %v5146_v3, %v5145_v54  ;;  %v5150_v53 = vsel %vm171_vm0, %v5082_v46, 0.0  ;;  %v5158_v56 = vsel %vm171_vm0, %v5083_v39, 0.0  ;;  %v5159_v9 = vsel %vm171_vm0, %v5084_v60, 0.0 }
 0x4b9   :  { %v5125_v0 = vadd.f32 %v5124_v27, %v5123_v40  ;;  %v5136_v20 = vadd.f32 %v5135_v23, %v5134_v17  ;;  %v5160_v7 = vadd.f32 %v5159_v9, %v5158_v56  ;;  %v5161_v11 = vsel %vm171_vm0, %v5085_v28, 0.0 }
 0x4ba   :  { %v5149_v52 = vadd.f32 %v5148_v24, %v5147_v32  ;;  %v5163_v35 = vsel %vm171_vm0, %v5086_v33, 0.0  ;;  %v5171_v58 = vsel %vm171_vm0, %v5087_v49, 0.0  ;;  %v5172_v25 = vsel %vm171_vm0, %v5088_v57, 0.0 }
 0x4bb   :  { %v5126_v6 = vrot.slane %v5125_v0, 4  ;;  %v5138_v15 = vadd.f32 %v5137_v29, %v5136_v20  ;;  %v5162_v12 = vadd.f32 %v5161_v11, %v5160_v7  ;;  %v5173_v46 = vadd.f32 %v5172_v25, %v5171_v58 }
 0x4bc   :  { %v5151_v8 = vadd.f32 %v5150_v53, %v5149_v52  ;;  %v5174_v39 = vsel %vm171_vm0, %v12494_v61, 0.0  ;;  %v5176_v17 = vsel %vm171_vm0, %v12498_v50, 0.0  ;;  %v5184_v60 = vsel %vm171_vm0, %v5091_v62, 0.0 }
 0x4bd   :  { %v5127_v28 = vadd.f32 %v5126_v6, %v5125_v0  ;;  %v5139_v27 = vrot.slane %v5138_v15, 4  ;;  %v5164_v33 = vadd.f32 %v5163_v35, %v5162_v12  ;;  %v5175_v23 = vadd.f32 %v5174_v39, %v5173_v46 }
 0x4be   :  { %v5152_v49 = vrot.slane %v5151_v8, 4  ;;  %v5185_v57 = vsel %vm171_vm0, %v12504_v34, 0.0  ;;  %v5187_v20 = vsel %vm171_vm0, %v12508_v22, 0.0  ;;  %v5189_v52 = vsel %vm171_vm0, %v12512_v2, 0.0 }
 0x4bf   :  { %v5128_v61 = vrot.slane %v5127_v28, 2  ;;  %v5140_v29 = vadd.f32 %v5139_v27, %v5138_v15  ;;  %v5165_v54 = vrot.slane %v5164_v33, 4  ;;  %v5177_v50 = vadd.f32 %v5176_v17, %v5175_v23 }
 0x4c0   :  { %v5153_v40 = vadd.f32 %v5152_v49, %v5151_v8  ;;  %v5186_v62 = vadd.f32 %v5185_v57, %v5184_v60  ;;  %v5197_v3 = vsel %vm171_vm0, %v12516_v18, 0.0  ;;  %v5198_v24 = vsel %vm171_vm0, %v12520_v1, 0.0 }
 0x4c1   :  { %v5129_v32 = vadd.f32 %v5128_v61, %v5127_v28  ;;  %v5141_v34 = vrot.slane %v5140_v29, 2  ;;  %v5166_v53 = vadd.f32 %v5165_v54, %v5164_v33  ;;  %v5178_v56 = vrot.slane %v5177_v50, 4 }
 0x4c2   :  { %v5154_v22 = vrot.slane %v5153_v40, 2  ;;  %v5188_v9 = vadd.f32 %v5187_v20, %v5186_v62  ;;  %v5199_v0 = vadd.f32 %v5198_v24, %v5197_v3  ;;  %v5200_v2 = vsel %vm171_vm0, %v12524_v63, 0.0 }
 0x4c3   :  { %v5130_v7 = vrot.slane %v5129_v32, 1  ;;  %v5142_v11 = vadd.f32 %v5141_v34, %v5140_v29  ;;  %v5167_v35 = vrot.slane %v5166_v53, 2  ;;  %v5179_v58 = vadd.f32 %v5178_v56, %v5177_v50 }
 0x4c4   :  { %v5155_v25 = vadd.f32 %v5154_v22, %v5153_v40  ;;  %v5190_v6 = vadd.f32 %v5189_v52, %v5188_v9  ;;  %v5201_v18 = vadd.f32 %v5200_v2, %v5199_v0  ;;  %v5202_v1 = vsel %vm171_vm0, %v12531_v13, 0.0 }
 0x4c5   :  { %v12654_v15 = vadd.f32 %v5130_v7, %v5129_v32  ;;  %v5143_v12 = vrot.slane %v5142_v11, 1  ;;  %v5168_v46 = vadd.f32 %v5167_v35, %v5166_v53  ;;  %v5180_v8 = vrot.slane %v5179_v58, 2 }
 0x4c6   :  { %v5156_v39 = vrot.slane %v5155_v25, 1  ;;  %v5191_v17 = vrot.slane %v5190_v6, 4  ;;  %v5203_v60 = vadd.f32 %v5202_v1, %v5201_v18  ;;  %v5210_v63 = vsel %vm171_vm0, %v12535_v51, 0.0 }
 0x4c7   :  { %v12658_v28 = vadd.f32 %v5143_v12, %v5142_v11  ;;  %v5169_v27 = vrot.slane %v5168_v46, 1  ;;  %v5181_v33 = vadd.f32 %v5180_v8, %v5179_v58  ;;  %v5211_v23 = vsel %vm171_vm0, %v12539_v10, 0.0 }
 0x4c8   :  { %v12662_v49 = vadd.f32 %v5156_v39, %v5155_v25  ;;  %v5192_v13 = vadd.f32 %v5191_v17, %v5190_v6  ;;  %v5204_v57 = vrot.slane %v5203_v60, 4  ;;  %v5212_v20 = vadd.f32 %v5211_v23, %v5210_v63  ;;  %v15025_v63 = vld [vmem:[#allocation5_spill] sm:$0xff] }
 0x4c9   :  { %v12664_v52 = vadd.f32 %v5169_v27, %v5168_v46  ;;  %v5182_v61 = vrot.slane %v5181_v33, 1  ;;  %v5213_v29 = vsel %vm171_vm0, %v12543_v42, 0.0  ;;  %v5215_v51 = vsel %vm171_vm0, %v12547_v43, 0.0 }
 0x4ca   :  { %v5193_v54 = vrot.slane %v5192_v13, 2  ;;  %v5205_v50 = vadd.f32 %v5204_v57, %v5203_v60  ;;  %v5214_v40 = vadd.f32 %v5213_v29, %v5212_v20  ;;  %v5223_v10 = vsel %vm171_vm0, %v12551_v31, 0.0  ;;  %v6113_v57 = vld [vmem:[%s13304_s2] sm:$0xff]  ;;  %v15028_v20 = vld [vmem:[#allocation16_spill] sm:$0xff] }
 0x4cb   :  { %v5183_v62 = vadd.f32 %v5182_v61, %v5181_v33  ;;  %v5224_v3 = vsel %vm171_vm0, %v12555_v16, 0.0  ;;  %v5226_v24 = vsel %vm171_vm0, %v12559_v59, 0.0  ;;  %v5228_v32 = vsel %vm171_vm0, %v12563_v30, 0.0 }
 0x4cc   :  { %v5194_v42 = vadd.f32 %v5193_v54, %v5192_v13  ;;  %v5206_v34 = vrot.slane %v5205_v50, 2  ;;  %v5216_v53 = vadd.f32 %v5215_v51, %v5214_v40  ;;  %v5225_v43 = vadd.f32 %v5224_v3, %v5223_v10 }
 0x4cd   :  { %v5236_v56 = vsel %vm171_vm0, %v12567_v4, 0.0  ;;  %v5237_v31 = vsel %vm171_vm0, %v12571_v36, 0.0  ;;  %v5239_v22 = vsel %vm171_vm0, %v12575_v37, 0.0  ;;  %v5241_v16 = vsel %vm171_vm0, %v12579_v45, 0.0 }
 0x4ce   :  { %v5195_v59 = vrot.slane %v5194_v42, 1  ;;  %v5207_v9 = vadd.f32 %v5206_v34, %v5205_v50  ;;  %v5217_v0 = vrot.slane %v5216_v53, 4  ;;  %v5227_v30 = vadd.f32 %v5226_v24, %v5225_v43 }
 0x4cf   :  { %v5238_v2 = vadd.f32 %v5237_v31, %v5236_v56  ;;  %v5249_v7 = vsel %vm171_vm0, %v12583_v55, 0.0  ;;  %v5250_v4 = vsel %vm171_vm0, %v12587_v41, 0.0  ;;  %v5252_v36 = vsel %vm171_vm0, %v12591_v38, 0.0  ;;  %v15033_v31 = vld [vmem:[#allocation21_spill] sm:$0xff] }
 0x4d0   :  { %v5196_v11 = vadd.f32 %v5195_v59, %v5194_v42  ;;  %v5208_v35 = vrot.slane %v5207_v9, 1  ;;  %v5218_v37 = vadd.f32 %v5217_v0, %v5216_v53  ;;  %v5229_v58 = vadd.f32 %v5228_v32, %v5227_v30  ;;  %v15034_v0 = vld [vmem:[#allocation17_spill] sm:$0xff] }
 0x4d1   :  { %v5240_v25 = vadd.f32 %v5239_v22, %v5238_v2  ;;  %v5251_v45 = vadd.f32 %v5250_v4, %v5249_v7  ;;  %v5254_v6 = vsel %vm171_vm0, %v12595_v5, 0.0  ;;  %v5262_v18 = vsel %vm171_vm0, %v12599_v47, 0.0  ;;  %v15026_v47 = vld [vmem:[#allocation79_spill] sm:$0xff]  ;;  %v6116_v7 = vld [vmem:[%s13304_s2 + $0x18] sm:$0xff] }
 0x4d2   :  { %v5209_v1 = vadd.f32 %v5208_v35, %v5207_v9  ;;  %v5219_v55 = vrot.slane %v5218_v37, 2  ;;  %v5230_v12 = vrot.slane %v5229_v58, 4  ;;  %v5263_v41 = vsel %vm171_vm0, %v12603_v14, 0.0  ;;  %v6115_v9 = vld [vmem:[%s13304_s2 + $0x10] sm:$0xff]  ;;  %v15035_v4 = vld [vmem:[#allocation29_spill] sm:$0xff] }
 0x4d3   :  { %v5242_v46 = vadd.f32 %v5241_v16, %v5240_v25  ;;  %v5253_v38 = vadd.f32 %v5252_v36, %v5251_v45  ;;  %v5264_v8 = vadd.f32 %v5263_v41, %v5262_v18  ;;  %v5265_v39 = vsel %vm171_vm0, %v12607_v19, 0.0  ;;  %v6119_v18 = vld [vmem:[%s13304_s2 + $0x30] sm:$0xff] }
 0x4d4   :  { %v5220_v17 = vadd.f32 %v5219_v55, %v5218_v37  ;;  %v5231_v60 = vadd.f32 %v5230_v12, %v5229_v58  ;;  %v5267_v5 = vsel %vm171_vm0, %v12611_v26, 0.0  ;;  %v15027_v27 = vsub.f32 %v15025_v63, %v15026_v47  ;;  %v6118_v37 = vld [vmem:[%s13304_s2 + $0x28] sm:$0xff]  ;;  %v6120_v12 = vld [vmem:[%s13304_s2 + $0x38] sm:$0xff]  ;;  %v6123_v63 = vld [vmem:[%s13304_s2 + $0x50] sm:$0xff] }
 0x4d5   :  { %v5243_v23 = vrot.slane %v5242_v46, 4  ;;  %v5255_v13 = vadd.f32 %v5254_v6, %v5253_v38  ;;  %v5266_v14 = vadd.f32 %v5265_v39, %v5264_v8  ;;  %v12712_v19 = vmul.f32 %v6113_v57, %v15028_v20  ;;  %v6122_v8 = vld [vmem:[%s13304_s2 + $0x48] sm:$0xff] }
 0x4d6   :  { %v12706_v33 = vrot.slane %v15027_v27, %v14554_v21  ;;  %v5221_v61 = vrot.slane %v5220_v17, 1  ;;  %v5232_v29 = vrot.slane %v5231_v60, 2  ;;  %v12752_v30 = vmul.f32 %v6115_v9, %v15034_v0  ;;  %v6124_v27 = vld [vmem:[%s13304_s2 + $0x58] sm:$0xff]  ;;  %v6126_v57 = vld [vmem:[%s13304_s2 + $0x68] sm:$0xff] }
 0x4d7   :  { %v5244_v54 = vadd.f32 %v5243_v23, %v5242_v46  ;;  %v5256_v50 = vrot.slane %v5255_v13, 4  ;;  %v5268_v40 = vadd.f32 %v5267_v5, %v5266_v14  ;;  %v12758_v36 = vmul.f32 %v6116_v7, %v15035_v4  ;;  %v6121_v46 = vld [vmem:[%s13304_s2 + $0x40] sm:$0xff] }
 0x4d8   :  { %v12716_v26 = vadd.f32 %v12706_v33, %v12654_v15  ;;  %v12720_v51 = vadd.f32 %v12706_v33, %v12658_v28  ;;  %v12724_v10 = vadd.f32 %v12706_v33, %v12662_v49  ;;  %v5222_v3 = vadd.f32 %v5221_v61, %v5220_v17 }
 0x4d9   :  { %v5233_v24 = vadd.f32 %v5232_v29, %v5231_v60  ;;  %v12728_v32 = vadd.f32 %v12706_v33, %v12664_v52  ;;  %v12731_v15 = vadd.f32 %v12706_v33, %v5183_v62  ;;  %v5245_v42 = vrot.slane %v5244_v54, 2  ;;  %v6114_v52 = vld [vmem:[%s13304_s2 + $0x8] sm:$0xff]  ;;  %v6127_v29 = vld [vmem:[%s13304_s2 + $0x70] sm:$0xff] }
 0x4da   :  { %15029 = vst [vmem:[#allocation43_spill] sm:$0xff] %v12716_v26  ;;  %v5257_v34 = vadd.f32 %v5256_v50, %v5255_v13  ;;  %v5269_v28 = vrot.slane %v5268_v40, 4  ;;  %v12734_v53 = vadd.f32 %v12706_v33, %v5196_v11  ;;  %v12737_v56 = vadd.f32 %v12706_v33, %v5209_v1  ;;  %v6117_v11 = vld [vmem:[%s13304_s2 + $0x20] sm:$0xff] }
 0x4db   :  { %v5234_v43 = vrot.slane %v5233_v24, 1  ;;  %v12740_v49 = vadd.f32 %v12706_v33, %v5222_v3  ;;  %v12746_v62 = vmul.f32 %v6114_v52, %v15033_v31  ;;  %v5246_v22 = vadd.f32 %v5245_v42, %v5244_v54  ;;  %v6125_v13 = vld [vmem:[%s13304_s2 + $0x60] sm:$0xff] }
 0x4dc   :  { %15030 = vst [vmem:[#allocation51_spill] sm:$0xff] %v12734_v53  ;;  %15031 = vst [vmem:[#allocation92_spill] sm:$0xff] %v12737_v56  ;;  %v5258_v16 = vrot.slane %v5257_v34, 2  ;;  %v5270_v59 = vadd.f32 %v5269_v28, %v5268_v40  ;;  %v12764_v35 = vmul.f32 %v6117_v11, %v15028_v20  ;;  %v12770_v58 = vmul.f32 %v6118_v37, %v15033_v31  ;;  %v6133_v11 = vld [vmem:[%s13304_s2 + $0xa0] sm:$0xff]  ;;  %v6160_v56 = vld [vmem:[%s13304_s2 + $0x178] sm:$0xff] }
 0x4dd   :  { %15032 = vst [vmem:[#allocation93_spill] sm:$0xff] %v12740_v49  ;;  %v5235_v2 = vadd.f32 %v5234_v43, %v5233_v24  ;;  %v5247_v25 = vrot.slane %v5246_v22, 1  ;;  %v12776_v1 = vmul.f32 %v6119_v18, %v15034_v0  ;;  %v12785_v41 = vmul.f32 %v6120_v12, %v15035_v4  ;;  %v6128_v24 = vld [vmem:[%s13304_s2 + $0x78] sm:$0xff]  ;;  %v6130_v43 = vld [vmem:[%s13304_s2 + $0x88] sm:$0xff]  ;;  %v6159_v49 = vld [vmem:[%s13304_s2 + $0x170] sm:$0xff] }
 0x4de   :  { %v5259_v45 = vadd.f32 %v5258_v16, %v5257_v34  ;;  %v5271_v6 = vrot.slane %v5270_v59, 2  ;;  %v12791_v38 = vmul.f32 %v6121_v46, %v15028_v20  ;;  %v12797_v39 = vmul.f32 %v6122_v8, %v15033_v31  ;;  %v6129_v34 = vld [vmem:[%s13304_s2 + $0x80] sm:$0xff]  ;;  %v6136_v12 = vld [vmem:[%s13304_s2 + $0xb8] sm:$0xff] }
 0x4df   :  { %v12779_v55 = vadd.f32 %v12706_v33, %v5235_v2  ;;  %v5248_v17 = vadd.f32 %v5247_v25, %v5246_v22  ;;  %v12803_v47 = vmul.f32 %v6123_v63, %v15034_v0  ;;  %v12809_v23 = vmul.f32 %v6124_v27, %v15035_v4  ;;  %v6131_v22 = vld [vmem:[%s13304_s2 + $0x90] sm:$0xff]  ;;  %v6134_v25 = vld [vmem:[%s13304_s2 + $0xa8] sm:$0xff]  ;;  %v6137_v8 = vld [vmem:[%s13304_s2 + $0xc0] sm:$0xff] }
 0x4e0   :  { %v5260_v60 = vrot.slane %v5259_v45, 1  ;;  %v5272_v5 = vadd.f32 %v5271_v6, %v5270_v59  ;;  %v12815_v14 = vmul.f32 %v6125_v13, %v15028_v20  ;;  %v12821_v61 = vmul.f32 %v6126_v57, %v15033_v31  ;;  %v6132_v59 = vld [vmem:[%s13304_s2 + $0x98] sm:$0xff]  ;;  %v6135_v6 = vld [vmem:[%s13304_s2 + $0xb0] sm:$0xff] }
 0x4e1   :  { %15036 = vst [vmem:[#allocation58_spill] sm:$0xff] %v12779_v55  ;;  %v12827_v54 = vmul.f32 %v6127_v29, %v15034_v0  ;;  %v12830_v3 = vadd.f32 %v12706_v33, %v5248_v17  ;;  %v12836_v42 = vmul.f32 %v6128_v24, %v15035_v4  ;;  %v12842_v28 = vmul.f32 %v6129_v34, %v15028_v20  ;;  %v6139_v27 = vld [vmem:[%s13304_s2 + $0xd0] sm:$0xff]  ;;  %v6140_v57 = vld [vmem:[%s13304_s2 + $0xd8] sm:$0xff] }
 0x4e2   :  { %v5261_v50 = vadd.f32 %v5260_v60, %v5259_v45  ;;  %v5273_v40 = vrot.slane %v5272_v5, 1  ;;  %v12848_v52 = vmul.f32 %v6130_v43, %v15033_v31  ;;  %v12854_v16 = vmul.f32 %v6131_v22, %v15034_v0  ;;  %v6138_v60 = vld [vmem:[%s13304_s2 + $0xc8] sm:$0xff]  ;;  %v6143_v34 = vld [vmem:[%s13304_s2 + $0xf0] sm:$0xff]  ;;  %v6144_v22 = vld [vmem:[%s13304_s2 + $0xf8] sm:$0xff] }
 0x4e3   :  { %15037 = vst [vmem:[#allocation95_spill] sm:$0xff] %v12830_v3  ;;  %v12860_v9 = vmul.f32 %v6132_v59, %v15035_v4  ;;  %v12869_v37 = vmul.f32 %v6133_v11, %v15028_v20  ;;  %v12875_v45 = vmul.f32 %v6134_v25, %v15033_v31  ;;  %v12881_v18 = vmul.f32 %v6135_v6, %v15034_v0  ;;  %v6146_v25 = vld [vmem:[%s13304_s2 + $0x108] sm:$0xff]  ;;  %v6155_v55 = vld [vmem:[%s13304_s2 + $0x150] sm:$0xff] }
 0x4e4   :  { %v5274_v2 = vadd.f32 %v5273_v40, %v5272_v5  ;;  %v12863_v7 = vadd.f32 %v12706_v33, %v5261_v50  ;;  %v12887_v46 = vmul.f32 %v6136_v12, %v15035_v4  ;;  %v12893_v17 = vmul.f32 %v6137_v8, %v15028_v20  ;;  %v6141_v50 = vld [vmem:[%s13304_s2 + $0xe0] sm:$0xff]  ;;  %v6142_v40 = vld [vmem:[%s13304_s2 + $0xe8] sm:$0xff]  ;;  %v6147_v12 = vld [vmem:[%s13304_s2 + $0x110] sm:$0xff] }
 0x4e5   :  { %v12899_v5 = vmul.f32 %v6138_v60, %v15033_v31  ;;  %v12908_v13 = vmul.f32 %v6139_v27, %v15034_v0  ;;  %v12914_v29 = vmul.f32 %v6140_v57, %v15035_v4  ;;  %v12926_v24 = vmul.f32 %v6142_v40, %v15033_v31  ;;  %v6148_v60 = vld [vmem:[%s13304_s2 + $0x118] sm:$0xff]  ;;  %v6149_v57 = vld [vmem:[%s13304_s2 + $0x120] sm:$0xff]  ;;  %v6150_v40 = vld [vmem:[%s13304_s2 + $0x128] sm:$0xff] }
 0x4e6   :  { %15038 = vst [vmem:[#allocation97_spill] sm:$0xff] %v12863_v7  ;;  %v12902_v63 = vadd.f32 %v12706_v33, %v5274_v2  ;;  %v12920_v33 = vmul.f32 %v6141_v50, %v15028_v20  ;;  %v12932_v43 = vmul.f32 %v6143_v34, %v15034_v0  ;;  %v12938_v59 = vmul.f32 %v6144_v22, %v15035_v4  ;;  %v6145_v2 = vld [vmem:[%s13304_s2 + $0x100] sm:$0xff]  ;;  %v6151_v22 = vld [vmem:[%s13304_s2 + $0x130] sm:$0xff]  ;;  %v6158_v3 = vld [vmem:[%s13304_s2 + $0x168] sm:$0xff] }
 0x4e7   :  { %v12944_v11 = vmul.f32 %v6145_v2, %v15028_v20  ;;  %v12950_v6 = vmul.f32 %v6146_v25, %v15033_v31  ;;  %v12956_v8 = vmul.f32 %v6147_v12, %v15034_v0  ;;  %v12962_v27 = vmul.f32 %v6148_v60, %v15035_v4  ;;  %v6152_v25 = vld [vmem:[%s13304_s2 + $0x138] sm:$0xff]  ;;  %v6153_v60 = vld [vmem:[%s13304_s2 + $0x140] sm:$0xff] }
 0x4e8   :  { %15039 = vst [vmem:[#allocation99_spill] sm:$0xff] %v12902_v63  ;;  %v12968_v50 = vmul.f32 %v6149_v57, %v15028_v20  ;;  %v12974_v34 = vmul.f32 %v6150_v40, %v15033_v31  ;;  %v12980_v2 = vmul.f32 %v6151_v22, %v15034_v0  ;;  %v12986_v12 = vmul.f32 %v6152_v25, %v15035_v4  ;;  %v6154_v40 = vld [vmem:[%s13304_s2 + $0x148] sm:$0xff]  ;;  %v6156_v63 = vld [vmem:[%s13304_s2 + $0x158] sm:$0xff]  ;;  %v6157_v7 = vld [vmem:[%s13304_s2 + $0x160] sm:$0xff] }
 0x4e9   :  { %v12992_v57 = vmul.f32 %v6153_v60, %v15028_v20  ;;  %v12998_v22 = vmul.f32 %v6154_v40, %v15033_v31  ;;  %v13004_v25 = vmul.f32 %v6155_v55, %v15034_v0  ;;  %v13010_v60 = vmul.f32 %v6156_v63, %v15035_v4 }
 0x4ea   :  { %v13016_v40 = vmul.f32 %v6157_v7, %v15028_v20  ;;  %v13022_v55 = vmul.f32 %v6158_v3, %v15033_v31  ;;  %v13028_v63 = vmul.f32 %v6159_v49, %v15034_v0  ;;  %v13034_v20 = vmul.f32 %v6160_v56, %v15035_v4 }
 0x4eb   :  { %v5341_v7 = vsel %vm171_vm0, %v12712_v19, 0.0  ;;  %v5342_v31 = vsel %vm171_vm0, %v12746_v62, 0.0  ;;  %v5344_v3 = vsel %vm171_vm0, %v12752_v30, 0.0  ;;  %v5346_v49 = vsel %vm171_vm0, %v12758_v36, 0.0 }
 0x4ec   :  { %v5354_v0 = vsel %vm171_vm0, %v12764_v35, 0.0  ;;  %v5343_v53 = vadd.f32 %v5342_v31, %v5341_v7  ;;  %v5355_v56 = vsel %vm171_vm0, %v12770_v58, 0.0  ;;  %v5357_v4 = vsel %vm171_vm0, %v12776_v1, 0.0 }
 0x4ed   :  { %v5359_v19 = vsel %vm171_vm0, %v12785_v41, 0.0  ;;  %v5356_v62 = vadd.f32 %v5355_v56, %v5354_v0  ;;  %v5367_v30 = vsel %vm171_vm0, %v12791_v38, 0.0  ;;  %v5368_v36 = vsel %vm171_vm0, %v12797_v39, 0.0 }
 0x4ee   :  { %v5370_v35 = vsel %vm171_vm0, %v12803_v47, 0.0  ;;  %v5345_v7 = vadd.f32 %v5344_v3, %v5343_v53  ;;  %v5369_v31 = vadd.f32 %v5368_v36, %v5367_v30  ;;  %v5372_v58 = vsel %vm171_vm0, %v12809_v23, 0.0 }
 0x4ef   :  { %v5380_v1 = vsel %vm171_vm0, %v12815_v14, 0.0  ;;  %v5358_v26 = vadd.f32 %v5357_v4, %v5356_v62  ;;  %v5381_v41 = vsel %vm171_vm0, %v12821_v61, 0.0  ;;  %v5383_v38 = vsel %vm171_vm0, %v12827_v54, 0.0 }
 0x4f0   :  { %v5385_v39 = vsel %vm171_vm0, %v12836_v42, 0.0  ;;  %v5347_v0 = vadd.f32 %v5346_v49, %v5345_v7  ;;  %v5371_v47 = vadd.f32 %v5370_v35, %v5369_v31  ;;  %v5382_v53 = vadd.f32 %v5381_v41, %v5380_v1 }
 0x4f1   :  { %v5393_v3 = vsel %vm171_vm0, %v12842_v28, 0.0  ;;  %v5360_v23 = vadd.f32 %v5359_v19, %v5358_v26  ;;  %v5394_v14 = vsel %vm171_vm0, %v12848_v52, 0.0  ;;  %v5396_v56 = vsel %vm171_vm0, %v12854_v16, 0.0 }
 0x4f2   :  { %v5398_v61 = vsel %vm171_vm0, %v12860_v9, 0.0  ;;  %v5348_v54 = vrot.slane %v5347_v0, 4  ;;  %v5373_v4 = vadd.f32 %v5372_v58, %v5371_v47  ;;  %v5384_v62 = vadd.f32 %v5383_v38, %v5382_v53 }
 0x4f3   :  { %v5395_v42 = vadd.f32 %v5394_v14, %v5393_v3  ;;  %v5361_v49 = vrot.slane %v5360_v23, 4  ;;  %v5406_v30 = vsel %vm171_vm0, %v12869_v37, 0.0  ;;  %v5407_v26 = vsel %vm171_vm0, %v12875_v45, 0.0 }
 0x4f4   :  { %v5409_v28 = vsel %vm171_vm0, %v12881_v18, 0.0  ;;  %v5349_v52 = vadd.f32 %v5348_v54, %v5347_v0  ;;  %v5374_v19 = vrot.slane %v5373_v4, 4  ;;  %v5386_v16 = vadd.f32 %v5385_v39, %v5384_v62 }
 0x4f5   :  { %v5397_v36 = vadd.f32 %v5396_v56, %v5395_v42  ;;  %v5362_v35 = vadd.f32 %v5361_v49, %v5360_v23  ;;  %v5408_v9 = vadd.f32 %v5407_v26, %v5406_v30  ;;  %v5411_v7 = vsel %vm171_vm0, %v12887_v46, 0.0 }
 0x4f6   :  { %v5419_v31 = vsel %vm171_vm0, %v12893_v17, 0.0  ;;  %v5350_v58 = vrot.slane %v5349_v52, 2  ;;  %v5375_v37 = vadd.f32 %v5374_v19, %v5373_v4  ;;  %v5387_v1 = vrot.slane %v5386_v16, 4 }
 0x4f7   :  { %v5399_v41 = vadd.f32 %v5398_v61, %v5397_v36  ;;  %v5363_v45 = vrot.slane %v5362_v35, 2  ;;  %v5410_v38 = vadd.f32 %v5409_v28, %v5408_v9  ;;  %v5420_v18 = vsel %vm171_vm0, %v12899_v5, 0.0 }
 0x4f8   :  { %v5422_v39 = vsel %vm171_vm0, %v12908_v13, 0.0  ;;  %v5351_v0 = vadd.f32 %v5350_v58, %v5349_v52  ;;  %v5376_v47 = vrot.slane %v5375_v37, 2  ;;  %v5388_v53 = vadd.f32 %v5387_v1, %v5386_v16 }
 0x4f9   :  { %v5400_v3 = vrot.slane %v5399_v41, 4  ;;  %v5364_v46 = vadd.f32 %v5363_v45, %v5362_v35  ;;  %v5412_v23 = vadd.f32 %v5411_v7, %v5410_v38  ;;  %v5421_v14 = vadd.f32 %v5420_v18, %v5419_v31 }
 0x4fa   :  { %v5424_v17 = vsel %vm171_vm0, %v12914_v29, 0.0  ;;  %v5352_v56 = vrot.slane %v5351_v0, 1  ;;  %v5377_v61 = vadd.f32 %v5376_v47, %v5375_v37  ;;  %v5389_v54 = vrot.slane %v5388_v53, 2 }
 0x4fb   :  { %v5401_v4 = vadd.f32 %v5400_v3, %v5399_v41  ;;  %v5365_v62 = vrot.slane %v5364_v46, 1  ;;  %v5413_v42 = vrot.slane %v5412_v23, 4  ;;  %v5423_v5 = vadd.f32 %v5422_v39, %v5421_v14 }
 0x4fc   :  { %v5432_v13 = vsel %vm171_vm0, %v12920_v33, 0.0  ;;  %v13094_v49 = vadd.f32 %v5352_v56, %v5351_v0  ;;  %v5378_v30 = vrot.slane %v5377_v61, 1  ;;  %v5390_v26 = vadd.f32 %v5389_v54, %v5388_v53 }
 0x4fd   :  { %v5402_v28 = vrot.slane %v5401_v4, 2  ;;  %v13096_v52 = vadd.f32 %v5365_v62, %v5364_v46  ;;  %v5414_v19 = vadd.f32 %v5413_v42, %v5412_v23  ;;  %v5425_v16 = vadd.f32 %v5424_v17, %v5423_v5 }
 0x4fe   :  { %v5433_v29 = vsel %vm171_vm0, %v12926_v24, 0.0  ;;  %v13100_v36 = vadd.f32 %v5378_v30, %v5377_v61  ;;  %v5391_v35 = vrot.slane %v5390_v26, 1  ;;  %v5435_v33 = vsel %vm171_vm0, %v12932_v43, 0.0 }
 0x4ff   :  { %v5403_v9 = vadd.f32 %v5402_v28, %v5401_v4  ;;  %v5434_v7 = vadd.f32 %v5433_v29, %v5432_v13  ;;  %v5415_v31 = vrot.slane %v5414_v19, 2  ;;  %v5426_v58 = vrot.slane %v5425_v16, 4 }
 0x500   :  { %v5437_v37 = vsel %vm171_vm0, %v12938_v59, 0.0  ;;  %v5392_v1 = vadd.f32 %v5391_v35, %v5390_v26  ;;  %v5445_v38 = vsel %vm171_vm0, %v12944_v11, 0.0  ;;  %v5446_v39 = vsel %vm171_vm0, %v12950_v6, 0.0 }
 0x501   :  { %v5404_v41 = vrot.slane %v5403_v9, 1  ;;  %v5436_v45 = vadd.f32 %v5435_v33, %v5434_v7  ;;  %v5416_v24 = vadd.f32 %v5415_v31, %v5414_v19  ;;  %v5427_v18 = vadd.f32 %v5426_v58, %v5425_v16  ;;  %v15040_v31 = vld [vmem:[#allocation6_spill] sm:$0xff]  ;;  %v15041_v58 = vld [vmem:[#allocation56_spill] sm:$0xff] }
 0x502   :  { %v5448_v0 = vsel %vm171_vm0, %v12956_v8, 0.0  ;;  %v5447_v43 = vadd.f32 %v5446_v39, %v5445_v38  ;;  %v5450_v59 = vsel %vm171_vm0, %v12962_v27, 0.0  ;;  %v5458_v23 = vsel %vm171_vm0, %v12968_v50, 0.0 }
 0x503   :  { %v5405_v47 = vadd.f32 %v5404_v41, %v5403_v9  ;;  %v5438_v53 = vadd.f32 %v5437_v37, %v5436_v45  ;;  %v5417_v3 = vrot.slane %v5416_v24, 1  ;;  %v5428_v46 = vrot.slane %v5427_v18, 2  ;;  %v15043_v37 = vld [vmem:[#allocation86_spill] sm:$0xff] }
 0x504   :  { %v5459_v11 = vsel %vm171_vm0, %v12974_v34, 0.0  ;;  %v5449_v17 = vadd.f32 %v5448_v0, %v5447_v43  ;;  %v5461_v8 = vsel %vm171_vm0, %v12980_v2, 0.0  ;;  %v5463_v54 = vsel %vm171_vm0, %v12986_v12, 0.0 }
 0x505   :  { %v5439_v14 = vrot.slane %v5438_v53, 4  ;;  %v5460_v6 = vadd.f32 %v5459_v11, %v5458_v23  ;;  %v5418_v56 = vadd.f32 %v5417_v3, %v5416_v24  ;;  %v5429_v61 = vadd.f32 %v5428_v46, %v5427_v18 }
 0x506   :  { %v5471_v27 = vsel %vm171_vm0, %v12992_v57, 0.0  ;;  %v5451_v62 = vadd.f32 %v5450_v59, %v5449_v17  ;;  %v5472_v34 = vsel %vm171_vm0, %v12998_v22, 0.0  ;;  %v5474_v13 = vsel %vm171_vm0, %v13004_v25, 0.0 }
 0x507   :  { %v5440_v4 = vadd.f32 %v5439_v14, %v5438_v53  ;;  %v5462_v50 = vadd.f32 %v5461_v8, %v5460_v6  ;;  %v5430_v42 = vrot.slane %v5429_v61, 1  ;;  %v5473_v5 = vadd.f32 %v5472_v34, %v5471_v27  ;;  %v15044_v6 = vld [vmem:[#allocation84_spill] sm:$0xff]  ;;  %v15045_v8 = vld [vmem:[#allocation107_spill] sm:$0xff]  ;;  %v15047_v34 = vld [vmem:[#allocation54_spill] sm:$0xff] }
 0x508   :  { %v5476_v2 = vsel %vm171_vm0, %v13010_v60, 0.0  ;;  %v5452_v26 = vrot.slane %v5451_v62, 4  ;;  %v5484_v57 = vsel %vm171_vm0, %v13016_v40, 0.0  ;;  %v5485_v16 = vsel %vm171_vm0, %v13022_v55, 0.0 }
 0x509   :  { %v5441_v30 = vrot.slane %v5440_v4, 2  ;;  %v5464_v12 = vadd.f32 %v5463_v54, %v5462_v50  ;;  %v5431_v28 = vadd.f32 %v5430_v42, %v5429_v61  ;;  %v5475_v19 = vadd.f32 %v5474_v13, %v5473_v5  ;;  %v15048_v5 = vld [vmem:[#allocation109_spill] sm:$0xff] }
 0x50a   :  { %v5487_v22 = vsel %vm171_vm0, %v13028_v63, 0.0  ;;  %v5453_v35 = vadd.f32 %v5452_v26, %v5451_v62  ;;  %v5486_v9 = vadd.f32 %v5485_v16, %v5484_v57  ;;  %v5489_v60 = vsel %vm171_vm0, %v13034_v20, 0.0 }
 0x50b   :  { %v5442_v29 = vadd.f32 %v5441_v30, %v5440_v4  ;;  %v5465_v25 = vrot.slane %v5464_v12, 4  ;;  %v5477_v7 = vadd.f32 %v5476_v2, %v5475_v19  ;;  %v15042_v40 = vsub.f32 %v15040_v31, %v15041_v58  ;;  %v15049_v19 = vld [vmem:[#allocation63_spill] sm:$0xff] }
 0x50c   :  { %v5527_v41 = vrot.slane %v15043_v37, 7  ;;  %v5454_v45 = vrot.slane %v5453_v35, 2  ;;  %v5488_v63 = vadd.f32 %v5487_v22, %v5486_v9  ;;  %v5529_v61 = vrot.slane %v15045_v8, 6  ;;  %v15050_v22 = vld [vmem:[#allocation65_spill] sm:$0xff] }
 0x50d   :  { %v13142_v33 = vrot.slane %v15042_v40, %v14554_v21  ;;  %v5443_v55 = vrot.slane %v5442_v29, 1  ;;  %v5466_v38 = vadd.f32 %v5465_v25, %v5464_v12  ;;  %v5478_v24 = vrot.slane %v5477_v7, 4  ;;  %v15052_v40 = vld [vmem:[#allocation55_spill] sm:$0xff] }
 0x50e   :  { %v5455_v0 = vadd.f32 %v5454_v45, %v5453_v35  ;;  %v5490_v43 = vadd.f32 %v5489_v60, %v5488_v63  ;;  %v5533_v42 = vrot.slane %v15047_v34, 4  ;;  %v5535_v13 = vrot.slane %v15048_v5, 3  ;;  %v15054_v63 = vld [vmem:[#allocation68_spill] sm:$0xff] }
 0x50f   :  { %v13147_v18 = vadd.f32 %v13142_v33, %v13094_v49  ;;  %v13151_v20 = vadd.f32 %v13142_v33, %v13096_v52  ;;  %v13155_v39 = vadd.f32 %v13142_v33, %v13100_v36  ;;  %v5444_v21 = vadd.f32 %v5443_v55, %v5442_v29  ;;  %v15062_v34 = vld [vmem:[#allocation52_spill] sm:$0xff] }
 0x510   :  { %v5467_v53 = vrot.slane %v5466_v38, 2  ;;  %v5479_v59 = vadd.f32 %v5478_v24, %v5477_v7  ;;  %v13158_v3 = vadd.f32 %v13142_v33, %v5392_v1  ;;  %v13161_v46 = vadd.f32 %v13142_v33, %v5405_v47  ;;  %v15051_v7 = vld [vmem:[#allocation87_spill] sm:$0xff] }
 0x511   :  { %v13164_v49 = vadd.f32 %v13142_v33, %v5418_v56  ;;  %v5456_v52 = vrot.slane %v5455_v0, 1  ;;  %v5491_v11 = vrot.slane %v5490_v43, 4  ;;  %v13167_v36 = vadd.f32 %v13142_v33, %v5431_v28  ;;  %v15046_v56 = vld [vmem:[#allocation108_spill] sm:$0xff] }
 0x512   :  { %v5468_v23 = vadd.f32 %v5467_v53, %v5466_v38  ;;  %v5480_v14 = vrot.slane %v5479_v59, 2  ;;  %v13170_v17 = vadd.f32 %v13142_v33, %v5444_v21  ;;  %v5528_v1 = vsel %vm1557_vm5, %v5527_v41, %v15044_v6  ;;  %v15053_v41 = vld [vmem:[#allocation47_spill] sm:$0xff] }
 0x513   :  { %v5457_v47 = vadd.f32 %v5456_v52, %v5455_v0  ;;  %v5492_v27 = vadd.f32 %v5491_v11, %v5490_v43  ;;  %v5531_v4 = vrot.slane %v15046_v56, 5  ;;  %v5530_v50 = vsel %vm1560_vm6, %v5529_v61, %v5528_v1  ;;  %v15057_v1 = vld [vmem:[#allocation49_spill] sm:$0xff]  ;;  %v15058_v61 = vld [vmem:[#allocation74_spill] sm:$0xff] }
 0x514   :  { %v5469_v54 = vrot.slane %v5468_v23, 1  ;;  %v5481_v62 = vadd.f32 %v5480_v14, %v5479_v59  ;;  %v5537_v16 = vrot.slane %v15049_v19, 2  ;;  %v5539_v29 = vrot.slane %v15050_v22, 1  ;;  %v15056_v14 = vld [vmem:[#allocation53_spill] sm:$0xff] }
 0x515   :  { %v5493_v30 = vrot.slane %v5492_v27, 2  ;;  %v13180_v26 = vadd.f32 %v13142_v33, %v5457_v47  ;;  %v5532_v12 = vsel %vm1563_vm7, %v5531_v4, %v5530_v50  ;;  %v5541_v60 = vrot.slane %v15051_v7, 7  ;;  %v15066_v7 = vld [vmem:[#allocation51_spill] sm:$0xff] }
 0x516   :  { %v5470_v2 = vadd.f32 %v5469_v54, %v5468_v23  ;;  %v5482_v57 = vrot.slane %v5481_v62, 1  ;;  %v5534_v28 = vsel %vm1566_vm8, %v5533_v42, %v5532_v12  ;;  %v5543_v37 = vrot.slane %v15052_v40, 6  ;;  %v15055_v23 = vld [vmem:[#allocation91_spill] sm:$0xff] }
 0x517   :  { %v5494_v35 = vadd.f32 %v5493_v30, %v5492_v27  ;;  %v5536_v9 = vsel %vm1569_vm9, %v5535_v13, %v5534_v28  ;;  %v5545_v55 = vrot.slane %v15053_v41, 5  ;;  %v5542_v24 = vsel %vm1557_vm5, %v5541_v60, %v15054_v63  ;;  %v15063_v13 = vld [vmem:[#allocation60_spill] sm:$0xff]  ;;  %v15064_v28 = vld [vmem:[#allocation66_spill] sm:$0xff]  ;;  %v15070_v63 = vld [vmem:[#allocation97_spill] sm:$0xff] }
 0x518   :  { %v13187_v25 = vadd.f32 %v13142_v33, %v5470_v2  ;;  %v5483_v31 = vadd.f32 %v5482_v57, %v5481_v62  ;;  %v5538_v58 = vsel %vm1572_vm10, %v5537_v16, %v5536_v9  ;;  %v5544_v0 = vsel %vm1560_vm6, %v5543_v37, %v5542_v24  ;;  %v15061_v62 = vld [vmem:[#allocation57_spill] sm:$0xff] }
 0x519   :  { %v5495_v45 = vrot.slane %v5494_v35, 1  ;;  %v5540_v38 = vsel %vm1575_vm11, %v5539_v29, %v5538_v58  ;;  %v5564_v53 = vrot.slane %v12425_v48, 7  ;;  %v5566_v43 = vrot.slane %v12429_v44, 6  ;;  %v15059_v48 = vld [vmem:[#allocation94_spill] sm:$0xff]  ;;  %v15060_v44 = vld [vmem:[#allocation96_spill] sm:$0xff]  ;;  %v15068_v37 = vld [vmem:[#allocation93_spill] sm:$0xff] }
 0x51a   :  { %v13198_v21 = vadd.f32 %v13142_v33, %v5483_v31  ;;  %5549 = vst.msk [vmem:[%s13305_s5] sm:$0xff] %vm171_vm0, %v5540_v38  ;;  %v5546_v52 = vsel %vm1563_vm7, %v5545_v55, %v5544_v0  ;;  %v5568_v11 = vrot.slane %v15055_v23, 5  ;;  %v5570_v6 = vrot.slane %v15056_v14, 4  ;;  %v15067_v58 = vld [vmem:[#allocation92_spill] sm:$0xff]  ;;  %v15069_v55 = vld [vmem:[#allocation95_spill] sm:$0xff] }
 0x51b   :  { %v5496_v59 = vadd.f32 %v5495_v45, %v5494_v35  ;;  %5551 = vst.msk [vmem:[%s13305_s5 + $0x8] sm:$0xf] %vm5550_vm12, %v5546_v52  ;;  %v5565_v8 = vsel %vm1557_vm5, %v5564_v53, %v15057_v1  ;;  %v5572_v47 = vrot.slane %v15058_v61, 3  ;;  %v5574_v54 = vrot.slane %v15059_v48, 2  ;;  %v15065_v35 = vld [vmem:[#allocation43_spill] sm:$0xff]  ;;  %v15072_v52 = vld [vmem:[#allocation58_spill] sm:$0xff] }
 0x51c   :  { %v5576_v27 = vrot.slane %v15060_v44, 1  ;;  %v5567_v4 = vsel %vm1560_vm6, %v5566_v43, %v5565_v8  ;;  %v5578_v50 = vrot.slane %v15061_v62, 7  ;;  %v5580_v42 = vrot.slane %v15062_v34, 6  ;;  %v15071_v0 = vld [vmem:[#allocation99_spill] sm:$0xff] }
 0x51d   :  { %v5514_v56 = vadd.f32 %v13142_v33, %v5496_v59  ;;  %v5569_v5 = vsel %vm1563_vm7, %v5568_v11, %v5567_v4  ;;  %v5582_v2 = vrot.slane %v15063_v13, 5  ;;  %v5601_v30 = vrot.slane %v12720_v51, 7 }
 0x51e   :  { %v5603_v12 = vrot.slane %v12724_v10, 6  ;;  %v5571_v57 = vsel %vm1566_vm8, %v5570_v6, %v5569_v5  ;;  %v5579_v19 = vsel %vm1557_vm5, %v5578_v50, %v15064_v28  ;;  %v5605_v33 = vrot.slane %v12728_v32, 5 }
 0x51f   :  { %v5607_v16 = vrot.slane %v12731_v15, 4  ;;  %v5573_v22 = vsel %vm1569_vm9, %v5572_v47, %v5571_v57  ;;  %v5581_v29 = vsel %vm1560_vm6, %v5580_v42, %v5579_v19  ;;  %v5602_v9 = vsel %vm1557_vm5, %v5601_v30, %v15065_v35 }
 0x520   :  { %v5609_v51 = vrot.slane %v15066_v7, 3  ;;  %v5575_v10 = vsel %vm1572_vm10, %v5574_v54, %v5573_v22  ;;  %v5583_v60 = vsel %vm1563_vm7, %v5582_v2, %v5581_v29  ;;  %v5604_v31 = vsel %vm1560_vm6, %v5603_v12, %v5602_v9 }
 0x521   :  { %v5611_v40 = vrot.slane %v15067_v58, 2  ;;  %v5577_v32 = vsel %vm1575_vm11, %v5576_v27, %v5575_v10  ;;  %5687 = vst.msk [vmem:[%s13305_s5 + $0x18] sm:$0xf] %vm5550_vm12, %v5583_v60  ;;  %v5606_v15 = vsel %vm1563_vm7, %v5605_v33, %v5604_v31  ;;  %v5613_v41 = vrot.slane %v15068_v37, 1 }
 0x522   :  { %v5615_v45 = vrot.slane %v15069_v55, 7  ;;  %5686 = vst.msk [vmem:[%s13305_s5 + $0x10] sm:$0xff] %vm171_vm0, %v5577_v32  ;;  %v5608_v38 = vsel %vm1566_vm8, %v5607_v16, %v5606_v15  ;;  %v5617_v24 = vrot.slane %v15070_v63, 6  ;;  %v5619_v53 = vrot.slane %v15071_v0, 5 }
 0x523   :  { %v5638_v43 = vrot.slane %v13151_v20, 7  ;;  %v5610_v59 = vsel %vm1569_vm9, %v5609_v51, %v5608_v38  ;;  %v5640_v11 = vrot.slane %v13155_v39, 6  ;;  %v5642_v14 = vrot.slane %v13158_v3, 5 }
 0x524   :  { %v5616_v23 = vsel %vm1557_vm5, %v5615_v45, %v15072_v52  ;;  %v5612_v6 = vsel %vm1572_vm10, %v5611_v40, %v5610_v59  ;;  %v5644_v61 = vrot.slane %v13161_v46, 4  ;;  %v5646_v54 = vrot.slane %v13164_v49, 3 }
 0x525   :  { %v5618_v1 = vsel %vm1560_vm6, %v5617_v24, %v5616_v23  ;;  %v5639_v8 = vsel %vm1557_vm5, %v5638_v43, %v13147_v18  ;;  %v5614_v20 = vsel %vm1575_vm11, %v5613_v41, %v5612_v6  ;;  %v5648_v39 = vrot.slane %v13167_v36, 2 }
 0x526   :  { %v5620_v47 = vsel %vm1563_vm7, %v5619_v53, %v5618_v1  ;;  %v5641_v48 = vsel %vm1560_vm6, %v5640_v11, %v5639_v8  ;;  %5688 = vst.msk [vmem:[%s13305_s5 + $0x20] sm:$0xff] %vm171_vm0, %v5614_v20  ;;  %v5650_v3 = vrot.slane %v13170_v17, 1  ;;  %v5652_v46 = vrot.slane %v13187_v25, 7 }
 0x527   :  { %5689 = vst.msk [vmem:[%s13305_s5 + $0x28] sm:$0xf] %vm5550_vm12, %v5620_v47  ;;  %v5643_v18 = vsel %vm1563_vm7, %v5642_v14, %v5641_v48  ;;  %v5654_v44 = vrot.slane %v13198_v21, 6  ;;  %v5656_v27 = vrot.slane %v5514_v56, 5 }
 0x528   :  { %v5645_v49 = vsel %vm1566_vm8, %v5644_v61, %v5643_v18  ;;  %v5653_v62 = vsel %vm1557_vm5, %v5652_v46, %v13180_v26 }
 0x529   :  { %v5647_v4 = vsel %vm1569_vm9, %v5646_v54, %v5645_v49  ;;  %v5655_v34 = vsel %vm1560_vm6, %v5654_v44, %v5653_v62 }
 0x52a   :  { %v5649_v50 = vsel %vm1572_vm10, %v5648_v39, %v5647_v4  ;;  %v5657_v17 = vsel %vm1563_vm7, %v5656_v27, %v5655_v34 }
 0x52b   :  { %v5651_v36 = vsel %vm1575_vm11, %v5650_v3, %v5649_v50  ;;  %5691 = vst.msk [vmem:[%s13305_s5 + $0x38] sm:$0xf] %vm5550_vm12, %v5657_v17 }
 0x52c   :  { %5690 = vst.msk [vmem:[%s13305_s5 + $0x30] sm:$0xff] %vm171_vm0, %v5651_v36 }

</bundles_post_ra>
